<compile_context>
chip_gen: v7x
topology: tpu7x:2x2x1
jax: 0.10.0
libtpu: 0.0.40
codegen_flags: <defaults>
</compile_context>

<pallas_src>
import functools

import jax
import jax.numpy as jnp
import numpy as np
from jax import lax
from jax.experimental import pallas as pl
from jax.experimental.pallas import tpu as pltpu


# ----------------------------- in-kernel math ------------------------------ #

def _erf(x):
  # Abramowitz & Stegun 7.1.26 rational approximation (max abs err ~1.5e-7,
  # i.e. float32-level accuracy). Uses only exp/abs/where so it always lowers
  # on Mosaic.  Matches PyTorch's exact (erf-based) F.gelu to f32 precision.
  a1, a2, a3, a4, a5 = (0.254829592, -0.284496736, 1.421413741,
                        -1.453152027, 1.061405429)
  p = 0.3275911
  sgn = jnp.where(x >= 0.0, 1.0, -1.0)
  ax = jnp.abs(x)
  t = 1.0 / (1.0 + p * ax)
  poly = ((((a5 * t + a4) * t + a3) * t + a2) * t + a1) * t
  y = 1.0 - poly * jnp.exp(-ax * ax)
  return sgn * y


def _gelu_exact(x):
  # F.gelu default (approximate='none'):  0.5 * x * (1 + erf(x / sqrt(2)))
  return 0.5 * x * (1.0 + _erf(x * 0.7071067811865476))


def _layer_norm_feats(x, gamma, beta, eps=1e-5):
  # x: (C, H, Wp); normalize over H (= n_feats). gamma/beta: (H, 1).
  # Fused statistics: one pass computing sum and sum-of-squares.
  h = x.shape[1]
  inv_h = 1.0 / h
  s1 = jnp.sum(x, axis=1, keepdims=True)
  s2 = jnp.sum(x * x, axis=1, keepdims=True)
  mean = s1 * inv_h
  var = s2 * inv_h - mean * mean
  inv = lax.rsqrt(var + eps)
  return (x - mean) * inv * gamma + beta


def _conv_same_vpu(x, w_smem, b_smem, k):
  """'Same' Conv2d, stride 1, odd k, computed on the VPU (shift-and-FMA).

  x:      (Cin, H, Wp) f32 with the padded time columns already zeroed.
  w_smem: SMEM ref, flat (Cout*Cin*k*k,) in PyTorch OIHW order.
  b_smem: SMEM ref, (Cout,).
  """
  cin, h, wp = x.shape
  cout = b_smem.shape[0]
  kk = k * k
  p = k // 2

  row = lax.broadcasted_iota(jnp.int32, (h, wp), 0)

  # k*k shifted copies of the input block built with XLU rolls.  Lane (W)
  # wrap-around lands in pre-zeroed pad columns (wrapper guarantees
  # Wp >= W + k//2), so only the sublane (H) wrap needs explicit masking.
  shifted = []          # shifted[dh_k*k + dw_k][ci] -> (H, Wp)
  for dhk in range(k):
    dh = dhk - p
    if dh == 0:
      xh = x
    else:
      xh = pltpu.roll(x, shift=(-dh) % h, axis=1)
      hmask = jnp.logical_and(row + dh >= 0, row + dh < h)
      xh = jnp.where(hmask, xh, 0.0)
    for dwk in range(k):
      dw = dwk - p
      xw = xh if dw == 0 else pltpu.roll(xh, shift=(-dw) % wp, axis=2)
      shifted.append([xw[ci] for ci in range(cin)])

  outs = []
  for co in range(cout):
    acc = jnp.zeros((h, wp), jnp.float32) + b_smem[co]
    base = co * cin * kk
    for ci in range(cin):
      for idx in range(kk):
        acc = acc + w_smem[base + ci * kk + idx] * shifted[idx][ci]
    outs.append(acc)
  return jnp.stack(outs, axis=0)


# -------------------------------- kernel ----------------------------------- #

def _residual_cnn_kernel(k, w_valid,
                         x_ref, g1_ref, b1_ref, w1_ref, cb1_ref,
                         g2_ref, b2_ref, w2_ref, cb2_ref, o_ref):
  x = x_ref[0].astype(jnp.float32)                      # (C, H, Wp)
  _, h, wp = x.shape

  col = lax.broadcasted_iota(jnp.int32, (h, wp), 1)
  valid_w = col < w_valid                               # real-time-step mask

  y = _layer_norm_feats(x, g1_ref[...], b1_ref[...])
  y = _gelu_exact(y)
  # TODO(synk): nn.Dropout has no deterministic train-mode equivalent here;
  # using eval-mode identity (pltpu.prng_* could implement training dropout).
  y = jnp.where(valid_w, y, 0.0)       # zero padded time cols before the conv
  y = _conv_same_vpu(y, w1_ref, cb1_ref, k)

  y = _layer_norm_feats(y, g2_ref[...], b2_ref[...])
  y = _gelu_exact(y)
  y = jnp.where(valid_w, y, 0.0)
  y = _conv_same_vpu(y, w2_ref, cb2_ref, k)

  o_ref[0] = (y + x).astype(o_ref.dtype)                # x += residual


# ------------------------------- wrapper ------------------------------------ #

def residual_cnn(x, params, kernel_size):
  """x: (N, C, n_feats, time) float32.  Requires stride=1, odd kernel size and
  in_channels == out_channels (needed for the residual add, as in DeepSpeech2)."""
  n, c, h, w = x.shape
  g1, b1, w1, cb1, g2, b2, w2, cb2 = params
  k = kernel_size
  p = k // 2
  cout = w1.shape[0]
  assert k % 2 == 1 and cout == c

  # Lane-dense time axis: pad W up to a multiple of 128 that is >= W + k//2 so
  # the conv's lane wrap-around always lands in zeroed pad columns.
  wp = ((w + p + 127) // 128) * 128
  x_pad = jnp.pad(x, ((0, 0), (0, 0), (0, 0), (0, wp - w)))

  # Conv weights flattened (OIHW order) + biases live in SMEM as scalars.
  w1_f = w1.reshape(-1)
  w2_f = w2.reshape(-1)
  g1_r, b1_r = g1.reshape(h, 1), b1.reshape(h, 1)
  g2_r, b2_r = g2.reshape(h, 1), b2.reshape(h, 1)

  def vmem_full(shape):
    return pl.BlockSpec(shape, lambda i, _s=shape: (0,) * len(_s))

  def smem_spec():
    return pl.BlockSpec(memory_space=pltpu.MemorySpace.SMEM)

  kernel = functools.partial(_residual_cnn_kernel, k, w)

  out = pl.pallas_call(
      kernel,
      out_shape=jax.ShapeDtypeStruct((n, c, h, wp), x.dtype),
      grid_spec=pltpu.PrefetchScalarGridSpec(
          num_scalar_prefetch=0,
          grid=(n,),
          in_specs=[
              pl.BlockSpec((1, c, h, wp), lambda i: (i, 0, 0, 0)),
              vmem_full((h, 1)), vmem_full((h, 1)),     # ln1 gamma / beta
              smem_spec(), smem_spec(),                 # conv1 weight / bias
              vmem_full((h, 1)), vmem_full((h, 1)),     # ln2 gamma / beta
              smem_spec(), smem_spec(),                 # conv2 weight / bias
          ],
          out_specs=pl.BlockSpec((1, c, h, wp), lambda i: (i, 0, 0, 0)),
      ),
      compiler_params=pltpu.CompilerParams(
          dimension_semantics=("parallel",),
          # Blocks here are tiny; at real DeepSpeech2 shapes tile the time axis
          # so (in + out blocks) x double buffering stays under this limit.
          vmem_limit_bytes=32 * 1024 * 1024,
      ),
  )(x_pad, g1_r, b1_r, w1_f, cb1, g2_r, b2_r, w2_f, cb2)

  return out[:, :, :, :w]


# --------------------------- pure-JAX reference ----------------------------- #

def residual_cnn_reference(x, params, k):
  g1, b1, w1, cb1, g2, b2, w2, cb2 = params

  def ln(z, g, b):
    zt = jnp.swapaxes(z, 2, 3)                       # (N, C, time, n_feats)
    m = zt.mean(-1, keepdims=True)
    v = ((zt - m) ** 2).mean(-1, keepdims=True)
    y = (zt - m) / jnp.sqrt(v + 1e-5) * g + b
    return jnp.swapaxes(y, 2, 3)

  def conv(z, wgt, bias):
    out = jax.lax.conv_general_dilated(
        z, wgt, window_strides=(1, 1),
        padding=[(k // 2, k // 2), (k // 2, k // 2)],
        dimension_numbers=("NCHW", "OIHW", "NCHW"))
    return out + bias.reshape(1, -1, 1, 1)

  h = ln(x, g1, b1)
  h = jax.nn.gelu(h, approximate=False)
  h = conv(h, w1, cb1)
  h = ln(h, g2, b2)
  h = jax.nn.gelu(h, approximate=False)
  h = conv(h, w2, cb2)
  return h + x


# ---------------------------------- main ------------------------------------ #

if __name__ == "__main__":
  N, C, N_FEATS, T = 2, 4, 16, 16       # in_channels == out_channels == 4
  K, STRIDE, DROPOUT = 3, 1, 0.1        # stride must be 1 for the residual add

  key = jax.random.PRNGKey(0)
  keys = jax.random.split(key, 6)
  x = jax.random.normal(keys[0], (N, C, N_FEATS, T), jnp.float32)

  # Deterministic parameter init (PyTorch-default-like uniform for conv,
  # ones/zeros for LayerNorm affine params).
  bound = 1.0 / np.sqrt(C * K * K)
  conv1_w = jax.random.uniform(keys[1], (C, C, K, K), jnp.float32, -bound, bound)
  conv1_b = jax.random.uniform(keys[2], (C,), jnp.float32, -bound, bound)
  conv2_w = jax.random.uniform(keys[3], (C, C, K, K), jnp.float32, -bound, bound)
  conv2_b = jax.random.uniform(keys[4], (C,), jnp.float32, -bound, bound)
  ln1_g = jnp.ones((N_FEATS,), jnp.float32)
  ln1_b = jnp.zeros((N_FEATS,), jnp.float32)
  ln2_g = jnp.ones((N_FEATS,), jnp.float32)
  ln2_b = jnp.zeros((N_FEATS,), jnp.float32)

  params = (ln1_g, ln1_b, conv1_w, conv1_b, ln2_g, ln2_b, conv2_w, conv2_b)

  out = residual_cnn(x, params, K)
  out = jax.block_until_ready(out)

  ref = residual_cnn_reference(x, params, K)
  np.testing.assert_allclose(np.asarray(out), np.asarray(ref),
                             atol=2e-4, rtol=2e-4)
  print("KERNEL_OK")
</pallas_src>

<mosaic_0001>
module attributes {stable_mosaic.version = 11 : i64} {
  func.func @_residual_cnn_kernel(%arg0: i32, %arg1: memref<1x4x16x128xf32, #tpu.memory_space<vmem>>, %arg2: memref<16x1xf32, #tpu.memory_space<vmem>>, %arg3: memref<16x1xf32, #tpu.memory_space<vmem>>, %arg4: memref<144xf32, #tpu.memory_space<smem>>, %arg5: memref<4xf32, #tpu.memory_space<smem>>, %arg6: memref<16x1xf32, #tpu.memory_space<vmem>>, %arg7: memref<16x1xf32, #tpu.memory_space<vmem>>, %arg8: memref<144xf32, #tpu.memory_space<smem>>, %arg9: memref<4xf32, #tpu.memory_space<smem>>, %arg10: memref<1x4x16x128xf32, #tpu.memory_space<vmem>>) attributes {dimension_semantics = [#tpu.dimension_semantics<parallel>], iteration_bounds = array<i64: 2>, scalar_prefetch = 0 : i64, scratch_operands = 0 : i64, tpu.core_type = #tpu.core_type<tc>, window_params = [{transform_indices = @transform_0, window_bounds = array<i64: 1, 4, 16, 128>}, {pipeline_mode = #tpu.pipeline_mode<synchronous>, transform_indices = @transform_1, window_bounds = array<i64: 16, 1>}, {pipeline_mode = #tpu.pipeline_mode<synchronous>, transform_indices = @transform_2, window_bounds = array<i64: 16, 1>}, {transform_indices = @transform_3, window_bounds = array<i64: 144>}, {transform_indices = @transform_4, window_bounds = array<i64: 4>}, {pipeline_mode = #tpu.pipeline_mode<synchronous>, transform_indices = @transform_5, window_bounds = array<i64: 16, 1>}, {pipeline_mode = #tpu.pipeline_mode<synchronous>, transform_indices = @transform_6, window_bounds = array<i64: 16, 1>}, {transform_indices = @transform_7, window_bounds = array<i64: 144>}, {transform_indices = @transform_8, window_bounds = array<i64: 4>}, {transform_indices = @transform_9, window_bounds = array<i64: 1, 4, 16, 128>}]} {
    %c0 = arith.constant 0 : index
    %c0_0 = arith.constant 0 : index
    %c0_1 = arith.constant 0 : index
    %c0_2 = arith.constant 0 : index
    %0 = vector.load %arg1[%c0, %c0_0, %c0_1, %c0_2] : memref<1x4x16x128xf32, #tpu.memory_space<vmem>>, vector<1x4x16x128xf32>
    %1 = vector.shape_cast %0 : vector<1x4x16x128xf32> to vector<4x16x128xf32>
    %2 = tpu.iota {dimensions = array<i32: 1>} : vector<16x128xi32>
    %c16_i32 = arith.constant 16 : i32
    %3 = vector.broadcast %c16_i32 : i32 to vector<16x128xi32>
    %4 = arith.cmpi slt, %2, %3 : vector<16x128xi32>
    %c0_3 = arith.constant 0 : index
    %c0_4 = arith.constant 0 : index
    %5 = vector.load %arg2[%c0_3, %c0_4] : memref<16x1xf32, #tpu.memory_space<vmem>>, vector<16x1xf32>
    %c0_5 = arith.constant 0 : index
    %c0_6 = arith.constant 0 : index
    %6 = vector.load %arg3[%c0_5, %c0_6] : memref<16x1xf32, #tpu.memory_space<vmem>>, vector<16x1xf32>
    %cst = arith.constant dense<0.000000e+00> : vector<4x128xf32>
    %7 = vector.multi_reduction <add>, %1, %cst [1] : vector<4x16x128xf32> to vector<4x128xf32>
    %8 = vector.shape_cast %7 : vector<4x128xf32> to vector<4x1x128xf32>
    %9 = arith.mulf %1, %1 : vector<4x16x128xf32>
    %cst_7 = arith.constant dense<0.000000e+00> : vector<4x128xf32>
    %10 = vector.multi_reduction <add>, %9, %cst_7 [1] : vector<4x16x128xf32> to vector<4x128xf32>
    %11 = vector.shape_cast %10 : vector<4x128xf32> to vector<4x1x128xf32>
    %cst_8 = arith.constant 6.250000e-02 : f32
    %12 = vector.broadcast %cst_8 : f32 to vector<4x1x128xf32>
    %13 = arith.mulf %8, %12 : vector<4x1x128xf32>
    %cst_9 = arith.constant 6.250000e-02 : f32
    %14 = vector.broadcast %cst_9 : f32 to vector<4x1x128xf32>
    %15 = arith.mulf %11, %14 : vector<4x1x128xf32>
    %16 = arith.mulf %13, %13 : vector<4x1x128xf32>
    %17 = arith.subf %15, %16 : vector<4x1x128xf32>
    %cst_10 = arith.constant 9.99999974E-6 : f32
    %18 = vector.broadcast %cst_10 : f32 to vector<4x1x128xf32>
    %19 = arith.addf %17, %18 : vector<4x1x128xf32>
    %20 = math.rsqrt %19 : vector<4x1x128xf32>
    %21 = vector.broadcast %13 : vector<4x1x128xf32> to vector<4x16x128xf32>
    %22 = arith.subf %1, %21 : vector<4x16x128xf32>
    %23 = vector.broadcast %20 : vector<4x1x128xf32> to vector<4x16x128xf32>
    %24 = arith.mulf %22, %23 : vector<4x16x128xf32>
    %25 = vector.shape_cast %5 : vector<16x1xf32> to vector<1x16x1xf32>
    %26 = vector.broadcast %25 : vector<1x16x1xf32> to vector<4x16x128xf32>
    %27 = arith.mulf %24, %26 : vector<4x16x128xf32>
    %28 = vector.shape_cast %6 : vector<16x1xf32> to vector<1x16x1xf32>
    %29 = vector.broadcast %28 : vector<1x16x1xf32> to vector<4x16x128xf32>
    %30 = arith.addf %27, %29 : vector<4x16x128xf32>
    %cst_11 = arith.constant 5.000000e-01 : f32
    %31 = vector.broadcast %cst_11 : f32 to vector<4x16x128xf32>
    %32 = arith.mulf %31, %30 : vector<4x16x128xf32>
    %cst_12 = arith.constant 0.707106769 : f32
    %33 = vector.broadcast %cst_12 : f32 to vector<4x16x128xf32>
    %34 = arith.mulf %30, %33 : vector<4x16x128xf32>
    %cst_13 = arith.constant 0.000000e+00 : f32
    %35 = vector.broadcast %cst_13 : f32 to vector<4x16x128xf32>
    %36 = arith.cmpf oge, %34, %35 : vector<4x16x128xf32>
    %cst_14 = arith.constant 1.000000e+00 : f32
    %cst_15 = arith.constant -1.000000e+00 : f32
    %37 = vector.broadcast %cst_14 : f32 to vector<4x16x128xf32>
    %38 = vector.broadcast %cst_15 : f32 to vector<4x16x128xf32>
    %39 = arith.select %36, %37, %38 : vector<4x16x128xi1>, vector<4x16x128xf32>
    %40 = math.absf %34 : vector<4x16x128xf32>
    %cst_16 = arith.constant 0.327591091 : f32
    %41 = vector.broadcast %cst_16 : f32 to vector<4x16x128xf32>
    %42 = arith.mulf %41, %40 : vector<4x16x128xf32>
    %cst_17 = arith.constant 1.000000e+00 : f32
    %43 = vector.broadcast %cst_17 : f32 to vector<4x16x128xf32>
    %44 = arith.addf %43, %42 : vector<4x16x128xf32>
    %cst_18 = arith.constant 1.000000e+00 : f32
    %45 = vector.broadcast %cst_18 : f32 to vector<4x16x128xf32>
    %46 = arith.divf %45, %44 : vector<4x16x128xf32>
    %cst_19 = arith.constant 1.06140542 : f32
    %47 = vector.broadcast %cst_19 : f32 to vector<4x16x128xf32>
    %48 = arith.mulf %47, %46 : vector<4x16x128xf32>
    %cst_20 = arith.constant -1.45315206 : f32
    %49 = vector.broadcast %cst_20 : f32 to vector<4x16x128xf32>
    %50 = arith.addf %48, %49 : vector<4x16x128xf32>
    %51 = arith.mulf %50, %46 : vector<4x16x128xf32>
    %cst_21 = arith.constant 1.42141378 : f32
    %52 = vector.broadcast %cst_21 : f32 to vector<4x16x128xf32>
    %53 = arith.addf %51, %52 : vector<4x16x128xf32>
    %54 = arith.mulf %53, %46 : vector<4x16x128xf32>
    %cst_22 = arith.constant -0.284496725 : f32
    %55 = vector.broadcast %cst_22 : f32 to vector<4x16x128xf32>
    %56 = arith.addf %54, %55 : vector<4x16x128xf32>
    %57 = arith.mulf %56, %46 : vector<4x16x128xf32>
    %cst_23 = arith.constant 0.254829586 : f32
    %58 = vector.broadcast %cst_23 : f32 to vector<4x16x128xf32>
    %59 = arith.addf %57, %58 : vector<4x16x128xf32>
    %60 = arith.mulf %59, %46 : vector<4x16x128xf32>
    %cst_24 = arith.constant 0.000000e+00 : f32
    %61 = vector.broadcast %cst_24 : f32 to vector<4x16x128xf32>
    %62 = arith.subf %61, %40 : vector<4x16x128xf32>
    %63 = arith.mulf %62, %40 : vector<4x16x128xf32>
    %64 = math.exp %63 : vector<4x16x128xf32>
    %65 = arith.mulf %60, %64 : vector<4x16x128xf32>
    %cst_25 = arith.constant 1.000000e+00 : f32
    %66 = vector.broadcast %cst_25 : f32 to vector<4x16x128xf32>
    %67 = arith.subf %66, %65 : vector<4x16x128xf32>
    %68 = arith.mulf %39, %67 : vector<4x16x128xf32>
    %cst_26 = arith.constant 1.000000e+00 : f32
    %69 = vector.broadcast %cst_26 : f32 to vector<4x16x128xf32>
    %70 = arith.addf %69, %68 : vector<4x16x128xf32>
    %71 = arith.mulf %32, %70 : vector<4x16x128xf32>
    %cst_27 = arith.constant 0.000000e+00 : f32
    %72 = vector.shape_cast %4 : vector<16x128xi1> to vector<1x16x128xi1>
    %73 = vector.broadcast %72 : vector<1x16x128xi1> to vector<4x16x128xi1>
    %74 = vector.broadcast %cst_27 : f32 to vector<4x16x128xf32>
    %75 = arith.select %73, %71, %74 : vector<4x16x128xi1>, vector<4x16x128xf32>
    %76 = tpu.iota {dimensions = array<i32: 0>} : vector<16x128xi32>
    %c1_i32 = arith.constant 1 : i32
    %77 = tpu.dynamic_rotate %75 by %c1_i32 dim 1 : vector<4x16x128xf32>, i32 -> vector<4x16x128xf32>
    %c-1_i32 = arith.constant -1 : i32
    %78 = vector.broadcast %c-1_i32 : i32 to vector<16x128xi32>
    %79 = arith.addi %76, %78 : vector<16x128xi32>
    %c0_i32 = arith.constant 0 : i32
    %80 = vector.broadcast %c0_i32 : i32 to vector<16x128xi32>
    %81 = arith.cmpi sge, %79, %80 : vector<16x128xi32>
    %c-1_i32_28 = arith.constant -1 : i32
    %82 = vector.broadcast %c-1_i32_28 : i32 to vector<16x128xi32>
    %83 = arith.addi %76, %82 : vector<16x128xi32>
    %c16_i32_29 = arith.constant 16 : i32
    %84 = vector.broadcast %c16_i32_29 : i32 to vector<16x128xi32>
    %85 = arith.cmpi slt, %83, %84 : vector<16x128xi32>
    %86 = arith.andi %81, %85 : vector<16x128xi1>
    %cst_30 = arith.constant 0.000000e+00 : f32
    %87 = vector.shape_cast %86 : vector<16x128xi1> to vector<1x16x128xi1>
    %88 = vector.broadcast %87 : vector<1x16x128xi1> to vector<4x16x128xi1>
    %89 = vector.broadcast %cst_30 : f32 to vector<4x16x128xf32>
    %90 = arith.select %88, %77, %89 : vector<4x16x128xi1>, vector<4x16x128xf32>
    %c1_i32_31 = arith.constant 1 : i32
    %91 = tpu.dynamic_rotate %90 by %c1_i32_31 dim 2 : vector<4x16x128xf32>, i32 -> vector<4x16x128xf32>
    %92 = vector.extract_strided_slice %91 {offsets = [0, 0, 0], sizes = [1, 16, 128], strides = [1, 1, 1]} : vector<4x16x128xf32> to vector<1x16x128xf32>
    %93 = vector.shape_cast %92 : vector<1x16x128xf32> to vector<16x128xf32>
    %94 = vector.extract_strided_slice %91 {offsets = [1, 0, 0], sizes = [1, 16, 128], strides = [1, 1, 1]} : vector<4x16x128xf32> to vector<1x16x128xf32>
    %95 = vector.shape_cast %94 : vector<1x16x128xf32> to vector<16x128xf32>
    %96 = vector.extract_strided_slice %91 {offsets = [2, 0, 0], sizes = [1, 16, 128], strides = [1, 1, 1]} : vector<4x16x128xf32> to vector<1x16x128xf32>
    %97 = vector.shape_cast %96 : vector<1x16x128xf32> to vector<16x128xf32>
    %98 = vector.extract_strided_slice %91 {offsets = [3, 0, 0], sizes = [1, 16, 128], strides = [1, 1, 1]} : vector<4x16x128xf32> to vector<1x16x128xf32>
    %99 = vector.shape_cast %98 : vector<1x16x128xf32> to vector<16x128xf32>
    %100 = vector.extract_strided_slice %90 {offsets = [0, 0, 0], sizes = [1, 16, 128], strides = [1, 1, 1]} : vector<4x16x128xf32> to vector<1x16x128xf32>
    %101 = vector.shape_cast %100 : vector<1x16x128xf32> to vector<16x128xf32>
    %102 = vector.extract_strided_slice %90 {offsets = [1, 0, 0], sizes = [1, 16, 128], strides = [1, 1, 1]} : vector<4x16x128xf32> to vector<1x16x128xf32>
    %103 = vector.shape_cast %102 : vector<1x16x128xf32> to vector<16x128xf32>
    %104 = vector.extract_strided_slice %90 {offsets = [2, 0, 0], sizes = [1, 16, 128], strides = [1, 1, 1]} : vector<4x16x128xf32> to vector<1x16x128xf32>
    %105 = vector.shape_cast %104 : vector<1x16x128xf32> to vector<16x128xf32>
    %106 = vector.extract_strided_slice %90 {offsets = [3, 0, 0], sizes = [1, 16, 128], strides = [1, 1, 1]} : vector<4x16x128xf32> to vector<1x16x128xf32>
    %107 = vector.shape_cast %106 : vector<1x16x128xf32> to vector<16x128xf32>
    %c127_i32 = arith.constant 127 : i32
    %108 = tpu.dynamic_rotate %90 by %c127_i32 dim 2 : vector<4x16x128xf32>, i32 -> vector<4x16x128xf32>
    %109 = vector.extract_strided_slice %108 {offsets = [0, 0, 0], sizes = [1, 16, 128], strides = [1, 1, 1]} : vector<4x16x128xf32> to vector<1x16x128xf32>
    %110 = vector.shape_cast %109 : vector<1x16x128xf32> to vector<16x128xf32>
    %111 = vector.extract_strided_slice %108 {offsets = [1, 0, 0], sizes = [1, 16, 128], strides = [1, 1, 1]} : vector<4x16x128xf32> to vector<1x16x128xf32>
    %112 = vector.shape_cast %111 : vector<1x16x128xf32> to vector<16x128xf32>
    %113 = vector.extract_strided_slice %108 {offsets = [2, 0, 0], sizes = [1, 16, 128], strides = [1, 1, 1]} : vector<4x16x128xf32> to vector<1x16x128xf32>
    %114 = vector.shape_cast %113 : vector<1x16x128xf32> to vector<16x128xf32>
    %115 = vector.extract_strided_slice %108 {offsets = [3, 0, 0], sizes = [1, 16, 128], strides = [1, 1, 1]} : vector<4x16x128xf32> to vector<1x16x128xf32>
    %116 = vector.shape_cast %115 : vector<1x16x128xf32> to vector<16x128xf32>
    %c1_i32_32 = arith.constant 1 : i32
    %117 = tpu.dynamic_rotate %75 by %c1_i32_32 dim 2 : vector<4x16x128xf32>, i32 -> vector<4x16x128xf32>
    %118 = vector.extract_strided_slice %117 {offsets = [0, 0, 0], sizes = [1, 16, 128], strides = [1, 1, 1]} : vector<4x16x128xf32> to vector<1x16x128xf32>
    %119 = vector.shape_cast %118 : vector<1x16x128xf32> to vector<16x128xf32>
    %120 = vector.extract_strided_slice %117 {offsets = [1, 0, 0], sizes = [1, 16, 128], strides = [1, 1, 1]} : vector<4x16x128xf32> to vector<1x16x128xf32>
    %121 = vector.shape_cast %120 : vector<1x16x128xf32> to vector<16x128xf32>
    %122 = vector.extract_strided_slice %117 {offsets = [2, 0, 0], sizes = [1, 16, 128], strides = [1, 1, 1]} : vector<4x16x128xf32> to vector<1x16x128xf32>
    %123 = vector.shape_cast %122 : vector<1x16x128xf32> to vector<16x128xf32>
    %124 = vector.extract_strided_slice %117 {offsets = [3, 0, 0], sizes = [1, 16, 128], strides = [1, 1, 1]} : vector<4x16x128xf32> to vector<1x16x128xf32>
    %125 = vector.shape_cast %124 : vector<1x16x128xf32> to vector<16x128xf32>
    %126 = vector.extract_strided_slice %75 {offsets = [0, 0, 0], sizes = [1, 16, 128], strides = [1, 1, 1]} : vector<4x16x128xf32> to vector<1x16x128xf32>
    %127 = vector.shape_cast %126 : vector<1x16x128xf32> to vector<16x128xf32>
    %128 = vector.extract_strided_slice %75 {offsets = [1, 0, 0], sizes = [1, 16, 128], strides = [1, 1, 1]} : vector<4x16x128xf32> to vector<1x16x128xf32>
    %129 = vector.shape_cast %128 : vector<1x16x128xf32> to vector<16x128xf32>
    %130 = vector.extract_strided_slice %75 {offsets = [2, 0, 0], sizes = [1, 16, 128], strides = [1, 1, 1]} : vector<4x16x128xf32> to vector<1x16x128xf32>
    %131 = vector.shape_cast %130 : vector<1x16x128xf32> to vector<16x128xf32>
    %132 = vector.extract_strided_slice %75 {offsets = [3, 0, 0], sizes = [1, 16, 128], strides = [1, 1, 1]} : vector<4x16x128xf32> to vector<1x16x128xf32>
    %133 = vector.shape_cast %132 : vector<1x16x128xf32> to vector<16x128xf32>
    %c127_i32_33 = arith.constant 127 : i32
    %134 = tpu.dynamic_rotate %75 by %c127_i32_33 dim 2 : vector<4x16x128xf32>, i32 -> vector<4x16x128xf32>
    %135 = vector.extract_strided_slice %134 {offsets = [0, 0, 0], sizes = [1, 16, 128], strides = [1, 1, 1]} : vector<4x16x128xf32> to vector<1x16x128xf32>
    %136 = vector.shape_cast %135 : vector<1x16x128xf32> to vector<16x128xf32>
    %137 = vector.extract_strided_slice %134 {offsets = [1, 0, 0], sizes = [1, 16, 128], strides = [1, 1, 1]} : vector<4x16x128xf32> to vector<1x16x128xf32>
    %138 = vector.shape_cast %137 : vector<1x16x128xf32> to vector<16x128xf32>
    %139 = vector.extract_strided_slice %134 {offsets = [2, 0, 0], sizes = [1, 16, 128], strides = [1, 1, 1]} : vector<4x16x128xf32> to vector<1x16x128xf32>
    %140 = vector.shape_cast %139 : vector<1x16x128xf32> to vector<16x128xf32>
    %141 = vector.extract_strided_slice %134 {offsets = [3, 0, 0], sizes = [1, 16, 128], strides = [1, 1, 1]} : vector<4x16x128xf32> to vector<1x16x128xf32>
    %142 = vector.shape_cast %141 : vector<1x16x128xf32> to vector<16x128xf32>
    %c15_i32 = arith.constant 15 : i32
    %143 = tpu.dynamic_rotate %75 by %c15_i32 dim 1 : vector<4x16x128xf32>, i32 -> vector<4x16x128xf32>
    %c1_i32_34 = arith.constant 1 : i32
    %144 = vector.broadcast %c1_i32_34 : i32 to vector<16x128xi32>
    %145 = arith.addi %76, %144 : vector<16x128xi32>
    %c0_i32_35 = arith.constant 0 : i32
    %146 = vector.broadcast %c0_i32_35 : i32 to vector<16x128xi32>
    %147 = arith.cmpi sge, %145, %146 : vector<16x128xi32>
    %c1_i32_36 = arith.constant 1 : i32
    %148 = vector.broadcast %c1_i32_36 : i32 to vector<16x128xi32>
    %149 = arith.addi %76, %148 : vector<16x128xi32>
    %c16_i32_37 = arith.constant 16 : i32
    %150 = vector.broadcast %c16_i32_37 : i32 to vector<16x128xi32>
    %151 = arith.cmpi slt, %149, %150 : vector<16x128xi32>
    %152 = arith.andi %147, %151 : vector<16x128xi1>
    %cst_38 = arith.constant 0.000000e+00 : f32
    %153 = vector.shape_cast %152 : vector<16x128xi1> to vector<1x16x128xi1>
    %154 = vector.broadcast %153 : vector<1x16x128xi1> to vector<4x16x128xi1>
    %155 = vector.broadcast %cst_38 : f32 to vector<4x16x128xf32>
    %156 = arith.select %154, %143, %155 : vector<4x16x128xi1>, vector<4x16x128xf32>
    %c1_i32_39 = arith.constant 1 : i32
    %157 = tpu.dynamic_rotate %156 by %c1_i32_39 dim 2 : vector<4x16x128xf32>, i32 -> vector<4x16x128xf32>
    %158 = vector.extract_strided_slice %157 {offsets = [0, 0, 0], sizes = [1, 16, 128], strides = [1, 1, 1]} : vector<4x16x128xf32> to vector<1x16x128xf32>
    %159 = vector.shape_cast %158 : vector<1x16x128xf32> to vector<16x128xf32>
    %160 = vector.extract_strided_slice %157 {offsets = [1, 0, 0], sizes = [1, 16, 128], strides = [1, 1, 1]} : vector<4x16x128xf32> to vector<1x16x128xf32>
    %161 = vector.shape_cast %160 : vector<1x16x128xf32> to vector<16x128xf32>
    %162 = vector.extract_strided_slice %157 {offsets = [2, 0, 0], sizes = [1, 16, 128], strides = [1, 1, 1]} : vector<4x16x128xf32> to vector<1x16x128xf32>
    %163 = vector.shape_cast %162 : vector<1x16x128xf32> to vector<16x128xf32>
    %164 = vector.extract_strided_slice %157 {offsets = [3, 0, 0], sizes = [1, 16, 128], strides = [1, 1, 1]} : vector<4x16x128xf32> to vector<1x16x128xf32>
    %165 = vector.shape_cast %164 : vector<1x16x128xf32> to vector<16x128xf32>
    %166 = vector.extract_strided_slice %156 {offsets = [0, 0, 0], sizes = [1, 16, 128], strides = [1, 1, 1]} : vector<4x16x128xf32> to vector<1x16x128xf32>
    %167 = vector.shape_cast %166 : vector<1x16x128xf32> to vector<16x128xf32>
    %168 = vector.extract_strided_slice %156 {offsets = [1, 0, 0], sizes = [1, 16, 128], strides = [1, 1, 1]} : vector<4x16x128xf32> to vector<1x16x128xf32>
    %169 = vector.shape_cast %168 : vector<1x16x128xf32> to vector<16x128xf32>
    %170 = vector.extract_strided_slice %156 {offsets = [2, 0, 0], sizes = [1, 16, 128], strides = [1, 1, 1]} : vector<4x16x128xf32> to vector<1x16x128xf32>
    %171 = vector.shape_cast %170 : vector<1x16x128xf32> to vector<16x128xf32>
    %172 = vector.extract_strided_slice %156 {offsets = [3, 0, 0], sizes = [1, 16, 128], strides = [1, 1, 1]} : vector<4x16x128xf32> to vector<1x16x128xf32>
    %173 = vector.shape_cast %172 : vector<1x16x128xf32> to vector<16x128xf32>
    %c127_i32_40 = arith.constant 127 : i32
    %174 = tpu.dynamic_rotate %156 by %c127_i32_40 dim 2 : vector<4x16x128xf32>, i32 -> vector<4x16x128xf32>
    %175 = vector.extract_strided_slice %174 {offsets = [0, 0, 0], sizes = [1, 16, 128], strides = [1, 1, 1]} : vector<4x16x128xf32> to vector<1x16x128xf32>
    %176 = vector.shape_cast %175 : vector<1x16x128xf32> to vector<16x128xf32>
    %177 = vector.extract_strided_slice %174 {offsets = [1, 0, 0], sizes = [1, 16, 128], strides = [1, 1, 1]} : vector<4x16x128xf32> to vector<1x16x128xf32>
    %178 = vector.shape_cast %177 : vector<1x16x128xf32> to vector<16x128xf32>
    %179 = vector.extract_strided_slice %174 {offsets = [2, 0, 0], sizes = [1, 16, 128], strides = [1, 1, 1]} : vector<4x16x128xf32> to vector<1x16x128xf32>
    %180 = vector.shape_cast %179 : vector<1x16x128xf32> to vector<16x128xf32>
    %181 = vector.extract_strided_slice %174 {offsets = [3, 0, 0], sizes = [1, 16, 128], strides = [1, 1, 1]} : vector<4x16x128xf32> to vector<1x16x128xf32>
    %182 = vector.shape_cast %181 : vector<1x16x128xf32> to vector<16x128xf32>
    %cst_41 = arith.constant 0.000000e+00 : f32
    %183 = vector.broadcast %cst_41 : f32 to vector<16x128xf32>
    %c0_42 = arith.constant 0 : index
    %184 = memref.load %arg5[%c0_42] : memref<4xf32, #tpu.memory_space<smem>>
    %185 = vector.broadcast %184 : f32 to vector<16x128xf32>
    %186 = arith.addf %183, %185 : vector<16x128xf32>
    %c0_43 = arith.constant 0 : index
    %187 = memref.load %arg4[%c0_43] : memref<144xf32, #tpu.memory_space<smem>>
    %188 = vector.broadcast %187 : f32 to vector<16x128xf32>
    %189 = arith.mulf %188, %93 : vector<16x128xf32>
    %190 = arith.addf %186, %189 : vector<16x128xf32>
    %c1 = arith.constant 1 : index
    %191 = memref.load %arg4[%c1] : memref<144xf32, #tpu.memory_space<smem>>
    %192 = vector.broadcast %191 : f32 to vector<16x128xf32>
    %193 = arith.mulf %192, %101 : vector<16x128xf32>
    %194 = arith.addf %190, %193 : vector<16x128xf32>
    %c2 = arith.constant 2 : index
    %195 = memref.load %arg4[%c2] : memref<144xf32, #tpu.memory_space<smem>>
    %196 = vector.broadcast %195 : f32 to vector<16x128xf32>
    %197 = arith.mulf %196, %110 : vector<16x128xf32>
    %198 = arith.addf %194, %197 : vector<16x128xf32>
    %c3 = arith.constant 3 : index
    %199 = memref.load %arg4[%c3] : memref<144xf32, #tpu.memory_space<smem>>
    %200 = vector.broadcast %199 : f32 to vector<16x128xf32>
    %201 = arith.mulf %200, %119 : vector<16x128xf32>
    %202 = arith.addf %198, %201 : vector<16x128xf32>
    %c4 = arith.constant 4 : index
    %203 = memref.load %arg4[%c4] : memref<144xf32, #tpu.memory_space<smem>>
    %204 = vector.broadcast %203 : f32 to vector<16x128xf32>
    %205 = arith.mulf %204, %127 : vector<16x128xf32>
    %206 = arith.addf %202, %205 : vector<16x128xf32>
    %c5 = arith.constant 5 : index
    %207 = memref.load %arg4[%c5] : memref<144xf32, #tpu.memory_space<smem>>
    %208 = vector.broadcast %207 : f32 to vector<16x128xf32>
    %209 = arith.mulf %208, %136 : vector<16x128xf32>
    %210 = arith.addf %206, %209 : vector<16x128xf32>
    %c6 = arith.constant 6 : index
    %211 = memref.load %arg4[%c6] : memref<144xf32, #tpu.memory_space<smem>>
    %212 = vector.broadcast %211 : f32 to vector<16x128xf32>
    %213 = arith.mulf %212, %159 : vector<16x128xf32>
    %214 = arith.addf %210, %213 : vector<16x128xf32>
    %c7 = arith.constant 7 : index
    %215 = memref.load %arg4[%c7] : memref<144xf32, #tpu.memory_space<smem>>
    %216 = vector.broadcast %215 : f32 to vector<16x128xf32>
    %217 = arith.mulf %216, %167 : vector<16x128xf32>
    %218 = arith.addf %214, %217 : vector<16x128xf32>
    %c8 = arith.constant 8 : index
    %219 = memref.load %arg4[%c8] : memref<144xf32, #tpu.memory_space<smem>>
    %220 = vector.broadcast %219 : f32 to vector<16x128xf32>
    %221 = arith.mulf %220, %176 : vector<16x128xf32>
    %222 = arith.addf %218, %221 : vector<16x128xf32>
    %c9 = arith.constant 9 : index
    %223 = memref.load %arg4[%c9] : memref<144xf32, #tpu.memory_space<smem>>
    %224 = vector.broadcast %223 : f32 to vector<16x128xf32>
    %225 = arith.mulf %224, %95 : vector<16x128xf32>
    %226 = arith.addf %222, %225 : vector<16x128xf32>
    %c10 = arith.constant 10 : index
    %227 = memref.load %arg4[%c10] : memref<144xf32, #tpu.memory_space<smem>>
    %228 = vector.broadcast %227 : f32 to vector<16x128xf32>
    %229 = arith.mulf %228, %103 : vector<16x128xf32>
    %230 = arith.addf %226, %229 : vector<16x128xf32>
    %c11 = arith.constant 11 : index
    %231 = memref.load %arg4[%c11] : memref<144xf32, #tpu.memory_space<smem>>
    %232 = vector.broadcast %231 : f32 to vector<16x128xf32>
    %233 = arith.mulf %232, %112 : vector<16x128xf32>
    %234 = arith.addf %230, %233 : vector<16x128xf32>
    %c12 = arith.constant 12 : index
    %235 = memref.load %arg4[%c12] : memref<144xf32, #tpu.memory_space<smem>>
    %236 = vector.broadcast %235 : f32 to vector<16x128xf32>
    %237 = arith.mulf %236, %121 : vector<16x128xf32>
    %238 = arith.addf %234, %237 : vector<16x128xf32>
    %c13 = arith.constant 13 : index
    %239 = memref.load %arg4[%c13] : memref<144xf32, #tpu.memory_space<smem>>
    %240 = vector.broadcast %239 : f32 to vector<16x128xf32>
    %241 = arith.mulf %240, %129 : vector<16x128xf32>
    %242 = arith.addf %238, %241 : vector<16x128xf32>
    %c14 = arith.constant 14 : index
    %243 = memref.load %arg4[%c14] : memref<144xf32, #tpu.memory_space<smem>>
    %244 = vector.broadcast %243 : f32 to vector<16x128xf32>
    %245 = arith.mulf %244, %138 : vector<16x128xf32>
    %246 = arith.addf %242, %245 : vector<16x128xf32>
    %c15 = arith.constant 15 : index
    %247 = memref.load %arg4[%c15] : memref<144xf32, #tpu.memory_space<smem>>
    %248 = vector.broadcast %247 : f32 to vector<16x128xf32>
    %249 = arith.mulf %248, %161 : vector<16x128xf32>
    %250 = arith.addf %246, %249 : vector<16x128xf32>
    %c16 = arith.constant 16 : index
    %251 = memref.load %arg4[%c16] : memref<144xf32, #tpu.memory_space<smem>>
    %252 = vector.broadcast %251 : f32 to vector<16x128xf32>
    %253 = arith.mulf %252, %169 : vector<16x128xf32>
    %254 = arith.addf %250, %253 : vector<16x128xf32>
    %c17 = arith.constant 17 : index
    %255 = memref.load %arg4[%c17] : memref<144xf32, #tpu.memory_space<smem>>
    %256 = vector.broadcast %255 : f32 to vector<16x128xf32>
    %257 = arith.mulf %256, %178 : vector<16x128xf32>
    %258 = arith.addf %254, %257 : vector<16x128xf32>
    %c18 = arith.constant 18 : index
    %259 = memref.load %arg4[%c18] : memref<144xf32, #tpu.memory_space<smem>>
    %260 = vector.broadcast %259 : f32 to vector<16x128xf32>
    %261 = arith.mulf %260, %97 : vector<16x128xf32>
    %262 = arith.addf %258, %261 : vector<16x128xf32>
    %c19 = arith.constant 19 : index
    %263 = memref.load %arg4[%c19] : memref<144xf32, #tpu.memory_space<smem>>
    %264 = vector.broadcast %263 : f32 to vector<16x128xf32>
    %265 = arith.mulf %264, %105 : vector<16x128xf32>
    %266 = arith.addf %262, %265 : vector<16x128xf32>
    %c20 = arith.constant 20 : index
    %267 = memref.load %arg4[%c20] : memref<144xf32, #tpu.memory_space<smem>>
    %268 = vector.broadcast %267 : f32 to vector<16x128xf32>
    %269 = arith.mulf %268, %114 : vector<16x128xf32>
    %270 = arith.addf %266, %269 : vector<16x128xf32>
    %c21 = arith.constant 21 : index
    %271 = memref.load %arg4[%c21] : memref<144xf32, #tpu.memory_space<smem>>
    %272 = vector.broadcast %271 : f32 to vector<16x128xf32>
    %273 = arith.mulf %272, %123 : vector<16x128xf32>
    %274 = arith.addf %270, %273 : vector<16x128xf32>
    %c22 = arith.constant 22 : index
    %275 = memref.load %arg4[%c22] : memref<144xf32, #tpu.memory_space<smem>>
    %276 = vector.broadcast %275 : f32 to vector<16x128xf32>
    %277 = arith.mulf %276, %131 : vector<16x128xf32>
    %278 = arith.addf %274, %277 : vector<16x128xf32>
    %c23 = arith.constant 23 : index
    %279 = memref.load %arg4[%c23] : memref<144xf32, #tpu.memory_space<smem>>
    %280 = vector.broadcast %279 : f32 to vector<16x128xf32>
    %281 = arith.mulf %280, %140 : vector<16x128xf32>
    %282 = arith.addf %278, %281 : vector<16x128xf32>
    %c24 = arith.constant 24 : index
    %283 = memref.load %arg4[%c24] : memref<144xf32, #tpu.memory_space<smem>>
    %284 = vector.broadcast %283 : f32 to vector<16x128xf32>
    %285 = arith.mulf %284, %163 : vector<16x128xf32>
    %286 = arith.addf %282, %285 : vector<16x128xf32>
    %c25 = arith.constant 25 : index
    %287 = memref.load %arg4[%c25] : memref<144xf32, #tpu.memory_space<smem>>
    %288 = vector.broadcast %287 : f32 to vector<16x128xf32>
    %289 = arith.mulf %288, %171 : vector<16x128xf32>
    %290 = arith.addf %286, %289 : vector<16x128xf32>
    %c26 = arith.constant 26 : index
    %291 = memref.load %arg4[%c26] : memref<144xf32, #tpu.memory_space<smem>>
    %292 = vector.broadcast %291 : f32 to vector<16x128xf32>
    %293 = arith.mulf %292, %180 : vector<16x128xf32>
    %294 = arith.addf %290, %293 : vector<16x128xf32>
    %c27 = arith.constant 27 : index
    %295 = memref.load %arg4[%c27] : memref<144xf32, #tpu.memory_space<smem>>
    %296 = vector.broadcast %295 : f32 to vector<16x128xf32>
    %297 = arith.mulf %296, %99 : vector<16x128xf32>
    %298 = arith.addf %294, %297 : vector<16x128xf32>
    %c28 = arith.constant 28 : index
    %299 = memref.load %arg4[%c28] : memref<144xf32, #tpu.memory_space<smem>>
    %300 = vector.broadcast %299 : f32 to vector<16x128xf32>
    %301 = arith.mulf %300, %107 : vector<16x128xf32>
    %302 = arith.addf %298, %301 : vector<16x128xf32>
    %c29 = arith.constant 29 : index
    %303 = memref.load %arg4[%c29] : memref<144xf32, #tpu.memory_space<smem>>
    %304 = vector.broadcast %303 : f32 to vector<16x128xf32>
    %305 = arith.mulf %304, %116 : vector<16x128xf32>
    %306 = arith.addf %302, %305 : vector<16x128xf32>
    %c30 = arith.constant 30 : index
    %307 = memref.load %arg4[%c30] : memref<144xf32, #tpu.memory_space<smem>>
    %308 = vector.broadcast %307 : f32 to vector<16x128xf32>
    %309 = arith.mulf %308, %125 : vector<16x128xf32>
    %310 = arith.addf %306, %309 : vector<16x128xf32>
    %c31 = arith.constant 31 : index
    %311 = memref.load %arg4[%c31] : memref<144xf32, #tpu.memory_space<smem>>
    %312 = vector.broadcast %311 : f32 to vector<16x128xf32>
    %313 = arith.mulf %312, %133 : vector<16x128xf32>
    %314 = arith.addf %310, %313 : vector<16x128xf32>
    %c32 = arith.constant 32 : index
    %315 = memref.load %arg4[%c32] : memref<144xf32, #tpu.memory_space<smem>>
    %316 = vector.broadcast %315 : f32 to vector<16x128xf32>
    %317 = arith.mulf %316, %142 : vector<16x128xf32>
    %318 = arith.addf %314, %317 : vector<16x128xf32>
    %c33 = arith.constant 33 : index
    %319 = memref.load %arg4[%c33] : memref<144xf32, #tpu.memory_space<smem>>
    %320 = vector.broadcast %319 : f32 to vector<16x128xf32>
    %321 = arith.mulf %320, %165 : vector<16x128xf32>
    %322 = arith.addf %318, %321 : vector<16x128xf32>
    %c34 = arith.constant 34 : index
    %323 = memref.load %arg4[%c34] : memref<144xf32, #tpu.memory_space<smem>>
    %324 = vector.broadcast %323 : f32 to vector<16x128xf32>
    %325 = arith.mulf %324, %173 : vector<16x128xf32>
    %326 = arith.addf %322, %325 : vector<16x128xf32>
    %c35 = arith.constant 35 : index
    %327 = memref.load %arg4[%c35] : memref<144xf32, #tpu.memory_space<smem>>
    %328 = vector.broadcast %327 : f32 to vector<16x128xf32>
    %329 = arith.mulf %328, %182 : vector<16x128xf32>
    %330 = arith.addf %326, %329 : vector<16x128xf32>
    %cst_44 = arith.constant 0.000000e+00 : f32
    %331 = vector.broadcast %cst_44 : f32 to vector<16x128xf32>
    %c1_45 = arith.constant 1 : index
    %332 = memref.load %arg5[%c1_45] : memref<4xf32, #tpu.memory_space<smem>>
    %333 = vector.broadcast %332 : f32 to vector<16x128xf32>
    %334 = arith.addf %331, %333 : vector<16x128xf32>
    %c36 = arith.constant 36 : index
    %335 = memref.load %arg4[%c36] : memref<144xf32, #tpu.memory_space<smem>>
    %336 = vector.broadcast %335 : f32 to vector<16x128xf32>
    %337 = arith.mulf %336, %93 : vector<16x128xf32>
    %338 = arith.addf %334, %337 : vector<16x128xf32>
    %c37 = arith.constant 37 : index
    %339 = memref.load %arg4[%c37] : memref<144xf32, #tpu.memory_space<smem>>
    %340 = vector.broadcast %339 : f32 to vector<16x128xf32>
    %341 = arith.mulf %340, %101 : vector<16x128xf32>
    %342 = arith.addf %338, %341 : vector<16x128xf32>
    %c38 = arith.constant 38 : index
    %343 = memref.load %arg4[%c38] : memref<144xf32, #tpu.memory_space<smem>>
    %344 = vector.broadcast %343 : f32 to vector<16x128xf32>
    %345 = arith.mulf %344, %110 : vector<16x128xf32>
    %346 = arith.addf %342, %345 : vector<16x128xf32>
    %c39 = arith.constant 39 : index
    %347 = memref.load %arg4[%c39] : memref<144xf32, #tpu.memory_space<smem>>
    %348 = vector.broadcast %347 : f32 to vector<16x128xf32>
    %349 = arith.mulf %348, %119 : vector<16x128xf32>
    %350 = arith.addf %346, %349 : vector<16x128xf32>
    %c40 = arith.constant 40 : index
    %351 = memref.load %arg4[%c40] : memref<144xf32, #tpu.memory_space<smem>>
    %352 = vector.broadcast %351 : f32 to vector<16x128xf32>
    %353 = arith.mulf %352, %127 : vector<16x128xf32>
    %354 = arith.addf %350, %353 : vector<16x128xf32>
    %c41 = arith.constant 41 : index
    %355 = memref.load %arg4[%c41] : memref<144xf32, #tpu.memory_space<smem>>
    %356 = vector.broadcast %355 : f32 to vector<16x128xf32>
    %357 = arith.mulf %356, %136 : vector<16x128xf32>
    %358 = arith.addf %354, %357 : vector<16x128xf32>
    %c42 = arith.constant 42 : index
    %359 = memref.load %arg4[%c42] : memref<144xf32, #tpu.memory_space<smem>>
    %360 = vector.broadcast %359 : f32 to vector<16x128xf32>
    %361 = arith.mulf %360, %159 : vector<16x128xf32>
    %362 = arith.addf %358, %361 : vector<16x128xf32>
    %c43 = arith.constant 43 : index
    %363 = memref.load %arg4[%c43] : memref<144xf32, #tpu.memory_space<smem>>
    %364 = vector.broadcast %363 : f32 to vector<16x128xf32>
    %365 = arith.mulf %364, %167 : vector<16x128xf32>
    %366 = arith.addf %362, %365 : vector<16x128xf32>
    %c44 = arith.constant 44 : index
    %367 = memref.load %arg4[%c44] : memref<144xf32, #tpu.memory_space<smem>>
    %368 = vector.broadcast %367 : f32 to vector<16x128xf32>
    %369 = arith.mulf %368, %176 : vector<16x128xf32>
    %370 = arith.addf %366, %369 : vector<16x128xf32>
    %c45 = arith.constant 45 : index
    %371 = memref.load %arg4[%c45] : memref<144xf32, #tpu.memory_space<smem>>
    %372 = vector.broadcast %371 : f32 to vector<16x128xf32>
    %373 = arith.mulf %372, %95 : vector<16x128xf32>
    %374 = arith.addf %370, %373 : vector<16x128xf32>
    %c46 = arith.constant 46 : index
    %375 = memref.load %arg4[%c46] : memref<144xf32, #tpu.memory_space<smem>>
    %376 = vector.broadcast %375 : f32 to vector<16x128xf32>
    %377 = arith.mulf %376, %103 : vector<16x128xf32>
    %378 = arith.addf %374, %377 : vector<16x128xf32>
    %c47 = arith.constant 47 : index
    %379 = memref.load %arg4[%c47] : memref<144xf32, #tpu.memory_space<smem>>
    %380 = vector.broadcast %379 : f32 to vector<16x128xf32>
    %381 = arith.mulf %380, %112 : vector<16x128xf32>
    %382 = arith.addf %378, %381 : vector<16x128xf32>
    %c48 = arith.constant 48 : index
    %383 = memref.load %arg4[%c48] : memref<144xf32, #tpu.memory_space<smem>>
    %384 = vector.broadcast %383 : f32 to vector<16x128xf32>
    %385 = arith.mulf %384, %121 : vector<16x128xf32>
    %386 = arith.addf %382, %385 : vector<16x128xf32>
    %c49 = arith.constant 49 : index
    %387 = memref.load %arg4[%c49] : memref<144xf32, #tpu.memory_space<smem>>
    %388 = vector.broadcast %387 : f32 to vector<16x128xf32>
    %389 = arith.mulf %388, %129 : vector<16x128xf32>
    %390 = arith.addf %386, %389 : vector<16x128xf32>
    %c50 = arith.constant 50 : index
    %391 = memref.load %arg4[%c50] : memref<144xf32, #tpu.memory_space<smem>>
    %392 = vector.broadcast %391 : f32 to vector<16x128xf32>
    %393 = arith.mulf %392, %138 : vector<16x128xf32>
    %394 = arith.addf %390, %393 : vector<16x128xf32>
    %c51 = arith.constant 51 : index
    %395 = memref.load %arg4[%c51] : memref<144xf32, #tpu.memory_space<smem>>
    %396 = vector.broadcast %395 : f32 to vector<16x128xf32>
    %397 = arith.mulf %396, %161 : vector<16x128xf32>
    %398 = arith.addf %394, %397 : vector<16x128xf32>
    %c52 = arith.constant 52 : index
    %399 = memref.load %arg4[%c52] : memref<144xf32, #tpu.memory_space<smem>>
    %400 = vector.broadcast %399 : f32 to vector<16x128xf32>
    %401 = arith.mulf %400, %169 : vector<16x128xf32>
    %402 = arith.addf %398, %401 : vector<16x128xf32>
    %c53 = arith.constant 53 : index
    %403 = memref.load %arg4[%c53] : memref<144xf32, #tpu.memory_space<smem>>
    %404 = vector.broadcast %403 : f32 to vector<16x128xf32>
    %405 = arith.mulf %404, %178 : vector<16x128xf32>
    %406 = arith.addf %402, %405 : vector<16x128xf32>
    %c54 = arith.constant 54 : index
    %407 = memref.load %arg4[%c54] : memref<144xf32, #tpu.memory_space<smem>>
    %408 = vector.broadcast %407 : f32 to vector<16x128xf32>
    %409 = arith.mulf %408, %97 : vector<16x128xf32>
    %410 = arith.addf %406, %409 : vector<16x128xf32>
    %c55 = arith.constant 55 : index
    %411 = memref.load %arg4[%c55] : memref<144xf32, #tpu.memory_space<smem>>
    %412 = vector.broadcast %411 : f32 to vector<16x128xf32>
    %413 = arith.mulf %412, %105 : vector<16x128xf32>
    %414 = arith.addf %410, %413 : vector<16x128xf32>
    %c56 = arith.constant 56 : index
    %415 = memref.load %arg4[%c56] : memref<144xf32, #tpu.memory_space<smem>>
    %416 = vector.broadcast %415 : f32 to vector<16x128xf32>
    %417 = arith.mulf %416, %114 : vector<16x128xf32>
    %418 = arith.addf %414, %417 : vector<16x128xf32>
    %c57 = arith.constant 57 : index
    %419 = memref.load %arg4[%c57] : memref<144xf32, #tpu.memory_space<smem>>
    %420 = vector.broadcast %419 : f32 to vector<16x128xf32>
    %421 = arith.mulf %420, %123 : vector<16x128xf32>
    %422 = arith.addf %418, %421 : vector<16x128xf32>
    %c58 = arith.constant 58 : index
    %423 = memref.load %arg4[%c58] : memref<144xf32, #tpu.memory_space<smem>>
    %424 = vector.broadcast %423 : f32 to vector<16x128xf32>
    %425 = arith.mulf %424, %131 : vector<16x128xf32>
    %426 = arith.addf %422, %425 : vector<16x128xf32>
    %c59 = arith.constant 59 : index
    %427 = memref.load %arg4[%c59] : memref<144xf32, #tpu.memory_space<smem>>
    %428 = vector.broadcast %427 : f32 to vector<16x128xf32>
    %429 = arith.mulf %428, %140 : vector<16x128xf32>
    %430 = arith.addf %426, %429 : vector<16x128xf32>
    %c60 = arith.constant 60 : index
    %431 = memref.load %arg4[%c60] : memref<144xf32, #tpu.memory_space<smem>>
    %432 = vector.broadcast %431 : f32 to vector<16x128xf32>
    %433 = arith.mulf %432, %163 : vector<16x128xf32>
    %434 = arith.addf %430, %433 : vector<16x128xf32>
    %c61 = arith.constant 61 : index
    %435 = memref.load %arg4[%c61] : memref<144xf32, #tpu.memory_space<smem>>
    %436 = vector.broadcast %435 : f32 to vector<16x128xf32>
    %437 = arith.mulf %436, %171 : vector<16x128xf32>
    %438 = arith.addf %434, %437 : vector<16x128xf32>
    %c62 = arith.constant 62 : index
    %439 = memref.load %arg4[%c62] : memref<144xf32, #tpu.memory_space<smem>>
    %440 = vector.broadcast %439 : f32 to vector<16x128xf32>
    %441 = arith.mulf %440, %180 : vector<16x128xf32>
    %442 = arith.addf %438, %441 : vector<16x128xf32>
    %c63 = arith.constant 63 : index
    %443 = memref.load %arg4[%c63] : memref<144xf32, #tpu.memory_space<smem>>
    %444 = vector.broadcast %443 : f32 to vector<16x128xf32>
    %445 = arith.mulf %444, %99 : vector<16x128xf32>
    %446 = arith.addf %442, %445 : vector<16x128xf32>
    %c64 = arith.constant 64 : index
    %447 = memref.load %arg4[%c64] : memref<144xf32, #tpu.memory_space<smem>>
    %448 = vector.broadcast %447 : f32 to vector<16x128xf32>
    %449 = arith.mulf %448, %107 : vector<16x128xf32>
    %450 = arith.addf %446, %449 : vector<16x128xf32>
    %c65 = arith.constant 65 : index
    %451 = memref.load %arg4[%c65] : memref<144xf32, #tpu.memory_space<smem>>
    %452 = vector.broadcast %451 : f32 to vector<16x128xf32>
    %453 = arith.mulf %452, %116 : vector<16x128xf32>
    %454 = arith.addf %450, %453 : vector<16x128xf32>
    %c66 = arith.constant 66 : index
    %455 = memref.load %arg4[%c66] : memref<144xf32, #tpu.memory_space<smem>>
    %456 = vector.broadcast %455 : f32 to vector<16x128xf32>
    %457 = arith.mulf %456, %125 : vector<16x128xf32>
    %458 = arith.addf %454, %457 : vector<16x128xf32>
    %c67 = arith.constant 67 : index
    %459 = memref.load %arg4[%c67] : memref<144xf32, #tpu.memory_space<smem>>
    %460 = vector.broadcast %459 : f32 to vector<16x128xf32>
    %461 = arith.mulf %460, %133 : vector<16x128xf32>
    %462 = arith.addf %458, %461 : vector<16x128xf32>
    %c68 = arith.constant 68 : index
    %463 = memref.load %arg4[%c68] : memref<144xf32, #tpu.memory_space<smem>>
    %464 = vector.broadcast %463 : f32 to vector<16x128xf32>
    %465 = arith.mulf %464, %142 : vector<16x128xf32>
    %466 = arith.addf %462, %465 : vector<16x128xf32>
    %c69 = arith.constant 69 : index
    %467 = memref.load %arg4[%c69] : memref<144xf32, #tpu.memory_space<smem>>
    %468 = vector.broadcast %467 : f32 to vector<16x128xf32>
    %469 = arith.mulf %468, %165 : vector<16x128xf32>
    %470 = arith.addf %466, %469 : vector<16x128xf32>
    %c70 = arith.constant 70 : index
    %471 = memref.load %arg4[%c70] : memref<144xf32, #tpu.memory_space<smem>>
    %472 = vector.broadcast %471 : f32 to vector<16x128xf32>
    %473 = arith.mulf %472, %173 : vector<16x128xf32>
    %474 = arith.addf %470, %473 : vector<16x128xf32>
    %c71 = arith.constant 71 : index
    %475 = memref.load %arg4[%c71] : memref<144xf32, #tpu.memory_space<smem>>
    %476 = vector.broadcast %475 : f32 to vector<16x128xf32>
    %477 = arith.mulf %476, %182 : vector<16x128xf32>
    %478 = arith.addf %474, %477 : vector<16x128xf32>
    %cst_46 = arith.constant 0.000000e+00 : f32
    %479 = vector.broadcast %cst_46 : f32 to vector<16x128xf32>
    %c2_47 = arith.constant 2 : index
    %480 = memref.load %arg5[%c2_47] : memref<4xf32, #tpu.memory_space<smem>>
    %481 = vector.broadcast %480 : f32 to vector<16x128xf32>
    %482 = arith.addf %479, %481 : vector<16x128xf32>
    %c72 = arith.constant 72 : index
    %483 = memref.load %arg4[%c72] : memref<144xf32, #tpu.memory_space<smem>>
    %484 = vector.broadcast %483 : f32 to vector<16x128xf32>
    %485 = arith.mulf %484, %93 : vector<16x128xf32>
    %486 = arith.addf %482, %485 : vector<16x128xf32>
    %c73 = arith.constant 73 : index
    %487 = memref.load %arg4[%c73] : memref<144xf32, #tpu.memory_space<smem>>
    %488 = vector.broadcast %487 : f32 to vector<16x128xf32>
    %489 = arith.mulf %488, %101 : vector<16x128xf32>
    %490 = arith.addf %486, %489 : vector<16x128xf32>
    %c74 = arith.constant 74 : index
    %491 = memref.load %arg4[%c74] : memref<144xf32, #tpu.memory_space<smem>>
    %492 = vector.broadcast %491 : f32 to vector<16x128xf32>
    %493 = arith.mulf %492, %110 : vector<16x128xf32>
    %494 = arith.addf %490, %493 : vector<16x128xf32>
    %c75 = arith.constant 75 : index
    %495 = memref.load %arg4[%c75] : memref<144xf32, #tpu.memory_space<smem>>
    %496 = vector.broadcast %495 : f32 to vector<16x128xf32>
    %497 = arith.mulf %496, %119 : vector<16x128xf32>
    %498 = arith.addf %494, %497 : vector<16x128xf32>
    %c76 = arith.constant 76 : index
    %499 = memref.load %arg4[%c76] : memref<144xf32, #tpu.memory_space<smem>>
    %500 = vector.broadcast %499 : f32 to vector<16x128xf32>
    %501 = arith.mulf %500, %127 : vector<16x128xf32>
    %502 = arith.addf %498, %501 : vector<16x128xf32>
    %c77 = arith.constant 77 : index
    %503 = memref.load %arg4[%c77] : memref<144xf32, #tpu.memory_space<smem>>
    %504 = vector.broadcast %503 : f32 to vector<16x128xf32>
    %505 = arith.mulf %504, %136 : vector<16x128xf32>
    %506 = arith.addf %502, %505 : vector<16x128xf32>
    %c78 = arith.constant 78 : index
    %507 = memref.load %arg4[%c78] : memref<144xf32, #tpu.memory_space<smem>>
    %508 = vector.broadcast %507 : f32 to vector<16x128xf32>
    %509 = arith.mulf %508, %159 : vector<16x128xf32>
    %510 = arith.addf %506, %509 : vector<16x128xf32>
    %c79 = arith.constant 79 : index
    %511 = memref.load %arg4[%c79] : memref<144xf32, #tpu.memory_space<smem>>
    %512 = vector.broadcast %511 : f32 to vector<16x128xf32>
    %513 = arith.mulf %512, %167 : vector<16x128xf32>
    %514 = arith.addf %510, %513 : vector<16x128xf32>
    %c80 = arith.constant 80 : index
    %515 = memref.load %arg4[%c80] : memref<144xf32, #tpu.memory_space<smem>>
    %516 = vector.broadcast %515 : f32 to vector<16x128xf32>
    %517 = arith.mulf %516, %176 : vector<16x128xf32>
    %518 = arith.addf %514, %517 : vector<16x128xf32>
    %c81 = arith.constant 81 : index
    %519 = memref.load %arg4[%c81] : memref<144xf32, #tpu.memory_space<smem>>
    %520 = vector.broadcast %519 : f32 to vector<16x128xf32>
    %521 = arith.mulf %520, %95 : vector<16x128xf32>
    %522 = arith.addf %518, %521 : vector<16x128xf32>
    %c82 = arith.constant 82 : index
    %523 = memref.load %arg4[%c82] : memref<144xf32, #tpu.memory_space<smem>>
    %524 = vector.broadcast %523 : f32 to vector<16x128xf32>
    %525 = arith.mulf %524, %103 : vector<16x128xf32>
    %526 = arith.addf %522, %525 : vector<16x128xf32>
    %c83 = arith.constant 83 : index
    %527 = memref.load %arg4[%c83] : memref<144xf32, #tpu.memory_space<smem>>
    %528 = vector.broadcast %527 : f32 to vector<16x128xf32>
    %529 = arith.mulf %528, %112 : vector<16x128xf32>
    %530 = arith.addf %526, %529 : vector<16x128xf32>
    %c84 = arith.constant 84 : index
    %531 = memref.load %arg4[%c84] : memref<144xf32, #tpu.memory_space<smem>>
    %532 = vector.broadcast %531 : f32 to vector<16x128xf32>
    %533 = arith.mulf %532, %121 : vector<16x128xf32>
    %534 = arith.addf %530, %533 : vector<16x128xf32>
    %c85 = arith.constant 85 : index
    %535 = memref.load %arg4[%c85] : memref<144xf32, #tpu.memory_space<smem>>
    %536 = vector.broadcast %535 : f32 to vector<16x128xf32>
    %537 = arith.mulf %536, %129 : vector<16x128xf32>
    %538 = arith.addf %534, %537 : vector<16x128xf32>
    %c86 = arith.constant 86 : index
    %539 = memref.load %arg4[%c86] : memref<144xf32, #tpu.memory_space<smem>>
    %540 = vector.broadcast %539 : f32 to vector<16x128xf32>
    %541 = arith.mulf %540, %138 : vector<16x128xf32>
    %542 = arith.addf %538, %541 : vector<16x128xf32>
    %c87 = arith.constant 87 : index
    %543 = memref.load %arg4[%c87] : memref<144xf32, #tpu.memory_space<smem>>
    %544 = vector.broadcast %543 : f32 to vector<16x128xf32>
    %545 = arith.mulf %544, %161 : vector<16x128xf32>
    %546 = arith.addf %542, %545 : vector<16x128xf32>
    %c88 = arith.constant 88 : index
    %547 = memref.load %arg4[%c88] : memref<144xf32, #tpu.memory_space<smem>>
    %548 = vector.broadcast %547 : f32 to vector<16x128xf32>
    %549 = arith.mulf %548, %169 : vector<16x128xf32>
    %550 = arith.addf %546, %549 : vector<16x128xf32>
    %c89 = arith.constant 89 : index
    %551 = memref.load %arg4[%c89] : memref<144xf32, #tpu.memory_space<smem>>
    %552 = vector.broadcast %551 : f32 to vector<16x128xf32>
    %553 = arith.mulf %552, %178 : vector<16x128xf32>
    %554 = arith.addf %550, %553 : vector<16x128xf32>
    %c90 = arith.constant 90 : index
    %555 = memref.load %arg4[%c90] : memref<144xf32, #tpu.memory_space<smem>>
    %556 = vector.broadcast %555 : f32 to vector<16x128xf32>
    %557 = arith.mulf %556, %97 : vector<16x128xf32>
    %558 = arith.addf %554, %557 : vector<16x128xf32>
    %c91 = arith.constant 91 : index
    %559 = memref.load %arg4[%c91] : memref<144xf32, #tpu.memory_space<smem>>
    %560 = vector.broadcast %559 : f32 to vector<16x128xf32>
    %561 = arith.mulf %560, %105 : vector<16x128xf32>
    %562 = arith.addf %558, %561 : vector<16x128xf32>
    %c92 = arith.constant 92 : index
    %563 = memref.load %arg4[%c92] : memref<144xf32, #tpu.memory_space<smem>>
    %564 = vector.broadcast %563 : f32 to vector<16x128xf32>
    %565 = arith.mulf %564, %114 : vector<16x128xf32>
    %566 = arith.addf %562, %565 : vector<16x128xf32>
    %c93 = arith.constant 93 : index
    %567 = memref.load %arg4[%c93] : memref<144xf32, #tpu.memory_space<smem>>
    %568 = vector.broadcast %567 : f32 to vector<16x128xf32>
    %569 = arith.mulf %568, %123 : vector<16x128xf32>
    %570 = arith.addf %566, %569 : vector<16x128xf32>
    %c94 = arith.constant 94 : index
    %571 = memref.load %arg4[%c94] : memref<144xf32, #tpu.memory_space<smem>>
    %572 = vector.broadcast %571 : f32 to vector<16x128xf32>
    %573 = arith.mulf %572, %131 : vector<16x128xf32>
    %574 = arith.addf %570, %573 : vector<16x128xf32>
    %c95 = arith.constant 95 : index
    %575 = memref.load %arg4[%c95] : memref<144xf32, #tpu.memory_space<smem>>
    %576 = vector.broadcast %575 : f32 to vector<16x128xf32>
    %577 = arith.mulf %576, %140 : vector<16x128xf32>
    %578 = arith.addf %574, %577 : vector<16x128xf32>
    %c96 = arith.constant 96 : index
    %579 = memref.load %arg4[%c96] : memref<144xf32, #tpu.memory_space<smem>>
    %580 = vector.broadcast %579 : f32 to vector<16x128xf32>
    %581 = arith.mulf %580, %163 : vector<16x128xf32>
    %582 = arith.addf %578, %581 : vector<16x128xf32>
    %c97 = arith.constant 97 : index
    %583 = memref.load %arg4[%c97] : memref<144xf32, #tpu.memory_space<smem>>
    %584 = vector.broadcast %583 : f32 to vector<16x128xf32>
    %585 = arith.mulf %584, %171 : vector<16x128xf32>
    %586 = arith.addf %582, %585 : vector<16x128xf32>
    %c98 = arith.constant 98 : index
    %587 = memref.load %arg4[%c98] : memref<144xf32, #tpu.memory_space<smem>>
    %588 = vector.broadcast %587 : f32 to vector<16x128xf32>
    %589 = arith.mulf %588, %180 : vector<16x128xf32>
    %590 = arith.addf %586, %589 : vector<16x128xf32>
    %c99 = arith.constant 99 : index
    %591 = memref.load %arg4[%c99] : memref<144xf32, #tpu.memory_space<smem>>
    %592 = vector.broadcast %591 : f32 to vector<16x128xf32>
    %593 = arith.mulf %592, %99 : vector<16x128xf32>
    %594 = arith.addf %590, %593 : vector<16x128xf32>
    %c100 = arith.constant 100 : index
    %595 = memref.load %arg4[%c100] : memref<144xf32, #tpu.memory_space<smem>>
    %596 = vector.broadcast %595 : f32 to vector<16x128xf32>
    %597 = arith.mulf %596, %107 : vector<16x128xf32>
    %598 = arith.addf %594, %597 : vector<16x128xf32>
    %c101 = arith.constant 101 : index
    %599 = memref.load %arg4[%c101] : memref<144xf32, #tpu.memory_space<smem>>
    %600 = vector.broadcast %599 : f32 to vector<16x128xf32>
    %601 = arith.mulf %600, %116 : vector<16x128xf32>
    %602 = arith.addf %598, %601 : vector<16x128xf32>
    %c102 = arith.constant 102 : index
    %603 = memref.load %arg4[%c102] : memref<144xf32, #tpu.memory_space<smem>>
    %604 = vector.broadcast %603 : f32 to vector<16x128xf32>
    %605 = arith.mulf %604, %125 : vector<16x128xf32>
    %606 = arith.addf %602, %605 : vector<16x128xf32>
    %c103 = arith.constant 103 : index
    %607 = memref.load %arg4[%c103] : memref<144xf32, #tpu.memory_space<smem>>
    %608 = vector.broadcast %607 : f32 to vector<16x128xf32>
    %609 = arith.mulf %608, %133 : vector<16x128xf32>
    %610 = arith.addf %606, %609 : vector<16x128xf32>
    %c104 = arith.constant 104 : index
    %611 = memref.load %arg4[%c104] : memref<144xf32, #tpu.memory_space<smem>>
    %612 = vector.broadcast %611 : f32 to vector<16x128xf32>
    %613 = arith.mulf %612, %142 : vector<16x128xf32>
    %614 = arith.addf %610, %613 : vector<16x128xf32>
    %c105 = arith.constant 105 : index
    %615 = memref.load %arg4[%c105] : memref<144xf32, #tpu.memory_space<smem>>
    %616 = vector.broadcast %615 : f32 to vector<16x128xf32>
    %617 = arith.mulf %616, %165 : vector<16x128xf32>
    %618 = arith.addf %614, %617 : vector<16x128xf32>
    %c106 = arith.constant 106 : index
    %619 = memref.load %arg4[%c106] : memref<144xf32, #tpu.memory_space<smem>>
    %620 = vector.broadcast %619 : f32 to vector<16x128xf32>
    %621 = arith.mulf %620, %173 : vector<16x128xf32>
    %622 = arith.addf %618, %621 : vector<16x128xf32>
    %c107 = arith.constant 107 : index
    %623 = memref.load %arg4[%c107] : memref<144xf32, #tpu.memory_space<smem>>
    %624 = vector.broadcast %623 : f32 to vector<16x128xf32>
    %625 = arith.mulf %624, %182 : vector<16x128xf32>
    %626 = arith.addf %622, %625 : vector<16x128xf32>
    %cst_48 = arith.constant 0.000000e+00 : f32
    %627 = vector.broadcast %cst_48 : f32 to vector<16x128xf32>
    %c3_49 = arith.constant 3 : index
    %628 = memref.load %arg5[%c3_49] : memref<4xf32, #tpu.memory_space<smem>>
    %629 = vector.broadcast %628 : f32 to vector<16x128xf32>
    %630 = arith.addf %627, %629 : vector<16x128xf32>
    %c108 = arith.constant 108 : index
    %631 = memref.load %arg4[%c108] : memref<144xf32, #tpu.memory_space<smem>>
    %632 = vector.broadcast %631 : f32 to vector<16x128xf32>
    %633 = arith.mulf %632, %93 : vector<16x128xf32>
    %634 = arith.addf %630, %633 : vector<16x128xf32>
    %c109 = arith.constant 109 : index
    %635 = memref.load %arg4[%c109] : memref<144xf32, #tpu.memory_space<smem>>
    %636 = vector.broadcast %635 : f32 to vector<16x128xf32>
    %637 = arith.mulf %636, %101 : vector<16x128xf32>
    %638 = arith.addf %634, %637 : vector<16x128xf32>
    %c110 = arith.constant 110 : index
    %639 = memref.load %arg4[%c110] : memref<144xf32, #tpu.memory_space<smem>>
    %640 = vector.broadcast %639 : f32 to vector<16x128xf32>
    %641 = arith.mulf %640, %110 : vector<16x128xf32>
    %642 = arith.addf %638, %641 : vector<16x128xf32>
    %c111 = arith.constant 111 : index
    %643 = memref.load %arg4[%c111] : memref<144xf32, #tpu.memory_space<smem>>
    %644 = vector.broadcast %643 : f32 to vector<16x128xf32>
    %645 = arith.mulf %644, %119 : vector<16x128xf32>
    %646 = arith.addf %642, %645 : vector<16x128xf32>
    %c112 = arith.constant 112 : index
    %647 = memref.load %arg4[%c112] : memref<144xf32, #tpu.memory_space<smem>>
    %648 = vector.broadcast %647 : f32 to vector<16x128xf32>
    %649 = arith.mulf %648, %127 : vector<16x128xf32>
    %650 = arith.addf %646, %649 : vector<16x128xf32>
    %c113 = arith.constant 113 : index
    %651 = memref.load %arg4[%c113] : memref<144xf32, #tpu.memory_space<smem>>
    %652 = vector.broadcast %651 : f32 to vector<16x128xf32>
    %653 = arith.mulf %652, %136 : vector<16x128xf32>
    %654 = arith.addf %650, %653 : vector<16x128xf32>
    %c114 = arith.constant 114 : index
    %655 = memref.load %arg4[%c114] : memref<144xf32, #tpu.memory_space<smem>>
    %656 = vector.broadcast %655 : f32 to vector<16x128xf32>
    %657 = arith.mulf %656, %159 : vector<16x128xf32>
    %658 = arith.addf %654, %657 : vector<16x128xf32>
    %c115 = arith.constant 115 : index
    %659 = memref.load %arg4[%c115] : memref<144xf32, #tpu.memory_space<smem>>
    %660 = vector.broadcast %659 : f32 to vector<16x128xf32>
    %661 = arith.mulf %660, %167 : vector<16x128xf32>
    %662 = arith.addf %658, %661 : vector<16x128xf32>
    %c116 = arith.constant 116 : index
    %663 = memref.load %arg4[%c116] : memref<144xf32, #tpu.memory_space<smem>>
    %664 = vector.broadcast %663 : f32 to vector<16x128xf32>
    %665 = arith.mulf %664, %176 : vector<16x128xf32>
    %666 = arith.addf %662, %665 : vector<16x128xf32>
    %c117 = arith.constant 117 : index
    %667 = memref.load %arg4[%c117] : memref<144xf32, #tpu.memory_space<smem>>
    %668 = vector.broadcast %667 : f32 to vector<16x128xf32>
    %669 = arith.mulf %668, %95 : vector<16x128xf32>
    %670 = arith.addf %666, %669 : vector<16x128xf32>
    %c118 = arith.constant 118 : index
    %671 = memref.load %arg4[%c118] : memref<144xf32, #tpu.memory_space<smem>>
    %672 = vector.broadcast %671 : f32 to vector<16x128xf32>
    %673 = arith.mulf %672, %103 : vector<16x128xf32>
    %674 = arith.addf %670, %673 : vector<16x128xf32>
    %c119 = arith.constant 119 : index
    %675 = memref.load %arg4[%c119] : memref<144xf32, #tpu.memory_space<smem>>
    %676 = vector.broadcast %675 : f32 to vector<16x128xf32>
    %677 = arith.mulf %676, %112 : vector<16x128xf32>
    %678 = arith.addf %674, %677 : vector<16x128xf32>
    %c120 = arith.constant 120 : index
    %679 = memref.load %arg4[%c120] : memref<144xf32, #tpu.memory_space<smem>>
    %680 = vector.broadcast %679 : f32 to vector<16x128xf32>
    %681 = arith.mulf %680, %121 : vector<16x128xf32>
    %682 = arith.addf %678, %681 : vector<16x128xf32>
    %c121 = arith.constant 121 : index
    %683 = memref.load %arg4[%c121] : memref<144xf32, #tpu.memory_space<smem>>
    %684 = vector.broadcast %683 : f32 to vector<16x128xf32>
    %685 = arith.mulf %684, %129 : vector<16x128xf32>
    %686 = arith.addf %682, %685 : vector<16x128xf32>
    %c122 = arith.constant 122 : index
    %687 = memref.load %arg4[%c122] : memref<144xf32, #tpu.memory_space<smem>>
    %688 = vector.broadcast %687 : f32 to vector<16x128xf32>
    %689 = arith.mulf %688, %138 : vector<16x128xf32>
    %690 = arith.addf %686, %689 : vector<16x128xf32>
    %c123 = arith.constant 123 : index
    %691 = memref.load %arg4[%c123] : memref<144xf32, #tpu.memory_space<smem>>
    %692 = vector.broadcast %691 : f32 to vector<16x128xf32>
    %693 = arith.mulf %692, %161 : vector<16x128xf32>
    %694 = arith.addf %690, %693 : vector<16x128xf32>
    %c124 = arith.constant 124 : index
    %695 = memref.load %arg4[%c124] : memref<144xf32, #tpu.memory_space<smem>>
    %696 = vector.broadcast %695 : f32 to vector<16x128xf32>
    %697 = arith.mulf %696, %169 : vector<16x128xf32>
    %698 = arith.addf %694, %697 : vector<16x128xf32>
    %c125 = arith.constant 125 : index
    %699 = memref.load %arg4[%c125] : memref<144xf32, #tpu.memory_space<smem>>
    %700 = vector.broadcast %699 : f32 to vector<16x128xf32>
    %701 = arith.mulf %700, %178 : vector<16x128xf32>
    %702 = arith.addf %698, %701 : vector<16x128xf32>
    %c126 = arith.constant 126 : index
    %703 = memref.load %arg4[%c126] : memref<144xf32, #tpu.memory_space<smem>>
    %704 = vector.broadcast %703 : f32 to vector<16x128xf32>
    %705 = arith.mulf %704, %97 : vector<16x128xf32>
    %706 = arith.addf %702, %705 : vector<16x128xf32>
    %c127 = arith.constant 127 : index
    %707 = memref.load %arg4[%c127] : memref<144xf32, #tpu.memory_space<smem>>
    %708 = vector.broadcast %707 : f32 to vector<16x128xf32>
    %709 = arith.mulf %708, %105 : vector<16x128xf32>
    %710 = arith.addf %706, %709 : vector<16x128xf32>
    %c128 = arith.constant 128 : index
    %711 = memref.load %arg4[%c128] : memref<144xf32, #tpu.memory_space<smem>>
    %712 = vector.broadcast %711 : f32 to vector<16x128xf32>
    %713 = arith.mulf %712, %114 : vector<16x128xf32>
    %714 = arith.addf %710, %713 : vector<16x128xf32>
    %c129 = arith.constant 129 : index
    %715 = memref.load %arg4[%c129] : memref<144xf32, #tpu.memory_space<smem>>
    %716 = vector.broadcast %715 : f32 to vector<16x128xf32>
    %717 = arith.mulf %716, %123 : vector<16x128xf32>
    %718 = arith.addf %714, %717 : vector<16x128xf32>
    %c130 = arith.constant 130 : index
    %719 = memref.load %arg4[%c130] : memref<144xf32, #tpu.memory_space<smem>>
    %720 = vector.broadcast %719 : f32 to vector<16x128xf32>
    %721 = arith.mulf %720, %131 : vector<16x128xf32>
    %722 = arith.addf %718, %721 : vector<16x128xf32>
    %c131 = arith.constant 131 : index
    %723 = memref.load %arg4[%c131] : memref<144xf32, #tpu.memory_space<smem>>
    %724 = vector.broadcast %723 : f32 to vector<16x128xf32>
    %725 = arith.mulf %724, %140 : vector<16x128xf32>
    %726 = arith.addf %722, %725 : vector<16x128xf32>
    %c132 = arith.constant 132 : index
    %727 = memref.load %arg4[%c132] : memref<144xf32, #tpu.memory_space<smem>>
    %728 = vector.broadcast %727 : f32 to vector<16x128xf32>
    %729 = arith.mulf %728, %163 : vector<16x128xf32>
    %730 = arith.addf %726, %729 : vector<16x128xf32>
    %c133 = arith.constant 133 : index
    %731 = memref.load %arg4[%c133] : memref<144xf32, #tpu.memory_space<smem>>
    %732 = vector.broadcast %731 : f32 to vector<16x128xf32>
    %733 = arith.mulf %732, %171 : vector<16x128xf32>
    %734 = arith.addf %730, %733 : vector<16x128xf32>
    %c134 = arith.constant 134 : index
    %735 = memref.load %arg4[%c134] : memref<144xf32, #tpu.memory_space<smem>>
    %736 = vector.broadcast %735 : f32 to vector<16x128xf32>
    %737 = arith.mulf %736, %180 : vector<16x128xf32>
    %738 = arith.addf %734, %737 : vector<16x128xf32>
    %c135 = arith.constant 135 : index
    %739 = memref.load %arg4[%c135] : memref<144xf32, #tpu.memory_space<smem>>
    %740 = vector.broadcast %739 : f32 to vector<16x128xf32>
    %741 = arith.mulf %740, %99 : vector<16x128xf32>
    %742 = arith.addf %738, %741 : vector<16x128xf32>
    %c136 = arith.constant 136 : index
    %743 = memref.load %arg4[%c136] : memref<144xf32, #tpu.memory_space<smem>>
    %744 = vector.broadcast %743 : f32 to vector<16x128xf32>
    %745 = arith.mulf %744, %107 : vector<16x128xf32>
    %746 = arith.addf %742, %745 : vector<16x128xf32>
    %c137 = arith.constant 137 : index
    %747 = memref.load %arg4[%c137] : memref<144xf32, #tpu.memory_space<smem>>
    %748 = vector.broadcast %747 : f32 to vector<16x128xf32>
    %749 = arith.mulf %748, %116 : vector<16x128xf32>
    %750 = arith.addf %746, %749 : vector<16x128xf32>
    %c138 = arith.constant 138 : index
    %751 = memref.load %arg4[%c138] : memref<144xf32, #tpu.memory_space<smem>>
    %752 = vector.broadcast %751 : f32 to vector<16x128xf32>
    %753 = arith.mulf %752, %125 : vector<16x128xf32>
    %754 = arith.addf %750, %753 : vector<16x128xf32>
    %c139 = arith.constant 139 : index
    %755 = memref.load %arg4[%c139] : memref<144xf32, #tpu.memory_space<smem>>
    %756 = vector.broadcast %755 : f32 to vector<16x128xf32>
    %757 = arith.mulf %756, %133 : vector<16x128xf32>
    %758 = arith.addf %754, %757 : vector<16x128xf32>
    %c140 = arith.constant 140 : index
    %759 = memref.load %arg4[%c140] : memref<144xf32, #tpu.memory_space<smem>>
    %760 = vector.broadcast %759 : f32 to vector<16x128xf32>
    %761 = arith.mulf %760, %142 : vector<16x128xf32>
    %762 = arith.addf %758, %761 : vector<16x128xf32>
    %c141 = arith.constant 141 : index
    %763 = memref.load %arg4[%c141] : memref<144xf32, #tpu.memory_space<smem>>
    %764 = vector.broadcast %763 : f32 to vector<16x128xf32>
    %765 = arith.mulf %764, %165 : vector<16x128xf32>
    %766 = arith.addf %762, %765 : vector<16x128xf32>
    %c142 = arith.constant 142 : index
    %767 = memref.load %arg4[%c142] : memref<144xf32, #tpu.memory_space<smem>>
    %768 = vector.broadcast %767 : f32 to vector<16x128xf32>
    %769 = arith.mulf %768, %173 : vector<16x128xf32>
    %770 = arith.addf %766, %769 : vector<16x128xf32>
    %c143 = arith.constant 143 : index
    %771 = memref.load %arg4[%c143] : memref<144xf32, #tpu.memory_space<smem>>
    %772 = vector.broadcast %771 : f32 to vector<16x128xf32>
    %773 = arith.mulf %772, %182 : vector<16x128xf32>
    %774 = arith.addf %770, %773 : vector<16x128xf32>
    %775 = vector.shape_cast %330 : vector<16x128xf32> to vector<1x16x128xf32>
    %776 = vector.shape_cast %478 : vector<16x128xf32> to vector<1x16x128xf32>
    %777 = vector.shape_cast %626 : vector<16x128xf32> to vector<1x16x128xf32>
    %778 = vector.shape_cast %774 : vector<16x128xf32> to vector<1x16x128xf32>
    %779 = tpu.concatenate %775, %776, %777, %778 in 0 : vector<1x16x128xf32>, vector<1x16x128xf32>, vector<1x16x128xf32>, vector<1x16x128xf32> -> vector<4x16x128xf32>
    %c0_50 = arith.constant 0 : index
    %c0_51 = arith.constant 0 : index
    %780 = vector.load %arg6[%c0_50, %c0_51] : memref<16x1xf32, #tpu.memory_space<vmem>>, vector<16x1xf32>
    %c0_52 = arith.constant 0 : index
    %c0_53 = arith.constant 0 : index
    %781 = vector.load %arg7[%c0_52, %c0_53] : memref<16x1xf32, #tpu.memory_space<vmem>>, vector<16x1xf32>
    %cst_54 = arith.constant dense<0.000000e+00> : vector<4x128xf32>
    %782 = vector.multi_reduction <add>, %779, %cst_54 [1] : vector<4x16x128xf32> to vector<4x128xf32>
    %783 = vector.shape_cast %782 : vector<4x128xf32> to vector<4x1x128xf32>
    %784 = arith.mulf %779, %779 : vector<4x16x128xf32>
    %cst_55 = arith.constant dense<0.000000e+00> : vector<4x128xf32>
    %785 = vector.multi_reduction <add>, %784, %cst_55 [1] : vector<4x16x128xf32> to vector<4x128xf32>
    %786 = vector.shape_cast %785 : vector<4x128xf32> to vector<4x1x128xf32>
    %cst_56 = arith.constant 6.250000e-02 : f32
    %787 = vector.broadcast %cst_56 : f32 to vector<4x1x128xf32>
    %788 = arith.mulf %783, %787 : vector<4x1x128xf32>
    %cst_57 = arith.constant 6.250000e-02 : f32
    %789 = vector.broadcast %cst_57 : f32 to vector<4x1x128xf32>
    %790 = arith.mulf %786, %789 : vector<4x1x128xf32>
    %791 = arith.mulf %788, %788 : vector<4x1x128xf32>
    %792 = arith.subf %790, %791 : vector<4x1x128xf32>
    %cst_58 = arith.constant 9.99999974E-6 : f32
    %793 = vector.broadcast %cst_58 : f32 to vector<4x1x128xf32>
    %794 = arith.addf %792, %793 : vector<4x1x128xf32>
    %795 = math.rsqrt %794 : vector<4x1x128xf32>
    %796 = vector.broadcast %788 : vector<4x1x128xf32> to vector<4x16x128xf32>
    %797 = arith.subf %779, %796 : vector<4x16x128xf32>
    %798 = vector.broadcast %795 : vector<4x1x128xf32> to vector<4x16x128xf32>
    %799 = arith.mulf %797, %798 : vector<4x16x128xf32>
    %800 = vector.shape_cast %780 : vector<16x1xf32> to vector<1x16x1xf32>
    %801 = vector.broadcast %800 : vector<1x16x1xf32> to vector<4x16x128xf32>
    %802 = arith.mulf %799, %801 : vector<4x16x128xf32>
    %803 = vector.shape_cast %781 : vector<16x1xf32> to vector<1x16x1xf32>
    %804 = vector.broadcast %803 : vector<1x16x1xf32> to vector<4x16x128xf32>
    %805 = arith.addf %802, %804 : vector<4x16x128xf32>
    %cst_59 = arith.constant 5.000000e-01 : f32
    %806 = vector.broadcast %cst_59 : f32 to vector<4x16x128xf32>
    %807 = arith.mulf %806, %805 : vector<4x16x128xf32>
    %cst_60 = arith.constant 0.707106769 : f32
    %808 = vector.broadcast %cst_60 : f32 to vector<4x16x128xf32>
    %809 = arith.mulf %805, %808 : vector<4x16x128xf32>
    %cst_61 = arith.constant 0.000000e+00 : f32
    %810 = vector.broadcast %cst_61 : f32 to vector<4x16x128xf32>
    %811 = arith.cmpf oge, %809, %810 : vector<4x16x128xf32>
    %cst_62 = arith.constant 1.000000e+00 : f32
    %cst_63 = arith.constant -1.000000e+00 : f32
    %812 = vector.broadcast %cst_62 : f32 to vector<4x16x128xf32>
    %813 = vector.broadcast %cst_63 : f32 to vector<4x16x128xf32>
    %814 = arith.select %811, %812, %813 : vector<4x16x128xi1>, vector<4x16x128xf32>
    %815 = math.absf %809 : vector<4x16x128xf32>
    %cst_64 = arith.constant 0.327591091 : f32
    %816 = vector.broadcast %cst_64 : f32 to vector<4x16x128xf32>
    %817 = arith.mulf %816, %815 : vector<4x16x128xf32>
    %cst_65 = arith.constant 1.000000e+00 : f32
    %818 = vector.broadcast %cst_65 : f32 to vector<4x16x128xf32>
    %819 = arith.addf %818, %817 : vector<4x16x128xf32>
    %cst_66 = arith.constant 1.000000e+00 : f32
    %820 = vector.broadcast %cst_66 : f32 to vector<4x16x128xf32>
    %821 = arith.divf %820, %819 : vector<4x16x128xf32>
    %cst_67 = arith.constant 1.06140542 : f32
    %822 = vector.broadcast %cst_67 : f32 to vector<4x16x128xf32>
    %823 = arith.mulf %822, %821 : vector<4x16x128xf32>
    %cst_68 = arith.constant -1.45315206 : f32
    %824 = vector.broadcast %cst_68 : f32 to vector<4x16x128xf32>
    %825 = arith.addf %823, %824 : vector<4x16x128xf32>
    %826 = arith.mulf %825, %821 : vector<4x16x128xf32>
    %cst_69 = arith.constant 1.42141378 : f32
    %827 = vector.broadcast %cst_69 : f32 to vector<4x16x128xf32>
    %828 = arith.addf %826, %827 : vector<4x16x128xf32>
    %829 = arith.mulf %828, %821 : vector<4x16x128xf32>
    %cst_70 = arith.constant -0.284496725 : f32
    %830 = vector.broadcast %cst_70 : f32 to vector<4x16x128xf32>
    %831 = arith.addf %829, %830 : vector<4x16x128xf32>
    %832 = arith.mulf %831, %821 : vector<4x16x128xf32>
    %cst_71 = arith.constant 0.254829586 : f32
    %833 = vector.broadcast %cst_71 : f32 to vector<4x16x128xf32>
    %834 = arith.addf %832, %833 : vector<4x16x128xf32>
    %835 = arith.mulf %834, %821 : vector<4x16x128xf32>
    %cst_72 = arith.constant 0.000000e+00 : f32
    %836 = vector.broadcast %cst_72 : f32 to vector<4x16x128xf32>
    %837 = arith.subf %836, %815 : vector<4x16x128xf32>
    %838 = arith.mulf %837, %815 : vector<4x16x128xf32>
    %839 = math.exp %838 : vector<4x16x128xf32>
    %840 = arith.mulf %835, %839 : vector<4x16x128xf32>
    %cst_73 = arith.constant 1.000000e+00 : f32
    %841 = vector.broadcast %cst_73 : f32 to vector<4x16x128xf32>
    %842 = arith.subf %841, %840 : vector<4x16x128xf32>
    %843 = arith.mulf %814, %842 : vector<4x16x128xf32>
    %cst_74 = arith.constant 1.000000e+00 : f32
    %844 = vector.broadcast %cst_74 : f32 to vector<4x16x128xf32>
    %845 = arith.addf %844, %843 : vector<4x16x128xf32>
    %846 = arith.mulf %807, %845 : vector<4x16x128xf32>
    %cst_75 = arith.constant 0.000000e+00 : f32
    %847 = vector.shape_cast %4 : vector<16x128xi1> to vector<1x16x128xi1>
    %848 = vector.broadcast %847 : vector<1x16x128xi1> to vector<4x16x128xi1>
    %849 = vector.broadcast %cst_75 : f32 to vector<4x16x128xf32>
    %850 = arith.select %848, %846, %849 : vector<4x16x128xi1>, vector<4x16x128xf32>
    %851 = tpu.iota {dimensions = array<i32: 0>} : vector<16x128xi32>
    %c1_i32_76 = arith.constant 1 : i32
    %852 = tpu.dynamic_rotate %850 by %c1_i32_76 dim 1 : vector<4x16x128xf32>, i32 -> vector<4x16x128xf32>
    %c-1_i32_77 = arith.constant -1 : i32
    %853 = vector.broadcast %c-1_i32_77 : i32 to vector<16x128xi32>
    %854 = arith.addi %851, %853 : vector<16x128xi32>
    %c0_i32_78 = arith.constant 0 : i32
    %855 = vector.broadcast %c0_i32_78 : i32 to vector<16x128xi32>
    %856 = arith.cmpi sge, %854, %855 : vector<16x128xi32>
    %c-1_i32_79 = arith.constant -1 : i32
    %857 = vector.broadcast %c-1_i32_79 : i32 to vector<16x128xi32>
    %858 = arith.addi %851, %857 : vector<16x128xi32>
    %c16_i32_80 = arith.constant 16 : i32
    %859 = vector.broadcast %c16_i32_80 : i32 to vector<16x128xi32>
    %860 = arith.cmpi slt, %858, %859 : vector<16x128xi32>
    %861 = arith.andi %856, %860 : vector<16x128xi1>
    %cst_81 = arith.constant 0.000000e+00 : f32
    %862 = vector.shape_cast %861 : vector<16x128xi1> to vector<1x16x128xi1>
    %863 = vector.broadcast %862 : vector<1x16x128xi1> to vector<4x16x128xi1>
    %864 = vector.broadcast %cst_81 : f32 to vector<4x16x128xf32>
    %865 = arith.select %863, %852, %864 : vector<4x16x128xi1>, vector<4x16x128xf32>
    %c1_i32_82 = arith.constant 1 : i32
    %866 = tpu.dynamic_rotate %865 by %c1_i32_82 dim 2 : vector<4x16x128xf32>, i32 -> vector<4x16x128xf32>
    %867 = vector.extract_strided_slice %866 {offsets = [0, 0, 0], sizes = [1, 16, 128], strides = [1, 1, 1]} : vector<4x16x128xf32> to vector<1x16x128xf32>
    %868 = vector.shape_cast %867 : vector<1x16x128xf32> to vector<16x128xf32>
    %869 = vector.extract_strided_slice %866 {offsets = [1, 0, 0], sizes = [1, 16, 128], strides = [1, 1, 1]} : vector<4x16x128xf32> to vector<1x16x128xf32>
    %870 = vector.shape_cast %869 : vector<1x16x128xf32> to vector<16x128xf32>
    %871 = vector.extract_strided_slice %866 {offsets = [2, 0, 0], sizes = [1, 16, 128], strides = [1, 1, 1]} : vector<4x16x128xf32> to vector<1x16x128xf32>
    %872 = vector.shape_cast %871 : vector<1x16x128xf32> to vector<16x128xf32>
    %873 = vector.extract_strided_slice %866 {offsets = [3, 0, 0], sizes = [1, 16, 128], strides = [1, 1, 1]} : vector<4x16x128xf32> to vector<1x16x128xf32>
    %874 = vector.shape_cast %873 : vector<1x16x128xf32> to vector<16x128xf32>
    %875 = vector.extract_strided_slice %865 {offsets = [0, 0, 0], sizes = [1, 16, 128], strides = [1, 1, 1]} : vector<4x16x128xf32> to vector<1x16x128xf32>
    %876 = vector.shape_cast %875 : vector<1x16x128xf32> to vector<16x128xf32>
    %877 = vector.extract_strided_slice %865 {offsets = [1, 0, 0], sizes = [1, 16, 128], strides = [1, 1, 1]} : vector<4x16x128xf32> to vector<1x16x128xf32>
    %878 = vector.shape_cast %877 : vector<1x16x128xf32> to vector<16x128xf32>
    %879 = vector.extract_strided_slice %865 {offsets = [2, 0, 0], sizes = [1, 16, 128], strides = [1, 1, 1]} : vector<4x16x128xf32> to vector<1x16x128xf32>
    %880 = vector.shape_cast %879 : vector<1x16x128xf32> to vector<16x128xf32>
    %881 = vector.extract_strided_slice %865 {offsets = [3, 0, 0], sizes = [1, 16, 128], strides = [1, 1, 1]} : vector<4x16x128xf32> to vector<1x16x128xf32>
    %882 = vector.shape_cast %881 : vector<1x16x128xf32> to vector<16x128xf32>
    %c127_i32_83 = arith.constant 127 : i32
    %883 = tpu.dynamic_rotate %865 by %c127_i32_83 dim 2 : vector<4x16x128xf32>, i32 -> vector<4x16x128xf32>
    %884 = vector.extract_strided_slice %883 {offsets = [0, 0, 0], sizes = [1, 16, 128], strides = [1, 1, 1]} : vector<4x16x128xf32> to vector<1x16x128xf32>
    %885 = vector.shape_cast %884 : vector<1x16x128xf32> to vector<16x128xf32>
    %886 = vector.extract_strided_slice %883 {offsets = [1, 0, 0], sizes = [1, 16, 128], strides = [1, 1, 1]} : vector<4x16x128xf32> to vector<1x16x128xf32>
    %887 = vector.shape_cast %886 : vector<1x16x128xf32> to vector<16x128xf32>
    %888 = vector.extract_strided_slice %883 {offsets = [2, 0, 0], sizes = [1, 16, 128], strides = [1, 1, 1]} : vector<4x16x128xf32> to vector<1x16x128xf32>
    %889 = vector.shape_cast %888 : vector<1x16x128xf32> to vector<16x128xf32>
    %890 = vector.extract_strided_slice %883 {offsets = [3, 0, 0], sizes = [1, 16, 128], strides = [1, 1, 1]} : vector<4x16x128xf32> to vector<1x16x128xf32>
    %891 = vector.shape_cast %890 : vector<1x16x128xf32> to vector<16x128xf32>
    %c1_i32_84 = arith.constant 1 : i32
    %892 = tpu.dynamic_rotate %850 by %c1_i32_84 dim 2 : vector<4x16x128xf32>, i32 -> vector<4x16x128xf32>
    %893 = vector.extract_strided_slice %892 {offsets = [0, 0, 0], sizes = [1, 16, 128], strides = [1, 1, 1]} : vector<4x16x128xf32> to vector<1x16x128xf32>
    %894 = vector.shape_cast %893 : vector<1x16x128xf32> to vector<16x128xf32>
    %895 = vector.extract_strided_slice %892 {offsets = [1, 0, 0], sizes = [1, 16, 128], strides = [1, 1, 1]} : vector<4x16x128xf32> to vector<1x16x128xf32>
    %896 = vector.shape_cast %895 : vector<1x16x128xf32> to vector<16x128xf32>
    %897 = vector.extract_strided_slice %892 {offsets = [2, 0, 0], sizes = [1, 16, 128], strides = [1, 1, 1]} : vector<4x16x128xf32> to vector<1x16x128xf32>
    %898 = vector.shape_cast %897 : vector<1x16x128xf32> to vector<16x128xf32>
    %899 = vector.extract_strided_slice %892 {offsets = [3, 0, 0], sizes = [1, 16, 128], strides = [1, 1, 1]} : vector<4x16x128xf32> to vector<1x16x128xf32>
    %900 = vector.shape_cast %899 : vector<1x16x128xf32> to vector<16x128xf32>
    %901 = vector.extract_strided_slice %850 {offsets = [0, 0, 0], sizes = [1, 16, 128], strides = [1, 1, 1]} : vector<4x16x128xf32> to vector<1x16x128xf32>
    %902 = vector.shape_cast %901 : vector<1x16x128xf32> to vector<16x128xf32>
    %903 = vector.extract_strided_slice %850 {offsets = [1, 0, 0], sizes = [1, 16, 128], strides = [1, 1, 1]} : vector<4x16x128xf32> to vector<1x16x128xf32>
    %904 = vector.shape_cast %903 : vector<1x16x128xf32> to vector<16x128xf32>
    %905 = vector.extract_strided_slice %850 {offsets = [2, 0, 0], sizes = [1, 16, 128], strides = [1, 1, 1]} : vector<4x16x128xf32> to vector<1x16x128xf32>
    %906 = vector.shape_cast %905 : vector<1x16x128xf32> to vector<16x128xf32>
    %907 = vector.extract_strided_slice %850 {offsets = [3, 0, 0], sizes = [1, 16, 128], strides = [1, 1, 1]} : vector<4x16x128xf32> to vector<1x16x128xf32>
    %908 = vector.shape_cast %907 : vector<1x16x128xf32> to vector<16x128xf32>
    %c127_i32_85 = arith.constant 127 : i32
    %909 = tpu.dynamic_rotate %850 by %c127_i32_85 dim 2 : vector<4x16x128xf32>, i32 -> vector<4x16x128xf32>
    %910 = vector.extract_strided_slice %909 {offsets = [0, 0, 0], sizes = [1, 16, 128], strides = [1, 1, 1]} : vector<4x16x128xf32> to vector<1x16x128xf32>
    %911 = vector.shape_cast %910 : vector<1x16x128xf32> to vector<16x128xf32>
    %912 = vector.extract_strided_slice %909 {offsets = [1, 0, 0], sizes = [1, 16, 128], strides = [1, 1, 1]} : vector<4x16x128xf32> to vector<1x16x128xf32>
    %913 = vector.shape_cast %912 : vector<1x16x128xf32> to vector<16x128xf32>
    %914 = vector.extract_strided_slice %909 {offsets = [2, 0, 0], sizes = [1, 16, 128], strides = [1, 1, 1]} : vector<4x16x128xf32> to vector<1x16x128xf32>
    %915 = vector.shape_cast %914 : vector<1x16x128xf32> to vector<16x128xf32>
    %916 = vector.extract_strided_slice %909 {offsets = [3, 0, 0], sizes = [1, 16, 128], strides = [1, 1, 1]} : vector<4x16x128xf32> to vector<1x16x128xf32>
    %917 = vector.shape_cast %916 : vector<1x16x128xf32> to vector<16x128xf32>
    %c15_i32_86 = arith.constant 15 : i32
    %918 = tpu.dynamic_rotate %850 by %c15_i32_86 dim 1 : vector<4x16x128xf32>, i32 -> vector<4x16x128xf32>
    %c1_i32_87 = arith.constant 1 : i32
    %919 = vector.broadcast %c1_i32_87 : i32 to vector<16x128xi32>
    %920 = arith.addi %851, %919 : vector<16x128xi32>
    %c0_i32_88 = arith.constant 0 : i32
    %921 = vector.broadcast %c0_i32_88 : i32 to vector<16x128xi32>
    %922 = arith.cmpi sge, %920, %921 : vector<16x128xi32>
    %c1_i32_89 = arith.constant 1 : i32
    %923 = vector.broadcast %c1_i32_89 : i32 to vector<16x128xi32>
    %924 = arith.addi %851, %923 : vector<16x128xi32>
    %c16_i32_90 = arith.constant 16 : i32
    %925 = vector.broadcast %c16_i32_90 : i32 to vector<16x128xi32>
    %926 = arith.cmpi slt, %924, %925 : vector<16x128xi32>
    %927 = arith.andi %922, %926 : vector<16x128xi1>
    %cst_91 = arith.constant 0.000000e+00 : f32
    %928 = vector.shape_cast %927 : vector<16x128xi1> to vector<1x16x128xi1>
    %929 = vector.broadcast %928 : vector<1x16x128xi1> to vector<4x16x128xi1>
    %930 = vector.broadcast %cst_91 : f32 to vector<4x16x128xf32>
    %931 = arith.select %929, %918, %930 : vector<4x16x128xi1>, vector<4x16x128xf32>
    %c1_i32_92 = arith.constant 1 : i32
    %932 = tpu.dynamic_rotate %931 by %c1_i32_92 dim 2 : vector<4x16x128xf32>, i32 -> vector<4x16x128xf32>
    %933 = vector.extract_strided_slice %932 {offsets = [0, 0, 0], sizes = [1, 16, 128], strides = [1, 1, 1]} : vector<4x16x128xf32> to vector<1x16x128xf32>
    %934 = vector.shape_cast %933 : vector<1x16x128xf32> to vector<16x128xf32>
    %935 = vector.extract_strided_slice %932 {offsets = [1, 0, 0], sizes = [1, 16, 128], strides = [1, 1, 1]} : vector<4x16x128xf32> to vector<1x16x128xf32>
    %936 = vector.shape_cast %935 : vector<1x16x128xf32> to vector<16x128xf32>
    %937 = vector.extract_strided_slice %932 {offsets = [2, 0, 0], sizes = [1, 16, 128], strides = [1, 1, 1]} : vector<4x16x128xf32> to vector<1x16x128xf32>
    %938 = vector.shape_cast %937 : vector<1x16x128xf32> to vector<16x128xf32>
    %939 = vector.extract_strided_slice %932 {offsets = [3, 0, 0], sizes = [1, 16, 128], strides = [1, 1, 1]} : vector<4x16x128xf32> to vector<1x16x128xf32>
    %940 = vector.shape_cast %939 : vector<1x16x128xf32> to vector<16x128xf32>
    %941 = vector.extract_strided_slice %931 {offsets = [0, 0, 0], sizes = [1, 16, 128], strides = [1, 1, 1]} : vector<4x16x128xf32> to vector<1x16x128xf32>
    %942 = vector.shape_cast %941 : vector<1x16x128xf32> to vector<16x128xf32>
    %943 = vector.extract_strided_slice %931 {offsets = [1, 0, 0], sizes = [1, 16, 128], strides = [1, 1, 1]} : vector<4x16x128xf32> to vector<1x16x128xf32>
    %944 = vector.shape_cast %943 : vector<1x16x128xf32> to vector<16x128xf32>
    %945 = vector.extract_strided_slice %931 {offsets = [2, 0, 0], sizes = [1, 16, 128], strides = [1, 1, 1]} : vector<4x16x128xf32> to vector<1x16x128xf32>
    %946 = vector.shape_cast %945 : vector<1x16x128xf32> to vector<16x128xf32>
    %947 = vector.extract_strided_slice %931 {offsets = [3, 0, 0], sizes = [1, 16, 128], strides = [1, 1, 1]} : vector<4x16x128xf32> to vector<1x16x128xf32>
    %948 = vector.shape_cast %947 : vector<1x16x128xf32> to vector<16x128xf32>
    %c127_i32_93 = arith.constant 127 : i32
    %949 = tpu.dynamic_rotate %931 by %c127_i32_93 dim 2 : vector<4x16x128xf32>, i32 -> vector<4x16x128xf32>
    %950 = vector.extract_strided_slice %949 {offsets = [0, 0, 0], sizes = [1, 16, 128], strides = [1, 1, 1]} : vector<4x16x128xf32> to vector<1x16x128xf32>
    %951 = vector.shape_cast %950 : vector<1x16x128xf32> to vector<16x128xf32>
    %952 = vector.extract_strided_slice %949 {offsets = [1, 0, 0], sizes = [1, 16, 128], strides = [1, 1, 1]} : vector<4x16x128xf32> to vector<1x16x128xf32>
    %953 = vector.shape_cast %952 : vector<1x16x128xf32> to vector<16x128xf32>
    %954 = vector.extract_strided_slice %949 {offsets = [2, 0, 0], sizes = [1, 16, 128], strides = [1, 1, 1]} : vector<4x16x128xf32> to vector<1x16x128xf32>
    %955 = vector.shape_cast %954 : vector<1x16x128xf32> to vector<16x128xf32>
    %956 = vector.extract_strided_slice %949 {offsets = [3, 0, 0], sizes = [1, 16, 128], strides = [1, 1, 1]} : vector<4x16x128xf32> to vector<1x16x128xf32>
    %957 = vector.shape_cast %956 : vector<1x16x128xf32> to vector<16x128xf32>
    %cst_94 = arith.constant 0.000000e+00 : f32
    %958 = vector.broadcast %cst_94 : f32 to vector<16x128xf32>
    %c0_95 = arith.constant 0 : index
    %959 = memref.load %arg9[%c0_95] : memref<4xf32, #tpu.memory_space<smem>>
    %960 = vector.broadcast %959 : f32 to vector<16x128xf32>
    %961 = arith.addf %958, %960 : vector<16x128xf32>
    %c0_96 = arith.constant 0 : index
    %962 = memref.load %arg8[%c0_96] : memref<144xf32, #tpu.memory_space<smem>>
    %963 = vector.broadcast %962 : f32 to vector<16x128xf32>
    %964 = arith.mulf %963, %868 : vector<16x128xf32>
    %965 = arith.addf %961, %964 : vector<16x128xf32>
    %c1_97 = arith.constant 1 : index
    %966 = memref.load %arg8[%c1_97] : memref<144xf32, #tpu.memory_space<smem>>
    %967 = vector.broadcast %966 : f32 to vector<16x128xf32>
    %968 = arith.mulf %967, %876 : vector<16x128xf32>
    %969 = arith.addf %965, %968 : vector<16x128xf32>
    %c2_98 = arith.constant 2 : index
    %970 = memref.load %arg8[%c2_98] : memref<144xf32, #tpu.memory_space<smem>>
    %971 = vector.broadcast %970 : f32 to vector<16x128xf32>
    %972 = arith.mulf %971, %885 : vector<16x128xf32>
    %973 = arith.addf %969, %972 : vector<16x128xf32>
    %c3_99 = arith.constant 3 : index
    %974 = memref.load %arg8[%c3_99] : memref<144xf32, #tpu.memory_space<smem>>
    %975 = vector.broadcast %974 : f32 to vector<16x128xf32>
    %976 = arith.mulf %975, %894 : vector<16x128xf32>
    %977 = arith.addf %973, %976 : vector<16x128xf32>
    %c4_100 = arith.constant 4 : index
    %978 = memref.load %arg8[%c4_100] : memref<144xf32, #tpu.memory_space<smem>>
    %979 = vector.broadcast %978 : f32 to vector<16x128xf32>
    %980 = arith.mulf %979, %902 : vector<16x128xf32>
    %981 = arith.addf %977, %980 : vector<16x128xf32>
    %c5_101 = arith.constant 5 : index
    %982 = memref.load %arg8[%c5_101] : memref<144xf32, #tpu.memory_space<smem>>
    %983 = vector.broadcast %982 : f32 to vector<16x128xf32>
    %984 = arith.mulf %983, %911 : vector<16x128xf32>
    %985 = arith.addf %981, %984 : vector<16x128xf32>
    %c6_102 = arith.constant 6 : index
    %986 = memref.load %arg8[%c6_102] : memref<144xf32, #tpu.memory_space<smem>>
    %987 = vector.broadcast %986 : f32 to vector<16x128xf32>
    %988 = arith.mulf %987, %934 : vector<16x128xf32>
    %989 = arith.addf %985, %988 : vector<16x128xf32>
    %c7_103 = arith.constant 7 : index
    %990 = memref.load %arg8[%c7_103] : memref<144xf32, #tpu.memory_space<smem>>
    %991 = vector.broadcast %990 : f32 to vector<16x128xf32>
    %992 = arith.mulf %991, %942 : vector<16x128xf32>
    %993 = arith.addf %989, %992 : vector<16x128xf32>
    %c8_104 = arith.constant 8 : index
    %994 = memref.load %arg8[%c8_104] : memref<144xf32, #tpu.memory_space<smem>>
    %995 = vector.broadcast %994 : f32 to vector<16x128xf32>
    %996 = arith.mulf %995, %951 : vector<16x128xf32>
    %997 = arith.addf %993, %996 : vector<16x128xf32>
    %c9_105 = arith.constant 9 : index
    %998 = memref.load %arg8[%c9_105] : memref<144xf32, #tpu.memory_space<smem>>
    %999 = vector.broadcast %998 : f32 to vector<16x128xf32>
    %1000 = arith.mulf %999, %870 : vector<16x128xf32>
    %1001 = arith.addf %997, %1000 : vector<16x128xf32>
    %c10_106 = arith.constant 10 : index
    %1002 = memref.load %arg8[%c10_106] : memref<144xf32, #tpu.memory_space<smem>>
    %1003 = vector.broadcast %1002 : f32 to vector<16x128xf32>
    %1004 = arith.mulf %1003, %878 : vector<16x128xf32>
    %1005 = arith.addf %1001, %1004 : vector<16x128xf32>
    %c11_107 = arith.constant 11 : index
    %1006 = memref.load %arg8[%c11_107] : memref<144xf32, #tpu.memory_space<smem>>
    %1007 = vector.broadcast %1006 : f32 to vector<16x128xf32>
    %1008 = arith.mulf %1007, %887 : vector<16x128xf32>
    %1009 = arith.addf %1005, %1008 : vector<16x128xf32>
    %c12_108 = arith.constant 12 : index
    %1010 = memref.load %arg8[%c12_108] : memref<144xf32, #tpu.memory_space<smem>>
    %1011 = vector.broadcast %1010 : f32 to vector<16x128xf32>
    %1012 = arith.mulf %1011, %896 : vector<16x128xf32>
    %1013 = arith.addf %1009, %1012 : vector<16x128xf32>
    %c13_109 = arith.constant 13 : index
    %1014 = memref.load %arg8[%c13_109] : memref<144xf32, #tpu.memory_space<smem>>
    %1015 = vector.broadcast %1014 : f32 to vector<16x128xf32>
    %1016 = arith.mulf %1015, %904 : vector<16x128xf32>
    %1017 = arith.addf %1013, %1016 : vector<16x128xf32>
    %c14_110 = arith.constant 14 : index
    %1018 = memref.load %arg8[%c14_110] : memref<144xf32, #tpu.memory_space<smem>>
    %1019 = vector.broadcast %1018 : f32 to vector<16x128xf32>
    %1020 = arith.mulf %1019, %913 : vector<16x128xf32>
    %1021 = arith.addf %1017, %1020 : vector<16x128xf32>
    %c15_111 = arith.constant 15 : index
    %1022 = memref.load %arg8[%c15_111] : memref<144xf32, #tpu.memory_space<smem>>
    %1023 = vector.broadcast %1022 : f32 to vector<16x128xf32>
    %1024 = arith.mulf %1023, %936 : vector<16x128xf32>
    %1025 = arith.addf %1021, %1024 : vector<16x128xf32>
    %c16_112 = arith.constant 16 : index
    %1026 = memref.load %arg8[%c16_112] : memref<144xf32, #tpu.memory_space<smem>>
    %1027 = vector.broadcast %1026 : f32 to vector<16x128xf32>
    %1028 = arith.mulf %1027, %944 : vector<16x128xf32>
    %1029 = arith.addf %1025, %1028 : vector<16x128xf32>
    %c17_113 = arith.constant 17 : index
    %1030 = memref.load %arg8[%c17_113] : memref<144xf32, #tpu.memory_space<smem>>
    %1031 = vector.broadcast %1030 : f32 to vector<16x128xf32>
    %1032 = arith.mulf %1031, %953 : vector<16x128xf32>
    %1033 = arith.addf %1029, %1032 : vector<16x128xf32>
    %c18_114 = arith.constant 18 : index
    %1034 = memref.load %arg8[%c18_114] : memref<144xf32, #tpu.memory_space<smem>>
    %1035 = vector.broadcast %1034 : f32 to vector<16x128xf32>
    %1036 = arith.mulf %1035, %872 : vector<16x128xf32>
    %1037 = arith.addf %1033, %1036 : vector<16x128xf32>
    %c19_115 = arith.constant 19 : index
    %1038 = memref.load %arg8[%c19_115] : memref<144xf32, #tpu.memory_space<smem>>
    %1039 = vector.broadcast %1038 : f32 to vector<16x128xf32>
    %1040 = arith.mulf %1039, %880 : vector<16x128xf32>
    %1041 = arith.addf %1037, %1040 : vector<16x128xf32>
    %c20_116 = arith.constant 20 : index
    %1042 = memref.load %arg8[%c20_116] : memref<144xf32, #tpu.memory_space<smem>>
    %1043 = vector.broadcast %1042 : f32 to vector<16x128xf32>
    %1044 = arith.mulf %1043, %889 : vector<16x128xf32>
    %1045 = arith.addf %1041, %1044 : vector<16x128xf32>
    %c21_117 = arith.constant 21 : index
    %1046 = memref.load %arg8[%c21_117] : memref<144xf32, #tpu.memory_space<smem>>
    %1047 = vector.broadcast %1046 : f32 to vector<16x128xf32>
    %1048 = arith.mulf %1047, %898 : vector<16x128xf32>
    %1049 = arith.addf %1045, %1048 : vector<16x128xf32>
    %c22_118 = arith.constant 22 : index
    %1050 = memref.load %arg8[%c22_118] : memref<144xf32, #tpu.memory_space<smem>>
    %1051 = vector.broadcast %1050 : f32 to vector<16x128xf32>
    %1052 = arith.mulf %1051, %906 : vector<16x128xf32>
    %1053 = arith.addf %1049, %1052 : vector<16x128xf32>
    %c23_119 = arith.constant 23 : index
    %1054 = memref.load %arg8[%c23_119] : memref<144xf32, #tpu.memory_space<smem>>
    %1055 = vector.broadcast %1054 : f32 to vector<16x128xf32>
    %1056 = arith.mulf %1055, %915 : vector<16x128xf32>
    %1057 = arith.addf %1053, %1056 : vector<16x128xf32>
    %c24_120 = arith.constant 24 : index
    %1058 = memref.load %arg8[%c24_120] : memref<144xf32, #tpu.memory_space<smem>>
    %1059 = vector.broadcast %1058 : f32 to vector<16x128xf32>
    %1060 = arith.mulf %1059, %938 : vector<16x128xf32>
    %1061 = arith.addf %1057, %1060 : vector<16x128xf32>
    %c25_121 = arith.constant 25 : index
    %1062 = memref.load %arg8[%c25_121] : memref<144xf32, #tpu.memory_space<smem>>
    %1063 = vector.broadcast %1062 : f32 to vector<16x128xf32>
    %1064 = arith.mulf %1063, %946 : vector<16x128xf32>
    %1065 = arith.addf %1061, %1064 : vector<16x128xf32>
    %c26_122 = arith.constant 26 : index
    %1066 = memref.load %arg8[%c26_122] : memref<144xf32, #tpu.memory_space<smem>>
    %1067 = vector.broadcast %1066 : f32 to vector<16x128xf32>
    %1068 = arith.mulf %1067, %955 : vector<16x128xf32>
    %1069 = arith.addf %1065, %1068 : vector<16x128xf32>
    %c27_123 = arith.constant 27 : index
    %1070 = memref.load %arg8[%c27_123] : memref<144xf32, #tpu.memory_space<smem>>
    %1071 = vector.broadcast %1070 : f32 to vector<16x128xf32>
    %1072 = arith.mulf %1071, %874 : vector<16x128xf32>
    %1073 = arith.addf %1069, %1072 : vector<16x128xf32>
    %c28_124 = arith.constant 28 : index
    %1074 = memref.load %arg8[%c28_124] : memref<144xf32, #tpu.memory_space<smem>>
    %1075 = vector.broadcast %1074 : f32 to vector<16x128xf32>
    %1076 = arith.mulf %1075, %882 : vector<16x128xf32>
    %1077 = arith.addf %1073, %1076 : vector<16x128xf32>
    %c29_125 = arith.constant 29 : index
    %1078 = memref.load %arg8[%c29_125] : memref<144xf32, #tpu.memory_space<smem>>
    %1079 = vector.broadcast %1078 : f32 to vector<16x128xf32>
    %1080 = arith.mulf %1079, %891 : vector<16x128xf32>
    %1081 = arith.addf %1077, %1080 : vector<16x128xf32>
    %c30_126 = arith.constant 30 : index
    %1082 = memref.load %arg8[%c30_126] : memref<144xf32, #tpu.memory_space<smem>>
    %1083 = vector.broadcast %1082 : f32 to vector<16x128xf32>
    %1084 = arith.mulf %1083, %900 : vector<16x128xf32>
    %1085 = arith.addf %1081, %1084 : vector<16x128xf32>
    %c31_127 = arith.constant 31 : index
    %1086 = memref.load %arg8[%c31_127] : memref<144xf32, #tpu.memory_space<smem>>
    %1087 = vector.broadcast %1086 : f32 to vector<16x128xf32>
    %1088 = arith.mulf %1087, %908 : vector<16x128xf32>
    %1089 = arith.addf %1085, %1088 : vector<16x128xf32>
    %c32_128 = arith.constant 32 : index
    %1090 = memref.load %arg8[%c32_128] : memref<144xf32, #tpu.memory_space<smem>>
    %1091 = vector.broadcast %1090 : f32 to vector<16x128xf32>
    %1092 = arith.mulf %1091, %917 : vector<16x128xf32>
    %1093 = arith.addf %1089, %1092 : vector<16x128xf32>
    %c33_129 = arith.constant 33 : index
    %1094 = memref.load %arg8[%c33_129] : memref<144xf32, #tpu.memory_space<smem>>
    %1095 = vector.broadcast %1094 : f32 to vector<16x128xf32>
    %1096 = arith.mulf %1095, %940 : vector<16x128xf32>
    %1097 = arith.addf %1093, %1096 : vector<16x128xf32>
    %c34_130 = arith.constant 34 : index
    %1098 = memref.load %arg8[%c34_130] : memref<144xf32, #tpu.memory_space<smem>>
    %1099 = vector.broadcast %1098 : f32 to vector<16x128xf32>
    %1100 = arith.mulf %1099, %948 : vector<16x128xf32>
    %1101 = arith.addf %1097, %1100 : vector<16x128xf32>
    %c35_131 = arith.constant 35 : index
    %1102 = memref.load %arg8[%c35_131] : memref<144xf32, #tpu.memory_space<smem>>
    %1103 = vector.broadcast %1102 : f32 to vector<16x128xf32>
    %1104 = arith.mulf %1103, %957 : vector<16x128xf32>
    %1105 = arith.addf %1101, %1104 : vector<16x128xf32>
    %cst_132 = arith.constant 0.000000e+00 : f32
    %1106 = vector.broadcast %cst_132 : f32 to vector<16x128xf32>
    %c1_133 = arith.constant 1 : index
    %1107 = memref.load %arg9[%c1_133] : memref<4xf32, #tpu.memory_space<smem>>
    %1108 = vector.broadcast %1107 : f32 to vector<16x128xf32>
    %1109 = arith.addf %1106, %1108 : vector<16x128xf32>
    %c36_134 = arith.constant 36 : index
    %1110 = memref.load %arg8[%c36_134] : memref<144xf32, #tpu.memory_space<smem>>
    %1111 = vector.broadcast %1110 : f32 to vector<16x128xf32>
    %1112 = arith.mulf %1111, %868 : vector<16x128xf32>
    %1113 = arith.addf %1109, %1112 : vector<16x128xf32>
    %c37_135 = arith.constant 37 : index
    %1114 = memref.load %arg8[%c37_135] : memref<144xf32, #tpu.memory_space<smem>>
    %1115 = vector.broadcast %1114 : f32 to vector<16x128xf32>
    %1116 = arith.mulf %1115, %876 : vector<16x128xf32>
    %1117 = arith.addf %1113, %1116 : vector<16x128xf32>
    %c38_136 = arith.constant 38 : index
    %1118 = memref.load %arg8[%c38_136] : memref<144xf32, #tpu.memory_space<smem>>
    %1119 = vector.broadcast %1118 : f32 to vector<16x128xf32>
    %1120 = arith.mulf %1119, %885 : vector<16x128xf32>
    %1121 = arith.addf %1117, %1120 : vector<16x128xf32>
    %c39_137 = arith.constant 39 : index
    %1122 = memref.load %arg8[%c39_137] : memref<144xf32, #tpu.memory_space<smem>>
    %1123 = vector.broadcast %1122 : f32 to vector<16x128xf32>
    %1124 = arith.mulf %1123, %894 : vector<16x128xf32>
    %1125 = arith.addf %1121, %1124 : vector<16x128xf32>
    %c40_138 = arith.constant 40 : index
    %1126 = memref.load %arg8[%c40_138] : memref<144xf32, #tpu.memory_space<smem>>
    %1127 = vector.broadcast %1126 : f32 to vector<16x128xf32>
    %1128 = arith.mulf %1127, %902 : vector<16x128xf32>
    %1129 = arith.addf %1125, %1128 : vector<16x128xf32>
    %c41_139 = arith.constant 41 : index
    %1130 = memref.load %arg8[%c41_139] : memref<144xf32, #tpu.memory_space<smem>>
    %1131 = vector.broadcast %1130 : f32 to vector<16x128xf32>
    %1132 = arith.mulf %1131, %911 : vector<16x128xf32>
    %1133 = arith.addf %1129, %1132 : vector<16x128xf32>
    %c42_140 = arith.constant 42 : index
    %1134 = memref.load %arg8[%c42_140] : memref<144xf32, #tpu.memory_space<smem>>
    %1135 = vector.broadcast %1134 : f32 to vector<16x128xf32>
    %1136 = arith.mulf %1135, %934 : vector<16x128xf32>
    %1137 = arith.addf %1133, %1136 : vector<16x128xf32>
    %c43_141 = arith.constant 43 : index
    %1138 = memref.load %arg8[%c43_141] : memref<144xf32, #tpu.memory_space<smem>>
    %1139 = vector.broadcast %1138 : f32 to vector<16x128xf32>
    %1140 = arith.mulf %1139, %942 : vector<16x128xf32>
    %1141 = arith.addf %1137, %1140 : vector<16x128xf32>
    %c44_142 = arith.constant 44 : index
    %1142 = memref.load %arg8[%c44_142] : memref<144xf32, #tpu.memory_space<smem>>
    %1143 = vector.broadcast %1142 : f32 to vector<16x128xf32>
    %1144 = arith.mulf %1143, %951 : vector<16x128xf32>
    %1145 = arith.addf %1141, %1144 : vector<16x128xf32>
    %c45_143 = arith.constant 45 : index
    %1146 = memref.load %arg8[%c45_143] : memref<144xf32, #tpu.memory_space<smem>>
    %1147 = vector.broadcast %1146 : f32 to vector<16x128xf32>
    %1148 = arith.mulf %1147, %870 : vector<16x128xf32>
    %1149 = arith.addf %1145, %1148 : vector<16x128xf32>
    %c46_144 = arith.constant 46 : index
    %1150 = memref.load %arg8[%c46_144] : memref<144xf32, #tpu.memory_space<smem>>
    %1151 = vector.broadcast %1150 : f32 to vector<16x128xf32>
    %1152 = arith.mulf %1151, %878 : vector<16x128xf32>
    %1153 = arith.addf %1149, %1152 : vector<16x128xf32>
    %c47_145 = arith.constant 47 : index
    %1154 = memref.load %arg8[%c47_145] : memref<144xf32, #tpu.memory_space<smem>>
    %1155 = vector.broadcast %1154 : f32 to vector<16x128xf32>
    %1156 = arith.mulf %1155, %887 : vector<16x128xf32>
    %1157 = arith.addf %1153, %1156 : vector<16x128xf32>
    %c48_146 = arith.constant 48 : index
    %1158 = memref.load %arg8[%c48_146] : memref<144xf32, #tpu.memory_space<smem>>
    %1159 = vector.broadcast %1158 : f32 to vector<16x128xf32>
    %1160 = arith.mulf %1159, %896 : vector<16x128xf32>
    %1161 = arith.addf %1157, %1160 : vector<16x128xf32>
    %c49_147 = arith.constant 49 : index
    %1162 = memref.load %arg8[%c49_147] : memref<144xf32, #tpu.memory_space<smem>>
    %1163 = vector.broadcast %1162 : f32 to vector<16x128xf32>
    %1164 = arith.mulf %1163, %904 : vector<16x128xf32>
    %1165 = arith.addf %1161, %1164 : vector<16x128xf32>
    %c50_148 = arith.constant 50 : index
    %1166 = memref.load %arg8[%c50_148] : memref<144xf32, #tpu.memory_space<smem>>
    %1167 = vector.broadcast %1166 : f32 to vector<16x128xf32>
    %1168 = arith.mulf %1167, %913 : vector<16x128xf32>
    %1169 = arith.addf %1165, %1168 : vector<16x128xf32>
    %c51_149 = arith.constant 51 : index
    %1170 = memref.load %arg8[%c51_149] : memref<144xf32, #tpu.memory_space<smem>>
    %1171 = vector.broadcast %1170 : f32 to vector<16x128xf32>
    %1172 = arith.mulf %1171, %936 : vector<16x128xf32>
    %1173 = arith.addf %1169, %1172 : vector<16x128xf32>
    %c52_150 = arith.constant 52 : index
    %1174 = memref.load %arg8[%c52_150] : memref<144xf32, #tpu.memory_space<smem>>
    %1175 = vector.broadcast %1174 : f32 to vector<16x128xf32>
    %1176 = arith.mulf %1175, %944 : vector<16x128xf32>
    %1177 = arith.addf %1173, %1176 : vector<16x128xf32>
    %c53_151 = arith.constant 53 : index
    %1178 = memref.load %arg8[%c53_151] : memref<144xf32, #tpu.memory_space<smem>>
    %1179 = vector.broadcast %1178 : f32 to vector<16x128xf32>
    %1180 = arith.mulf %1179, %953 : vector<16x128xf32>
    %1181 = arith.addf %1177, %1180 : vector<16x128xf32>
    %c54_152 = arith.constant 54 : index
    %1182 = memref.load %arg8[%c54_152] : memref<144xf32, #tpu.memory_space<smem>>
    %1183 = vector.broadcast %1182 : f32 to vector<16x128xf32>
    %1184 = arith.mulf %1183, %872 : vector<16x128xf32>
    %1185 = arith.addf %1181, %1184 : vector<16x128xf32>
    %c55_153 = arith.constant 55 : index
    %1186 = memref.load %arg8[%c55_153] : memref<144xf32, #tpu.memory_space<smem>>
    %1187 = vector.broadcast %1186 : f32 to vector<16x128xf32>
    %1188 = arith.mulf %1187, %880 : vector<16x128xf32>
    %1189 = arith.addf %1185, %1188 : vector<16x128xf32>
    %c56_154 = arith.constant 56 : index
    %1190 = memref.load %arg8[%c56_154] : memref<144xf32, #tpu.memory_space<smem>>
    %1191 = vector.broadcast %1190 : f32 to vector<16x128xf32>
    %1192 = arith.mulf %1191, %889 : vector<16x128xf32>
    %1193 = arith.addf %1189, %1192 : vector<16x128xf32>
    %c57_155 = arith.constant 57 : index
    %1194 = memref.load %arg8[%c57_155] : memref<144xf32, #tpu.memory_space<smem>>
    %1195 = vector.broadcast %1194 : f32 to vector<16x128xf32>
    %1196 = arith.mulf %1195, %898 : vector<16x128xf32>
    %1197 = arith.addf %1193, %1196 : vector<16x128xf32>
    %c58_156 = arith.constant 58 : index
    %1198 = memref.load %arg8[%c58_156] : memref<144xf32, #tpu.memory_space<smem>>
    %1199 = vector.broadcast %1198 : f32 to vector<16x128xf32>
    %1200 = arith.mulf %1199, %906 : vector<16x128xf32>
    %1201 = arith.addf %1197, %1200 : vector<16x128xf32>
    %c59_157 = arith.constant 59 : index
    %1202 = memref.load %arg8[%c59_157] : memref<144xf32, #tpu.memory_space<smem>>
    %1203 = vector.broadcast %1202 : f32 to vector<16x128xf32>
    %1204 = arith.mulf %1203, %915 : vector<16x128xf32>
    %1205 = arith.addf %1201, %1204 : vector<16x128xf32>
    %c60_158 = arith.constant 60 : index
    %1206 = memref.load %arg8[%c60_158] : memref<144xf32, #tpu.memory_space<smem>>
    %1207 = vector.broadcast %1206 : f32 to vector<16x128xf32>
    %1208 = arith.mulf %1207, %938 : vector<16x128xf32>
    %1209 = arith.addf %1205, %1208 : vector<16x128xf32>
    %c61_159 = arith.constant 61 : index
    %1210 = memref.load %arg8[%c61_159] : memref<144xf32, #tpu.memory_space<smem>>
    %1211 = vector.broadcast %1210 : f32 to vector<16x128xf32>
    %1212 = arith.mulf %1211, %946 : vector<16x128xf32>
    %1213 = arith.addf %1209, %1212 : vector<16x128xf32>
    %c62_160 = arith.constant 62 : index
    %1214 = memref.load %arg8[%c62_160] : memref<144xf32, #tpu.memory_space<smem>>
    %1215 = vector.broadcast %1214 : f32 to vector<16x128xf32>
    %1216 = arith.mulf %1215, %955 : vector<16x128xf32>
    %1217 = arith.addf %1213, %1216 : vector<16x128xf32>
    %c63_161 = arith.constant 63 : index
    %1218 = memref.load %arg8[%c63_161] : memref<144xf32, #tpu.memory_space<smem>>
    %1219 = vector.broadcast %1218 : f32 to vector<16x128xf32>
    %1220 = arith.mulf %1219, %874 : vector<16x128xf32>
    %1221 = arith.addf %1217, %1220 : vector<16x128xf32>
    %c64_162 = arith.constant 64 : index
    %1222 = memref.load %arg8[%c64_162] : memref<144xf32, #tpu.memory_space<smem>>
    %1223 = vector.broadcast %1222 : f32 to vector<16x128xf32>
    %1224 = arith.mulf %1223, %882 : vector<16x128xf32>
    %1225 = arith.addf %1221, %1224 : vector<16x128xf32>
    %c65_163 = arith.constant 65 : index
    %1226 = memref.load %arg8[%c65_163] : memref<144xf32, #tpu.memory_space<smem>>
    %1227 = vector.broadcast %1226 : f32 to vector<16x128xf32>
    %1228 = arith.mulf %1227, %891 : vector<16x128xf32>
    %1229 = arith.addf %1225, %1228 : vector<16x128xf32>
    %c66_164 = arith.constant 66 : index
    %1230 = memref.load %arg8[%c66_164] : memref<144xf32, #tpu.memory_space<smem>>
    %1231 = vector.broadcast %1230 : f32 to vector<16x128xf32>
    %1232 = arith.mulf %1231, %900 : vector<16x128xf32>
    %1233 = arith.addf %1229, %1232 : vector<16x128xf32>
    %c67_165 = arith.constant 67 : index
    %1234 = memref.load %arg8[%c67_165] : memref<144xf32, #tpu.memory_space<smem>>
    %1235 = vector.broadcast %1234 : f32 to vector<16x128xf32>
    %1236 = arith.mulf %1235, %908 : vector<16x128xf32>
    %1237 = arith.addf %1233, %1236 : vector<16x128xf32>
    %c68_166 = arith.constant 68 : index
    %1238 = memref.load %arg8[%c68_166] : memref<144xf32, #tpu.memory_space<smem>>
    %1239 = vector.broadcast %1238 : f32 to vector<16x128xf32>
    %1240 = arith.mulf %1239, %917 : vector<16x128xf32>
    %1241 = arith.addf %1237, %1240 : vector<16x128xf32>
    %c69_167 = arith.constant 69 : index
    %1242 = memref.load %arg8[%c69_167] : memref<144xf32, #tpu.memory_space<smem>>
    %1243 = vector.broadcast %1242 : f32 to vector<16x128xf32>
    %1244 = arith.mulf %1243, %940 : vector<16x128xf32>
    %1245 = arith.addf %1241, %1244 : vector<16x128xf32>
    %c70_168 = arith.constant 70 : index
    %1246 = memref.load %arg8[%c70_168] : memref<144xf32, #tpu.memory_space<smem>>
    %1247 = vector.broadcast %1246 : f32 to vector<16x128xf32>
    %1248 = arith.mulf %1247, %948 : vector<16x128xf32>
    %1249 = arith.addf %1245, %1248 : vector<16x128xf32>
    %c71_169 = arith.constant 71 : index
    %1250 = memref.load %arg8[%c71_169] : memref<144xf32, #tpu.memory_space<smem>>
    %1251 = vector.broadcast %1250 : f32 to vector<16x128xf32>
    %1252 = arith.mulf %1251, %957 : vector<16x128xf32>
    %1253 = arith.addf %1249, %1252 : vector<16x128xf32>
    %cst_170 = arith.constant 0.000000e+00 : f32
    %1254 = vector.broadcast %cst_170 : f32 to vector<16x128xf32>
    %c2_171 = arith.constant 2 : index
    %1255 = memref.load %arg9[%c2_171] : memref<4xf32, #tpu.memory_space<smem>>
    %1256 = vector.broadcast %1255 : f32 to vector<16x128xf32>
    %1257 = arith.addf %1254, %1256 : vector<16x128xf32>
    %c72_172 = arith.constant 72 : index
    %1258 = memref.load %arg8[%c72_172] : memref<144xf32, #tpu.memory_space<smem>>
    %1259 = vector.broadcast %1258 : f32 to vector<16x128xf32>
    %1260 = arith.mulf %1259, %868 : vector<16x128xf32>
    %1261 = arith.addf %1257, %1260 : vector<16x128xf32>
    %c73_173 = arith.constant 73 : index
    %1262 = memref.load %arg8[%c73_173] : memref<144xf32, #tpu.memory_space<smem>>
    %1263 = vector.broadcast %1262 : f32 to vector<16x128xf32>
    %1264 = arith.mulf %1263, %876 : vector<16x128xf32>
    %1265 = arith.addf %1261, %1264 : vector<16x128xf32>
    %c74_174 = arith.constant 74 : index
    %1266 = memref.load %arg8[%c74_174] : memref<144xf32, #tpu.memory_space<smem>>
    %1267 = vector.broadcast %1266 : f32 to vector<16x128xf32>
    %1268 = arith.mulf %1267, %885 : vector<16x128xf32>
    %1269 = arith.addf %1265, %1268 : vector<16x128xf32>
    %c75_175 = arith.constant 75 : index
    %1270 = memref.load %arg8[%c75_175] : memref<144xf32, #tpu.memory_space<smem>>
    %1271 = vector.broadcast %1270 : f32 to vector<16x128xf32>
    %1272 = arith.mulf %1271, %894 : vector<16x128xf32>
    %1273 = arith.addf %1269, %1272 : vector<16x128xf32>
    %c76_176 = arith.constant 76 : index
    %1274 = memref.load %arg8[%c76_176] : memref<144xf32, #tpu.memory_space<smem>>
    %1275 = vector.broadcast %1274 : f32 to vector<16x128xf32>
    %1276 = arith.mulf %1275, %902 : vector<16x128xf32>
    %1277 = arith.addf %1273, %1276 : vector<16x128xf32>
    %c77_177 = arith.constant 77 : index
    %1278 = memref.load %arg8[%c77_177] : memref<144xf32, #tpu.memory_space<smem>>
    %1279 = vector.broadcast %1278 : f32 to vector<16x128xf32>
    %1280 = arith.mulf %1279, %911 : vector<16x128xf32>
    %1281 = arith.addf %1277, %1280 : vector<16x128xf32>
    %c78_178 = arith.constant 78 : index
    %1282 = memref.load %arg8[%c78_178] : memref<144xf32, #tpu.memory_space<smem>>
    %1283 = vector.broadcast %1282 : f32 to vector<16x128xf32>
    %1284 = arith.mulf %1283, %934 : vector<16x128xf32>
    %1285 = arith.addf %1281, %1284 : vector<16x128xf32>
    %c79_179 = arith.constant 79 : index
    %1286 = memref.load %arg8[%c79_179] : memref<144xf32, #tpu.memory_space<smem>>
    %1287 = vector.broadcast %1286 : f32 to vector<16x128xf32>
    %1288 = arith.mulf %1287, %942 : vector<16x128xf32>
    %1289 = arith.addf %1285, %1288 : vector<16x128xf32>
    %c80_180 = arith.constant 80 : index
    %1290 = memref.load %arg8[%c80_180] : memref<144xf32, #tpu.memory_space<smem>>
    %1291 = vector.broadcast %1290 : f32 to vector<16x128xf32>
    %1292 = arith.mulf %1291, %951 : vector<16x128xf32>
    %1293 = arith.addf %1289, %1292 : vector<16x128xf32>
    %c81_181 = arith.constant 81 : index
    %1294 = memref.load %arg8[%c81_181] : memref<144xf32, #tpu.memory_space<smem>>
    %1295 = vector.broadcast %1294 : f32 to vector<16x128xf32>
    %1296 = arith.mulf %1295, %870 : vector<16x128xf32>
    %1297 = arith.addf %1293, %1296 : vector<16x128xf32>
    %c82_182 = arith.constant 82 : index
    %1298 = memref.load %arg8[%c82_182] : memref<144xf32, #tpu.memory_space<smem>>
    %1299 = vector.broadcast %1298 : f32 to vector<16x128xf32>
    %1300 = arith.mulf %1299, %878 : vector<16x128xf32>
    %1301 = arith.addf %1297, %1300 : vector<16x128xf32>
    %c83_183 = arith.constant 83 : index
    %1302 = memref.load %arg8[%c83_183] : memref<144xf32, #tpu.memory_space<smem>>
    %1303 = vector.broadcast %1302 : f32 to vector<16x128xf32>
    %1304 = arith.mulf %1303, %887 : vector<16x128xf32>
    %1305 = arith.addf %1301, %1304 : vector<16x128xf32>
    %c84_184 = arith.constant 84 : index
    %1306 = memref.load %arg8[%c84_184] : memref<144xf32, #tpu.memory_space<smem>>
    %1307 = vector.broadcast %1306 : f32 to vector<16x128xf32>
    %1308 = arith.mulf %1307, %896 : vector<16x128xf32>
    %1309 = arith.addf %1305, %1308 : vector<16x128xf32>
    %c85_185 = arith.constant 85 : index
    %1310 = memref.load %arg8[%c85_185] : memref<144xf32, #tpu.memory_space<smem>>
    %1311 = vector.broadcast %1310 : f32 to vector<16x128xf32>
    %1312 = arith.mulf %1311, %904 : vector<16x128xf32>
    %1313 = arith.addf %1309, %1312 : vector<16x128xf32>
    %c86_186 = arith.constant 86 : index
    %1314 = memref.load %arg8[%c86_186] : memref<144xf32, #tpu.memory_space<smem>>
    %1315 = vector.broadcast %1314 : f32 to vector<16x128xf32>
    %1316 = arith.mulf %1315, %913 : vector<16x128xf32>
    %1317 = arith.addf %1313, %1316 : vector<16x128xf32>
    %c87_187 = arith.constant 87 : index
    %1318 = memref.load %arg8[%c87_187] : memref<144xf32, #tpu.memory_space<smem>>
    %1319 = vector.broadcast %1318 : f32 to vector<16x128xf32>
    %1320 = arith.mulf %1319, %936 : vector<16x128xf32>
    %1321 = arith.addf %1317, %1320 : vector<16x128xf32>
    %c88_188 = arith.constant 88 : index
    %1322 = memref.load %arg8[%c88_188] : memref<144xf32, #tpu.memory_space<smem>>
    %1323 = vector.broadcast %1322 : f32 to vector<16x128xf32>
    %1324 = arith.mulf %1323, %944 : vector<16x128xf32>
    %1325 = arith.addf %1321, %1324 : vector<16x128xf32>
    %c89_189 = arith.constant 89 : index
    %1326 = memref.load %arg8[%c89_189] : memref<144xf32, #tpu.memory_space<smem>>
    %1327 = vector.broadcast %1326 : f32 to vector<16x128xf32>
    %1328 = arith.mulf %1327, %953 : vector<16x128xf32>
    %1329 = arith.addf %1325, %1328 : vector<16x128xf32>
    %c90_190 = arith.constant 90 : index
    %1330 = memref.load %arg8[%c90_190] : memref<144xf32, #tpu.memory_space<smem>>
    %1331 = vector.broadcast %1330 : f32 to vector<16x128xf32>
    %1332 = arith.mulf %1331, %872 : vector<16x128xf32>
    %1333 = arith.addf %1329, %1332 : vector<16x128xf32>
    %c91_191 = arith.constant 91 : index
    %1334 = memref.load %arg8[%c91_191] : memref<144xf32, #tpu.memory_space<smem>>
    %1335 = vector.broadcast %1334 : f32 to vector<16x128xf32>
    %1336 = arith.mulf %1335, %880 : vector<16x128xf32>
    %1337 = arith.addf %1333, %1336 : vector<16x128xf32>
    %c92_192 = arith.constant 92 : index
    %1338 = memref.load %arg8[%c92_192] : memref<144xf32, #tpu.memory_space<smem>>
    %1339 = vector.broadcast %1338 : f32 to vector<16x128xf32>
    %1340 = arith.mulf %1339, %889 : vector<16x128xf32>
    %1341 = arith.addf %1337, %1340 : vector<16x128xf32>
    %c93_193 = arith.constant 93 : index
    %1342 = memref.load %arg8[%c93_193] : memref<144xf32, #tpu.memory_space<smem>>
    %1343 = vector.broadcast %1342 : f32 to vector<16x128xf32>
    %1344 = arith.mulf %1343, %898 : vector<16x128xf32>
    %1345 = arith.addf %1341, %1344 : vector<16x128xf32>
    %c94_194 = arith.constant 94 : index
    %1346 = memref.load %arg8[%c94_194] : memref<144xf32, #tpu.memory_space<smem>>
    %1347 = vector.broadcast %1346 : f32 to vector<16x128xf32>
    %1348 = arith.mulf %1347, %906 : vector<16x128xf32>
    %1349 = arith.addf %1345, %1348 : vector<16x128xf32>
    %c95_195 = arith.constant 95 : index
    %1350 = memref.load %arg8[%c95_195] : memref<144xf32, #tpu.memory_space<smem>>
    %1351 = vector.broadcast %1350 : f32 to vector<16x128xf32>
    %1352 = arith.mulf %1351, %915 : vector<16x128xf32>
    %1353 = arith.addf %1349, %1352 : vector<16x128xf32>
    %c96_196 = arith.constant 96 : index
    %1354 = memref.load %arg8[%c96_196] : memref<144xf32, #tpu.memory_space<smem>>
    %1355 = vector.broadcast %1354 : f32 to vector<16x128xf32>
    %1356 = arith.mulf %1355, %938 : vector<16x128xf32>
    %1357 = arith.addf %1353, %1356 : vector<16x128xf32>
    %c97_197 = arith.constant 97 : index
    %1358 = memref.load %arg8[%c97_197] : memref<144xf32, #tpu.memory_space<smem>>
    %1359 = vector.broadcast %1358 : f32 to vector<16x128xf32>
    %1360 = arith.mulf %1359, %946 : vector<16x128xf32>
    %1361 = arith.addf %1357, %1360 : vector<16x128xf32>
    %c98_198 = arith.constant 98 : index
    %1362 = memref.load %arg8[%c98_198] : memref<144xf32, #tpu.memory_space<smem>>
    %1363 = vector.broadcast %1362 : f32 to vector<16x128xf32>
    %1364 = arith.mulf %1363, %955 : vector<16x128xf32>
    %1365 = arith.addf %1361, %1364 : vector<16x128xf32>
    %c99_199 = arith.constant 99 : index
    %1366 = memref.load %arg8[%c99_199] : memref<144xf32, #tpu.memory_space<smem>>
    %1367 = vector.broadcast %1366 : f32 to vector<16x128xf32>
    %1368 = arith.mulf %1367, %874 : vector<16x128xf32>
    %1369 = arith.addf %1365, %1368 : vector<16x128xf32>
    %c100_200 = arith.constant 100 : index
    %1370 = memref.load %arg8[%c100_200] : memref<144xf32, #tpu.memory_space<smem>>
    %1371 = vector.broadcast %1370 : f32 to vector<16x128xf32>
    %1372 = arith.mulf %1371, %882 : vector<16x128xf32>
    %1373 = arith.addf %1369, %1372 : vector<16x128xf32>
    %c101_201 = arith.constant 101 : index
    %1374 = memref.load %arg8[%c101_201] : memref<144xf32, #tpu.memory_space<smem>>
    %1375 = vector.broadcast %1374 : f32 to vector<16x128xf32>
    %1376 = arith.mulf %1375, %891 : vector<16x128xf32>
    %1377 = arith.addf %1373, %1376 : vector<16x128xf32>
    %c102_202 = arith.constant 102 : index
    %1378 = memref.load %arg8[%c102_202] : memref<144xf32, #tpu.memory_space<smem>>
    %1379 = vector.broadcast %1378 : f32 to vector<16x128xf32>
    %1380 = arith.mulf %1379, %900 : vector<16x128xf32>
    %1381 = arith.addf %1377, %1380 : vector<16x128xf32>
    %c103_203 = arith.constant 103 : index
    %1382 = memref.load %arg8[%c103_203] : memref<144xf32, #tpu.memory_space<smem>>
    %1383 = vector.broadcast %1382 : f32 to vector<16x128xf32>
    %1384 = arith.mulf %1383, %908 : vector<16x128xf32>
    %1385 = arith.addf %1381, %1384 : vector<16x128xf32>
    %c104_204 = arith.constant 104 : index
    %1386 = memref.load %arg8[%c104_204] : memref<144xf32, #tpu.memory_space<smem>>
    %1387 = vector.broadcast %1386 : f32 to vector<16x128xf32>
    %1388 = arith.mulf %1387, %917 : vector<16x128xf32>
    %1389 = arith.addf %1385, %1388 : vector<16x128xf32>
    %c105_205 = arith.constant 105 : index
    %1390 = memref.load %arg8[%c105_205] : memref<144xf32, #tpu.memory_space<smem>>
    %1391 = vector.broadcast %1390 : f32 to vector<16x128xf32>
    %1392 = arith.mulf %1391, %940 : vector<16x128xf32>
    %1393 = arith.addf %1389, %1392 : vector<16x128xf32>
    %c106_206 = arith.constant 106 : index
    %1394 = memref.load %arg8[%c106_206] : memref<144xf32, #tpu.memory_space<smem>>
    %1395 = vector.broadcast %1394 : f32 to vector<16x128xf32>
    %1396 = arith.mulf %1395, %948 : vector<16x128xf32>
    %1397 = arith.addf %1393, %1396 : vector<16x128xf32>
    %c107_207 = arith.constant 107 : index
    %1398 = memref.load %arg8[%c107_207] : memref<144xf32, #tpu.memory_space<smem>>
    %1399 = vector.broadcast %1398 : f32 to vector<16x128xf32>
    %1400 = arith.mulf %1399, %957 : vector<16x128xf32>
    %1401 = arith.addf %1397, %1400 : vector<16x128xf32>
    %cst_208 = arith.constant 0.000000e+00 : f32
    %1402 = vector.broadcast %cst_208 : f32 to vector<16x128xf32>
    %c3_209 = arith.constant 3 : index
    %1403 = memref.load %arg9[%c3_209] : memref<4xf32, #tpu.memory_space<smem>>
    %1404 = vector.broadcast %1403 : f32 to vector<16x128xf32>
    %1405 = arith.addf %1402, %1404 : vector<16x128xf32>
    %c108_210 = arith.constant 108 : index
    %1406 = memref.load %arg8[%c108_210] : memref<144xf32, #tpu.memory_space<smem>>
    %1407 = vector.broadcast %1406 : f32 to vector<16x128xf32>
    %1408 = arith.mulf %1407, %868 : vector<16x128xf32>
    %1409 = arith.addf %1405, %1408 : vector<16x128xf32>
    %c109_211 = arith.constant 109 : index
    %1410 = memref.load %arg8[%c109_211] : memref<144xf32, #tpu.memory_space<smem>>
    %1411 = vector.broadcast %1410 : f32 to vector<16x128xf32>
    %1412 = arith.mulf %1411, %876 : vector<16x128xf32>
    %1413 = arith.addf %1409, %1412 : vector<16x128xf32>
    %c110_212 = arith.constant 110 : index
    %1414 = memref.load %arg8[%c110_212] : memref<144xf32, #tpu.memory_space<smem>>
    %1415 = vector.broadcast %1414 : f32 to vector<16x128xf32>
    %1416 = arith.mulf %1415, %885 : vector<16x128xf32>
    %1417 = arith.addf %1413, %1416 : vector<16x128xf32>
    %c111_213 = arith.constant 111 : index
    %1418 = memref.load %arg8[%c111_213] : memref<144xf32, #tpu.memory_space<smem>>
    %1419 = vector.broadcast %1418 : f32 to vector<16x128xf32>
    %1420 = arith.mulf %1419, %894 : vector<16x128xf32>
    %1421 = arith.addf %1417, %1420 : vector<16x128xf32>
    %c112_214 = arith.constant 112 : index
    %1422 = memref.load %arg8[%c112_214] : memref<144xf32, #tpu.memory_space<smem>>
    %1423 = vector.broadcast %1422 : f32 to vector<16x128xf32>
    %1424 = arith.mulf %1423, %902 : vector<16x128xf32>
    %1425 = arith.addf %1421, %1424 : vector<16x128xf32>
    %c113_215 = arith.constant 113 : index
    %1426 = memref.load %arg8[%c113_215] : memref<144xf32, #tpu.memory_space<smem>>
    %1427 = vector.broadcast %1426 : f32 to vector<16x128xf32>
    %1428 = arith.mulf %1427, %911 : vector<16x128xf32>
    %1429 = arith.addf %1425, %1428 : vector<16x128xf32>
    %c114_216 = arith.constant 114 : index
    %1430 = memref.load %arg8[%c114_216] : memref<144xf32, #tpu.memory_space<smem>>
    %1431 = vector.broadcast %1430 : f32 to vector<16x128xf32>
    %1432 = arith.mulf %1431, %934 : vector<16x128xf32>
    %1433 = arith.addf %1429, %1432 : vector<16x128xf32>
    %c115_217 = arith.constant 115 : index
    %1434 = memref.load %arg8[%c115_217] : memref<144xf32, #tpu.memory_space<smem>>
    %1435 = vector.broadcast %1434 : f32 to vector<16x128xf32>
    %1436 = arith.mulf %1435, %942 : vector<16x128xf32>
    %1437 = arith.addf %1433, %1436 : vector<16x128xf32>
    %c116_218 = arith.constant 116 : index
    %1438 = memref.load %arg8[%c116_218] : memref<144xf32, #tpu.memory_space<smem>>
    %1439 = vector.broadcast %1438 : f32 to vector<16x128xf32>
    %1440 = arith.mulf %1439, %951 : vector<16x128xf32>
    %1441 = arith.addf %1437, %1440 : vector<16x128xf32>
    %c117_219 = arith.constant 117 : index
    %1442 = memref.load %arg8[%c117_219] : memref<144xf32, #tpu.memory_space<smem>>
    %1443 = vector.broadcast %1442 : f32 to vector<16x128xf32>
    %1444 = arith.mulf %1443, %870 : vector<16x128xf32>
    %1445 = arith.addf %1441, %1444 : vector<16x128xf32>
    %c118_220 = arith.constant 118 : index
    %1446 = memref.load %arg8[%c118_220] : memref<144xf32, #tpu.memory_space<smem>>
    %1447 = vector.broadcast %1446 : f32 to vector<16x128xf32>
    %1448 = arith.mulf %1447, %878 : vector<16x128xf32>
    %1449 = arith.addf %1445, %1448 : vector<16x128xf32>
    %c119_221 = arith.constant 119 : index
    %1450 = memref.load %arg8[%c119_221] : memref<144xf32, #tpu.memory_space<smem>>
    %1451 = vector.broadcast %1450 : f32 to vector<16x128xf32>
    %1452 = arith.mulf %1451, %887 : vector<16x128xf32>
    %1453 = arith.addf %1449, %1452 : vector<16x128xf32>
    %c120_222 = arith.constant 120 : index
    %1454 = memref.load %arg8[%c120_222] : memref<144xf32, #tpu.memory_space<smem>>
    %1455 = vector.broadcast %1454 : f32 to vector<16x128xf32>
    %1456 = arith.mulf %1455, %896 : vector<16x128xf32>
    %1457 = arith.addf %1453, %1456 : vector<16x128xf32>
    %c121_223 = arith.constant 121 : index
    %1458 = memref.load %arg8[%c121_223] : memref<144xf32, #tpu.memory_space<smem>>
    %1459 = vector.broadcast %1458 : f32 to vector<16x128xf32>
    %1460 = arith.mulf %1459, %904 : vector<16x128xf32>
    %1461 = arith.addf %1457, %1460 : vector<16x128xf32>
    %c122_224 = arith.constant 122 : index
    %1462 = memref.load %arg8[%c122_224] : memref<144xf32, #tpu.memory_space<smem>>
    %1463 = vector.broadcast %1462 : f32 to vector<16x128xf32>
    %1464 = arith.mulf %1463, %913 : vector<16x128xf32>
    %1465 = arith.addf %1461, %1464 : vector<16x128xf32>
    %c123_225 = arith.constant 123 : index
    %1466 = memref.load %arg8[%c123_225] : memref<144xf32, #tpu.memory_space<smem>>
    %1467 = vector.broadcast %1466 : f32 to vector<16x128xf32>
    %1468 = arith.mulf %1467, %936 : vector<16x128xf32>
    %1469 = arith.addf %1465, %1468 : vector<16x128xf32>
    %c124_226 = arith.constant 124 : index
    %1470 = memref.load %arg8[%c124_226] : memref<144xf32, #tpu.memory_space<smem>>
    %1471 = vector.broadcast %1470 : f32 to vector<16x128xf32>
    %1472 = arith.mulf %1471, %944 : vector<16x128xf32>
    %1473 = arith.addf %1469, %1472 : vector<16x128xf32>
    %c125_227 = arith.constant 125 : index
    %1474 = memref.load %arg8[%c125_227] : memref<144xf32, #tpu.memory_space<smem>>
    %1475 = vector.broadcast %1474 : f32 to vector<16x128xf32>
    %1476 = arith.mulf %1475, %953 : vector<16x128xf32>
    %1477 = arith.addf %1473, %1476 : vector<16x128xf32>
    %c126_228 = arith.constant 126 : index
    %1478 = memref.load %arg8[%c126_228] : memref<144xf32, #tpu.memory_space<smem>>
    %1479 = vector.broadcast %1478 : f32 to vector<16x128xf32>
    %1480 = arith.mulf %1479, %872 : vector<16x128xf32>
    %1481 = arith.addf %1477, %1480 : vector<16x128xf32>
    %c127_229 = arith.constant 127 : index
    %1482 = memref.load %arg8[%c127_229] : memref<144xf32, #tpu.memory_space<smem>>
    %1483 = vector.broadcast %1482 : f32 to vector<16x128xf32>
    %1484 = arith.mulf %1483, %880 : vector<16x128xf32>
    %1485 = arith.addf %1481, %1484 : vector<16x128xf32>
    %c128_230 = arith.constant 128 : index
    %1486 = memref.load %arg8[%c128_230] : memref<144xf32, #tpu.memory_space<smem>>
    %1487 = vector.broadcast %1486 : f32 to vector<16x128xf32>
    %1488 = arith.mulf %1487, %889 : vector<16x128xf32>
    %1489 = arith.addf %1485, %1488 : vector<16x128xf32>
    %c129_231 = arith.constant 129 : index
    %1490 = memref.load %arg8[%c129_231] : memref<144xf32, #tpu.memory_space<smem>>
    %1491 = vector.broadcast %1490 : f32 to vector<16x128xf32>
    %1492 = arith.mulf %1491, %898 : vector<16x128xf32>
    %1493 = arith.addf %1489, %1492 : vector<16x128xf32>
    %c130_232 = arith.constant 130 : index
    %1494 = memref.load %arg8[%c130_232] : memref<144xf32, #tpu.memory_space<smem>>
    %1495 = vector.broadcast %1494 : f32 to vector<16x128xf32>
    %1496 = arith.mulf %1495, %906 : vector<16x128xf32>
    %1497 = arith.addf %1493, %1496 : vector<16x128xf32>
    %c131_233 = arith.constant 131 : index
    %1498 = memref.load %arg8[%c131_233] : memref<144xf32, #tpu.memory_space<smem>>
    %1499 = vector.broadcast %1498 : f32 to vector<16x128xf32>
    %1500 = arith.mulf %1499, %915 : vector<16x128xf32>
    %1501 = arith.addf %1497, %1500 : vector<16x128xf32>
    %c132_234 = arith.constant 132 : index
    %1502 = memref.load %arg8[%c132_234] : memref<144xf32, #tpu.memory_space<smem>>
    %1503 = vector.broadcast %1502 : f32 to vector<16x128xf32>
    %1504 = arith.mulf %1503, %938 : vector<16x128xf32>
    %1505 = arith.addf %1501, %1504 : vector<16x128xf32>
    %c133_235 = arith.constant 133 : index
    %1506 = memref.load %arg8[%c133_235] : memref<144xf32, #tpu.memory_space<smem>>
    %1507 = vector.broadcast %1506 : f32 to vector<16x128xf32>
    %1508 = arith.mulf %1507, %946 : vector<16x128xf32>
    %1509 = arith.addf %1505, %1508 : vector<16x128xf32>
    %c134_236 = arith.constant 134 : index
    %1510 = memref.load %arg8[%c134_236] : memref<144xf32, #tpu.memory_space<smem>>
    %1511 = vector.broadcast %1510 : f32 to vector<16x128xf32>
    %1512 = arith.mulf %1511, %955 : vector<16x128xf32>
    %1513 = arith.addf %1509, %1512 : vector<16x128xf32>
    %c135_237 = arith.constant 135 : index
    %1514 = memref.load %arg8[%c135_237] : memref<144xf32, #tpu.memory_space<smem>>
    %1515 = vector.broadcast %1514 : f32 to vector<16x128xf32>
    %1516 = arith.mulf %1515, %874 : vector<16x128xf32>
    %1517 = arith.addf %1513, %1516 : vector<16x128xf32>
    %c136_238 = arith.constant 136 : index
    %1518 = memref.load %arg8[%c136_238] : memref<144xf32, #tpu.memory_space<smem>>
    %1519 = vector.broadcast %1518 : f32 to vector<16x128xf32>
    %1520 = arith.mulf %1519, %882 : vector<16x128xf32>
    %1521 = arith.addf %1517, %1520 : vector<16x128xf32>
    %c137_239 = arith.constant 137 : index
    %1522 = memref.load %arg8[%c137_239] : memref<144xf32, #tpu.memory_space<smem>>
    %1523 = vector.broadcast %1522 : f32 to vector<16x128xf32>
    %1524 = arith.mulf %1523, %891 : vector<16x128xf32>
    %1525 = arith.addf %1521, %1524 : vector<16x128xf32>
    %c138_240 = arith.constant 138 : index
    %1526 = memref.load %arg8[%c138_240] : memref<144xf32, #tpu.memory_space<smem>>
    %1527 = vector.broadcast %1526 : f32 to vector<16x128xf32>
    %1528 = arith.mulf %1527, %900 : vector<16x128xf32>
    %1529 = arith.addf %1525, %1528 : vector<16x128xf32>
    %c139_241 = arith.constant 139 : index
    %1530 = memref.load %arg8[%c139_241] : memref<144xf32, #tpu.memory_space<smem>>
    %1531 = vector.broadcast %1530 : f32 to vector<16x128xf32>
    %1532 = arith.mulf %1531, %908 : vector<16x128xf32>
    %1533 = arith.addf %1529, %1532 : vector<16x128xf32>
    %c140_242 = arith.constant 140 : index
    %1534 = memref.load %arg8[%c140_242] : memref<144xf32, #tpu.memory_space<smem>>
    %1535 = vector.broadcast %1534 : f32 to vector<16x128xf32>
    %1536 = arith.mulf %1535, %917 : vector<16x128xf32>
    %1537 = arith.addf %1533, %1536 : vector<16x128xf32>
    %c141_243 = arith.constant 141 : index
    %1538 = memref.load %arg8[%c141_243] : memref<144xf32, #tpu.memory_space<smem>>
    %1539 = vector.broadcast %1538 : f32 to vector<16x128xf32>
    %1540 = arith.mulf %1539, %940 : vector<16x128xf32>
    %1541 = arith.addf %1537, %1540 : vector<16x128xf32>
    %c142_244 = arith.constant 142 : index
    %1542 = memref.load %arg8[%c142_244] : memref<144xf32, #tpu.memory_space<smem>>
    %1543 = vector.broadcast %1542 : f32 to vector<16x128xf32>
    %1544 = arith.mulf %1543, %948 : vector<16x128xf32>
    %1545 = arith.addf %1541, %1544 : vector<16x128xf32>
    %c143_245 = arith.constant 143 : index
    %1546 = memref.load %arg8[%c143_245] : memref<144xf32, #tpu.memory_space<smem>>
    %1547 = vector.broadcast %1546 : f32 to vector<16x128xf32>
    %1548 = arith.mulf %1547, %957 : vector<16x128xf32>
    %1549 = arith.addf %1545, %1548 : vector<16x128xf32>
    %1550 = vector.shape_cast %1105 : vector<16x128xf32> to vector<1x16x128xf32>
    %1551 = vector.shape_cast %1253 : vector<16x128xf32> to vector<1x16x128xf32>
    %1552 = vector.shape_cast %1401 : vector<16x128xf32> to vector<1x16x128xf32>
    %1553 = vector.shape_cast %1549 : vector<16x128xf32> to vector<1x16x128xf32>
    %1554 = tpu.concatenate %1550, %1551, %1552, %1553 in 0 : vector<1x16x128xf32>, vector<1x16x128xf32>, vector<1x16x128xf32>, vector<1x16x128xf32> -> vector<4x16x128xf32>
    %1555 = arith.addf %1554, %1 : vector<4x16x128xf32>
    %c0_246 = arith.constant 0 : index
    %c0_247 = arith.constant 0 : index
    %c0_248 = arith.constant 0 : index
    %c0_249 = arith.constant 0 : index
    %1556 = vector.load %arg10[%c0_246, %c0_247, %c0_248, %c0_249] : memref<1x4x16x128xf32, #tpu.memory_space<vmem>>, vector<1x4x16x128xf32>
    %1557 = vector.shape_cast %1556 : vector<1x4x16x128xf32> to vector<4x16x128xf32>
    %1558 = vector.shape_cast %1555 : vector<4x16x128xf32> to vector<1x4x16x128xf32>
    tpu.vector_store %arg10[%c0_246, %c0_247, %c0_248, %c0_249], %1558 {strides = array<i32>} : memref<1x4x16x128xf32, #tpu.memory_space<vmem>>, vector<1x4x16x128xf32>,
    return
  }
  func.func @transform_0(%arg0: i32) -> (i32, i32, i32, i32) {
    %c0_i32 = arith.constant 0 : i32
    %c0_i32_0 = arith.constant 0 : i32
    %c0_i32_1 = arith.constant 0 : i32
    %c0_i32_2 = arith.constant 0 : i32
    return %arg0, %c0_i32, %c0_i32_0, %c0_i32_1 : i32, i32, i32, i32
  }
  func.func @transform_1(%arg0: i32) -> (i32, i32) {
    %c0_i32 = arith.constant 0 : i32
    %c0_i32_0 = arith.constant 0 : i32
    %c0_i32_1 = arith.constant 0 : i32
    return %c0_i32, %c0_i32_0 : i32, i32
  }
  func.func @transform_2(%arg0: i32) -> (i32, i32) {
    %c0_i32 = arith.constant 0 : i32
    %c0_i32_0 = arith.constant 0 : i32
    %c0_i32_1 = arith.constant 0 : i32
    return %c0_i32, %c0_i32_0 : i32, i32
  }
  func.func @transform_3(%arg0: i32) -> i32 {
    %c0_i32 = arith.constant 0 : i32
    %c0_i32_0 = arith.constant 0 : i32
    return %c0_i32 : i32
  }
  func.func @transform_4(%arg0: i32) -> i32 {
    %c0_i32 = arith.constant 0 : i32
    %c0_i32_0 = arith.constant 0 : i32
    return %c0_i32 : i32
  }
  func.func @transform_5(%arg0: i32) -> (i32, i32) {
    %c0_i32 = arith.constant 0 : i32
    %c0_i32_0 = arith.constant 0 : i32
    %c0_i32_1 = arith.constant 0 : i32
    return %c0_i32, %c0_i32_0 : i32, i32
  }
  func.func @transform_6(%arg0: i32) -> (i32, i32) {
    %c0_i32 = arith.constant 0 : i32
    %c0_i32_0 = arith.constant 0 : i32
    %c0_i32_1 = arith.constant 0 : i32
    return %c0_i32, %c0_i32_0 : i32, i32
  }
  func.func @transform_7(%arg0: i32) -> i32 {
    %c0_i32 = arith.constant 0 : i32
    %c0_i32_0 = arith.constant 0 : i32
    return %c0_i32 : i32
  }
  func.func @transform_8(%arg0: i32) -> i32 {
    %c0_i32 = arith.constant 0 : i32
    %c0_i32_0 = arith.constant 0 : i32
    return %c0_i32 : i32
  }
  func.func @transform_9(%arg0: i32) -> (i32, i32, i32, i32) {
    %c0_i32 = arith.constant 0 : i32
    %c0_i32_0 = arith.constant 0 : i32
    %c0_i32_1 = arith.constant 0 : i32
    %c0_i32_2 = arith.constant 0 : i32
    return %arg0, %c0_i32, %c0_i32_0, %c0_i32_1 : i32, i32, i32, i32
  }
}

</mosaic_0001>

<bundles_post_ra>
// kernel: tpu_custom_call.1
= control target key start
LH: loop header
LB: loop body
LE: loop exit
PB: predicated region body
PF: predicated region fallthrough
CT: control target
= control target key end

     0   :  { %s8611_s0 = inlined_call_operand.hbm [shape: f32[2,4,16,128], index: 0, kind: input, shape index: {}]   ;;  %s8612_s1 = inlined_call_operand.vmem [shape: f32[16,1], index: 1, kind: input, shape index: {}]   ;;  %s8613_s2 = inlined_call_operand.vmem [shape: f32[16,1], index: 2, kind: input, shape index: {}]   ;;  %s8614_s3 = inlined_call_operand.vmem [shape: f32[144], index: 3, kind: input, shape index: {}]   ;;  %s8615_s4 = inlined_call_operand.vmem [shape: f32[4], index: 4, kind: input, shape index: {}]   ;;  %s8616_s5 = inlined_call_operand.vmem [shape: f32[16,1], index: 5, kind: input, shape index: {}]   ;;  %s8617_s6 = inlined_call_operand.vmem [shape: f32[16,1], index: 6, kind: input, shape index: {}]   ;;  %s8618_s7 = inlined_call_operand.vmem [shape: f32[144], index: 7, kind: input, shape index: {}]   ;;  %s8619_s8 = inlined_call_operand.vmem [shape: f32[4], index: 8, kind: input, shape index: {}]   ;;  %s8620_s9 = inlined_call_operand.hbm [shape: f32[2,4,16,128], index: 9, kind: output, shape index: {}]  }
   0x1   :  { %9176 = sst [smem:[#allocation219_spill]] %s8611_s0 }
   0x2   :  { %9177 = sst [smem:[#allocation220_spill]] %s8612_s1 }
   0x3   :  { %9178 = sst [smem:[#allocation221_spill]] %s8613_s2 }
   0x4   :  { %9179 = sst [smem:[#allocation222_spill]] %s8614_s3 }
   0x5   :  { %9180 = sst [smem:[#allocation223_spill]] %s8615_s4 }
   0x6   :  { %9181 = sst [smem:[#allocation224_spill]] %s8616_s5 }
   0x7   :  { %9182 = sst [smem:[#allocation225_spill]] %s8617_s6 }
   0x8   :  { %9183 = sst [smem:[#allocation226_spill]] %s8618_s7 }
   0x9   :  { %9184 = sst [smem:[#allocation227_spill]] %s8619_s8 }
   0xa   :  { %9185 = sst [smem:[#allocation228_spill]] %s8620_s9 }
   0xb   :  { %14 = vsyncpa [#allocation3], 0 }
   0xc   :  { %16 = vsyncpa [#allocation3 + $0x1], 0 }
   0xd   :  { %17 = vsyncpa [#allocation5], 0 }
   0xe   :  { %18 = vsyncpa [#allocation8], 0 }
   0xf   :  { %19 = vsyncpa [#allocation11], 0 }
  0x10   :  { %20 = vsyncpa [#allocation4], 0 }
  0x11   :  { %22 = vsyncpa [#allocation4 + $0x1], 0  ;;  %s4100_s30 = smov 0   ;;  %s4102_s10 = smov 0  }
  0x12   :  { %s4104_s11 = smov 0   ;;  %s4106_s12 = smov 0  }
  0x13 LB: > { %9186 = sst [smem:[#allocation18_spill]] %s4022_s30  ;;  %s4121_s13 = sadd.s32 4294967295, %s4034_s12   ;;  %s4034_s12 = sphi %s4106_s12, %s10755_s12   ;;  %s4030_s11 = sphi %s4104_s11, %s10758_s11   ;;  %s4026_s10 = sphi %s4102_s10, %s10757_s10   ;;  %s4022_s30 = sphi %s4100_s30, %s10756_s30  }
  0x14   : > { %9187 = sst [smem:[#allocation19_spill]] %s4026_s10  ;;  %s3365_s14 = sadd.s32 4294967294, %s4034_s12  }
  0x15   : > { %9188 = sst [smem:[#allocation20_spill]] %s4030_s11  ;;  %p48_p0 = scmp.ne.s32.totalorder %s4026_s10, %s4022_s30 }
  0x16   : > { %9189 = sst [smem:[#allocation21_spill]] %s4034_s12  ;;  %p8621_p1 = scmp.eq.s32.totalorder %s4121_s13, 0 }
  0x17   : > { %9190 = sst [smem:[#allocation22_spill]] %s4121_s13  ;;  %p246_p3 = scmp.eq.s32.totalorder %s3365_s14, 1 }
  0x18   : > { %p4130_p4 = por %p8621_p1, %p48_p0  ;;  %p3366_p5 = scmp.ge.s32.totalorder %s4034_s12, 1 }
  0x19   : > { %p4135_p6 = por %p246_p3, %p48_p0  ;;  %p253_p7 = scmp.lt.s32.totalorder %s4034_s12, 3 }
  0x1a   : > { %s9191_s15 = scalar_select %p4130_p4, 1, 0 }
  0x1b   : > { %s9192_s16 = scalar_select %p4135_p6, 1, 0 }
  0x1c   : > { %s9194_s4 = sld [smem:[#allocation223_spill]]  ;;  %p4143_p8 = pnand %p3366_p5, %p253_p7 }
  0x1d   : > { %9193 = sst [smem:[#allocation23_spill]] %s9192_s16  ;;  %s9196_s3 = sld [smem:[#allocation222_spill]] }
  0x1e   : > { %s9195_s20 = scalar_select %p4143_p8, 1, 0 }
  0x1f   : > { %p3701_p10 = pneg %p4143_p8  ;;  %s9198_s7 = sld [smem:[#allocation226_spill]] }
  0x20   : > { %s9199_s8 = sld [smem:[#allocation227_spill]] }
  0x21   : > { %p4155_p11 = pnand %p3701_p10, %p8621_p1 }
  0x22   : > { %s283_s19 = sshll.u32 %s9194_s4, 4  ;;  %s284_s19 = int_to_ptr.vmem [resolvable:$true] %s283_s19 }
  0x23   : > { %s272_s23 = sshll.u32 %s9196_s3, 4  ;;  %s3866_s17 = scalar_lea.vmem %s284_s19, 16  ;;  %s273_s23 = int_to_ptr.vmem [resolvable:$true] %s272_s23 }
  0x24   : > { %p3867_p12 = scmp.ne.s32.totalorder %s284_s19, %s3866_s17  ;;  %p3868_p13 = pneg %p4155_p11 }
  0x25   : > { %s300_s27 = sshll.u32 %s9198_s7, 4  ;;  %p3874_p5 = scmp.lt.s32.totalorder %s284_s19, %s284_s19  ;;  %s4162_s27 = int_to_ptr.vmem [resolvable:$true] %s300_s27 }
  0x26   : > { %s311_s14 = sshll.u32 %s9199_s8, 4  ;;  %p3869_p0 = pnand %p3868_p13, %p3867_p12  ;;  %s312_s14 = int_to_ptr.vmem [resolvable:$true] %s311_s14 }
  0x27   : > { %p3875_p7 = scmp.lt.s32.totalorder %s3866_s17, %s3866_s17 }
  0x28   : > { %p3870_p3 = pneg %p3869_p0 }
  0x29   : > { %p3876_p10 = por %p3875_p7, %p3874_p5 }
  0x2b   : > { %p3877_p9 = pnand %p3876_p10, %p3870_p3 }
  0x2d   : > { %3880 = shalt.err (!%p3877_p9)
}
  0x2e   : > { %s4036_s18 = smov [#allocation7]   ;;  %s3881_s21 = scalar_lea.vmem %s273_s23, 32 }
  0x2f   : > { %3707 = dma.vmem_to_smem (!%p4155_p11), %s284_s19, 16, %s4036_s18, [#allocation8]  }
  0x30   : > { %p3882_p1 = scmp.ne.s32.totalorder %s273_s23, %s3881_s21  ;;  %p3889_p4 = scmp.lt.s32.totalorder %s273_s23, %s273_s23 }
  0x31   : > { %p3890_p8 = scmp.lt.s32.totalorder %s3881_s21, %s3881_s21 }
  0x32   : > { %p3884_p2 = pnand %p3882_p1, %p3868_p13 }
  0x33   : > { %p3891_p12 = por %p3890_p8, %p3889_p4 }
  0x34   : > { %p3885_p6 = pneg %p3884_p2 }
  0x36   : > { %p3892_p0 = pnand %p3891_p12, %p3885_p6 }
  0x38   : > { %3895 = shalt.err (!%p3892_p0)
}
  0x39   : > { %s4037_s22 = smov [#allocation6]   ;;  %s3896_s19 = scalar_lea.vmem %s4162_s27, 32 }
  0x3a   : > { %3704 = dma.vmem_to_smem (!%p4155_p11), %s273_s23, 32, %s4037_s22, [#allocation5]  }
  0x3b   : > { %p3897_p9 = scmp.ne.s32.totalorder %s4162_s27, %s3896_s19  ;;  %p3904_p2 = scmp.lt.s32.totalorder %s4162_s27, %s4162_s27 }
  0x3c   : > { %p3905_p5 = scmp.lt.s32.totalorder %s3896_s19, %s3896_s19 }
  0x3d   : > { %p3899_p3 = pnand %p3897_p9, %p3868_p13 }
  0x3e   : > { %p3906_p4 = por %p3905_p5, %p3904_p2 }
  0x3f   : > { %p3900_p1 = pneg %p3899_p3 }
  0x41   : > { %p3907_p6 = pnand %p3906_p4, %p3900_p1 }
  0x43   : > { %3910 = shalt.err (!%p3907_p6)
}
  0x44   : > { %s4038_s25 = smov [#allocation9]   ;;  %s3911_s28 = scalar_lea.vmem %s312_s14, 16 }
  0x45   : > { %3710 = dma.vmem_to_smem (!%p4155_p11), %s4162_s27, 32, %s4038_s25, [#allocation8]  }
  0x46   : > { %p3912_p8 = scmp.ne.s32.totalorder %s312_s14, %s3911_s28  ;;  %p3919_p12 = scmp.lt.s32.totalorder %s312_s14, %s312_s14 }
  0x47   : > { %p3920_p0 = scmp.lt.s32.totalorder %s3911_s28, %s3911_s28 }
  0x48   : > { %p3914_p7 = pnand %p3912_p8, %p3868_p13 }
  0x49   : > { %p3921_p9 = por %p3920_p0, %p3919_p12 }
  0x4a   : > { %p3915_p10 = pneg %p3914_p7 }
  0x4c   : > { %p3922_p3 = pnand %p3921_p9, %p3915_p10 }
  0x4e   : > { %3925 = shalt.err (!%p3922_p3)
}
  0x4f   : > { %s4039_s29 = smov [#allocation10]   ;;  %s4199_s27 = sadd.s32 1, %s4034_s12  }
  0x50   : > { %3713 = dma.vmem_to_smem (!%p4155_p11), %s312_s14, 16, %s4039_s29, [#allocation11]  }
  0x51   : > { %9200 = sst [smem:[#allocation24_spill]] %s4199_s27  ;;  %s32_s17 = ssub.s32 %s4034_s12, %s4199_s27 }
  0x52   : > { %p33_p13 = scmp.eq.s32.totalorder %s32_s17, 0  ;;  %s35_s18 = sadd.s32 1, %s4030_s11 }
  0x53   : > { %p42_p1 = scmp.ne.s32.totalorder %s4030_s11, %s4026_s10  ;;  %p43_p2 = scmp.eq.s32.totalorder %s4034_s12, 0 }
  0x54   : > { %s4208_s24 = scalar_select %p33_p13, %s4030_s11, %s35_s18  }
  0x55   : > { %p44_p5 = por %p43_p2, %p42_p1  ;;  %p9202_p4 = scmp.eq.s32.totalorder %s4121_s13, 1 }
  0x56   : > { %9201 = sst [smem:[#allocation25_spill]] %s4208_s24  ;;  %p3726_p8 = scmp.lt.s32.totalorder %s4034_s12, 2 }
  0x57   : > { %p4212_p6 = por %p9202_p4, %p42_p1  ;;  %s322_s22 = sand.u32 1, %s4030_s11  }
  0x58   : > { %s3372_s19 = sshll.u32 %s322_s22, 6  ;;  %s3679_s14 = sshll.u32 %s4034_s12, 10 }
  0x59   : > { %s9203_s21 = scalar_select %p4212_p6, 1, 0 }
  0x5a   : > { %s9205_s0 = sld [smem:[#allocation219_spill]]  ;;  %s326_s28 = scalar_lea.vmem [#allocation2], %s3372_s19 }
  0x5b   : > { %9204 = sst [smem:[#allocation26_spill]] %s9203_s21  ;;  %s333_s29 = sshll.u32 %s326_s28, 4  ;;  %s4224_s29 = int_to_ptr.vmem [resolvable:$true] %s333_s29 }
  0x5c   : > { %p4226_p11 = pnand %p3726_p8, %p44_p5  ;;  %s4230_s18 = scalar_lea.sflag [#allocation3], %s322_s22 }
  0x5e   : > { %p3928_p10 = pneg %p4226_p11 }
  0x60   : > { %s4222_s23 = scalar_lea.hbm %s9205_s0, %s3679_s14  ;;  %s3931_s25 = scalar_lea.hbm %s9205_s0, 2048 }
  0x61   : > { %s3926_s3 = scalar_lea.hbm %s4222_s23, 1024  ;;  %p3932_p9 = scmp.lt.u32.totalorder %s4222_s23, %s9205_s0 }
  0x62   : > { %p3927_p7 = scmp.ne.s32.totalorder %s4222_s23, %s3926_s3  ;;  %p3933_p3 = scmp.lt.u32.totalorder %s3931_s25, %s3926_s3 }
  0x63   : > { %p3935_p1 = scmp.lt.u32.totalorder %s3926_s3, %s4222_s23 }
  0x64   : > { %p3929_p12 = pnand %p3928_p10, %p3927_p7  ;;  %p3934_p13 = por %p3933_p3, %p3932_p9 }
  0x66   : > { %p3930_p0 = pneg %p3929_p12  ;;  %p3936_p2 = por %p3935_p1, %p3934_p13 }
  0x68   : > { %p3937_p5 = pnand %p3936_p2, %p3930_p0 }
  0x6a   : > { %3940 = shalt.err (!%p3937_p5)
}
  0x6b   : > { %s3941_s22 = scalar_lea.vmem %s4224_s29, 1024  ;;  %s4040_s19 = smov [#allocation2]  }
  0x6c   : > { %p3942_p4 = scmp.ne.s32.totalorder %s4224_s29, %s3941_s22  ;;  %s3946_s14 = sshll.u32 %s4040_s19, 4  ;;  %s3947_s14 = int_to_ptr.vmem [resolvable:$false] %s3946_s14 }
  0x6d   : > { %s3948_s26 = scalar_lea.vmem %s3947_s14, 2048  ;;  %p3949_p12 = scmp.lt.s32.totalorder %s4224_s29, %s3947_s14 }
  0x6e   : > { %p3944_p8 = pnand %p3942_p4, %p3928_p10  ;;  %p3950_p9 = scmp.lt.s32.totalorder %s3948_s26, %s3941_s22 }
  0x70   : > { %p3945_p7 = pneg %p3944_p8  ;;  %p3951_p3 = por %p3950_p9, %p3949_p12 }
  0x72   : > { %p3952_p13 = pnand %p3951_p3, %p3945_p7 }
  0x74   : > { %3955 = shalt.err (!%p3952_p13)
}
  0x75   : > { %s4041_s3 = smov 128   ;;  %s4042_s25 = smov 8  }
  0x76   : > { %3717 = dma.hbm_to_vmem [thread:$0]  (!%p4226_p11), %s4222_s23, 1024, %s4224_s29, %s4230_s18, %s4041_s3, %s4041_s3, %s4042_s25  }
  0x77   : > { %p9207_p10 = scmp.ne.s32.totalorder %s9195_s20, 0 }
  0x79   : > { %345 = sbr.rel (%p9207_p10) target bundleno = 1037 (0x40d), region = 56 }
  0x80   : > { %s4261_s28 = sand.u32 1, %s4026_s10   ;;  %p9210_p0 = scmp.ne.s32.totalorder %s9191_s15, 0 }
  0x81   : > { %9208 = sst [smem:[#allocation27_spill]] %s4261_s28  ;;  %s8624_s22 = sshll.u32 %s4261_s28, 6 }
  0x82   : > { %s348_s19 = scalar_lea.sflag [#allocation3], %s4261_s28  ;;  %s4267_s14 = scalar_lea.vmem [#allocation2], %s8624_s22 }
  0x83   : > { %9209 = sst [smem:[#allocation28_spill]] %s4267_s14 }
  0x84   : > { %4001 = dma.done.wait (%p9210_p0), %s348_s19, 1024  }
  0x85   : > { %4003 = vsyncadd (%p9210_p0), %s348_s19, 4294966272  ;;  %p9211_p11 = scmp.eq.s32.totalorder %s4121_s13, 0 }
  0x87   : > { %4005 = dma.done.wait (%p9211_p11), [#allocation5], 32   ;;  %p9212_p1 = pmov %p9211_p11 }
  0x89   : > { %4007 = vsyncadd (%p9212_p1), [#allocation5], 4294967264  ;;  %p9213_p2 = pmov %p9212_p1 }
  0x8a   : > { %p9214_p5 = pmov %p9212_p1 }
  0x8b   : > { %4009 = dma.done.wait (%p9213_p2), [#allocation8], 48  }
  0x8c   : > { %4011 = vsyncadd (%p9214_p5), [#allocation8], 4294967248  ;;  %p9215_p4 = pmov %p9212_p1 }
  0x8d   : > { %p9216_p8 = pmov %p9212_p1 }
  0x8e   : > { %4013 = dma.done.wait (%p9215_p4), [#allocation11], 16  }
  0x8f   : > { %4015 = vsyncadd (%p9216_p8), [#allocation11], 4294967280 }
  0x90   : > { %372 = sfence }
  0x91   : > { %s9217_s2 = sld [smem:[#allocation221_spill]]  ;;  %s9218_s1 = sld [smem:[#allocation220_spill]]  ;;  %v4043_v2 = vmov 0   ;;  %v4298_v5 = vld [vmem:[%s4267_s14] sm:$0xff]  ;;  %v4301_v6 = vld [vmem:[%s4267_s14 + $0x8] sm:$0xff]  ;;  %v4304_v7 = vld [vmem:[%s4267_s14 + $0x10] sm:$0xff] }
  0x92   : > { %3777 = vset.pattern.permute.xlu1 %v4043_v2  ;;  %3776 = vset.pattern.permute.xlu0 %v4043_v2  ;;  %v4307_v8 = vld [vmem:[%s4267_s14 + $0x18] sm:$0xff]  ;;  %v418_v9 = vadd.f32 %v4301_v6, %v4298_v5  ;;  %v446_v10 = vmul.f32 %v4298_v5, %v4298_v5  ;;  %v447_v11 = vmul.f32 %v4301_v6, %v4301_v6  ;;  %v4322_v15 = vld [vmem:[%s4267_s14 + $0x20] sm:$0xff]  ;;  %v4325_v16 = vld [vmem:[%s4267_s14 + $0x28] sm:$0xff]  ;;  %s8625_s25 = smov 1   ;;  %s8627_s19 = smov 127  }
  0x93   : > { %v425_v12 = vadd.f32 %v4307_v8, %v4304_v7  ;;  %v448_v13 = vmul.f32 %v4304_v7, %v4304_v7  ;;  %v449_v14 = vmul.f32 %v4307_v8, %v4307_v8  ;;  %v432_v21 = vadd.f32 %v4325_v16, %v4322_v15  ;;  %v4334_v52 = vld [vmem:[%s4267_s14 + $0x30] sm:$0xff]  ;;  %v4337_v53 = vld [vmem:[%s4267_s14 + $0x38] sm:$0xff]  ;;  %s4630_s15 = sld [smem:[#allocation6 + $0x4]]  ;;  %s4638_s20 = sld [smem:[#allocation6 + $0x28]] }
  0x94   : > { %v419_v17 = vrot.slane %v418_v9, 4  ;;  %v454_v18 = vadd.f32 %v447_v11, %v446_v10  ;;  %v450_v23 = vmul.f32 %v4322_v15, %v4322_v15  ;;  %v451_v24 = vmul.f32 %v4325_v16, %v4325_v16  ;;  %s4640_s23 = sld [smem:[#allocation6 + $0x4c]]  ;;  %s4649_s29 = sld [smem:[#allocation6 + $0x1]] }
  0x95   : > { %v426_v19 = vrot.slane %v425_v12, 4  ;;  %v461_v20 = vadd.f32 %v449_v14, %v448_v13  ;;  %v433_v29 = vrot.slane %v432_v21, 4  ;;  %v439_v60 = vadd.f32 %v4337_v53, %v4334_v52  ;;  %s4651_s17 = sld [smem:[#allocation6 + $0x25]]  ;;  %s4653_s18 = sld [smem:[#allocation6 + $0x49]] }
  0x96   : > { %v420_v22 = vadd.f32 %v419_v17, %v418_v9  ;;  %v455_v25 = vrot.slane %v454_v18, 4  ;;  %v468_v31 = vadd.f32 %v451_v24, %v450_v23  ;;  %v452_v61 = vmul.f32 %v4334_v52, %v4334_v52  ;;  %s4655_s26 = sld [smem:[#allocation6 + $0x6d]]  ;;  %s4662_s3 = sld [smem:[#allocation6 + $0x70]] }
  0x97   : > { %v416_v0 = vld [vmem:[%s9217_s2] sm:$0xff]  ;;  %v417_v3 = vld [vmem:[%s9217_s2 + $0x8] sm:$0xff]  ;;  %v427_v26 = vadd.f32 %v426_v19, %v425_v12  ;;  %v462_v27 = vrot.slane %v461_v20, 4  ;;  %v434_v35 = vadd.f32 %v433_v29, %v432_v21  ;;  %v453_v62 = vmul.f32 %v4337_v53, %v4337_v53  ;;  %s4664_s22 = sld [smem:[#allocation6 + $0xd]]  ;;  %s4677_s2 = sld [smem:[#allocation6 + $0x79]] }
  0x98   : > { %v414_v1 = vld [vmem:[%s9218_s1] sm:$0xff]  ;;  %542 = vperm.xlu1 %3777, %v416_v0   ;;  %v415_v4 = vld [vmem:[%s9218_s1 + $0x8] sm:$0xff]  ;;  %v421_v28 = vrot.slane %v420_v22, 2  ;;  %v456_v30 = vadd.f32 %v455_v25, %v454_v18  ;;  %v469_v37 = vrot.slane %v468_v31, 4  ;;  %v440_v9 = vrot.slane %v439_v60, 4  ;;  %s4671_s0 = sld [smem:[#allocation6 + $0x55]] }
  0x99   : > { %524 = vperm.xlu0 %3776, %v414_v1   ;;  %v428_v32 = vrot.slane %v427_v26, 2  ;;  %v463_v33 = vadd.f32 %v462_v27, %v461_v20  ;;  %v435_v41 = vrot.slane %v434_v35, 2  ;;  %v475_v10 = vadd.f32 %v453_v62, %v452_v61  ;;  %9223 = sst [smem:[#allocation33_spill]] %s4630_s15  ;;  %s4675_s1 = sld [smem:[#allocation6 + $0x7]] }
  0x9a   : > { %v422_v34 = vadd.f32 %v421_v28, %v420_v22  ;;  %v457_v36 = vrot.slane %v456_v30, 2  ;;  %v470_v43 = vadd.f32 %v469_v37, %v468_v31  ;;  %v441_v17 = vadd.f32 %v440_v9, %v439_v60  ;;  %9224 = sst [smem:[#allocation34_spill]] %s4638_s20  ;;  %s4680_s4 = sld [smem:[#allocation6 + $0x2b]] }
  0x9b   : > { %v429_v38 = vadd.f32 %v428_v32, %v427_v26  ;;  %v464_v39 = vrot.slane %v463_v33, 2  ;;  %v436_v47 = vadd.f32 %v435_v41, %v434_v35  ;;  %v476_v18 = vrot.slane %v475_v10, 4  ;;  %9225 = sst [smem:[#allocation35_spill]] %s4640_s23  ;;  %s4682_s7 = sld [smem:[#allocation6 + $0x4f]] }
  0x9c   : > { %547 = vperm.xlu1 %3777, %v417_v3   ;;  %v423_v40 = vrot.slane %v422_v34, 1  ;;  %v458_v42 = vadd.f32 %v457_v36, %v456_v30  ;;  %v471_v49 = vrot.slane %v470_v43, 2  ;;  %v442_v23 = vrot.slane %v441_v17, 2  ;;  %9226 = sst [smem:[#allocation36_spill]] %s4649_s29  ;;  %s4684_s8 = sld [smem:[#allocation6 + $0x73]] }
  0x9d   : > { %529 = vperm.xlu0 %3776, %v415_v4   ;;  %v430_v44 = vrot.slane %v429_v38, 1  ;;  %v465_v45 = vadd.f32 %v464_v39, %v463_v33  ;;  %v437_v54 = vrot.slane %v436_v47, 1  ;;  %v477_v24 = vadd.f32 %v476_v18, %v475_v10  ;;  %9227 = sst [smem:[#allocation37_spill]] %s4651_s17  ;;  %s4686_s24 = sld [smem:[#allocation6 + $0xa]] }
  0x9e   : > { %v424_v46 = vadd.f32 %v423_v40, %v422_v34  ;;  %v459_v48 = vrot.slane %v458_v42, 1  ;;  %v472_v56 = vadd.f32 %v471_v49, %v470_v43  ;;  %v443_v26 = vadd.f32 %v442_v23, %v441_v17  ;;  %9228 = sst [smem:[#allocation38_spill]] %s4653_s18  ;;  %s4694_s11 = sld [smem:[#allocation6 + $0x2e]] }
  0x9f   : > { %v431_v50 = vadd.f32 %v430_v44, %v429_v38  ;;  %v466_v51 = vrot.slane %v465_v45, 1  ;;  %v438_v63 = vadd.f32 %v437_v54, %v436_v47  ;;  %v478_v27 = vrot.slane %v477_v24, 2  ;;  %9229 = sst [smem:[#allocation39_spill]] %s4655_s26  ;;  %s4696_s10 = sld [smem:[#allocation6 + $0x52]] }
  0xa0   : > { %v460_v55 = vadd.f32 %v459_v48, %v458_v42  ;;  %v4339_v57 = vmul.f32 0.0625, %v424_v46  ;;  %v473_v0 = vrot.slane %v472_v56, 1  ;;  %v444_v29 = vrot.slane %v443_v26, 1  ;;  %9230 = sst [smem:[#allocation40_spill]] %s4662_s3  ;;  %s4701_s27 = sld [smem:[#allocation6 + $0x76]] }
  0xa1   : > { %v467_v58 = vadd.f32 %v466_v51, %v465_v45  ;;  %v4341_v59 = vmul.f32 0.0625, %v431_v50  ;;  %v484_v12 = vmul.f32 0.0625, %v438_v63  ;;  %v479_v30 = vadd.f32 %v478_v27, %v477_v24  ;;  %9231 = sst [smem:[#allocation41_spill]] %s4664_s22  ;;  %s4703_s12 = sld [smem:[#allocation6 + $0x16]] }
  0xa2   : > { %v486_v1 = vmul.f32 0.0625, %v460_v55  ;;  %v490_v2 = vmul.f32 %v4339_v57, %v4339_v57  ;;  %v474_v11 = vadd.f32 %v473_v0, %v472_v56  ;;  %v506_v32 = vsub.f32 %v4298_v5, %v4339_v57  ;;  %9233 = sst [smem:[#allocation43_spill]] %s4671_s0  ;;  %s4705_s16 = sld [smem:[#allocation6 + $0x10]] }
  0xa3   : > { %v487_v3 = vmul.f32 0.0625, %v467_v58  ;;  %v491_v4 = vmul.f32 %v4341_v59, %v4341_v59  ;;  %v492_v20 = vmul.f32 %v484_v12, %v484_v12  ;;  %v508_v33 = vsub.f32 %v4304_v7, %v4341_v59  ;;  %9234 = sst [smem:[#allocation44_spill]] %s4675_s1  ;;  %s4707_s30 = sld [smem:[#allocation6 + $0x34]] }
  0xa4   : > { %v494_v13 = vsub.f32 %v486_v1, %v490_v2  ;;  %v488_v19 = vmul.f32 0.0625, %v474_v11  ;;  %v445_v35 = vadd.f32 %v444_v29, %v443_v26  ;;  %v480_v36 = vrot.slane %v479_v30, 1  ;;  %9235 = sst [smem:[#allocation45_spill]] %s4677_s2  ;;  %s4710_s9 = sld [smem:[#allocation6 + $0x58]] }
  0xa5   : > { %v495_v14 = vsub.f32 %v487_v3, %v491_v4  ;;  %v510_v42 = vsub.f32 %v4322_v15, %v484_v12  ;;  %v507_v47 = vsub.f32 %v4301_v6, %v4339_v57  ;;  %v509_v15 = vsub.f32 %v4307_v8, %v4341_v59  ;;  %9236 = sst [smem:[#allocation46_spill]] %s4680_s4  ;;  %s4712_s21 = sld [smem:[#allocation6 + $0x7c]] }
  0xa6   : > { %v498_v21 = vadd.f32 1e-05, %v494_v13  ;;  %v496_v25 = vsub.f32 %v488_v19, %v492_v20  ;;  %v481_v39 = vadd.f32 %v480_v36, %v479_v30  ;;  %v4357_v40 = vmul.f32 0.0625, %v445_v35  ;;  %9237 = sst [smem:[#allocation47_spill]] %s4682_s7  ;;  %s9249_s13 = smov 127  }
  0xa7   : > { %v499_v22 = vadd.f32 1e-05, %v495_v14  ;;  %v511_v51 = vsub.f32 %v4325_v16, %v484_v12  ;;  %9238 = sst [smem:[#allocation48_spill]] %s4684_s8  ;;  %s4719_s28 = sld [smem:[#allocation6 + $0x13]] }
  0xa8   : > { %3778 = vrsqrt.f32 %v498_v21  ;;  %v500_v28 = vadd.f32 1e-05, %v496_v25  ;;  %v489_v7 = vmul.f32 0.0625, %v481_v39  ;;  %v493_v46 = vmul.f32 %v4357_v40, %v4357_v40  ;;  %9239 = sst [smem:[#allocation49_spill]] %s4686_s24  ;;  %s4721_s14 = sld [smem:[#allocation6 + $0x37]] }
  0xa9   : > { %3780 = vrsqrt.f32 %v499_v22  ;;  %v513_v24 = vsub.f32 %v4337_v53, %v4357_v40  ;;  %9241 = sst [smem:[#allocation50_spill]] %s4694_s11  ;;  %s4725_s6 = sld [smem:[#allocation6 + $0x5b]] }
  0xaa   : > { %3782 = vrsqrt.f32 %v500_v28  ;;  %v497_v54 = vsub.f32 %v489_v7, %v493_v46  ;;  %9242 = sst [smem:[#allocation51_spill]] %s4696_s10  ;;  %s4727_s5 = sld [smem:[#allocation6 + $0x7f]] }
  0xab   : > { %9243 = sst [smem:[#allocation52_spill]] %s4701_s27 }
  0xac   : > { %v501_v63 = vadd.f32 1e-05, %v497_v54  ;;  %9244 = sst [smem:[#allocation53_spill]] %s4703_s12  ;;  %s4912_s12 = sld [smem:[#allocation7]] }
  0xad   : > { %9245 = sst [smem:[#allocation54_spill]] %s4705_s16 }
  0xae   : > { %3784 = vrsqrt.f32 %v501_v63  ;;  %9246 = sst [smem:[#allocation55_spill]] %s4707_s30  ;;  %s4905_s30 = sld [smem:[#allocation6 + $0x50]] }
  0xaf   : > { %9247 = sst [smem:[#allocation56_spill]] %s4710_s9  ;;  %s4732_s9 = sld [smem:[#allocation6 + $0x5e]] }
  0xb0   : > { %9248 = sst [smem:[#allocation57_spill]] %s4712_s21  ;;  %s4730_s21 = sld [smem:[#allocation6 + $0x3a]] }
  0xb1   : > { %9250 = sst [smem:[#allocation58_spill]] %s4719_s28  ;;  %s4740_s28 = sld [smem:[#allocation6 + $0x1f]] }
  0xb2   : > { %v3779_v31 = vpop.eup %3778  ;;  %9251 = sst [smem:[#allocation59_spill]] %s4721_s14  ;;  %s4738_s14 = sld [smem:[#allocation6 + $0x82]] }
  0xb3   : > { %v3781_v34 = vpop.eup %3780  ;;  %v514_v37 = vmul.f32 %v3779_v31, %v506_v32  ;;  %v515_v6 = vmul.f32 %v3779_v31, %v507_v47  ;;  %v512_v31 = vsub.f32 %v4334_v52, %v4357_v40  ;;  %9252 = sst [smem:[#allocation60_spill]] %s4725_s6  ;;  %s4744_s6 = sld [smem:[#allocation6 + $0x43]] }
  0xb4   : > { %v516_v38 = vmul.f32 %v3781_v34, %v508_v33  ;;  %v3783_v43 = vpop.eup %3782  ;;  %v517_v58 = vmul.f32 %v3781_v34, %v509_v15  ;;  %9253 = sst [smem:[#allocation61_spill]] %s4727_s5 }
  0xb5   : > { %v518_v50 = vmul.f32 %v3783_v43, %v510_v42  ;;  %v519_v62 = vmul.f32 %v3783_v43, %v511_v51  ;;  %9255 = sst [smem:[#allocation63_spill]] %s4732_s9  ;;  %s4746_s5 = sld [smem:[#allocation6 + $0x67]] }
  0xb6   : > { %9254 = sst [smem:[#allocation62_spill]] %s4730_s21  ;;  %s4760_s9 = sld [smem:[#allocation6 + $0x3d]] }
  0xb7   : > { %9257 = sst [smem:[#allocation65_spill]] %s4740_s28  ;;  %s5172_s21 = sld [smem:[#allocation6 + $0xf]] }
  0xb8   : > { %v3785_v27 = vpop.eup %3784  ;;  %9256 = sst [smem:[#allocation64_spill]] %s4738_s14  ;;  %s4756_s14 = sld [smem:[#allocation6 + $0x19]] }
  0xb9   : > { %v521_v39 = vmul.f32 %v3785_v27, %v513_v24  ;;  %v520_v7 = vmul.f32 %v3785_v27, %v512_v31  ;;  %9258 = sst [smem:[#allocation66_spill]] %s4744_s6  ;;  %s4758_s28 = sld [smem:[#allocation6 + $0x8b]] }
  0xba   : > { %s4762_s6 = sld [smem:[#allocation6 + $0x61]]  ;;  %9308 = sst [smem:[#allocation99_spill]] %s4905_s30 }
  0xbb   : > { %9259 = sst [smem:[#allocation67_spill]] %s4746_s5  ;;  %s4924_s30 = sld [smem:[#allocation7 + $0x1]] }
  0xbc   : > { %9262 = sst [smem:[#allocation70_spill]] %s4760_s9  ;;  %s4766_s5 = sld [smem:[#allocation6 + $0x85]] }
  0xbd   : > { %s4774_s9 = sld [smem:[#allocation6 + $0x1c]]  ;;  %9310 = sst [smem:[#allocation101_spill]] %s4912_s12 }
  0xbe   : > { %9260 = sst [smem:[#allocation68_spill]] %s4756_s14  ;;  %s4784_s14 = sld [smem:[#allocation6 + $0x88]] }
  0xbf   : > { %9261 = sst [smem:[#allocation69_spill]] %s4758_s28  ;;  %s4937_s28 = sld [smem:[#allocation7 + $0x2]] }
  0xc0   : > { %9263 = sst [smem:[#allocation71_spill]] %s4762_s6  ;;  %s4776_s6 = sld [smem:[#allocation6 + $0x40]] }
  0xc1   : > { %9313 = sst [smem:[#allocation103_spill]] %s4924_s30  ;;  %s5194_s30 = sld [smem:[#allocation6 + $0x33]] }
  0xc2   : > { %9264 = sst [smem:[#allocation72_spill]] %s4766_s5  ;;  %s4782_s5 = sld [smem:[#allocation6 + $0x64]] }
  0xc3   : > { %9265 = sst [smem:[#allocation73_spill]] %s4774_s9  ;;  %s4789_s9 = sld [smem:[#allocation6 + $0x22]] }
  0xc4   : > { %9268 = sst [smem:[#allocation76_spill]] %s4784_s14  ;;  %s5082_s14 = sld [smem:[#allocation6 + $0x75]] }
  0xc5   : > { %9315 = sst [smem:[#allocation105_spill]] %s4937_s28  ;;  %s5037_s28 = sld [smem:[#allocation6 + $0x9]] }
  0xc6   : > { %9266 = sst [smem:[#allocation74_spill]] %s4776_s6  ;;  %s4791_s6 = sld [smem:[#allocation6 + $0x46]] }
  0xc7   : > { %9374 = sst [smem:[#allocation51_spill]] %s5172_s21  ;;  %s9384_s12 = sld [smem:[#allocation56_spill]] }
  0xc8   : > { %9267 = sst [smem:[#allocation75_spill]] %s4782_s5  ;;  %s9375_s5 = sld [smem:[#allocation54_spill]] }
  0xc9   : > { %9269 = sst [smem:[#allocation77_spill]] %s4789_s9  ;;  %s5115_s9 = sld [smem:[#allocation6 + $0x7a]] }
  0xca   : > { %9349 = sst [smem:[#allocation39_spill]] %s5082_s14  ;;  %s5283_s14 = sld [smem:[#allocation6 + $0x5a]] }
  0xcb   : > { %9341 = sst [smem:[#allocation36_spill]] %s5037_s28  ;;  %s9409_s28 = sld [smem:[#allocation59_spill]] }
  0xcc   : > { %9270 = sst [smem:[#allocation78_spill]] %s4791_s6  ;;  %s4811_s6 = sld [smem:[#allocation6 + $0x27]] }
  0xcd   : > { %9380 = sst [smem:[#allocation52_spill]] %s5194_s30  ;;  %s5427_s30 = sld [smem:[#allocation6 + $0x60]] }
  0xce   : > { %s5475_s21 = sld [smem:[#allocation6 + $0x62]] }
  0xcf   : > { %9355 = sst [smem:[#allocation46_spill]] %s5115_s9 }
  0xd0   : > { %s9449_s9 = sld [smem:[#allocation62_spill]] }
  0xd2   : > { %9274 = sst [smem:[#allocation82_spill]] %s4811_s6  ;;  %s4968_s6 = sld [smem:[#allocation6 + $0x6e]] }
  0xd8   : > { %9330 = sst [smem:[#allocation110_spill]] %s4968_s6  ;;  %s9382_s6 = sld [smem:[#allocation55_spill]] }
 0x117   : > { %v4364_v45 = vpop.permute.xlu1 %542 }
 0x118   : > { %v4359_v41 = vpop.permute.xlu0 %524 }
 0x119   : > { %v532_v44 = vmul.f32 %v4359_v41, %v514_v37  ;;  %v534_v5 = vmul.f32 %v4359_v41, %v516_v38  ;;  %v536_v60 = vmul.f32 %v4359_v41, %v518_v50  ;;  %v538_v54 = vmul.f32 %v4359_v41, %v520_v7 }
 0x11b   : > { %v4371_v48 = vadd.f32 %v4364_v45, %v532_v44  ;;  %v4374_v49 = vadd.f32 %v4364_v45, %v534_v5  ;;  %v4389_v1 = vadd.f32 %v4364_v45, %v536_v60  ;;  %v548_v9 = vpop.permute.xlu1 %547 }
 0x11c   : > { %v530_v57 = vpop.permute.xlu0 %529 }
 0x11d   : > { %v4380_v55 = vmul.f32 0.70710677, %v4371_v48  ;;  %v4383_v56 = vmul.f32 0.70710677, %v4374_v49  ;;  %v533_v59 = vmul.f32 %v530_v57, %v515_v6  ;;  %v535_v0 = vmul.f32 %v530_v57, %v517_v58 }
 0x11e   : > { %v537_v3 = vmul.f32 %v530_v57, %v519_v62  ;;  %v4396_v13 = vmul.f32 0.70710677, %v4389_v1  ;;  %v539_v50 = vmul.f32 %v530_v57, %v521_v39 }
 0x11f   : > { %v590_v61 = vand.u32 2147483647, %v4380_v55  ;;  %v592_v8 = vand.u32 2147483647, %v4383_v56  ;;  %v4391_v11 = vadd.f32 %v548_v9, %v533_v59  ;;  %v4393_v12 = vadd.f32 %v548_v9, %v535_v0 }
 0x120   : > { %v4398_v14 = vadd.f32 %v548_v9, %v537_v3  ;;  %v4410_v20 = vand.u32 2147483647, %v4396_v13  ;;  %v4424_v62 = vadd.f32 %v548_v9, %v539_v50  ;;  %vm574_vm0 = vcmp.ge.f32.partialorder %v4380_v55, 0.0 }
 0x121   : > { %v598_v16 = vmul.f32 0.3275911, %v590_v61  ;;  %v600_v2 = vmul.f32 0.3275911, %v592_v8  ;;  %v4401_v17 = vmul.f32 0.70710677, %v4391_v11 }
 0x122   : > { %v4404_v18 = vmul.f32 0.70710677, %v4393_v12  ;;  %v4407_v19 = vmul.f32 0.70710677, %v4398_v14  ;;  %v702_v22 = vsub.f32 0.0, %v590_v61  ;;  %v704_v23 = vsub.f32 0.0, %v592_v8 }
 0x123   : > { %v606_v4 = vadd.f32 1.0, %v598_v16  ;;  %v608_v10 = vadd.f32 1.0, %v600_v2  ;;  %v591_v21 = vand.u32 2147483647, %v4401_v17  ;;  %v602_v28 = vmul.f32 0.3275911, %v4410_v20 }
 0x124   : > { %v593_v25 = vand.u32 2147483647, %v4404_v18  ;;  %v4417_v26 = vand.u32 2147483647, %v4407_v19  ;;  %v710_v32 = vmul.f32 %v702_v22, %v590_v61  ;;  %v712_v53 = vmul.f32 %v704_v23, %v592_v8 }
 0x125   : > { %3786 = vrcp.f32 %v606_v4  ;;  %v599_v29 = vmul.f32 0.3275911, %v591_v21  ;;  %v610_v44 = vadd.f32 1.0, %v602_v28  ;;  %v703_v60 = vsub.f32 0.0, %v591_v21 }
 0x126   : > { %3788 = vrcp.f32 %v608_v10  ;;  %v601_v33 = vmul.f32 0.3275911, %v593_v25  ;;  %v603_v34 = vmul.f32 0.3275911, %v4417_v26  ;;  %v718_v47 = vmul.f32 1.442695, %v710_v32 }
 0x127   : > { %v607_v37 = vadd.f32 1.0, %v599_v29  ;;  %v722_v40 = vmul.f32 1.442695, %v712_v53  ;;  %v705_v63 = vsub.f32 0.0, %v593_v25  ;;  %v411_v8 = vlaneseq }
 0x128   : > { %v609_v42 = vadd.f32 1.0, %v601_v33  ;;  %v611_v43 = vadd.f32 1.0, %v603_v34  ;;  %v4427_v16 = vadd.f32 %v4364_v45, %v538_v54  ;;  %v711_v3 = vmul.f32 %v703_v60, %v591_v21 }
 0x129   : > { %3790 = vrcp.f32 %v607_v37  ;;  %v4434_v10 = vmul.f32 0.70710677, %v4424_v62  ;;  %v713_v22 = vmul.f32 %v705_v63, %v593_v25  ;;  %v4438_v23 = vand.u32 127, %v411_v8 }
 0x12a   : > { %3792 = vrcp.f32 %v609_v42  ;;  %v4444_v28 = vmul.f32 0.70710677, %v4427_v16  ;;  %v720_v25 = vmul.f32 1.442695, %v711_v3  ;;  %vm576_vm1 = vcmp.ge.f32.partialorder %v4383_v56, 0.0 }
 0x12b   : > { %3794 = vrcp.f32 %v611_v43  ;;  %9219 = vst [vmem:[#allocation29_spill] sm:$0xff] %v4438_v23  ;;  %v4450_v53 = vand.u32 2147483647, %v4434_v10  ;;  %v8719_v55 = vmov -1.0   ;;  %vm413_vm2 = vcmp.lt.s32.totalorder %v4438_v23, 16 }
 0x12c   : > { %3796 = vrcp.f32 %v610_v44  ;;  %v584_v60 = vsel %vm576_vm1, 1.0, %v8719_v55  ;;  %vm575_vm3 = vcmp.ge.f32.partialorder %v4401_v17, 0.0  ;;  %vm577_vm4 = vcmp.ge.f32.partialorder %v4404_v18, 0.0 }
 0x12d   : > { %3798 = vpow2.f32 %v718_v47  ;;  %vm579_vm8 = vcmp.ge.f32.partialorder %v4407_v19, 0.0  ;;  %vm578_vm9 = vcmp.ge.f32.partialorder %v4396_v13, 0.0  ;;  %vm581_vm11 = vcmp.ge.f32.partialorder %v4434_v10, 0.0 }
 0x12e   : > { %3800 = vpow2.f32 %v722_v40  ;;  %v587_v19 = vsel %vm579_vm8, 1.0, %v8719_v55  ;;  %vm580_vm12 = vcmp.ge.f32.partialorder %v4444_v28, 0.0  ;;  %v589_v10 = vsel %vm581_vm11, 1.0, %v8719_v55 }
 0x12f   : > { %v3787_v30 = vpop.eup %3786  ;;  %3802 = vpow2.f32 %v720_v25  ;;  %v9426_v23 = vstv %s9409_s28 }
 0x130   : > { %v3789_v35 = vpop.eup %3788  ;;  %v630_v36 = vmul.f32 1.0614054, %v3787_v30 }
 0x131   : > { %v632_v38 = vmul.f32 1.0614054, %v3789_v35 }
 0x132   : > { %v638_v5 = vadd.f32 -1.4531521, %v630_v36 }
 0x133   : > { %v640_v46 = vadd.f32 -1.4531521, %v632_v38  ;;  %v4429_v0 = vpop.eup %3790  ;;  %v724_v38 = vmul.f32 1.442695, %v713_v22 }
 0x134   : > { %v646_v52 = vmul.f32 %v3787_v30, %v638_v5  ;;  %v4431_v41 = vpop.eup %3792  ;;  %v631_v9 = vmul.f32 1.0614054, %v4429_v0  ;;  %v4458_v5 = vand.u32 2147483647, %v4444_v28  ;;  %v588_v28 = vsel %vm580_vm12, 1.0, %v8719_v55 }
 0x135   : > { %v648_v15 = vmul.f32 %v3789_v35, %v640_v46  ;;  %v633_v45 = vmul.f32 1.0614054, %v4431_v41  ;;  %v4441_v27 = vpop.eup %3794  ;;  %3804 = vpow2.f32 %v724_v38 }
 0x136   : > { %v654_v51 = vadd.f32 1.4214138, %v646_v52  ;;  %v639_v29 = vadd.f32 -1.4531521, %v631_v9  ;;  %v4446_v31 = vpop.eup %3796  ;;  %v635_v43 = vmul.f32 1.0614054, %v4441_v27 }
 0x137   : > { %v656_v6 = vadd.f32 1.4214138, %v648_v15  ;;  %v641_v33 = vadd.f32 -1.4531521, %v633_v45  ;;  %v3799_v34 = vpop.eup %3798  ;;  %v634_v46 = vmul.f32 1.0614054, %v4446_v31 }
 0x138   : > { %v662_v58 = vmul.f32 %v3787_v30, %v654_v51  ;;  %v647_v37 = vmul.f32 %v4429_v0, %v639_v29  ;;  %v3801_v39 = vpop.eup %3800  ;;  %v605_v15 = vmul.f32 0.3275911, %v4450_v53  ;;  %v643_v54 = vadd.f32 -1.4531521, %v635_v43 }
 0x139   : > { %v664_v61 = vmul.f32 %v3789_v35, %v656_v6  ;;  %v649_v44 = vmul.f32 %v4431_v41, %v641_v33 }
 0x13a   : > { %v670_v59 = vadd.f32 -0.28449672, %v662_v58  ;;  %v655_v7 = vadd.f32 1.4214138, %v647_v37  ;;  %v558_v58 = vmul.f32 0.5, %v4371_v48 }
 0x13b   : > { %v672_v57 = vadd.f32 -0.28449672, %v664_v61  ;;  %v657_v52 = vadd.f32 1.4214138, %v649_v44  ;;  %v604_v61 = vmul.f32 0.3275911, %v4458_v5 }
 0x13c   : > { %v678_v2 = vmul.f32 %v3787_v30, %v670_v59  ;;  %v663_v50 = vmul.f32 %v4429_v0, %v655_v7  ;;  %v642_v59 = vadd.f32 -1.4531521, %v634_v46 }
 0x13d   : > { %v680_v4 = vmul.f32 %v3789_v35, %v672_v57  ;;  %v665_v6 = vmul.f32 %v4431_v41, %v657_v52  ;;  %v612_v45 = vadd.f32 1.0, %v604_v61  ;;  %v4505_v61 = vshrl.u32 %v411_v8, 7 }
 0x13e   : > { %v686_v24 = vadd.f32 0.2548296, %v678_v2  ;;  %v671_v63 = vadd.f32 -0.28449672, %v663_v50  ;;  %v559_v50 = vmul.f32 0.5, %v4391_v11 }
 0x13f   : > { %v688_v21 = vadd.f32 0.2548296, %v680_v4  ;;  %v673_v3 = vadd.f32 -0.28449672, %v665_v6  ;;  %v613_v4 = vadd.f32 1.0, %v605_v15  ;;  %9220 = vst [vmem:[#allocation30_spill] sm:$0xff] %v4505_v61 }
 0x140   : > { %v694_v32 = vmul.f32 %v3787_v30, %v686_v24  ;;  %v582_v30 = vsel %vm574_vm0, 1.0, %v8719_v55  ;;  %v679_v9 = vmul.f32 %v4429_v0, %v671_v63  ;;  %v651_v24 = vmul.f32 %v4441_v27, %v643_v54 }
 0x141   : > { %v696_v36 = vmul.f32 %v3789_v35, %v688_v21  ;;  %v681_v48 = vmul.f32 %v4431_v41, %v673_v3  ;;  %v650_v21 = vmul.f32 %v4446_v31, %v642_v59  ;;  %3806 = vrcp.f32 %v613_v4 }
 0x142   : > { %v734_v42 = vmul.f32 %v3799_v34, %v694_v32  ;;  %v687_v56 = vadd.f32 0.2548296, %v679_v9  ;;  %v3803_v34 = vpop.eup %3802  ;;  %v659_v37 = vadd.f32 1.4214138, %v651_v24  ;;  %3808 = vrcp.f32 %v612_v45 }
 0x143   : > { %v736_v35 = vmul.f32 %v3801_v39, %v696_v36  ;;  %v689_v32 = vadd.f32 0.2548296, %v681_v48  ;;  %v560_v36 = vmul.f32 0.5, %v4374_v49  ;;  %v3805_v39 = vpop.eup %3804  ;;  %v658_v44 = vadd.f32 1.4214138, %v650_v21 }
 0x144   : > { %v742_v47 = vsub.f32 1.0, %v734_v42  ;;  %v695_v25 = vmul.f32 %v4429_v0, %v687_v56  ;;  %v707_v42 = vsub.f32 0.0, %v4417_v26  ;;  %v583_v49 = vsel %vm575_vm3, 1.0, %v8719_v55 }
 0x145   : > { %v744_v40 = vsub.f32 1.0, %v736_v35  ;;  %v697_v38 = vmul.f32 %v4431_v41, %v689_v32  ;;  %v706_v35 = vsub.f32 0.0, %v4410_v20  ;;  %v667_v41 = vmul.f32 %v4441_v27, %v659_v37 }
 0x146   : > { %v750_v51 = vmul.f32 %v742_v47, %v582_v30  ;;  %v735_v43 = vmul.f32 %v3803_v34, %v695_v25  ;;  %v715_v46 = vmul.f32 %v707_v42, %v4417_v26  ;;  %v666_v52 = vmul.f32 %v4446_v31, %v658_v44 }
 0x147   : > { %v752_v57 = vmul.f32 %v744_v40, %v584_v60  ;;  %v737_v0 = vmul.f32 %v3805_v39, %v697_v38  ;;  %v585_v40 = vsel %vm577_vm4, 1.0, %v8719_v55  ;;  %v714_v15 = vmul.f32 %v706_v35, %v4410_v20 }
 0x148   : > { %v758_v2 = vadd.f32 1.0, %v750_v51  ;;  %v743_v7 = vsub.f32 1.0, %v735_v43  ;;  %v675_v6 = vadd.f32 -0.28449672, %v667_v41  ;;  %v674_v63 = vadd.f32 -0.28449672, %v666_v52 }
 0x149   : > { %v760_v29 = vadd.f32 1.0, %v752_v57  ;;  %v745_v17 = vsub.f32 1.0, %v737_v0  ;;  %v726_v57 = vmul.f32 1.442695, %v714_v15  ;;  %vm896_vm5 = vcmp.lt.s32.totalorder %v4505_v61, 7 }
 0x14a   : > { %v766_v22 = vmul.f32 %v758_v2, %v558_v58  ;;  %v751_v47 = vmul.f32 %v743_v7, %v583_v49  ;;  %v728_v58 = vmul.f32 1.442695, %v715_v46  ;;  %v683_v3 = vmul.f32 %v4441_v27, %v675_v6 }
 0x14b   : > { %v768_v30 = vmul.f32 %v760_v29, %v560_v36  ;;  %v753_v51 = vmul.f32 %v745_v17, %v585_v40  ;;  %v4502_v26 = vpop.eup %3806  ;;  %v561_v9 = vmul.f32 0.5, %v4393_v12  ;;  %v682_v24 = vmul.f32 %v4446_v31, %v674_v63 }
 0x14c   : > { %v4476_v33 = vsel %vm413_vm2, %v766_v22, 0.0  ;;  %v759_v54 = vadd.f32 1.0, %v751_v47  ;;  %v4507_v59 = vpop.eup %3808  ;;  %v637_v2 = vmul.f32 1.0614054, %v4502_v26  ;;  %3810 = vpow2.f32 %v728_v58 }
 0x14d   : > { %856 = vrot.lane.b32.xlu0 %v4476_v33, %s8625_s25  ;;  %v4496_v18 = vsel %vm413_vm2, %v768_v30, 0.0  ;;  %v761_v20 = vadd.f32 1.0, %v753_v51  ;;  %v888_v8 = vrot.slane %v4476_v33, 1  ;;  %v636_v22 = vmul.f32 1.0614054, %v4507_v59 }
 0x14e   : > { %v767_v60 = vmul.f32 %v759_v54, %v559_v50  ;;  %3812 = vpow2.f32 %v726_v57  ;;  %v4535_v56 = vadd.s32 4294967295, %v4505_v61  ;;  %v645_v21 = vadd.f32 -1.4531521, %v637_v2 }
 0x14f   : > { %v769_v45 = vmul.f32 %v761_v20, %v561_v9  ;;  %v691_v29 = vadd.f32 0.2548296, %v683_v3  ;;  %vm795_vm6 = vcmp.lt.s32.totalorder %v4505_v61, 1  ;;  %v787_v32 = vrot.slane %v4476_v33, 7 }
 0x150   : > { %v4511_v11 = vsel %vm413_vm2, %v767_v60, 0.0  ;;  %9221 = vst [vmem:[#allocation31_spill] sm:$0xff] %v4535_v56  ;;  %v644_v25 = vadd.f32 -1.4531521, %v636_v22  ;;  %v690_v34 = vadd.f32 0.2548296, %v682_v24  ;;  %v653_v38 = vmul.f32 %v4502_v26, %v645_v21 }
 0x151   : > { %872 = vrot.lane.b32.xlu0 %v4476_v33, %s8627_s19  ;;  %858 = vrot.lane.b32.xlu1 %v4511_v11, %s8625_s25  ;;  %v892_v4 = vrot.slane %v4511_v11, 1  ;;  %v791_v12 = vrot.slane %v4511_v11, 7  ;;  %v4543_v36 = vsel %vm413_vm2, %v769_v45, 0.0  ;;  %vm806_vm7 = vcmp.ge.s32.totalorder %v4535_v56, 0 }
 0x152   : > { %v699_v39 = vmul.f32 %v4441_v27, %v691_v29  ;;  %v652_v42 = vmul.f32 %v4507_v59, %v644_v25  ;;  %v698_v43 = vmul.f32 %v4446_v31, %v690_v34  ;;  %v661_v27 = vadd.f32 1.4214138, %v653_v38 }
 0x153   : > { %v4529_v48 = vsel %vm896_vm5, %v888_v8, %v892_v4  ;;  %v800_v37 = vsel %vm795_vm6, %v791_v12, %v787_v32  ;;  %v4562_v0 = vsel %vm795_vm6, %v787_v32, %v791_v12  ;;  %v709_v31 = vsub.f32 0.0, %v4450_v53 }
 0x154   : > { %v4558_v44 = vsel %vm806_vm7, %v800_v37, 0.0  ;;  %v660_v49 = vadd.f32 1.4214138, %v652_v42  ;;  %v708_v17 = vsub.f32 0.0, %v4458_v5  ;;  %v792_v46 = vrot.slane %v4543_v36, 7 }
 0x155   : > { %860 = vrot.lane.b32.xlu0 %v4496_v18, %s8625_s25  ;;  %874 = vrot.lane.b32.xlu1 %v4511_v11, %s8627_s19  ;;  %v669_v47 = vmul.f32 %v4502_v26, %v661_v27  ;;  %v717_v40 = vmul.f32 %v709_v31, %v4450_v53  ;;  %v788_v15 = vrot.slane %v4496_v18, 7  ;;  %v893_v54 = vrot.slane %v4543_v36, 1 }
 0x156   : > { %v3811_v30 = vpop.eup %3810  ;;  %v668_v50 = vmul.f32 %v4507_v59, %v660_v49  ;;  %v716_v6 = vmul.f32 %v708_v17, %v4458_v5  ;;  %v786_v53 = vadd.s32 8, %v4505_v61  ;;  %v889_v63 = vrot.slane %v4496_v18, 1 }
 0x157   : > { %v739_v35 = vmul.f32 %v3811_v30, %v699_v39  ;;  %v4586_v58 = vsel %vm795_vm6, %v788_v15, %v792_v46  ;;  %v677_v60 = vadd.f32 -0.28449672, %v669_v47  ;;  %v586_v5 = vsel %vm578_vm9, 1.0, %v8719_v55 }
 0x158   : > { %v3813_v7 = vpop.eup %3812  ;;  %v732_v57 = vmul.f32 1.442695, %v717_v40  ;;  %v676_v20 = vadd.f32 -0.28449672, %v668_v50  ;;  %v4601_v3 = vsel %vm896_vm5, %v889_v63, %v893_v54  ;;  %v730_v9 = vmul.f32 1.442695, %v716_v6 }
 0x159   : > { %925 = vrot.lane.b32.xlu0 %v4529_v48, %s8625_s25  ;;  %862 = vrot.lane.b32.xlu1 %v4543_v36, %s8625_s25  ;;  %v738_v41 = vmul.f32 %v3813_v7, %v698_v43  ;;  %v747_v52 = vsub.f32 1.0, %v739_v35  ;;  %v4605_v22 = vadd.s32 1, %v786_v53  ;;  %v685_v24 = vmul.f32 %v4502_v26, %v677_v60 }
 0x15a   : > { %3814 = vpow2.f32 %v732_v57  ;;  %v684_v12 = vmul.f32 %v4507_v59, %v676_v20  ;;  %v563_v29 = vmul.f32 0.5, %v4398_v14  ;;  %v801_v32 = vsel %vm795_vm6, %v792_v46, %v788_v15 }
 0x15b   : > { %v746_v51 = vsub.f32 1.0, %v738_v41  ;;  %v755_v13 = vmul.f32 %v747_v52, %v587_v19  ;;  %9222 = vst [vmem:[#allocation32_spill] sm:$0xff] %v4605_v22  ;;  %3816 = vpow2.f32 %v730_v9  ;;  %vm910_vm10 = vcmp.lt.s32.totalorder %v4605_v22, 16 }
 0x15c   : > { %v562_v25 = vmul.f32 0.5, %v4389_v1  ;;  %v693_v34 = vadd.f32 0.2548296, %v685_v24  ;;  %v901_v14 = vsel %vm896_vm5, %v892_v4, %v888_v8  ;;  %v692_v38 = vadd.f32 0.2548296, %v684_v12 }
 0x15d   : > { %941 = vrot.lane.b32.xlu0 %v4529_v48, %s8627_s19  ;;  %826 = vrot.lane.b32.xlu1 %v4562_v0, %s8625_s25  ;;  %v754_v2 = vmul.f32 %v746_v51, %v586_v5  ;;  %v763_v45 = vadd.f32 1.0, %v755_v13  ;;  %v4628_v42 = vsel %vm806_vm7, %v801_v32, 0.0  ;;  %v4634_v1 = vsel %vm910_vm10, %v901_v14, 0.0 }
 0x15e   : > { %v701_v8 = vmul.f32 %v4502_v26, %v693_v34  ;;  %v700_v43 = vmul.f32 %v4507_v59, %v692_v38  ;;  %v902_v50 = vsel %vm896_vm5, %v893_v54, %v889_v63  ;;  %v565_v6 = vmul.f32 0.5, %v4424_v62 }
 0x15f   : > { %v762_v21 = vadd.f32 1.0, %v754_v2  ;;  %v771_v37 = vmul.f32 %v763_v45, %v563_v29  ;;  %v4770_v54 = vsel %vm910_vm10, %v902_v50, 0.0  ;;  %v564_v53 = vmul.f32 0.5, %v4427_v16 }
 0x160   : > { %v985_v13 = vstv %s4630_s15  ;;  %v1204_v63 = vstv %s4638_s20  ;;  %v1423_v5 = vstv %s4640_s23  ;;  %v967_v20 = vstv %s4649_s29  ;;  %s4803_s20 = sld [smem:[#allocation6 + $0x6a]]  ;;  %s4805_s23 = sld [smem:[#allocation6 + $0x8e]] }
 0x161   : > { %824 = vrot.lane.b32.xlu0 %v4558_v44, %s8625_s25  ;;  %842 = vrot.lane.b32.xlu1 %v4562_v0, %s8627_s19  ;;  %v770_v39 = vmul.f32 %v762_v21, %v562_v25  ;;  %v4645_v4 = vsel %vm413_vm2, %v771_v37, 0.0  ;;  %v1186_v2 = vstv %s4651_s17  ;;  %s4809_s15 = sld [smem:[#allocation6 + $0x3]]  ;;  %v1405_v9 = vstv %s4653_s18  ;;  %s4824_s29 = sld [smem:[#allocation6 + $0x6f]] }
 0x162   : > { %v793_v27 = vrot.slane %v4645_v4, 7  ;;  %v894_v19 = vrot.slane %v4645_v4, 1  ;;  %v1624_v24 = vstv %s4655_s26  ;;  %v1642_v45 = vstv %s4662_s3  ;;  %s4822_s17 = sld [smem:[#allocation6 + $0x4b]]  ;;  %s4829_s18 = sld [smem:[#allocation6 + $0x5]] }
 0x163   : > { %v4660_v26 = vsel %vm413_vm2, %v770_v39, 0.0  ;;  %v8783_v21 = vstv %s4664_s22  ;;  %v8784_v32 = vstv %s4671_s0  ;;  %s4831_s3 = sld [smem:[#allocation6 + $0x29]]  ;;  %v1003_v25 = vstv %s4675_s1  ;;  %s4841_s26 = sld [smem:[#allocation6 + $0x4d]] }
 0x164   : > { %v3815_v30 = vpop.eup %3814  ;;  %v789_v7 = vrot.slane %v4660_v26, 7  ;;  %v890_v60 = vrot.slane %v4660_v26, 1  ;;  %v1222_v34 = vstv %s4680_s4  ;;  %v1441_v37 = vstv %s4682_s7  ;;  %s4843_s0 = sld [smem:[#allocation6 + $0x71]]  ;;  %s4851_s7 = sld [smem:[#allocation6 + $0xc]] }
 0x165   : > { %840 = vrot.lane.b32.xlu0 %v4558_v44, %s8627_s19  ;;  %830 = vrot.lane.b32.xlu1 %v4586_v58, %s8625_s25  ;;  %v741_v35 = vmul.f32 %v3815_v30, %v701_v8  ;;  %v3817_v59 = vpop.eup %3816  ;;  %v8794_v14 = vstv %s4677_s2  ;;  %v1660_v39 = vstv %s4684_s8  ;;  %s4853_s1 = sld [smem:[#allocation6 + $0x30]]  ;;  %s4948_s8 = sld [smem:[#allocation7 + $0x3]]  ;;  %v5054_v50 = vmul.f32 %v1642_v45, %v4476_v33 }
 0x166   : > { %v740_v31 = vmul.f32 %v3817_v59, %v700_v43  ;;  %v4690_v49 = vsel %vm795_vm6, %v789_v7, %v793_v27  ;;  %v802_v46 = vsel %vm795_vm6, %v793_v27, %v789_v7  ;;  %v4799_v57 = vsel %vm896_vm5, %v890_v60, %v894_v19  ;;  %9271 = sst [smem:[#allocation79_spill]] %s4803_s20  ;;  %s4958_s22 = sld [smem:[#allocation6 + $0x2]] }
 0x167   : > { %v749_v41 = vsub.f32 1.0, %v741_v35  ;;  %v4736_v40 = vsel %vm806_vm7, %v802_v46, 0.0  ;;  %9272 = sst [smem:[#allocation80_spill]] %s4805_s23  ;;  %v1021_v8 = vstv %s4686_s24  ;;  %v1240_v43 = vstv %s4694_s11  ;;  %s4860_s11 = sld [smem:[#allocation6 + $0x54]] }
 0x168   : > { %v748_v17 = vsub.f32 1.0, %v740_v31  ;;  %9273 = sst [smem:[#allocation81_spill]] %s4809_s15  ;;  %v1459_v27 = vstv %s4696_s10  ;;  %v1678_v35 = vstv %s4701_s27  ;;  %v8785_v7 = vstv %s4705_s16  ;;  %s4870_s10 = sld [smem:[#allocation6 + $0x2a]] }
 0x169   : > { %876 = vrot.lane.b32.xlu0 %v4496_v18, %s8627_s19  ;;  %846 = vrot.lane.b32.xlu1 %v4586_v58, %s8627_s19  ;;  %v757_v47 = vmul.f32 %v749_v41, %v589_v10  ;;  %9275 = sst [smem:[#allocation83_spill]] %s4822_s17  ;;  %s4893_s24 = sld [smem:[#allocation6 + $0x2c]]  ;;  %v4977_v59 = vmul.f32 %v985_v13, %v4476_v33  ;;  %v5163_v55 = vmul.f32 %v1441_v37, %v4634_v1 }
 0x16a   : > { %v756_v52 = vmul.f32 %v748_v17, %v588_v28  ;;  %9276 = sst [smem:[#allocation84_spill]] %s4824_s29  ;;  %s4914_s27 = sld [smem:[#allocation6]]  ;;  %v5059_v28 = vmul.f32 %v967_v20, %v4558_v44  ;;  %v5187_v10 = vmul.f32 %v1678_v35, %v4586_v58  ;;  %v5192_v41 = vmul.f32 %v1021_v8, %v4628_v42 }
 0x16b   : > { %v765_v15 = vadd.f32 1.0, %v757_v47  ;;  %9277 = sst [smem:[#allocation85_spill]] %s4829_s18  ;;  %s4939_s16 = sld [smem:[#allocation6 + $0x48]]  ;;  %v5019_v47 = vmul.f32 %v967_v20, %v4562_v0  ;;  %v5080_v20 = vmul.f32 %v1624_v24, %v4558_v44  ;;  %9369 = vst [vmem:[#allocation118_spill] sm:$0xff] %v5163_v55  ;;  %v5201_v31 = vmul.f32 %v8783_v21, %v4496_v18 }
 0x16c   : > { %v764_v51 = vadd.f32 1.0, %v756_v52  ;;  %9278 = sst [smem:[#allocation86_spill]] %s4831_s3  ;;  %s4966_s23 = sld [smem:[#allocation6 + $0x4a]]  ;;  %9378 = vst [vmem:[#allocation121_spill] sm:$0xff] %v5187_v10  ;;  %9379 = vst [vmem:[#allocation122_spill] sm:$0xff] %v5192_v41 }
 0x16d   : > { %929 = vrot.lane.b32.xlu0 %v4601_v3, %s8625_s25  ;;  %878 = vrot.lane.b32.xlu1 %v4543_v36, %s8627_s19  ;;  %v773_v62 = vmul.f32 %v765_v15, %v565_v6  ;;  %9279 = sst [smem:[#allocation87_spill]] %s4841_s26  ;;  %s4950_s26 = sld [smem:[#allocation6 + $0x6c]]  ;;  %v5035_v15 = vmul.f32 %v1405_v9, %v4562_v0  ;;  %9383 = vst [vmem:[#allocation123_spill] sm:$0xff] %v5201_v31 }
 0x16e   : > { %v772_v16 = vmul.f32 %v764_v51, %v564_v53  ;;  %9280 = sst [smem:[#allocation88_spill]] %s4843_s0  ;;  %s4862_s0 = sld [smem:[#allocation6 + $0x78]] }
 0x16f   : > { %v4818_v12 = vsel %vm413_vm2, %v773_v62, 0.0  ;;  %9284 = sst [smem:[#allocation89_spill]] %s4851_s7  ;;  %s4926_s7 = sld [smem:[#allocation6 + $0x24]]  ;;  %v5049_v62 = vmul.f32 %v1423_v5, %v4476_v33 }
 0x170   : > { %v4839_v38 = vsel %vm413_vm2, %v772_v16, 0.0  ;;  %v794_v30 = vrot.slane %v4818_v12, 7  ;;  %9286 = sst [smem:[#allocation90_spill]] %s4853_s1  ;;  %s4868_s1 = sld [smem:[#allocation6 + $0x6]]  ;;  %v903_v16 = vsel %vm896_vm5, %v894_v19, %v890_v60  ;;  %v4982_v19 = vmul.f32 %v1204_v63, %v4476_v33 }
 0x171   : > { %945 = vrot.lane.b32.xlu0 %v4601_v3, %s8627_s19  ;;  %927 = vrot.lane.b32.xlu1 %v4634_v1, %s8625_s25  ;;  %9289 = sst [smem:[#allocation91_spill]] %s4860_s11  ;;  %v790_v17 = vrot.slane %v4839_v38, 7  ;;  %s4877_s11 = sld [smem:[#allocation6 + $0x72]]  ;;  %v4933_v53 = vsel %vm910_vm10, %v903_v16, 0.0  ;;  %v891_v16 = vrot.slane %v4839_v38, 1  ;;  %v5075_v33 = vmul.f32 %v1405_v9, %v4558_v44 }
 0x172   : > { %9294 = sst [smem:[#allocation94_spill]] %s4870_s10  ;;  %s9331_s29 = smov 127   ;;  %v5113_v9 = vmul.f32 %v1003_v25, %v4529_v48 }
 0x173   : > { %v4885_v51 = vsel %vm795_vm6, %v790_v17, %v794_v30  ;;  %v803_v6 = vsel %vm795_vm6, %v794_v30, %v790_v17  ;;  %9305 = sst [smem:[#allocation98_spill]] %s4893_s24  ;;  %v895_v30 = vrot.slane %v4818_v12, 1  ;;  %s5141_s20 = sld [smem:[#allocation6 + $0x2f]] }
 0x174   : > { %9291 = sst [smem:[#allocation92_spill]] %s4862_s0  ;;  %v4922_v60 = vsel %vm806_vm7, %v803_v6, 0.0  ;;  %v5027_v6 = vmul.f32 %v1186_v2, %v4562_v0  ;;  %s5143_s15 = sld [smem:[#allocation6 + $0x53]] }
 0x175   : > { %828 = vrot.lane.b32.xlu0 %v4628_v42, %s8625_s25  ;;  %s4669_s25 = sld [smem:[#allocation6 + $0x31]]  ;;  %943 = vrot.lane.b32.xlu1 %v4634_v1, %s8627_s19  ;;  %9311 = sst [smem:[#allocation102_spill]] %s4914_s27  ;;  %v904_v52 = vsel %vm896_vm5, %v895_v30, %v891_v16  ;;  %v4993_v17 = vsel %vm896_vm5, %v891_v16, %v895_v30  ;;  %v5044_v16 = vmul.f32 %v1624_v24, %v4562_v0 }
 0x176   : > { %9292 = sst [smem:[#allocation93_spill]] %s4868_s1  ;;  %v5006_v30 = vsel %vm910_vm10, %v904_v52, 0.0  ;;  %v5070_v0 = vmul.f32 %v1186_v2, %v4558_v44  ;;  %v5089_v52 = vmul.f32 %v985_v13, %v4511_v11  ;;  %v5098_v2 = vmul.f32 %v1204_v63, %v4511_v11  ;;  %s9363_s27 = sld [smem:[#allocation41_spill]] }
 0x177   : > { %9297 = sst [smem:[#allocation96_spill]] %s4877_s11  ;;  %9336 = vst [vmem:[#allocation111_spill] sm:$0xff] %v5006_v30  ;;  %v5103_v44 = vmul.f32 %v1423_v5, %v4511_v11  ;;  %v5108_v13 = vmul.f32 %v1642_v45, %v4511_v11  ;;  %v5122_v63 = vmul.f32 %v1222_v34, %v4529_v48  ;;  %v5127_v5 = vmul.f32 %v1441_v37, %v4529_v48  ;;  %s9370_s1 = sld [smem:[#allocation224_spill]] }
 0x178   : > { %9314 = sst [smem:[#allocation104_spill]] %s4926_s7  ;;  %s5117_s7 = sld [smem:[#allocation6 + $0xb]]  ;;  %v5132_v11 = vmul.f32 %v1660_v39, %v4529_v48  ;;  %v5137_v24 = vmul.f32 %v1003_v25, %v4634_v1  ;;  %v5148_v45 = vmul.f32 %v1021_v8, %v4586_v58  ;;  %v5153_v48 = vmul.f32 %v1222_v34, %v4634_v1 }
 0x179   : > { %844 = vrot.lane.b32.xlu0 %v4628_v42, %s8627_s19  ;;  %s9240_s19 = smov 1   ;;  %9316 = sst [smem:[#allocation106_spill]] %s4939_s16  ;;  %9358 = vst [vmem:[#allocation112_spill] sm:$0xff] %v5127_v5  ;;  %v5158_v25 = vmul.f32 %v1240_v43, %v4586_v58  ;;  %v5177_v34 = vmul.f32 %v1459_v27, %v4586_v58  ;;  %v5182_v37 = vmul.f32 %v1660_v39, %v4634_v1 }
 0x17a   : > { %834 = vrot.lane.b32.xlu1 %v4690_v49, %s9240_s19  ;;  %9319 = sst [smem:[#allocation107_spill]] %s4948_s8  ;;  %s9342_s8 = smov 1   ;;  %9360 = vst [vmem:[#allocation113_spill] sm:$0xff] %v5132_v11  ;;  %9361 = vst [vmem:[#allocation114_spill] sm:$0xff] %v5137_v24  ;;  %v5206_v1 = vmul.f32 %v1240_v43, %v4628_v42  ;;  %v5216_v39 = vmul.f32 %v1459_v27, %v4628_v42  ;;  %v5225_v8 = vmul.f32 %v8784_v32, %v4496_v18 }
 0x17b   : > { %9232 = sst [smem:[#allocation42_spill]] %s4669_s25  ;;  %v8782_v29 = vstv %s4669_s25  ;;  %s4891_s25 = sld [smem:[#allocation6 + $0x8]]  ;;  %9365 = vst [vmem:[#allocation115_spill] sm:$0xff] %v5148_v45  ;;  %9367 = vst [vmem:[#allocation116_spill] sm:$0xff] %v5153_v48  ;;  %v5230_v43 = vmul.f32 %v1678_v35, %v4628_v42  ;;  %v5240_v27 = vmul.f32 %v8785_v7, %v4601_v3  ;;  %v9397_v42 = vstv %s9382_s6 }
 0x17c   : > { %9320 = sst [smem:[#allocation108_spill]] %s4950_s26  ;;  %s5091_s16 = sld [smem:[#allocation6 + $0x32]]  ;;  %9368 = vst [vmem:[#allocation117_spill] sm:$0xff] %v5158_v25  ;;  %9376 = vst [vmem:[#allocation119_spill] sm:$0xff] %v5177_v34  ;;  %v5211_v58 = vmul.f32 %v8782_v29, %v4496_v18  ;;  %v5235_v29 = vmul.f32 %v8794_v14, %v4496_v18  ;;  %v5251_v18 = vmul.f32 %v9397_v42, %v4601_v3  ;;  %v9399_v35 = vstv %s9384_s12 }
 0x17d   : > { %864 = vrot.lane.b32.xlu0 %v4660_v26, %s9240_s19  ;;  %9326 = sst [smem:[#allocation33_spill]] %s4958_s22  ;;  %s5084_s26 = sld [smem:[#allocation6 + $0xe]]  ;;  %v1833_v46 = vld [vmem:[%s9370_s1] sm:$0xff]  ;;  %9377 = vst [vmem:[#allocation120_spill] sm:$0xff] %v5182_v37  ;;  %9385 = vst [vmem:[#allocation124_spill] sm:$0xff] %v5206_v1  ;;  %v5256_v7 = vmul.f32 %v9399_v35, %v4601_v3  ;;  %v9407_v14 = vstv %s9363_s27 }
 0x17e   : > { %850 = vrot.lane.b32.xlu1 %v4690_v49, %s9249_s13  ;;  %9328 = sst [smem:[#allocation109_spill]] %s4966_s23  ;;  %s5061_s23 = sld [smem:[#allocation6 + $0x2d]]  ;;  %9386 = vst [vmem:[#allocation125_spill] sm:$0xff] %v5211_v58  ;;  %9387 = vst [vmem:[#allocation126_spill] sm:$0xff] %v5216_v39  ;;  %v5277_v22 = vmul.f32 %v9407_v14, %v4543_v36 }
 0x17f   : > { %9356 = sst [smem:[#allocation47_spill]] %s5117_s7  ;;  %s9366_s11 = sld [smem:[#allocation42_spill]]  ;;  %9390 = vst [vmem:[#allocation127_spill] sm:$0xff] %v5225_v8  ;;  %9391 = vst [vmem:[#allocation128_spill] sm:$0xff] %v5230_v43 }
 0x180   : > { %9362 = sst [smem:[#allocation48_spill]] %s5141_s20  ;;  %s9371_s0 = sld [smem:[#allocation43_spill]]  ;;  %9393 = vst [vmem:[#allocation129_spill] sm:$0xff] %v5235_v29  ;;  %9394 = vst [vmem:[#allocation130_spill] sm:$0xff] %v5240_v27 }
 0x181   : > { %880 = vrot.lane.b32.xlu0 %v4660_v26, %s9249_s13  ;;  %9303 = sst [smem:[#allocation97_spill]] %s4891_s25  ;;  %s4907_s25 = sld [smem:[#allocation6 + $0x74]]  ;;  %9398 = vst [vmem:[#allocation131_spill] sm:$0xff] %v5251_v18  ;;  %9400 = vst [vmem:[#allocation132_spill] sm:$0xff] %v5256_v7 }
 0x182   : > { %866 = vrot.lane.b32.xlu1 %v4645_v4, %s9240_s19  ;;  %9352 = sst [smem:[#allocation40_spill]] %s5091_s16  ;;  %s5170_s22 = sld [smem:[#allocation6 + $0x77]]  ;;  %9408 = vst [vmem:[#allocation134_spill] sm:$0xff] %v5277_v22 }
 0x183   : > { %9350 = sst [smem:[#allocation35_spill]] %s5084_s26  ;;  %s9373_s4 = sld [smem:[#allocation45_spill]] }
 0x184   : > { %9344 = sst [smem:[#allocation37_spill]] %s5061_s23  ;;  %s5218_s2 = sld [smem:[#allocation6 + $0x7b]] }
 0x185   : > { %832 = vrot.lane.b32.xlu0 %v4736_v40, %s9240_s19  ;;  %9364 = sst [smem:[#allocation49_spill]] %s5143_s15  ;;  %s5196_s10 = sld [smem:[#allocation6 + $0x57]]  ;;  %v9413_v21 = vstv %s9366_s11 }
 0x186   : > { %931 = vrot.lane.b32.xlu1 %v4770_v54, %s9240_s19  ;;  %s5220_s3 = sld [smem:[#allocation6 + $0x11]]  ;;  %s9392_s17 = sld [smem:[#allocation57_spill]]  ;;  %v5288_v32 = vmul.f32 %v9413_v21, %v4543_v36 }
 0x187   : > { %9309 = sst [smem:[#allocation100_spill]] %s4907_s25  ;;  %s5244_s24 = sld [smem:[#allocation6 + $0x35]] }
 0x188   : > { %9372 = sst [smem:[#allocation50_spill]] %s5170_s22  ;;  %s5246_s25 = sld [smem:[#allocation6 + $0x59]]  ;;  %9414 = vst [vmem:[#allocation135_spill] sm:$0xff] %v5288_v32 }
 0x189   : > { %848 = vrot.lane.b32.xlu0 %v4736_v40, %s9249_s13  ;;  %s9401_s18 = sld [smem:[#allocation225_spill]]  ;;  %s5265_s1 = sld [smem:[#allocation6 + $0x7d]]  ;;  %v9420_v61 = vstv %s9373_s4 }
 0x18a   : > { %947 = vrot.lane.b32.xlu1 %v4770_v54, %s9249_s13  ;;  %9388 = sst [smem:[#allocation42_spill]] %s5218_s2  ;;  %s5281_s23 = sld [smem:[#allocation6 + $0x36]]  ;;  %v5304_v56 = vmul.f32 %v9420_v61, %v4543_v36 }
 0x18b   : > { %9381 = sst [smem:[#allocation41_spill]] %s5196_s10  ;;  %s5297_s27 = sld [smem:[#allocation6 + $0x7e]] }
 0x18c   : > { %9389 = sst [smem:[#allocation43_spill]] %s5220_s3  ;;  %v9405_v42 = vstv %s9392_s17  ;;  %s9418_s16 = sld [smem:[#allocation61_spill]]  ;;  %9421 = vst [vmem:[#allocation137_spill] sm:$0xff] %v5304_v56 }
 0x18d   : > { %933 = vrot.lane.b32.xlu0 %v4799_v57, %s9240_s19  ;;  %9395 = sst [smem:[#allocation45_spill]] %s5244_s24  ;;  %s5267_s24 = sld [smem:[#allocation6 + $0x12]]  ;;  %v5272_v35 = vmul.f32 %v9405_v42, %v4601_v3  ;;  %v9415_v3 = vstv %s9371_s0 }
 0x18e   : > { %882 = vrot.lane.b32.xlu1 %v4645_v4, %s9249_s13  ;;  %9396 = sst [smem:[#allocation54_spill]] %s5246_s25  ;;  %s9402_s25 = sld [smem:[#allocation58_spill]]  ;;  %v5293_v42 = vmul.f32 %v9415_v3, %v4543_v36 }
 0x18f   : > { %9403 = sst [smem:[#allocation55_spill]] %s5265_s1  ;;  %9406 = vst [vmem:[#allocation133_spill] sm:$0xff] %v5272_v35  ;;  %s5299_s26 = sld [smem:[#allocation6 + $0x15]] }
 0x190   : > { %9410 = sst [smem:[#allocation57_spill]] %s5281_s23  ;;  %9416 = vst [vmem:[#allocation136_spill] sm:$0xff] %v5293_v42  ;;  %s5313_s0 = sld [smem:[#allocation6 + $0x39]]  ;;  %v5320_v42 = vmul.f32 %v9426_v23, %v4736_v40 }
 0x191   : > { %949 = vrot.lane.b32.xlu0 %v4799_v57, %s9249_s13  ;;  %s4875_s13 = sld [smem:[#allocation6 + $0x4e]]  ;;  %9412 = sst [smem:[#allocation58_spill]] %s5283_s14 }
 0x192   : > { %838 = vrot.lane.b32.xlu1 %v4885_v51, %s9240_s19  ;;  %9417 = sst [smem:[#allocation59_spill]] %s5297_s27  ;;  %9427 = vst [vmem:[#allocation140_spill] sm:$0xff] %v5320_v42  ;;  %s5331_s4 = sld [smem:[#allocation6 + $0x81]]  ;;  %v9432_v23 = vstv %s9418_s16  ;;  %v9460_v56 = vstv %s9418_s16 }
 0x193   : > { %9404 = sst [smem:[#allocation56_spill]] %s5267_s24  ;;  %s5315_s11 = sld [smem:[#allocation6 + $0x5d]]  ;;  %v5338_v14 = vmul.f32 %v9432_v23, %v4736_v40 }
 0x194   : > { %v9422_v21 = vstv %s9402_s25  ;;  %s5333_s20 = sld [smem:[#allocation6 + $0x14]]  ;;  %s9437_s15 = sld [smem:[#allocation224_spill]] }
 0x195   : > { %868 = vrot.lane.b32.xlu0 %v4839_v38, %s9240_s19  ;;  %v5309_v32 = vmul.f32 %v9422_v21, %v4736_v40  ;;  %9433 = vst [vmem:[#allocation144_spill] sm:$0xff] %v5338_v14  ;;  %s5350_s22 = sld [smem:[#allocation6 + $0x38]]  ;;  %s9452_s2 = sld [smem:[#allocation64_spill]] }
 0x196   : > { %935 = vrot.lane.b32.xlu1 %v4933_v53, %s9240_s19  ;;  %9424 = sst [smem:[#allocation61_spill]] %s5313_s0  ;;  %s9469_s1 = sld [smem:[#allocation72_spill]] }
 0x197   : > { %9296 = sst [smem:[#allocation95_spill]] %s4875_s13  ;;  %s5093_s13 = sld [smem:[#allocation6 + $0x56]]  ;;  %9423 = vst [vmem:[#allocation138_spill] sm:$0xff] %v5309_v32 }
 0x198   : > { %9430 = sst [smem:[#allocation142_spill]] %s5331_s4  ;;  %s5384_s10 = sld [smem:[#allocation6 + $0x5f]] }
 0x199   : > { %836 = vrot.lane.b32.xlu0 %v4922_v60, %s9240_s19  ;;  %s4960_s19 = sld [smem:[#allocation6 + $0x26]]  ;;  %9425 = sst [smem:[#allocation139_spill]] %s5315_s11 }
 0x19a   : > { %951 = vrot.lane.b32.xlu1 %v4933_v53, %s9331_s29  ;;  %9431 = sst [smem:[#allocation143_spill]] %s5333_s20  ;;  %v1834_v21 = vld [vmem:[%s9437_s15 + $0x8] sm:$0xff]  ;;  %s5366_s15 = sld [smem:[#allocation6 + $0x80]] }
 0x19b   : > { %9438 = sst [smem:[#allocation146_spill]] %s5350_s22  ;;  %s9482_s3 = sld [smem:[#allocation73_spill]] }
 0x19c   : > { %s5420_s16 = sld [smem:[#allocation6 + $0x3c]]  ;;  %9495 = sst [smem:[#allocation73_spill]] %s5475_s21 }
 0x19d   : > { %852 = vrot.lane.b32.xlu0 %v4922_v60, %s9331_s29  ;;  %9353 = sst [smem:[#allocation44_spill]] %s5093_s13  ;;  %s5352_s13 = sld [smem:[#allocation6 + $0x5c]] }
 0x19e   : > { %854 = vrot.lane.b32.xlu1 %v4885_v51, %s9331_s29  ;;  %s5439_s7 = sld [smem:[#allocation6 + $0x84]]  ;;  %s9504_s21 = sld [smem:[#allocation65_spill]] }
 0x19f   : > { %9327 = sst [smem:[#allocation34_spill]] %s4960_s19  ;;  %s5063_s19 = sld [smem:[#allocation6 + $0x51]] }
 0x1a0   : > { %s5659_s14 = sld [smem:[#allocation6 + $0x8c]]  ;;  %s5667_s24 = sld [smem:[#allocation6 + $0x45]] }
 0x1a1   : > { %884 = vrot.lane.b32.xlu0 %v4839_v38, %s9331_s29  ;;  %s5669_s20 = sld [smem:[#allocation6 + $0x69]]  ;;  %s9588_s27 = sld [smem:[#allocation83_spill]] }
 0x1a2   : > { %870 = vrot.lane.b32.xlu1 %v4818_v12, %s9342_s8  ;;  %9470 = sst [smem:[#allocation64_spill]] %s5420_s16  ;;  %s9590_s16 = sld [smem:[#allocation84_spill]] }
 0x1a3   : > { %9439 = sst [smem:[#allocation147_spill]] %s5352_s13  ;;  %s9592_s23 = sld [smem:[#allocation85_spill]] }
 0x1a4   : > { %s9593_s4 = sld [smem:[#allocation86_spill]]  ;;  %s9594_s22 = sld [smem:[#allocation87_spill]] }
 0x1a5   : > { %937 = vrot.lane.b32.xlu0 %v4993_v17, %s9342_s8  ;;  %9345 = sst [smem:[#allocation38_spill]] %s5063_s19  ;;  %s9466_s19 = sld [smem:[#allocation71_spill]] }
 0x1a6   : > { %886 = vrot.lane.b32.xlu1 %v4818_v12, %s9331_s29  ;;  %9570 = sst [smem:[#allocation200_spill]] %s5659_s14  ;;  %s9595_s13 = sld [smem:[#allocation88_spill]] }
 0x1a7   : > { %9576 = sst [smem:[#allocation202_spill]] %s5667_s24  ;;  %s9611_s24 = sld [smem:[#allocation95_spill]] }
 0x1a8   : > { %9578 = sst [smem:[#allocation203_spill]] %s5669_s20  ;;  %s9613_s0 = sld [smem:[#allocation96_spill]] }
 0x1a9   : > { %953 = vrot.lane.b32.xlu0 %v4993_v17, %s9331_s29  ;;  %s9609_s20 = sld [smem:[#allocation94_spill]]  ;;  %s9719_s11 = sld [smem:[#allocation55_spill]] }
 0x1aa   : > { %939 = vrot.lane.b32.xlu1 %v5006_v30, %s9342_s8  ;;  %s9411_s8 = sld [smem:[#allocation60_spill]]  ;;  %s9717_s14 = sld [smem:[#allocation54_spill]] }
 0x1ab   : > { %9419 = sst [smem:[#allocation60_spill]] %s5299_s26  ;;  %s5661_s26 = sld [smem:[#allocation6 + $0x21]] }
 0x1ad   : > { %1943 = vperm.xlu0 %3776, %v1833_v46   ;;  %v1835_v46 = vld [vmem:[%s9401_s18] sm:$0xff] }
 0x1ae   : > { %955 = vrot.lane.b32.xlu1 %v5006_v30, %s9331_s29  ;;  %s5368_s29 = sld [smem:[#allocation6 + $0x17]] }
 0x1af   : > { %v9629_v18 = vstv %s9609_s20 }
 0x1b0   : > { %v9428_v61 = vstv %s9411_s8 }
 0x1b1   : > { %1961 = vperm.xlu0 %3776, %v1835_v46   ;;  %v5325_v36 = vmul.f32 %v9428_v61, %v4736_v40  ;;  %v9434_v61 = vstv %s9375_s5  ;;  %v9440_v40 = vstv %s9402_s25  ;;  %s9445_s5 = sld [smem:[#allocation53_spill]]  ;;  %s5382_s25 = sld [smem:[#allocation6 + $0x3b]]  ;;  %v9454_v46 = vstv %s9411_s8 }
 0x1b2   : > { %v5343_v3 = vmul.f32 %v9434_v61, %v4770_v54  ;;  %v5357_v23 = vmul.f32 %v9440_v40, %v4690_v49  ;;  %v9443_v61 = vstv %s9382_s6  ;;  %v9448_v40 = vstv %s9384_s12  ;;  %s9451_s6 = sld [smem:[#allocation63_spill]]  ;;  %9453 = sst [smem:[#allocation53_spill]] %s5384_s10  ;;  %1948 = vperm.xlu1 %3777, %v1834_v21  }
 0x1b3   : > { %9429 = vst [vmem:[#allocation141_spill] sm:$0xff] %v5325_v36  ;;  %v9446_v36 = vstv %s9409_s28  ;;  %v5389_v14 = vmul.f32 %v9454_v46, %v4690_v49  ;;  %s9458_s12 = sld [smem:[#allocation68_spill]]  ;;  %s5398_s28 = sld [smem:[#allocation6 + $0x83]]  ;;  %v9467_v21 = vstv %s9449_s9 }
 0x1b4   : > { %9436 = vst [vmem:[#allocation145_spill] sm:$0xff] %v5343_v3  ;;  %9442 = vst [vmem:[#allocation148_spill] sm:$0xff] %v5357_v23  ;;  %v5362_v3 = vmul.f32 %v9443_v61, %v4770_v54  ;;  %v5373_v42 = vmul.f32 %v9446_v36, %v4690_v49  ;;  %v5378_v23 = vmul.f32 %v9448_v40, %v4770_v54  ;;  %v9456_v36 = vstv %s9392_s17  ;;  %s9463_s8 = sld [smem:[#allocation70_spill]]  ;;  %9473 = sst [smem:[#allocation68_spill]] %s5427_s30 }
 0x1b5   : > { %9455 = vst [vmem:[#allocation152_spill] sm:$0xff] %v5389_v14  ;;  %s5410_s17 = sld [smem:[#allocation6 + $0x18]]  ;;  %s9489_s9 = sld [smem:[#allocation74_spill]] }
 0x1b6   : > { %9444 = vst [vmem:[#allocation149_spill] sm:$0xff] %v5362_v3  ;;  %9447 = vst [vmem:[#allocation150_spill] sm:$0xff] %v5373_v42  ;;  %v5394_v42 = vmul.f32 %v9456_v36, %v4770_v54  ;;  %v1836_v54 = vld [vmem:[%s9401_s18 + $0x8] sm:$0xff]  ;;  %v5418_v36 = vmul.f32 %v9467_v21, %v4660_v26  ;;  %9478 = sst [smem:[#allocation70_spill]] %s5439_s7  ;;  %s9492_s18 = sld [smem:[#allocation75_spill]] }
 0x1b7   : > { %9450 = vst [vmem:[#allocation151_spill] sm:$0xff] %v5378_v23  ;;  %v5403_v23 = vmul.f32 %v9460_v56, %v4690_v49  ;;  %v9462_v46 = vstv %s9445_s5  ;;  %v9476_v40 = vstv %s9445_s5  ;;  %s5461_s5 = sld [smem:[#allocation6 + $0x1a]]  ;;  %1966 = vperm.xlu1 %3777, %v1836_v54   ;;  %v9507_v54 = vstv %s9482_s3  ;;  %s5515_s7 = sld [smem:[#allocation6 + $0x63]] }
 0x1b8   : > { %9457 = vst [vmem:[#allocation153_spill] sm:$0xff] %v5394_v42  ;;  %v5408_v14 = vmul.f32 %v9462_v46, %v4660_v26  ;;  %9468 = vst [vmem:[#allocation156_spill] sm:$0xff] %v5418_v36  ;;  %v9471_v56 = vstv %s9451_s6  ;;  %v9474_v46 = vstv %s9452_s2  ;;  %v5444_v36 = vmul.f32 %v9467_v21, %v4645_v4  ;;  %s5468_s6 = sld [smem:[#allocation6 + $0x3e]]  ;;  %s5681_s10 = sld [smem:[#allocation6 + $0x23]] }
 0x1b9   : > { %9459 = sst [smem:[#allocation62_spill]] %s5398_s28  ;;  %9461 = vst [vmem:[#allocation154_spill] sm:$0xff] %v5403_v23  ;;  %v5425_v49 = vmul.f32 %v9471_v56, %v4660_v26  ;;  %v5432_v61 = vmul.f32 %v9474_v46, %v4660_v26  ;;  %v5437_v23 = vmul.f32 %v9476_v40, %v4645_v4  ;;  %v9481_v26 = vmov %v9474_v46  ;;  %s9494_s2 = sld [smem:[#allocation76_spill]] }
 0x1ba   : > { %9464 = vst [vmem:[#allocation155_spill] sm:$0xff] %v5408_v14  ;;  %9479 = vst [vmem:[#allocation160_spill] sm:$0xff] %v5444_v36  ;;  %v5454_v46 = vmul.f32 %v9481_v26, %v4645_v4  ;;  %v9484_v40 = vstv %s9458_s12  ;;  %s9509_s12 = sld [smem:[#allocation66_spill]]  ;;  %9572 = sst [smem:[#allocation201_spill]] %s5661_s26 }
 0x1bb   : > { %9465 = sst [smem:[#allocation63_spill]] %s5410_s17  ;;  %9472 = vst [vmem:[#allocation157_spill] sm:$0xff] %v5425_v49  ;;  %9475 = vst [vmem:[#allocation158_spill] sm:$0xff] %v5432_v61  ;;  %v5449_v49 = vmul.f32 %v9471_v56, %v4645_v4  ;;  %v9487_v61 = vstv %s9463_s8  ;;  %v9491_v56 = vstv %s9466_s19  ;;  %v9496_v4 = vstv %s9469_s1  ;;  %s5537_s1 = sld [smem:[#allocation6 + $0x87]] }
 0x1bc   : > { %9477 = vst [vmem:[#allocation159_spill] sm:$0xff] %v5437_v23  ;;  %9483 = vst [vmem:[#allocation162_spill] sm:$0xff] %v5454_v46  ;;  %v5459_v23 = vmul.f32 %v9484_v40, %v4799_v57  ;;  %v5466_v21 = vmul.f32 %v9487_v61, %v4799_v57  ;;  %v5480_v26 = vmul.f32 %v9496_v4, %v4799_v57  ;;  %s5675_s26 = sld [smem:[#allocation6 + $0x8d]]  ;;  %s5683_s17 = sld [smem:[#allocation6 + $0x47]] }
 0x1bd   : > { %9480 = vst [vmem:[#allocation161_spill] sm:$0xff] %v5449_v49  ;;  %9486 = sst [smem:[#allocation71_spill]] %s5461_s5  ;;  %v5473_v49 = vmul.f32 %v9491_v56, %v4799_v57  ;;  %v5485_v61 = vmul.f32 %v9484_v40, %v4933_v53  ;;  %s5489_s5 = sld [smem:[#allocation6 + $0x1b]]  ;;  %v9501_v56 = vstv %s9463_s8  ;;  %v5504_v40 = vmul.f32 %v9496_v4, %v4933_v53 }
 0x1be   : > { %9485 = vst [vmem:[#allocation163_spill] sm:$0xff] %v5459_v23  ;;  %9488 = vst [vmem:[#allocation164_spill] sm:$0xff] %v5466_v21  ;;  %9490 = sst [smem:[#allocation72_spill]] %s5468_s6  ;;  %s5487_s6 = sld [smem:[#allocation6 + $0x86]]  ;;  %v5494_v46 = vmul.f32 %v9501_v56, %v4933_v53 }
 0x1bf   : > { %9493 = vst [vmem:[#allocation165_spill] sm:$0xff] %v5473_v49  ;;  %9497 = vst [vmem:[#allocation166_spill] sm:$0xff] %v5480_v26  ;;  %v9503_v49 = vstv %s9466_s19  ;;  %v5511_v26 = vpop.permute.xlu0 %856  ;;  %s9510_s8 = sld [smem:[#allocation67_spill]]  ;;  %9513 = sst [smem:[#allocation65_spill]] %s5515_s7 }
 0x1c0   : > { %9498 = vst [vmem:[#allocation167_spill] sm:$0xff] %v5485_v61  ;;  %9502 = vst [vmem:[#allocation168_spill] sm:$0xff] %v5494_v46  ;;  %v5499_v57 = vmul.f32 %v9503_v49, %v4933_v53  ;;  %v5509_v61 = vmul.f32 %v9507_v54, %v4922_v60  ;;  %v9514_v49 = vstv %s9489_s9  ;;  %v9516_v53 = vstv %s9492_s18  ;;  %s5539_s19 = sld [smem:[#allocation6 + $0x1e]]  ;;  %s9524_s7 = sld [smem:[#allocation77_spill]] }
 0x1c1   : > { %9506 = vst [vmem:[#allocation170_spill] sm:$0xff] %v5504_v40  ;;  %v5520_v56 = vmul.f32 %v9514_v49, %v4922_v60  ;;  %v5525_v4 = vmul.f32 %v9516_v53, %v4922_v60  ;;  %v9518_v54 = vstv %s9494_s2  ;;  %v9520_v40 = vstv %s9482_s3  ;;  %9522 = sst [smem:[#allocation66_spill]] %s5537_s1  ;;  %s9531_s3 = sld [smem:[#allocation78_spill]] }
 0x1c2   : > { %9505 = vst [vmem:[#allocation169_spill] sm:$0xff] %v5499_v57  ;;  %9508 = vst [vmem:[#allocation171_spill] sm:$0xff] %v5509_v61  ;;  %v5530_v61 = vmul.f32 %v9518_v54, %v4922_v60  ;;  %v5535_v57 = vmul.f32 %v9520_v40, %v4885_v51  ;;  %v5544_v53 = vmul.f32 %v9514_v49, %v4885_v51  ;;  %v9529_v40 = vstv %s9504_s21  ;;  %s5561_s1 = sld [smem:[#allocation6 + $0x42]]  ;;  %s5563_s9 = sld [smem:[#allocation6 + $0x66]] }
 0x1c3   : > { %9500 = sst [smem:[#allocation75_spill]] %s5489_s5  ;;  %s5513_s5 = sld [smem:[#allocation6 + $0x3f]]  ;;  %9515 = vst [vmem:[#allocation172_spill] sm:$0xff] %v5520_v56  ;;  %9517 = vst [vmem:[#allocation173_spill] sm:$0xff] %v5525_v4  ;;  %v9526_v4 = vstv %s9492_s18  ;;  %v9535_v49 = vstv %s9509_s12  ;;  %v9604_v46 = vstv %s9592_s23  ;;  %v9608_v56 = vstv %s9595_s13 }
 0x1c4   : > { %9499 = sst [smem:[#allocation74_spill]] %s5487_s6  ;;  %s9512_s6 = sld [smem:[#allocation69_spill]]  ;;  %9519 = vst [vmem:[#allocation174_spill] sm:$0xff] %v5530_v61  ;;  %9521 = vst [vmem:[#allocation175_spill] sm:$0xff] %v5535_v57  ;;  %v5549_v60 = vmul.f32 %v9526_v4, %v4885_v51  ;;  %v5554_v61 = vmul.f32 %v9518_v54, %v4885_v51  ;;  %v5559_v57 = vmul.f32 %v9529_v40, %v4839_v38 }
 0x1c5   : > { %9525 = vst [vmem:[#allocation176_spill] sm:$0xff] %v5544_v53  ;;  %v5568_v53 = vmul.f32 %v9535_v49, %v4839_v38  ;;  %v9538_v4 = vstv %s9510_s8  ;;  %s5585_s18 = sld [smem:[#allocation6 + $0x8a]]  ;;  %s5587_s2 = sld [smem:[#allocation6 + $0x1d]] }
 0x1c6   : > { %9523 = sst [smem:[#allocation67_spill]] %s5539_s19  ;;  %9527 = vst [vmem:[#allocation177_spill] sm:$0xff] %v5549_v60  ;;  %9528 = vst [vmem:[#allocation178_spill] sm:$0xff] %v5554_v61  ;;  %s9533_s19 = sld [smem:[#allocation79_spill]]  ;;  %v5573_v51 = vmul.f32 %v9538_v4, %v4839_v38 }
 0x1c7   : > { %9530 = vst [vmem:[#allocation179_spill] sm:$0xff] %v5559_v57  ;;  %9537 = vst [vmem:[#allocation180_spill] sm:$0xff] %v5568_v53  ;;  %v9542_v57 = vstv %s9504_s21  ;;  %v5592_v53 = vmul.f32 %v9535_v49, %v4818_v12  ;;  %s5611_s21 = sld [smem:[#allocation6 + $0x41]]  ;;  %s5613_s12 = sld [smem:[#allocation6 + $0x65]]  ;;  %v9554_v49 = vstv %s9531_s3 }
 0x1c8   : > { %9532 = sst [smem:[#allocation69_spill]] %s5561_s1  ;;  %9539 = vst [vmem:[#allocation181_spill] sm:$0xff] %v5573_v51  ;;  %v5583_v61 = vmul.f32 %v9542_v57, %v4818_v12  ;;  %v5597_v51 = vmul.f32 %v9538_v4, %v4818_v12  ;;  %v9550_v57 = vstv %s9524_s7  ;;  %v5618_v4 = vmul.f32 %v9554_v49, %v4993_v17  ;;  %s5640_s8 = sld [smem:[#allocation6 + $0x20]] }
 0x1c9   : > { %9511 = sst [smem:[#allocation76_spill]] %s5513_s5  ;;  %s9536_s5 = sld [smem:[#allocation80_spill]]  ;;  %9546 = vst [vmem:[#allocation185_spill] sm:$0xff] %v5592_v53  ;;  %v9599_v53 = vstv %s9588_s27 }
 0x1ca   : > { %9534 = sst [smem:[#allocation77_spill]] %s5563_s9  ;;  %v9540_v54 = vstv %s9512_s6  ;;  %9543 = vst [vmem:[#allocation183_spill] sm:$0xff] %v5583_v61  ;;  %9547 = vst [vmem:[#allocation186_spill] sm:$0xff] %v5597_v51  ;;  %v5607_v61 = vmul.f32 %v9550_v57, %v4993_v17  ;;  %s5638_s6 = sld [smem:[#allocation6 + $0x89]] }
 0x1cb   : > { %v5578_v40 = vmul.f32 %v9540_v54, %v4839_v38  ;;  %9544 = sst [smem:[#allocation78_spill]] %s5585_s18  ;;  %v9548_v38 = vmov %v9540_v54  ;;  %9555 = vst [vmem:[#allocation191_spill] sm:$0xff] %v5618_v4  ;;  %s9585_s30 = sld [smem:[#allocation81_spill]]  ;;  %v9605_v4 = vstv %s9593_s4 }
 0x1cc   : > { %9545 = sst [smem:[#allocation184_spill]] %s5587_s2  ;;  %v5602_v54 = vmul.f32 %v9548_v38, %v4818_v12  ;;  %9551 = vst [vmem:[#allocation188_spill] sm:$0xff] %v5607_v61  ;;  %v9556_v12 = vstv %s9533_s19  ;;  %s9586_s3 = sld [smem:[#allocation82_spill]] }
 0x1cd   : > { %9541 = vst [vmem:[#allocation182_spill] sm:$0xff] %v5578_v40  ;;  %v5609_v40 = vpop.permute.xlu0 %872  ;;  %9552 = sst [smem:[#allocation189_spill]] %s5611_s21  ;;  %v5623_v38 = vmul.f32 %v9556_v12, %v4993_v17  ;;  %v9564_v12 = vmov %v9554_v49  ;;  %s5689_s19 = sld [smem:[#allocation6 + $0x6b]] }
 0x1ce   : > { %9549 = vst [vmem:[#allocation187_spill] sm:$0xff] %v5602_v54  ;;  %9553 = sst [smem:[#allocation190_spill]] %s5613_s12  ;;  %v9560_v54 = vstv %s9524_s7  ;;  %s5651_s7 = sld [smem:[#allocation6 + $0x44]]  ;;  %v5735_v36 = vmul.f32 %v9605_v4, %v5609_v40 }
 0x1cf   : > { %9557 = vst [vmem:[#allocation192_spill] sm:$0xff] %v5623_v38  ;;  %v9558_v57 = vstv %s9536_s5  ;;  %v5633_v51 = vmul.f32 %v9560_v54, %v5006_v30  ;;  %9563 = sst [smem:[#allocation196_spill]] %s5640_s8  ;;  %s5653_s5 = sld [smem:[#allocation6 + $0x68]] }
 0x1d0   : > { %v5628_v61 = vmul.f32 %v9558_v57, %v4993_v17  ;;  %9562 = sst [smem:[#allocation195_spill]] %s5638_s6  ;;  %v5645_v17 = vmul.f32 %v9564_v12, %v5006_v30  ;;  %s9597_s9 = sld [smem:[#allocation89_spill]]  ;;  %v9601_v12 = vstv %s9590_s16 }
 0x1d1   : > { %9561 = vst [vmem:[#allocation194_spill] sm:$0xff] %v5633_v51  ;;  %9582 = sst [smem:[#allocation204_spill]] %s5675_s26  ;;  %v861_v54 = vpop.permute.xlu0 %860  ;;  %v5716_v51 = vmul.f32 %v9599_v53, %v5511_v26  ;;  %s9600_s8 = sld [smem:[#allocation90_spill]]  ;;  %v5722_v57 = vmul.f32 %v9601_v12, %v5511_v26  ;;  %v5730_v53 = vmul.f32 %v9604_v46, %v5609_v40 }
 0x1d2   : > { %9559 = vst [vmem:[#allocation193_spill] sm:$0xff] %v5628_v61  ;;  %9565 = vst [vmem:[#allocation197_spill] sm:$0xff] %v5645_v17  ;;  %9583 = sst [smem:[#allocation205_spill]] %s5681_s10  ;;  %v859_v17 = vpop.permute.xlu1 %858  ;;  %v9596_v61 = vstv %s9585_s30  ;;  %v9598_v49 = vstv %s9586_s3  ;;  %s9607_s28 = sld [smem:[#allocation93_spill]]  ;;  %v9623_v14 = vstv %s9586_s3 }
 0x1d3   : > { %9584 = sst [smem:[#allocation206_spill]] %s5683_s17  ;;  %v5706_v38 = vmul.f32 %v9596_v61, %v5511_v26  ;;  %v5711_v60 = vmul.f32 %v9598_v49, %v5511_v26  ;;  %v9606_v26 = vstv %s9594_s22  ;;  %v5746_v49 = vmul.f32 %v9608_v56, %v5609_v40  ;;  %s9622_s6 = sld [smem:[#allocation98_spill]] }
 0x1d4   : > { %9566 = sst [smem:[#allocation198_spill]] %s5651_s7  ;;  %s9603_s7 = sld [smem:[#allocation92_spill]]  ;;  %v5740_v12 = vmul.f32 %v9606_v26, %v5609_v40  ;;  %v5773_v4 = vmul.f32 %v9623_v14, %v859_v17  ;;  %v9630_v14 = vstv %s9611_s24 }
 0x1d5   : > { %9567 = sst [smem:[#allocation199_spill]] %s5653_s5  ;;  %s9602_s5 = sld [smem:[#allocation91_spill]]  ;;  %v926_v61 = vpop.permute.xlu0 %925 }
 0x1d6   : > { %9587 = sst [smem:[#allocation81_spill]] %s5689_s19  ;;  %v875_v21 = vpop.permute.xlu1 %874  ;;  %v9610_v23 = vstv %s9597_s9  ;;  %s9624_s17 = sld [smem:[#allocation99_spill]]  ;;  %v5789_v27 = vmul.f32 %v9629_v18, %v926_v61  ;;  %v5793_v29 = vmul.f32 %v9630_v14, %v926_v61  ;;  %v9639_v18 = vstv %s9595_s13 }
 0x1d7   : > { %v5750_v46 = vmul.f32 %v9610_v23, %v861_v54  ;;  %v9614_v42 = vstv %s9600_s8  ;;  %s9620_s26 = sld [smem:[#allocation97_spill]]  ;;  %v9621_v23 = vstv %s9585_s30  ;;  %s9626_s10 = sld [smem:[#allocation100_spill]]  ;;  %v5813_v14 = vmul.f32 %v9639_v18, %v875_v21 }
 0x1d8   : > { %v5756_v26 = vmul.f32 %v9614_v42, %v861_v54  ;;  %v5769_v22 = vmul.f32 %v9621_v23, %v859_v17  ;;  %v9625_v42 = vstv %s9588_s27  ;;  %v9628_v40 = vstv %s9607_s28  ;;  %s9632_s30 = sld [smem:[#allocation102_spill]]  ;;  %s9634_s27 = sld [smem:[#allocation104_spill]] }
 0x1d9   : > { %9612 = vst [vmem:[#allocation207_spill] sm:$0xff] %v5750_v46  ;;  %v5777_v35 = vmul.f32 %v9625_v42, %v859_v17  ;;  %v5785_v23 = vmul.f32 %v9628_v40, %v926_v61  ;;  %v9631_v42 = vstv %s9613_s0  ;;  %v9637_v40 = vstv %s9594_s22  ;;  %s9638_s3 = sld [smem:[#allocation108_spill]]  ;;  %s9647_s22 = sld [smem:[#allocation101_spill]] }
 0x1da   : > { %9615 = vst [vmem:[#allocation208_spill] sm:$0xff] %v5756_v26  ;;  %v9618_v32 = vstv %s9603_s7  ;;  %v5797_v8 = vmul.f32 %v9631_v42, %v926_v61  ;;  %v5809_v58 = vmul.f32 %v9637_v40, %v875_v21  ;;  %v9642_v42 = vstv %s9622_s6  ;;  %s9650_s13 = sld [smem:[#allocation103_spill]]  ;;  %s9704_s19 = sld [smem:[#allocation51_spill]] }
 0x1db   : > { %v9616_v3 = vstv %s9602_s5  ;;  %v5764_v56 = vmul.f32 %v9618_v32, %v861_v54  ;;  %v942_v32 = vpop.permute.xlu0 %941  ;;  %v9649_v43 = vstv %s9597_s9  ;;  %v9652_v18 = vstv %s9600_s8  ;;  %s9668_s9 = sld [smem:[#allocation34_spill]]  ;;  %s9675_s8 = sld [smem:[#allocation109_spill]] }
 0x1dc   : > { %v5760_v30 = vmul.f32 %v9616_v3, %v861_v54  ;;  %v9627_v3 = vstv %s9590_s16  ;;  %v863_v54 = vpop.permute.xlu1 %862  ;;  %s9636_s16 = sld [smem:[#allocation106_spill]]  ;;  %v9644_v26 = vstv %s9624_s17  ;;  %v9655_v46 = vstv %s9602_s5  ;;  %s9665_s5 = sld [smem:[#allocation33_spill]] }
 0x1dd   : > { %9619 = vst [vmem:[#allocation210_spill] sm:$0xff] %v5764_v56  ;;  %v5781_v7 = vmul.f32 %v9627_v3, %v859_v17  ;;  %v9633_v17 = vstv %s9592_s23  ;;  %v9635_v56 = vstv %s9593_s4  ;;  %v9640_v31 = vstv %s9620_s26  ;;  %s9653_s23 = sld [smem:[#allocation105_spill]]  ;;  %s9656_s4 = sld [smem:[#allocation107_spill]] }
 0x1de   : > { %9617 = vst [vmem:[#allocation209_spill] sm:$0xff] %v5760_v30  ;;  %v5801_v3 = vmul.f32 %v9633_v17, %v875_v21  ;;  %v5805_v30 = vmul.f32 %v9635_v56, %v875_v21  ;;  %v5817_v61 = vmul.f32 %v9640_v31, %v942_v32  ;;  %v5821_v17 = vmul.f32 %v9642_v42, %v942_v32  ;;  %s9705_s12 = sld [smem:[#allocation52_spill]]  ;;  %s9707_s21 = sld [smem:[#allocation41_spill]] }
 0x1df   : > { %v5825_v56 = vmul.f32 %v9644_v26, %v942_v32  ;;  %v9646_v10 = vstv %s9626_s10  ;;  %v5833_v21 = vmul.f32 %v9649_v43, %v863_v54  ;;  %v5837_v31 = vmul.f32 %v9652_v18, %v863_v54  ;;  %v825_v39 = vpop.permute.xlu0 %824  ;;  %s9709_s2 = sld [smem:[#allocation42_spill]]  ;;  %s9714_s18 = sld [smem:[#allocation43_spill]] }
 0x1e0   : > { %9641 = vst [vmem:[#allocation211_spill] sm:$0xff] %v5817_v61  ;;  %9643 = vst [vmem:[#allocation212_spill] sm:$0xff] %v5821_v17  ;;  %v5829_v40 = vmul.f32 %v9646_v10, %v942_v32  ;;  %v5841_v42 = vmul.f32 %v9655_v46, %v863_v54  ;;  %v9658_v34 = vstv %s9603_s7  ;;  %v827_v10 = vpop.permute.xlu1 %826  ;;  %v9660_v32 = vstv %s9632_s30  ;;  %s9678_s7 = sld [smem:[#allocation110_spill]]  ;;  %s9686_s30 = sld [smem:[#allocation36_spill]] }
 0x1e1   : > { %9645 = vst [vmem:[#allocation213_spill] sm:$0xff] %v5825_v56  ;;  %9651 = vst [vmem:[#allocation215_spill] sm:$0xff] %v5833_v21  ;;  %v5845_v26 = vmul.f32 %v9658_v34, %v863_v54  ;;  %v962_v43 = vmul.f32 %v9660_v32, %v825_v39  ;;  %v9661_v21 = vstv %s9634_s27  ;;  %v9664_v41 = vmov %v9660_v32  ;;  %s9688_s27 = sld [smem:[#allocation37_spill]] }
 0x1e2   : > { %9648 = vst [vmem:[#allocation214_spill] sm:$0xff] %v5829_v40  ;;  %9654 = vst [vmem:[#allocation216_spill] sm:$0xff] %v5837_v31  ;;  %v1181_v25 = vmul.f32 %v9661_v21, %v825_v39  ;;  %v9662_v1 = vstv %s9636_s16  ;;  %v9663_v31 = vstv %s9638_s3  ;;  %v963_v46 = vmul.f32 %v9664_v41, %v827_v10  ;;  %s9689_s16 = sld [smem:[#allocation38_spill]]  ;;  %s9690_s3 = sld [smem:[#allocation39_spill]] }
 0x1e3   : > { %9657 = vst [vmem:[#allocation217_spill] sm:$0xff] %v5841_v42  ;;  %9659 = vst [vmem:[#allocation218_spill] sm:$0xff] %v5845_v26  ;;  %v1400_v18 = vmul.f32 %v9662_v1, %v825_v39  ;;  %v1619_v45 = vmul.f32 %v9663_v31, %v825_v39  ;;  %v9666_v42 = vmov %v9661_v21  ;;  %v9667_v34 = vmov %v9662_v1  ;;  %s9716_s1 = sld [smem:[#allocation45_spill]] }
 0x1e4   : > { %v1182_v37 = vmul.f32 %v9666_v42, %v827_v10  ;;  %v1401_v54 = vmul.f32 %v9667_v34, %v827_v10  ;;  %v9669_v26 = vmov %v9663_v31  ;;  %v9670_v56 = vstv %s9647_s22  ;;  %v843_v24 = vpop.permute.xlu1 %842  ;;  %s9691_s22 = sld [smem:[#allocation35_spill]] }
 0x1e5   : > { %v1620_v40 = vmul.f32 %v9669_v26, %v827_v10  ;;  %v964_v55 = vadd.f32 %v962_v43, %v9670_v56  ;;  %v9671_v32 = vstv %s9650_s13  ;;  %v9672_v21 = vstv %s9653_s23  ;;  %v841_v10 = vpop.permute.xlu0 %840  ;;  %s9692_s13 = sld [smem:[#allocation40_spill]]  ;;  %s9693_s23 = sld [smem:[#allocation44_spill]] }
 0x1e6   : > { %v1183_v11 = vadd.f32 %v1181_v25, %v9671_v32  ;;  %v1402_v1 = vadd.f32 %v1400_v18, %v9672_v21  ;;  %v9673_v48 = vstv %s9656_s4  ;;  %v9674_v31 = vmov %v9670_v56  ;;  %s9695_s4 = sld [smem:[#allocation46_spill]] }
 0x1e7   : > { %v1621_v39 = vadd.f32 %v1619_v45, %v9673_v48  ;;  %v965_v41 = vadd.f32 %v963_v46, %v9674_v31  ;;  %v9676_v5 = vmov %v9671_v32  ;;  %v9677_v17 = vmov %v9672_v21 }
 0x1e8   : > { %v1184_v42 = vadd.f32 %v1182_v37, %v9676_v5  ;;  %v1403_v34 = vadd.f32 %v1401_v54, %v9677_v17  ;;  %v9679_v61 = vmov %v9673_v48  ;;  %v970_v56 = vadd.f32 %v5059_v28, %v964_v55 }
 0x1e9   : > { %v1622_v26 = vadd.f32 %v1620_v40, %v9679_v61  ;;  %v9680_v25 = vstv %s9665_s5  ;;  %v1189_v18 = vadd.f32 %v5070_v0, %v1183_v11  ;;  %v9681_v32 = vstv %s9668_s9  ;;  %s9697_s5 = sld [smem:[#allocation47_spill]]  ;;  %s9698_s9 = sld [smem:[#allocation48_spill]] }
 0x1ea   : > { %v974_v43 = vmul.f32 %v9680_v25, %v841_v10  ;;  %v1193_v45 = vmul.f32 %v9681_v32, %v841_v10  ;;  %v971_v48 = vadd.f32 %v5019_v47, %v965_v41  ;;  %v9682_v46 = vmov %v9680_v25  ;;  %v877_v47 = vpop.permute.xlu0 %876 }
 0x1eb   : > { %v975_v5 = vmul.f32 %v9682_v46, %v843_v24  ;;  %v1190_v37 = vadd.f32 %v5027_v6, %v1184_v42  ;;  %v9683_v17 = vmov %v9681_v32  ;;  %v1409_v61 = vadd.f32 %v5035_v15, %v1403_v34  ;;  %v831_v15 = vpop.permute.xlu1 %830 }
 0x1ec   : > { %v1194_v54 = vmul.f32 %v9683_v17, %v843_v24  ;;  %v9684_v40 = vstv %s9675_s8  ;;  %v1628_v55 = vadd.f32 %v5044_v16, %v1622_v26  ;;  %v9685_v28 = vstv %s9678_s7  ;;  %s9700_s8 = sld [smem:[#allocation49_spill]]  ;;  %s9703_s7 = sld [smem:[#allocation50_spill]] }
 0x1ed   : > { %v1413_v21 = vmul.f32 %v9684_v40, %v843_v24  ;;  %v1632_v31 = vmul.f32 %v9685_v28, %v843_v24  ;;  %v977_v0 = vadd.f32 %v975_v5, %v971_v48  ;;  %v976_v25 = vadd.f32 %v974_v43, %v970_v56 }
 0x1ee   : > { %v1196_v11 = vadd.f32 %v1194_v54, %v1190_v37  ;;  %v1195_v32 = vadd.f32 %v1193_v45, %v1189_v18  ;;  %v1408_v6 = vadd.f32 %v5075_v33, %v1402_v1  ;;  %v9687_v42 = vmov %v9684_v40 }
 0x1ef   : > { %v1415_v41 = vadd.f32 %v1413_v21, %v1409_v61  ;;  %v1634_v46 = vadd.f32 %v1632_v31, %v1628_v55  ;;  %v1412_v17 = vmul.f32 %v9687_v42, %v841_v10  ;;  %v983_v16 = vadd.f32 %v5769_v22, %v977_v0 }
 0x1f0   : > { %v1202_v24 = vadd.f32 %v5773_v4, %v1196_v11  ;;  %v982_v34 = vadd.f32 %v5706_v38, %v976_v25  ;;  %v1201_v26 = vadd.f32 %v5711_v60, %v1195_v32  ;;  %v1627_v1 = vadd.f32 %v5080_v20, %v1621_v39 }
 0x1f1   : > { %v1421_v56 = vadd.f32 %v5777_v35, %v1415_v41  ;;  %v1640_v43 = vadd.f32 %v5781_v7, %v1634_v46  ;;  %v1414_v33 = vadd.f32 %v1412_v17, %v1408_v6  ;;  %v9694_v45 = vmov %v9685_v28  ;;  %v930_v35 = vpop.permute.xlu0 %929 }
 0x1f2   : > { %v988_v18 = vadd.f32 %v4977_v59, %v982_v34  ;;  %v1207_v22 = vadd.f32 %v4982_v19, %v1201_v26  ;;  %v1631_v4 = vmul.f32 %v9694_v45, %v841_v10  ;;  %v9696_v38 = vstv %s9686_s30  ;;  %v847_v10 = vpop.permute.xlu1 %846 }
 0x1f3   : > { %v5913_v48 = vmul.f32 %v9696_v38, %v831_v15  ;;  %v1420_v7 = vadd.f32 %v5716_v51, %v1414_v33  ;;  %v9699_v60 = vstv %s9688_s27  ;;  %v9701_v39 = vstv %s9689_s16 }
 0x1f4   : > { %v5918_v20 = vmul.f32 %v9699_v60, %v831_v15  ;;  %v5922_v59 = vmul.f32 %v9701_v39, %v831_v15  ;;  %v9702_v5 = vstv %s9690_s3  ;;  %v994_v37 = vadd.f32 %v5730_v53, %v988_v18 }
 0x1f5   : > { %v5926_v19 = vmul.f32 %v9702_v5, %v831_v15  ;;  %v1213_v54 = vadd.f32 %v5735_v36, %v1207_v22  ;;  %v1633_v61 = vadd.f32 %v1631_v4, %v1627_v1  ;;  %v9706_v51 = vstv %s9691_s22  ;;  %v946_v42 = vpop.permute.xlu0 %945  ;;  %s9790_s22 = sld [smem:[#allocation62_spill]] }
 0x1f6   : > { %v5932_v40 = vmul.f32 %v9706_v51, %v877_v47  ;;  %v1426_v21 = vadd.f32 %v5049_v62, %v1420_v7  ;;  %v9708_v55 = vstv %s9692_s13  ;;  %v9710_v31 = vstv %s9693_s23  ;;  %v879_v1 = vpop.permute.xlu1 %878  ;;  %s9879_s13 = sld [smem:[#allocation66_spill]]  ;;  %s9880_s23 = sld [smem:[#allocation67_spill]] }
 0x1f7   : > { %v5937_v28 = vmul.f32 %v9708_v55, %v877_v47  ;;  %v5941_v0 = vmul.f32 %v9710_v31, %v877_v47  ;;  %v9711_v11 = vstv %s9695_s4  ;;  %v1639_v36 = vadd.f32 %v5722_v57, %v1633_v61  ;;  %s9882_s4 = sld [smem:[#allocation69_spill]] }
 0x1f8   : > { %v5945_v53 = vmul.f32 %v9711_v11, %v877_v47  ;;  %v9712_v25 = vstv %s9697_s5  ;;  %v9713_v62 = vstv %s9698_s9  ;;  %v9715_v46 = vstv %s9700_s8 }
 0x1f9   : > { %v5950_v32 = vmul.f32 %v9712_v25, %v847_v10  ;;  %v5954_v41 = vmul.f32 %v9713_v62, %v847_v10  ;;  %v5958_v6 = vmul.f32 %v9715_v46, %v847_v10  ;;  %v1432_v47 = vadd.f32 %v5740_v12, %v1426_v21  ;;  %v829_v46 = vpop.permute.xlu0 %828 }
 0x1fa   : > { %v9718_v17 = vstv %s9703_s7  ;;  %v9720_v57 = vstv %s9704_s19  ;;  %v9721_v26 = vstv %s9705_s12  ;;  %v1645_v18 = vadd.f32 %v5054_v50, %v1639_v36 }
 0x1fb   : > { %v5963_v15 = vmul.f32 %v9718_v17, %v847_v10  ;;  %v5967_v34 = vmul.f32 %v9720_v57, %v930_v35  ;;  %v5971_v33 = vmul.f32 %v9721_v26, %v930_v35  ;;  %v9722_v22 = vstv %s9707_s21  ;;  %v928_v17 = vpop.permute.xlu1 %927 }
 0x1fc   : > { %v5976_v45 = vmul.f32 %v9722_v22, %v930_v35  ;;  %v9723_v4 = vstv %s9709_s2  ;;  %v9724_v12 = vmov %v9706_v51  ;;  %v9725_v60 = vmov %v9708_v55 }
 0x1fd   : > { %v5980_v38 = vmul.f32 %v9723_v4, %v930_v35  ;;  %v5984_v7 = vmul.f32 %v9724_v12, %v879_v1  ;;  %v5988_v39 = vmul.f32 %v9725_v60, %v879_v1  ;;  %v9726_v5 = vmov %v9710_v31 }
 0x1fe   : > { %v5992_v10 = vmul.f32 %v9726_v5, %v879_v1  ;;  %v9727_v61 = vmov %v9711_v11  ;;  %v9728_v51 = vstv %s9714_s18  ;;  %v1651_v35 = vadd.f32 %v5746_v49, %v1645_v18 }
 0x1ff   : > { %v5996_v50 = vmul.f32 %v9727_v61, %v879_v1  ;;  %v6000_v21 = vmul.f32 %v9728_v51, %v946_v42  ;;  %v9729_v55 = vstv %s9716_s1  ;;  %v9730_v11 = vstv %s9717_s14 }
 0x200   : > { %v6005_v31 = vmul.f32 %v9729_v55, %v946_v42  ;;  %v6009_v36 = vmul.f32 %v9730_v11, %v946_v42  ;;  %v9731_v25 = vstv %s9719_s11  ;;  %v989_v57 = vadd.f32 %v5089_v52, %v983_v16 }
 0x201   : > { %v6013_v62 = vmul.f32 %v9731_v25, %v946_v42  ;;  %v1208_v26 = vadd.f32 %v5098_v2, %v1202_v24  ;;  %v1427_v1 = vadd.f32 %v5103_v44, %v1421_v56  ;;  %v1646_v49 = vadd.f32 %v5108_v13, %v1640_v43 }
 0x202   : > { %v9732_v18 = vstv %s9607_s28  ;;  %v9733_v4 = vstv %s9609_s20  ;;  %v9734_v60 = vstv %s9611_s24  ;;  %v9735_v42 = vstv %s9613_s0  ;;  %s9763_s20 = sld [smem:[#allocation57_spill]]  ;;  %s9770_s24 = sld [smem:[#allocation59_spill]] }
 0x203   : > { %v999_v22 = vmul.f32 %v9732_v18, %v928_v17  ;;  %v1218_v12 = vmul.f32 %v9733_v4, %v928_v17  ;;  %v1437_v5 = vmul.f32 %v9734_v60, %v928_v17  ;;  %v1656_v61 = vmul.f32 %v9735_v42, %v928_v17  ;;  %v9744_v42 = vld [vmem:[#allocation112_spill] sm:$0xff]  ;;  %s9772_s0 = sld [smem:[#allocation60_spill]]  ;;  %s9774_s28 = sld [smem:[#allocation61_spill]] }
 0x204   : > { %v995_v51 = vadd.f32 %v5801_v3, %v989_v57  ;;  %v1214_v55 = vadd.f32 %v5805_v30, %v1208_v26  ;;  %v1433_v52 = vadd.f32 %v5809_v58, %v1427_v1  ;;  %v1652_v2 = vadd.f32 %v5813_v14, %v1646_v49  ;;  %v944_v57 = vpop.permute.xlu1 %943  ;;  %v845_v26 = vpop.permute.xlu0 %844  ;;  %v9740_v49 = vld [vmem:[#allocation114_spill] sm:$0xff] }
 0x205   : > { %v1000_v44 = vadd.f32 %v5785_v23, %v994_v37  ;;  %v9736_v13 = vstv %s9686_s30  ;;  %v1219_v24 = vadd.f32 %v5789_v27, %v1213_v54  ;;  %v9737_v56 = vstv %s9688_s27  ;;  %s9779_s30 = sld [smem:[#allocation143_spill]]  ;;  %s9781_s27 = sld [smem:[#allocation146_spill]] }
 0x206   : > { %v1016_v16 = vmul.f32 %v9736_v13, %v829_v46  ;;  %v1235_v43 = vmul.f32 %v9737_v56, %v829_v46  ;;  %v1001_v11 = vadd.f32 %v999_v22, %v995_v51  ;;  %v1220_v25 = vadd.f32 %v1218_v12, %v1214_v55  ;;  %v9742_v12 = vld [vmem:[#allocation211_spill] sm:$0xff] }
 0x207   : > { %v1439_v3 = vadd.f32 %v1437_v5, %v1433_v52  ;;  %v1658_v17 = vadd.f32 %v1656_v61, %v1652_v2  ;;  %v1006_v30 = vadd.f32 %v5113_v9, %v1000_v44  ;;  %v1225_v58 = vadd.f32 %v5122_v63, %v1219_v24  ;;  %v9743_v5 = vld [vmem:[#allocation212_spill] sm:$0xff]  ;;  %v9745_v61 = vld [vmem:[#allocation116_spill] sm:$0xff]  ;;  %v9748_v52 = vld [vmem:[#allocation118_spill] sm:$0xff] }
 0x208   : > { %v1438_v14 = vadd.f32 %v5793_v29, %v1432_v47  ;;  %v9738_v23 = vstv %s9689_s16  ;;  %v1657_v1 = vadd.f32 %v5797_v8, %v1651_v35  ;;  %v9739_v27 = vstv %s9690_s3  ;;  %v9746_v47 = vld [vmem:[#allocation113_spill] sm:$0xff]  ;;  %v835_v2 = vpop.permute.xlu1 %834  ;;  %v9749_v24 = vld [vmem:[#allocation213_spill] sm:$0xff]  ;;  %s9784_s16 = sld [smem:[#allocation147_spill]]  ;;  %s9788_s3 = sld [smem:[#allocation53_spill]] }
 0x209   : > { %v1454_v37 = vmul.f32 %v9738_v23, %v829_v46  ;;  %v1673_v54 = vmul.f32 %v9739_v27, %v829_v46  ;;  %v1007_v18 = vadd.f32 %v9740_v49, %v1001_v11  ;;  %v9741_v22 = vstv %s9620_s26  ;;  %s9762_s26 = sld [smem:[#allocation56_spill]] }
 0x20a   : > { %v1011_v4 = vmul.f32 %v9741_v22, %v944_v57  ;;  %v1012_v60 = vadd.f32 %v9742_v12, %v1006_v30  ;;  %v1231_v9 = vadd.f32 %v9743_v5, %v1225_v58  ;;  %v1444_v63 = vadd.f32 %v9744_v42, %v1438_v14  ;;  %v9751_v58 = vld [vmem:[#allocation214_spill] sm:$0xff]  ;;  %v865_v12 = vpop.permute.xlu0 %864 }
 0x20b   : > { %v1226_v29 = vadd.f32 %v9745_v61, %v1220_v25  ;;  %v1663_v51 = vadd.f32 %v9746_v47, %v1657_v1  ;;  %v9747_v8 = vstv %s9622_s6  ;;  %v1445_v46 = vadd.f32 %v9748_v52, %v1439_v3  ;;  %v9752_v1 = vld [vmem:[#allocation120_spill] sm:$0xff]  ;;  %s9778_s6 = sld [smem:[#allocation142_spill]] }
 0x20c   : > { %v1013_v55 = vadd.f32 %v1011_v4, %v1007_v18  ;;  %v1230_v35 = vmul.f32 %v9747_v8, %v944_v57  ;;  %v1018_v44 = vadd.f32 %v1016_v16, %v1012_v60  ;;  %v1237_v13 = vadd.f32 %v1235_v43, %v1231_v9  ;;  %v9754_v4 = vld [vmem:[#allocation122_spill] sm:$0xff]  ;;  %v9755_v60 = vld [vmem:[#allocation115_spill] sm:$0xff] }
 0x20d   : > { %v1450_v56 = vadd.f32 %v9749_v24, %v1444_v63  ;;  %v9750_v11 = vstv %s9624_s17  ;;  %v1669_v14 = vadd.f32 %v9751_v58, %v1663_v51  ;;  %v1664_v27 = vadd.f32 %v9752_v1, %v1658_v17  ;;  %v9757_v17 = vld [vmem:[#allocation124_spill] sm:$0xff]  ;;  %v9769_v1 = vld [vmem:[#allocation121_spill] sm:$0xff]  ;;  %s9775_s17 = sld [smem:[#allocation139_spill]] }
 0x20e   : > { %v1449_v30 = vmul.f32 %v9750_v11, %v944_v57  ;;  %v1019_v25 = vadd.f32 %v5913_v48, %v1013_v55  ;;  %v1232_v23 = vadd.f32 %v1230_v35, %v1226_v29  ;;  %v9753_v22 = vstv %s9626_s10  ;;  %v9759_v55 = vld [vmem:[#allocation117_spill] sm:$0xff]  ;;  %v9760_v35 = vld [vmem:[#allocation126_spill] sm:$0xff]  ;;  %v9765_v11 = vld [vmem:[#allocation207_spill] sm:$0xff]  ;;  %s9766_s10 = sld [smem:[#allocation58_spill]] }
 0x20f   : > { %v1456_v49 = vadd.f32 %v1454_v37, %v1450_v56  ;;  %v1668_v3 = vmul.f32 %v9753_v22, %v944_v57  ;;  %v1024_v16 = vadd.f32 %v9754_v4, %v1018_v44  ;;  %v1675_v43 = vadd.f32 %v1673_v54, %v1669_v14  ;;  %v851_v57 = vpop.permute.xlu1 %850  ;;  %v881_v22 = vpop.permute.xlu0 %880 }
 0x210   : > { %v1451_v18 = vadd.f32 %v1449_v30, %v1445_v46  ;;  %v1025_v5 = vadd.f32 %v9755_v60, %v1019_v25  ;;  %v1238_v9 = vadd.f32 %v5918_v20, %v1232_v23  ;;  %v9756_v42 = vstv %s9697_s5  ;;  %v9761_v46 = vld [vmem:[#allocation119_spill] sm:$0xff]  ;;  %s9883_s5 = sld [smem:[#allocation77_spill]] }
 0x211   : > { %v1028_v63 = vmul.f32 %v9756_v42, %v845_v26  ;;  %v1670_v61 = vadd.f32 %v1668_v3, %v1664_v27  ;;  %v1243_v37 = vadd.f32 %v9757_v17, %v1237_v13  ;;  %v9758_v29 = vstv %s9698_s9  ;;  %v9773_v3 = vld [vmem:[#allocation123_spill] sm:$0xff]  ;;  %v9782_v42 = vld [vmem:[#allocation209_spill] sm:$0xff]  ;;  %s9884_s9 = sld [smem:[#allocation78_spill]] }
 0x212   : > { %v1457_v48 = vadd.f32 %v5922_v59, %v1451_v18  ;;  %v1247_v47 = vmul.f32 %v9758_v29, %v845_v26  ;;  %v1031_v51 = vadd.f32 %v5950_v32, %v1025_v5  ;;  %v1244_v54 = vadd.f32 %v9759_v55, %v1238_v9  ;;  %v9767_v32 = vld [vmem:[#allocation128_spill] sm:$0xff]  ;;  %v9780_v5 = vld [vmem:[#allocation125_spill] sm:$0xff]  ;;  %v9785_v29 = vld [vmem:[#allocation210_spill] sm:$0xff] }
 0x213   : > { %v1030_v8 = vadd.f32 %v1028_v63, %v1024_v16  ;;  %v1462_v52 = vadd.f32 %v9760_v35, %v1456_v49  ;;  %v1676_v59 = vadd.f32 %v5926_v19, %v1670_v61  ;;  %v9764_v24 = vstv %s9700_s8  ;;  %v9771_v49 = vld [vmem:[#allocation208_spill] sm:$0xff]  ;;  %v867_v17 = vpop.permute.xlu1 %866  ;;  %s9903_s8 = sld [smem:[#allocation184_spill]] }
 0x214   : > { %v1463_v20 = vadd.f32 %v9761_v46, %v1457_v48  ;;  %v1249_v44 = vadd.f32 %v1247_v47, %v1243_v37  ;;  %v1466_v56 = vmul.f32 %v9764_v24, %v845_v26  ;;  %v1250_v13 = vadd.f32 %v5954_v41, %v1244_v54 }
 0x215   : > { %v1036_v30 = vadd.f32 %v9765_v11, %v1030_v8  ;;  %v1681_v58 = vadd.f32 %v9767_v32, %v1675_v43  ;;  %v9768_v14 = vstv %s9703_s7  ;;  %v1682_v27 = vadd.f32 %v9769_v1, %v1676_v59  ;;  %s9905_s7 = sld [smem:[#allocation189_spill]] }
 0x216   : > { %v1685_v25 = vmul.f32 %v9768_v14, %v845_v26  ;;  %v1469_v23 = vadd.f32 %v5958_v6, %v1463_v20  ;;  %v1255_v19 = vadd.f32 %v9771_v49, %v1249_v44  ;;  %v1468_v18 = vadd.f32 %v1466_v56, %v1462_v52  ;;  %v9789_v52 = vld [vmem:[#allocation127_spill] sm:$0xff] }
 0x217   : > { %v1042_v41 = vadd.f32 %v9773_v3, %v1036_v30  ;;  %v9776_v16 = vstv %s9762_s26  ;;  %v9777_v43 = vstv %s9763_s20  ;;  %v6098_v6 = vadd.f32 %v5963_v15, %v1682_v27 }
 0x218   : > { %v1687_v4 = vadd.f32 %v1685_v25, %v1681_v58  ;;  %v6091_v60 = vmul.f32 %v9776_v16, %v835_v2  ;;  %v6095_v26 = vmul.f32 %v9777_v43, %v835_v2  ;;  %v1261_v9 = vadd.f32 %v9780_v5, %v1255_v19 }
 0x219   : > { %v1474_v63 = vadd.f32 %v9782_v42, %v1468_v18  ;;  %v9783_v48 = vstv %s9766_s10  ;;  %v1048_v37 = vadd.f32 %v5932_v40, %v1042_v41  ;;  %v9786_v55 = vstv %s9770_s24 }
 0x21a   : > { %v6104_v61 = vmul.f32 %v9783_v48, %v835_v2  ;;  %v1693_v47 = vadd.f32 %v9785_v29, %v1687_v4  ;;  %v6110_v54 = vmul.f32 %v9786_v55, %v835_v2  ;;  %v9787_v15 = vstv %s9772_s0  ;;  %v9793_v2 = vld [vmem:[#allocation129_spill] sm:$0xff]  ;;  %v932_v55 = vpop.permute.xlu1 %931  ;;  %s9931_s0 = sld [smem:[#allocation199_spill]] }
 0x21b   : > { %v6114_v8 = vmul.f32 %v9787_v15, %v865_v12  ;;  %v1267_v35 = vadd.f32 %v5937_v28, %v1261_v9  ;;  %v1480_v46 = vadd.f32 %v9789_v52, %v1474_v63  ;;  %v9791_v20 = vstv %s9774_s28  ;;  %s9934_s28 = sld [smem:[#allocation200_spill]] }
 0x21c   : > { %v6120_v59 = vmul.f32 %v9791_v20, %v865_v12  ;;  %v9792_v40 = vstv %s9775_s17  ;;  %v1699_v24 = vadd.f32 %v9793_v2, %v1693_v47  ;;  %v9794_v56 = vstv %s9778_s6  ;;  %s6375_s17 = sld [smem:[#allocation6 + $0x8f]]  ;;  %s9939_s6 = sld [smem:[#allocation201_spill]] }
 0x21d   : > { %v6124_v44 = vmul.f32 %v9792_v40, %v865_v12  ;;  %v6129_v11 = vmul.f32 %v9794_v56, %v865_v12  ;;  %v9795_v30 = vstv %s9779_s30  ;;  %v9796_v32 = vstv %s9781_s27  ;;  %v833_v12 = vpop.permute.xlu0 %832 }
 0x21e   : > { %v6133_v28 = vmul.f32 %v9795_v30, %v851_v57  ;;  %v6137_v58 = vmul.f32 %v9796_v32, %v851_v57  ;;  %v1486_v14 = vadd.f32 %v5941_v0, %v1480_v46  ;;  %v9797_v25 = vstv %s9784_s16 }
 0x21f   : > { %v6142_v1 = vmul.f32 %v9797_v25, %v851_v57  ;;  %v9798_v27 = vstv %s5366_s15  ;;  %v9799_v19 = vstv %s5368_s29  ;;  %v1705_v3 = vadd.f32 %v5945_v53, %v1699_v24 }
 0x220   : > { %v6146_v49 = vmul.f32 %v9798_v27, %v851_v57  ;;  %v6150_v18 = vmul.f32 %v9799_v19, %v881_v22  ;;  %v9800_v41 = vstv %s5382_s25  ;;  %v9801_v16 = vstv %s9788_s3  ;;  %v9812_v19 = vld [vmem:[#allocation131_spill] sm:$0xff] }
 0x221   : > { %v6155_v4 = vmul.f32 %v9800_v41, %v881_v22  ;;  %v6159_v0 = vmul.f32 %v9801_v16, %v881_v22  ;;  %v9802_v43 = vstv %s9790_s22  ;;  %v9803_v9 = vmov %v9787_v15 }
 0x222   : > { %v6163_v5 = vmul.f32 %v9802_v43, %v881_v22  ;;  %v6167_v57 = vmul.f32 %v9803_v9, %v867_v17  ;;  %v9804_v42 = vmov %v9791_v20  ;;  %v9805_v48 = vmov %v9792_v40  ;;  %v9816_v9 = vld [vmem:[#allocation133_spill] sm:$0xff] }
 0x223   : > { %v6171_v63 = vmul.f32 %v9804_v42, %v867_v17  ;;  %v6175_v29 = vmul.f32 %v9805_v48, %v867_v17  ;;  %v9806_v53 = vmov %v9794_v56  ;;  %v1054_v15 = vadd.f32 %v5967_v34, %v1048_v37  ;;  %v9813_v34 = vld [vmem:[#allocation215_spill] sm:$0xff] }
 0x224   : > { %v6179_v47 = vmul.f32 %v9806_v53, %v867_v17  ;;  %v9807_v52 = vstv %s9762_s26  ;;  %v1273_v46 = vadd.f32 %v5971_v33, %v1267_v35  ;;  %v9808_v20 = vstv %s9763_s20  ;;  %v9811_v17 = vld [vmem:[#allocation130_spill] sm:$0xff]  ;;  %v9815_v33 = vld [vmem:[#allocation132_spill] sm:$0xff]  ;;  %s9913_s26 = sld [smem:[#allocation190_spill]]  ;;  %s9916_s20 = sld [smem:[#allocation195_spill]] }
 0x225   : > { %v1070_v22 = vmul.f32 %v9807_v52, %v833_v12  ;;  %v1289_v40 = vmul.f32 %v9808_v20, %v833_v12  ;;  %v1492_v2 = vadd.f32 %v5976_v45, %v1486_v14  ;;  %v9809_v24 = vstv %s9766_s10  ;;  %v9817_v45 = vld [vmem:[#allocation216_spill] sm:$0xff]  ;;  %v9820_v52 = vld [vmem:[#allocation217_spill] sm:$0xff]  ;;  %s9926_s10 = sld [smem:[#allocation196_spill]] }
 0x226   : > { %v1508_v56 = vmul.f32 %v9809_v24, %v833_v12  ;;  %v1711_v30 = vadd.f32 %v5980_v38, %v1705_v3  ;;  %v9810_v32 = vstv %s9770_s24  ;;  %v1060_v27 = vadd.f32 %v9811_v17, %v1054_v15  ;;  %v9819_v3 = vld [vmem:[#allocation134_spill] sm:$0xff]  ;;  %s9928_s24 = sld [smem:[#allocation198_spill]] }
 0x227   : > { %v1727_v25 = vmul.f32 %v9810_v32, %v833_v12  ;;  %v1279_v41 = vadd.f32 %v9812_v19, %v1273_v46  ;;  %v1037_v37 = vadd.f32 %v9813_v34, %v1031_v51  ;;  %v9814_v16 = vstv %s9704_s19  ;;  %v849_v19 = vpop.permute.xlu0 %848  ;;  %s9837_s19 = sld [smem:[#allocation63_spill]] }
 0x228   : > { %v1053_v43 = vmul.f32 %v9814_v16, %v932_v55  ;;  %v1498_v35 = vadd.f32 %v9815_v33, %v1492_v2  ;;  %v1717_v42 = vadd.f32 %v9816_v9, %v1711_v30  ;;  %v1256_v14 = vadd.f32 %v9817_v45, %v1250_v13  ;;  %v9821_v2 = vld [vmem:[#allocation135_spill] sm:$0xff] }
 0x229   : > { %v9818_v48 = vstv %s9705_s12  ;;  %v1066_v38 = vadd.f32 %v6000_v21, %v1060_v27  ;;  %v1285_v12 = vadd.f32 %v6005_v31, %v1279_v41  ;;  %v1043_v15 = vadd.f32 %v9819_v3, %v1037_v37  ;;  %v9823_v27 = vld [vmem:[#allocation136_spill] sm:$0xff]  ;;  %v948_v41 = vpop.permute.xlu1 %947  ;;  %s9877_s12 = sld [smem:[#allocation65_spill]] }
 0x22a   : > { %v1272_v53 = vmul.f32 %v9818_v48, %v932_v55  ;;  %v1475_v46 = vadd.f32 %v9820_v52, %v1469_v23  ;;  %v1504_v51 = vadd.f32 %v6009_v36, %v1498_v35  ;;  %v1723_v20 = vadd.f32 %v6013_v62, %v1717_v42  ;;  %v9824_v62 = vld [vmem:[#allocation218_spill] sm:$0xff]  ;;  %v9827_v42 = vld [vmem:[#allocation137_spill] sm:$0xff] }
 0x22b   : > { %v1262_v24 = vadd.f32 %v9821_v2, %v1256_v14  ;;  %v9822_v30 = vstv %s9707_s21  ;;  %v1072_v13 = vadd.f32 %v1070_v22, %v1066_v38  ;;  %v1291_v17 = vadd.f32 %v1289_v40, %v1285_v12  ;;  %v9833_v52 = vld [vmem:[#allocation144_spill] sm:$0xff]  ;;  %s9876_s21 = sld [smem:[#allocation76_spill]] }
 0x22c   : > { %v1491_v32 = vmul.f32 %v9822_v30, %v932_v55  ;;  %v1049_v21 = vadd.f32 %v5984_v7, %v1043_v15  ;;  %v1481_v31 = vadd.f32 %v9823_v27, %v1475_v46  ;;  %v1510_v23 = vadd.f32 %v1508_v56, %v1504_v51  ;;  %v9826_v7 = vld [vmem:[#allocation138_spill] sm:$0xff] }
 0x22d   : > { %v1729_v36 = vadd.f32 %v1727_v25, %v1723_v20  ;;  %v1268_v34 = vadd.f32 %v5988_v39, %v1262_v24  ;;  %v1694_v37 = vadd.f32 %v9824_v62, %v6098_v6  ;;  %v9825_v40 = vstv %s9709_s2  ;;  %v9829_v25 = vld [vmem:[#allocation140_spill] sm:$0xff]  ;;  %v9831_v6 = vld [vmem:[#allocation141_spill] sm:$0xff]  ;;  %v9835_v24 = vld [vmem:[#allocation145_spill] sm:$0xff]  ;;  %s9872_s2 = sld [smem:[#allocation75_spill]] }
 0x22e   : > { %v1055_v16 = vadd.f32 %v1053_v43, %v1049_v21  ;;  %v1487_v22 = vadd.f32 %v5992_v10, %v1481_v31  ;;  %v1710_v33 = vmul.f32 %v9825_v40, %v932_v55  ;;  %v1078_v35 = vadd.f32 %v9826_v7, %v1072_v13  ;;  %v883_v21 = vpop.permute.xlu1 %882  ;;  %v9841_v40 = vld [vmem:[#allocation151_spill] sm:$0xff] }
 0x22f   : > { %v1274_v9 = vadd.f32 %v1272_v53, %v1268_v34  ;;  %v1700_v45 = vadd.f32 %v9827_v42, %v1694_v37  ;;  %v9828_v14 = vstv %s9779_s30  ;;  %v1297_v48 = vadd.f32 %v9829_v25, %v1291_v17  ;;  %v934_v17 = vpop.permute.xlu0 %933  ;;  %v9843_v42 = vld [vmem:[#allocation153_spill] sm:$0xff]  ;;  %s9941_s30 = sld [smem:[#allocation202_spill]] }
 0x230   : > { %v1082_v56 = vmul.f32 %v9828_v14, %v849_v19  ;;  %v1493_v39 = vadd.f32 %v1491_v32, %v1487_v22  ;;  %v9830_v38 = vstv %s9781_s27  ;;  %v1516_v3 = vadd.f32 %v9831_v6, %v1510_v23  ;;  %v9838_v23 = vld [vmem:[#allocation149_spill] sm:$0xff]  ;;  %s9945_s27 = sld [smem:[#allocation203_spill]] }
 0x231   : > { %v1301_v12 = vmul.f32 %v9830_v38, %v849_v19  ;;  %v9832_v43 = vstv %s9784_s16  ;;  %v1706_v10 = vadd.f32 %v5996_v50, %v1700_v45  ;;  %v1735_v46 = vadd.f32 %v9833_v52, %v1729_v36  ;;  %s9946_s16 = sld [smem:[#allocation204_spill]] }
 0x232   : > { %v1520_v15 = vmul.f32 %v9832_v43, %v849_v19  ;;  %v1084_v55 = vadd.f32 %v1082_v56, %v1078_v35  ;;  %v9834_v53 = vstv %s5366_s15  ;;  %v1061_v30 = vadd.f32 %v9835_v24, %v1055_v16  ;;  %s9839_s15 = sld [smem:[#allocation64_spill]]  ;;  %v839_v52 = vpop.permute.xlu1 %838  ;;  %v9854_v24 = vld [vmem:[#allocation150_spill] sm:$0xff] }
 0x233   : > { %v1739_v51 = vmul.f32 %v9834_v53, %v849_v19  ;;  %v1303_v20 = vadd.f32 %v1301_v12, %v1297_v48  ;;  %v9836_v32 = vstv %s9714_s18  ;;  %v1712_v27 = vadd.f32 %v1710_v33, %v1706_v10  ;;  %s9845_s18 = sld [smem:[#allocation68_spill]]  ;;  %v9848_v12 = vld [vmem:[#allocation156_spill] sm:$0xff]  ;;  %v9852_v53 = vld [vmem:[#allocation157_spill] sm:$0xff] }
 0x234   : > { %v1522_v2 = vadd.f32 %v1520_v15, %v1516_v3  ;;  %v1065_v13 = vmul.f32 %v9836_v32, %v948_v41  ;;  %v1090_v31 = vadd.f32 %v6114_v8, %v1084_v55  ;;  %v1280_v34 = vadd.f32 %v9838_v23, %v1274_v9  ;;  %v950_v55 = vpop.permute.xlu0 %949 }
 0x235   : > { %v1741_v50 = vadd.f32 %v1739_v51, %v1735_v46  ;;  %v1309_v19 = vadd.f32 %v6120_v59, %v1303_v20  ;;  %v9840_v37 = vstv %s9716_s1  ;;  %v1499_v7 = vadd.f32 %v9841_v40, %v1493_v39  ;;  %v9846_v59 = vld [vmem:[#allocation155_spill] sm:$0xff]  ;;  %v9850_v39 = vld [vmem:[#allocation148_spill] sm:$0xff]  ;;  %s9862_s1 = sld [smem:[#allocation72_spill]] }
 0x236   : > { %v1528_v36 = vadd.f32 %v6124_v44, %v1522_v2  ;;  %v1067_v62 = vadd.f32 %v1065_v13, %v1061_v30  ;;  %v1284_v16 = vmul.f32 %v9840_v37, %v948_v41  ;;  %v9842_v35 = vstv %s9717_s14  ;;  %s9851_s14 = sld [smem:[#allocation70_spill]]  ;;  %v9855_v13 = vld [vmem:[#allocation158_spill] sm:$0xff] }
 0x237   : > { %v1747_v22 = vadd.f32 %v6129_v11, %v1741_v50  ;;  %v1503_v33 = vmul.f32 %v9842_v35, %v948_v41  ;;  %v1718_v8 = vadd.f32 %v9843_v42, %v1712_v27  ;;  %v9844_v9 = vstv %s9719_s11  ;;  %v9856_v27 = vld [vmem:[#allocation152_spill] sm:$0xff]  ;;  %s9860_s11 = sld [smem:[#allocation71_spill]] }
 0x238   : > { %v1073_v45 = vadd.f32 %v6091_v60, %v1067_v62  ;;  %v1286_v14 = vadd.f32 %v1284_v16, %v1280_v34  ;;  %v1722_v56 = vmul.f32 %v9844_v9, %v948_v41  ;;  %v1096_v25 = vadd.f32 %v9846_v59, %v1090_v31  ;;  %v9858_v34 = vld [vmem:[#allocation154_spill] sm:$0xff] }
 0x239   : > { %v1505_v44 = vadd.f32 %v1503_v33, %v1499_v7  ;;  %v9847_v48 = vstv %s9837_s19  ;;  %v1315_v6 = vadd.f32 %v9848_v12, %v1309_v19  ;;  %v9849_v11 = vstv %s9839_s15  ;;  %v9871_v12 = vld [vmem:[#allocation160_spill] sm:$0xff] }
 0x23a   : > { %v1106_v38 = vmul.f32 %v9847_v48, %v934_v17  ;;  %v1325_v3 = vmul.f32 %v9849_v11, %v934_v17  ;;  %v1079_v43 = vadd.f32 %v9850_v39, %v1073_v45  ;;  %v1292_v15 = vadd.f32 %v6095_v26, %v1286_v14  ;;  %v9873_v11 = vld [vmem:[#allocation161_spill] sm:$0xff] }
 0x23b   : > { %v1724_v10 = vadd.f32 %v1722_v56, %v1718_v8  ;;  %v1102_v60 = vadd.f32 %v6150_v18, %v1096_v25  ;;  %v1511_v41 = vadd.f32 %v6104_v61, %v1505_v44  ;;  %v1321_v46 = vadd.f32 %v6155_v4, %v1315_v6  ;;  %v869_v8 = vpop.permute.xlu0 %868  ;;  %v9866_v56 = vld [vmem:[#allocation163_spill] sm:$0xff]  ;;  %v9875_v39 = vld [vmem:[#allocation165_spill] sm:$0xff] }
 0x23c   : > { %v1534_v51 = vadd.f32 %v9852_v53, %v1528_v36  ;;  %v9853_v20 = vstv %s9845_s18  ;;  %v1298_v30 = vadd.f32 %v9854_v24, %v1292_v15  ;;  %v1753_v18 = vadd.f32 %v9855_v13, %v1747_v22  ;;  %v9878_v15 = vld [vmem:[#allocation162_spill] sm:$0xff] }
 0x23d   : > { %v1544_v2 = vmul.f32 %v9853_v20, %v934_v17  ;;  %v1730_v26 = vadd.f32 %v6110_v54, %v1724_v10  ;;  %v1108_v32 = vadd.f32 %v1106_v38, %v1102_v60  ;;  %v1517_v31 = vadd.f32 %v9856_v27, %v1511_v41  ;;  %v9869_v38 = vld [vmem:[#allocation164_spill] sm:$0xff]  ;;  %v9885_v20 = vld [vmem:[#allocation166_spill] sm:$0xff] }
 0x23e   : > { %v1327_v50 = vadd.f32 %v1325_v3, %v1321_v46  ;;  %v1540_v61 = vadd.f32 %v6159_v0, %v1534_v51  ;;  %v9857_v23 = vstv %s9851_s14  ;;  %v1759_v36 = vadd.f32 %v6163_v5, %v1753_v18 }
 0x23f   : > { %v1763_v4 = vmul.f32 %v9857_v23, %v934_v17  ;;  %v1736_v19 = vadd.f32 %v9858_v34, %v1730_v26  ;;  %v1085_v62 = vadd.f32 %v6133_v28, %v1079_v43  ;;  %v9859_v37 = vstv %s5368_s29  ;;  %v936_v28 = vpop.permute.xlu1 %935  ;;  %s9864_s29 = sld [smem:[#allocation73_spill]]  ;;  %v837_v27 = vpop.permute.xlu0 %836 }
 0x240   : > { %v1101_v54 = vmul.f32 %v9859_v37, %v883_v21  ;;  %v1546_v16 = vadd.f32 %v1544_v2, %v1540_v61  ;;  %v1304_v22 = vadd.f32 %v6137_v58, %v1298_v30  ;;  %v9861_v40 = vstv %s5382_s25  ;;  %s9870_s25 = sld [smem:[#allocation74_spill]] }
 0x241   : > { %v1320_v7 = vmul.f32 %v9861_v40, %v883_v21  ;;  %v1523_v35 = vadd.f32 %v6142_v1, %v1517_v31  ;;  %v1765_v0 = vadd.f32 %v1763_v4, %v1759_v36  ;;  %v1091_v17 = vadd.f32 %v6167_v57, %v1085_v62  ;;  %v9867_v1 = vld [vmem:[#allocation159_spill] sm:$0xff] }
 0x242   : > { %v9863_v33 = vstv %s9788_s3  ;;  %v1742_v5 = vadd.f32 %v6146_v49, %v1736_v19  ;;  %v1310_v45 = vadd.f32 %v6171_v63, %v1304_v22  ;;  %v9865_v58 = vstv %s9790_s22  ;;  %s9956_s3 = sld [smem:[#allocation205_spill]]  ;;  %s9958_s22 = sld [smem:[#allocation206_spill]] }
 0x243   : > { %v1539_v42 = vmul.f32 %v9863_v33, %v883_v21  ;;  %v1529_v14 = vadd.f32 %v6175_v29, %v1523_v35  ;;  %v1758_v9 = vmul.f32 %v9865_v58, %v883_v21  ;;  %v1114_v59 = vadd.f32 %v9866_v56, %v1108_v32  ;;  %v952_v31 = vpop.permute.xlu1 %951 }
 0x244   : > { %v1097_v25 = vadd.f32 %v9867_v1, %v1091_v17  ;;  %v1748_v44 = vadd.f32 %v6179_v47, %v1742_v5  ;;  %v9868_v57 = vstv %s9860_s11  ;;  %v1333_v49 = vadd.f32 %v9869_v38, %v1327_v50 }
 0x245   : > { %v1118_v48 = vmul.f32 %v9868_v57, %v950_v55  ;;  %v1316_v6 = vadd.f32 %v9871_v12, %v1310_v45  ;;  %v1535_v63 = vadd.f32 %v9873_v11, %v1529_v14  ;;  %v9874_v3 = vstv %s9862_s1  ;;  %v853_v11 = vpop.permute.xlu0 %852 }
 0x246   : > { %v1337_v29 = vmul.f32 %v9874_v3, %v950_v55  ;;  %v1552_v21 = vadd.f32 %v9875_v39, %v1546_v16  ;;  %v1103_v43 = vadd.f32 %v1101_v54, %v1097_v25  ;;  %v1754_v47 = vadd.f32 %v9878_v15, %v1748_v44  ;;  %v9904_v3 = vld [vmem:[#allocation167_spill] sm:$0xff]  ;;  %v9907_v15 = vld [vmem:[#allocation168_spill] sm:$0xff] }
 0x247   : > { %v1120_v10 = vadd.f32 %v1118_v48, %v1114_v59  ;;  %v9881_v60 = vstv %s9864_s29  ;;  %v1322_v46 = vadd.f32 %v1320_v7, %v1316_v6  ;;  %v1541_v53 = vadd.f32 %v1539_v42, %v1535_v63  ;;  %v855_v63 = vpop.permute.xlu1 %854 }
 0x248   : > { %v1556_v41 = vmul.f32 %v9881_v60, %v950_v55  ;;  %v1339_v51 = vadd.f32 %v1337_v29, %v1333_v49  ;;  %v1771_v2 = vadd.f32 %v9885_v20, %v1765_v0  ;;  %v1760_v24 = vadd.f32 %v1758_v9, %v1754_v47 }
 0x249   : > { %v9886_v26 = vstv %s9870_s25  ;;  %v9887_v13 = vstv %s9872_s2  ;;  %v9888_v50 = vstv %s9876_s21  ;;  %v9889_v23 = vstv %s9877_s12  ;;  %s6776_s25 = sld [smem:[#allocation9 + $0x49]]  ;;  %s6782_s2 = sld [smem:[#allocation9 + $0x6d]] }
 0x24a   : > { %v1558_v30 = vadd.f32 %v1556_v41, %v1552_v21  ;;  %v1775_v32 = vmul.f32 %v9886_v26, %v950_v55  ;;  %v1125_v18 = vmul.f32 %v9887_v13, %v839_v52  ;;  %v1344_v61 = vmul.f32 %v9888_v50, %v839_v52  ;;  %v9909_v41 = vld [vmem:[#allocation169_spill] sm:$0xff]  ;;  %s6784_s21 = sld [smem:[#allocation9 + $0x4]]  ;;  %s6786_s12 = sld [smem:[#allocation9 + $0x28]] }
 0x24b   : > { %v1563_v4 = vmul.f32 %v9889_v23, %v839_v52  ;;  %v9890_v34 = vstv %s9879_s13  ;;  %v9891_v36 = vstv %s9880_s23  ;;  %v9892_v54 = vstv %s9882_s4  ;;  %s6788_s13 = sld [smem:[#allocation9 + $0x4c]] }
 0x24c   : > { %v1782_v19 = vmul.f32 %v9890_v34, %v839_v52  ;;  %v1142_v62 = vmul.f32 %v9891_v36, %v869_v8  ;;  %v1777_v37 = vadd.f32 %v1775_v32, %v1771_v2  ;;  %v1361_v16 = vmul.f32 %v9892_v54, %v869_v8  ;;  %v9914_v32 = vld [vmem:[#allocation171_spill] sm:$0xff]  ;;  %v9917_v36 = vld [vmem:[#allocation172_spill] sm:$0xff] }
 0x24d   : > { %v9893_v55 = vstv %s9883_s5  ;;  %v9894_v40 = vstv %s9884_s9  ;;  %v9895_v35 = vstv %s9837_s19  ;;  %v9896_v17 = vstv %s9839_s15  ;;  %s9960_s19 = sld [smem:[#allocation81_spill]]  ;;  %s9965_s15 = sld [smem:[#allocation79_spill]] }
 0x24e   : > { %v1580_v22 = vmul.f32 %v9893_v55, %v869_v8  ;;  %v1799_v7 = vmul.f32 %v9894_v40, %v869_v8  ;;  %v1107_v0 = vmul.f32 %v9895_v35, %v936_v28  ;;  %v1326_v33 = vmul.f32 %v9896_v17, %v936_v28  ;;  %v9919_v17 = vld [vmem:[#allocation173_spill] sm:$0xff] }
 0x24f   : > { %v9897_v42 = vstv %s9845_s18  ;;  %v9898_v45 = vstv %s9851_s14  ;;  %v9899_v58 = vmov %v9887_v13  ;;  %v9900_v9 = vmov %v9888_v50  ;;  %s9970_s18 = sld [smem:[#allocation80_spill]]  ;;  %s9989_s14 = smov 1  }
 0x250   : > { %v1545_v5 = vmul.f32 %v9897_v42, %v936_v28  ;;  %v1764_v14 = vmul.f32 %v9898_v45, %v936_v28  ;;  %v1124_v52 = vmul.f32 %v9899_v58, %v837_v27  ;;  %v1343_v56 = vmul.f32 %v9900_v9, %v837_v27  ;;  %v885_v58 = vpop.permute.xlu0 %884  ;;  %9996 = sst [smem:[#allocation84_spill]] %s6776_s25 }
 0x251   : > { %v9901_v59 = vmov %v9889_v23  ;;  %v9902_v25 = vmov %v9890_v34  ;;  %v1109_v8 = vadd.f32 %v1107_v0, %v1103_v43  ;;  %v1328_v57 = vadd.f32 %v1326_v33, %v1322_v46  ;;  %9997 = sst [smem:[#allocation85_spill]] %s6782_s2 }
 0x252   : > { %v1562_v1 = vmul.f32 %v9901_v59, %v837_v27  ;;  %v1781_v44 = vmul.f32 %v9902_v25, %v837_v27  ;;  %v1547_v48 = vadd.f32 %v1545_v5, %v1541_v53  ;;  %v1766_v38 = vadd.f32 %v1764_v14, %v1760_v24  ;;  %v9923_v25 = vld [vmem:[#allocation175_spill] sm:$0xff]  ;;  %9998 = sst [smem:[#allocation86_spill]] %s6784_s21 }
 0x253   : > { %v1126_v49 = vadd.f32 %v1124_v52, %v1120_v10  ;;  %v1345_v12 = vadd.f32 %v1343_v56, %v1339_v51  ;;  %v1115_v29 = vadd.f32 %v9904_v3, %v1109_v8  ;;  %v9906_v39 = vstv %s9860_s11  ;;  %v9911_v10 = vld [vmem:[#allocation170_spill] sm:$0xff]  ;;  %v871_v52 = vpop.permute.xlu1 %870  ;;  %s9990_s11 = smov 127   ;;  %9999 = sst [smem:[#allocation87_spill]] %s6786_s12 }
 0x254   : > { %v1564_v28 = vadd.f32 %v1562_v1, %v1558_v30  ;;  %v1783_v6 = vadd.f32 %v1781_v44, %v1777_v37  ;;  %v1119_v21 = vmul.f32 %v9906_v39, %v952_v31  ;;  %v1334_v47 = vadd.f32 %v9907_v15, %v1328_v57  ;;  %v9921_v56 = vld [vmem:[#allocation174_spill] sm:$0xff]  ;;  %10000 = sst [smem:[#allocation88_spill]] %s6788_s13 }
 0x255   : > { %v9908_v60 = vstv %s9862_s1  ;;  %v1553_v46 = vadd.f32 %v9909_v41, %v1547_v48  ;;  %v9910_v53 = vstv %s9864_s29  ;;  %v1772_v51 = vadd.f32 %v9911_v10, %v1766_v38  ;;  %v9932_v39 = vld [vmem:[#allocation178_spill] sm:$0xff]  ;;  %v9935_v41 = vld [vmem:[#allocation179_spill] sm:$0xff]  ;;  %v9937_v10 = vld [vmem:[#allocation180_spill] sm:$0xff]  ;;  %s6766_s1 = sld [smem:[#allocation9 + $0x1]]  ;;  %s6774_s29 = sld [smem:[#allocation9 + $0x25]] }
 0x256   : > { %v1338_v43 = vmul.f32 %v9908_v60, %v952_v31  ;;  %v1557_v20 = vmul.f32 %v9910_v53, %v952_v31  ;;  %v9912_v2 = vmov %v9886_v26  ;;  %v1121_v30 = vadd.f32 %v1119_v21, %v1115_v29 }
 0x257   : > { %v1776_v24 = vmul.f32 %v9912_v2, %v952_v31  ;;  %v1132_v13 = vadd.f32 %v9914_v32, %v1126_v49  ;;  %v9915_v27 = vstv %s9903_s8  ;;  %v1351_v37 = vadd.f32 %v9917_v36, %v1345_v12  ;;  %s6802_s8 = sld [smem:[#allocation9 + $0x7]] }
 0x258   : > { %v1340_v26 = vadd.f32 %v1338_v43, %v1334_v47  ;;  %v1136_v50 = vmul.f32 %v9915_v27, %v853_v11  ;;  %v1559_v23 = vadd.f32 %v1557_v20, %v1553_v46  ;;  %v9918_v54 = vstv %s9905_s7  ;;  %s6804_s7 = sld [smem:[#allocation9 + $0xa]] }
 0x259   : > { %v1778_v34 = vadd.f32 %v1776_v24, %v1772_v51  ;;  %v1355_v55 = vmul.f32 %v9918_v54, %v853_v11  ;;  %v1127_v40 = vadd.f32 %v1125_v18, %v1121_v30  ;;  %v1570_v31 = vadd.f32 %v9919_v17, %v1564_v28  ;;  %v9929_v28 = vld [vmem:[#allocation177_spill] sm:$0xff]  ;;  %v938_v30 = vpop.permute.xlu0 %937 }
 0x25a   : > { %v1346_v35 = vadd.f32 %v1344_v61, %v1340_v26  ;;  %v1138_v0 = vadd.f32 %v1136_v50, %v1132_v13  ;;  %v1565_v33 = vadd.f32 %v1563_v4, %v1559_v23  ;;  %v9920_v45 = vstv %s9913_s26  ;;  %v9925_v4 = vld [vmem:[#allocation176_spill] sm:$0xff]  ;;  %s6806_s26 = sld [smem:[#allocation9 + $0x2b]] }
 0x25b   : > { %v1784_v42 = vadd.f32 %v1782_v19, %v1778_v34  ;;  %v1357_v5 = vadd.f32 %v1355_v55, %v1351_v37  ;;  %v1574_v14 = vmul.f32 %v9920_v45, %v853_v11  ;;  %v1789_v59 = vadd.f32 %v9921_v56, %v1783_v6  ;;  %9993 = sst [smem:[#allocation82_spill]] %s6766_s1 }
 0x25c   : > { %v1144_v9 = vadd.f32 %v1142_v62, %v1138_v0  ;;  %v9922_v1 = vstv %s9916_s20  ;;  %v1133_v61 = vadd.f32 %v9923_v25, %v1127_v40  ;;  %v9924_v57 = vmov %v9915_v27  ;;  %v9943_v27 = vld [vmem:[#allocation182_spill] sm:$0xff]  ;;  %9995 = sst [smem:[#allocation83_spill]] %s6774_s29  ;;  %s6808_s20 = sld [smem:[#allocation9 + $0x2e]] }
 0x25d   : > { %v1793_v18 = vmul.f32 %v9922_v1, %v853_v11  ;;  %v1363_v44 = vadd.f32 %v1361_v16, %v1357_v5  ;;  %v1576_v8 = vadd.f32 %v1574_v14, %v1570_v31  ;;  %v1137_v48 = vmul.f32 %v9924_v57, %v855_v63  ;;  %10005 = sst [smem:[#allocation93_spill]] %s6802_s8 }
 0x25e   : > { %v1352_v19 = vadd.f32 %v9925_v4, %v1346_v35  ;;  %v9927_v49 = vmov %v9918_v54  ;;  %v1571_v3 = vadd.f32 %v9929_v28, %v1565_v33  ;;  %v9930_v62 = vmov %v9920_v45  ;;  %v9955_v4 = vld [vmem:[#allocation183_spill] sm:$0xff]  ;;  %10006 = sst [smem:[#allocation94_spill]] %s6804_s7 }
 0x25f   : > { %v1795_v38 = vadd.f32 %v1793_v18, %v1789_v59  ;;  %v1356_v12 = vmul.f32 %v9927_v49, %v855_v63  ;;  %v1575_v29 = vmul.f32 %v9930_v62, %v855_v63  ;;  %v1582_v6 = vadd.f32 %v1580_v22, %v1576_v8  ;;  %v954_v49 = vpop.permute.xlu0 %953  ;;  %v9959_v62 = vld [vmem:[#allocation185_spill] sm:$0xff] }
 0x260   : > { %v1139_v11 = vadd.f32 %v1137_v48, %v1133_v61  ;;  %v1790_v21 = vadd.f32 %v9932_v39, %v1784_v42  ;;  %v9933_v16 = vmov %v9922_v1  ;;  %v1150_v46 = vadd.f32 %v9935_v41, %v1144_v9  ;;  %10007 = sst [smem:[#allocation95_spill]] %s6806_s26 }
 0x261   : > { %v1794_v15 = vmul.f32 %v9933_v16, %v855_v63  ;;  %v1801_v47 = vadd.f32 %v1799_v7, %v1795_v38  ;;  %v1358_v60 = vadd.f32 %v1356_v12, %v1352_v19  ;;  %v1577_v43 = vadd.f32 %v1575_v29, %v1571_v3  ;;  %v887_v7 = vpop.permute.xlu1 %886  ;;  %v9940_v63 = vld [vmem:[#allocation181_spill] sm:$0xff] }
 0x262   : > { %v9936_v20 = vstv %s9926_s10  ;;  %v1369_v51 = vadd.f32 %v9937_v10, %v1363_v44  ;;  %v9938_v2 = vstv %s9928_s24  ;;  %v1588_v26 = vadd.f32 %v9940_v63, %v1582_v6  ;;  %v9962_v16 = vld [vmem:[#allocation186_spill] sm:$0xff]  ;;  %10008 = sst [smem:[#allocation96_spill]] %s6808_s20  ;;  %s6810_s10 = sld [smem:[#allocation9 + $0x4f]] }
 0x263   : > { %v1796_v53 = vadd.f32 %v1794_v15, %v1790_v21  ;;  %v1154_v22 = vmul.f32 %v9936_v20, %v885_v58  ;;  %v1373_v24 = vmul.f32 %v9938_v2, %v885_v58  ;;  %v9942_v32 = vstv %s9931_s0  ;;  %s6812_s24 = sld [smem:[#allocation9 + $0x52]]  ;;  %s6816_s0 = sld [smem:[#allocation9 + $0x73]] }
 0x264   : > { %v1592_v13 = vmul.f32 %v9942_v32, %v885_v58  ;;  %v1807_v50 = vadd.f32 %v9943_v27, %v1801_v47  ;;  %v9944_v23 = vstv %s9934_s28  ;;  %v9947_v54 = vstv %s9880_s23  ;;  %v9963_v47 = vld [vmem:[#allocation187_spill] sm:$0xff]  ;;  %s6790_s23 = sld [smem:[#allocation9 + $0x70]]  ;;  %s6818_s28 = sld [smem:[#allocation9 + $0x76]] }
 0x265   : > { %v1811_v34 = vmul.f32 %v9944_v23, %v885_v58  ;;  %v1156_v36 = vadd.f32 %v1154_v22, %v1150_v46  ;;  %v1375_v37 = vadd.f32 %v1373_v24, %v1369_v51  ;;  %v1143_v55 = vmul.f32 %v9947_v54, %v871_v52  ;;  %v940_v12 = vpop.permute.xlu1 %939  ;;  %v9969_v24 = vld [vmem:[#allocation191_spill] sm:$0xff] }
 0x266   : > { %v9948_v40 = vstv %s9882_s4  ;;  %v1594_v0 = vadd.f32 %v1592_v13, %v1588_v26  ;;  %v9949_v31 = vstv %s9883_s5  ;;  %v9950_v42 = vstv %s9884_s9  ;;  %s6792_s4 = sld [smem:[#allocation9 + $0xd]]  ;;  %s6796_s5 = sld [smem:[#allocation9 + $0x31]] }
 0x267   : > { %v1362_v35 = vmul.f32 %v9948_v40, %v871_v52  ;;  %v1813_v17 = vadd.f32 %v1811_v34, %v1807_v50  ;;  %v1581_v33 = vmul.f32 %v9949_v31, %v871_v52  ;;  %v1800_v5 = vmul.f32 %v9950_v42, %v871_v52  ;;  %s6798_s9 = sld [smem:[#allocation9 + $0x55]] }
 0x268   : > { %v1145_v45 = vadd.f32 %v1143_v55, %v1139_v11  ;;  %v9951_v9 = vstv %s9939_s6  ;;  %v9952_v58 = vstv %s9941_s30  ;;  %v9953_v25 = vstv %s9945_s27  ;;  %10009 = sst [smem:[#allocation97_spill]] %s6810_s10  ;;  %s6826_s6 = sld [smem:[#allocation9 + $0x10]] }
 0x269   : > { %v1364_v14 = vadd.f32 %v1362_v35, %v1358_v60  ;;  %v1160_v56 = vmul.f32 %v9951_v9, %v938_v30  ;;  %v1379_v59 = vmul.f32 %v9952_v58, %v938_v30  ;;  %v1583_v1 = vadd.f32 %v1581_v33, %v1577_v43  ;;  %v956_v33 = vpop.permute.xlu1 %955  ;;  %10010 = sst [smem:[#allocation98_spill]] %s6812_s24  ;;  %s6830_s27 = sld [smem:[#allocation9 + $0x58]] }
 0x26a   : > { %v1802_v18 = vadd.f32 %v1800_v5, %v1796_v53  ;;  %v1598_v61 = vmul.f32 %v9953_v25, %v938_v30  ;;  %v9954_v44 = vstv %s9946_s16  ;;  %v1151_v52 = vadd.f32 %v9955_v4, %v1145_v45  ;;  %v9983_v4 = vld [vmem:[#allocation194_spill] sm:$0xff]  ;;  %10001 = sst [smem:[#allocation89_spill]] %s6790_s23  ;;  %s6828_s30 = sld [smem:[#allocation9 + $0x34]] }
 0x26b   : > { %v1817_v8 = vmul.f32 %v9954_v44, %v938_v30  ;;  %v1162_v57 = vadd.f32 %v1160_v56, %v1156_v36  ;;  %v1381_v48 = vadd.f32 %v1379_v59, %v1375_v37  ;;  %v9957_v19 = vmov %v9936_v20  ;;  %v9967_v20 = vld [vmem:[#allocation188_spill] sm:$0xff]  ;;  %v9974_v36 = vld [vmem:[#allocation193_spill] sm:$0xff]  ;;  %10011 = sst [smem:[#allocation99_spill]] %s6816_s0  ;;  %s6832_s16 = sld [smem:[#allocation9 + $0x7c]] }
 0x26c   : > { %v1155_v38 = vmul.f32 %v9957_v19, %v887_v7  ;;  %v1600_v28 = vadd.f32 %v1598_v61, %v1594_v0  ;;  %v1370_v29 = vadd.f32 %v9959_v62, %v1364_v14  ;;  %v1828_v6 = vstv %s6375_s17  ;;  %v9977_v0 = vld [vmem:[#allocation111_spill] sm:$0xff]  ;;  %10002 = sst [smem:[#allocation90_spill]] %s6792_s4  ;;  %s6824_s17 = sld [smem:[#allocation9 + $0x79]] }
 0x26d   : > { %v1819_v3 = vadd.f32 %v1817_v8, %v1813_v17  ;;  %v9961_v39 = vmov %v9938_v2  ;;  %v1589_v15 = vadd.f32 %v9962_v16, %v1583_v1  ;;  %v1808_v60 = vadd.f32 %v9963_v47, %v1802_v18  ;;  %v9984_v19 = vld [vmem:[#allocation197_spill] sm:$0xff]  ;;  %10003 = sst [smem:[#allocation91_spill]] %s6796_s5 }
 0x26e   : > { %v1157_v11 = vadd.f32 %v1155_v38, %v1151_v52  ;;  %v1374_v21 = vmul.f32 %v9961_v39, %v887_v7  ;;  %v9964_v43 = vmov %v9942_v32  ;;  %v9966_v46 = vmov %v9944_v23  ;;  %v9972_v32 = vld [vmem:[#allocation192_spill] sm:$0xff]  ;;  %10004 = sst [smem:[#allocation92_spill]] %s6798_s9 }
 0x26f   : > { %v1593_v41 = vmul.f32 %v9964_v43, %v887_v7  ;;  %v1812_v53 = vmul.f32 %v9966_v46, %v887_v7  ;;  %v1168_v22 = vadd.f32 %v9967_v20, %v1162_v57  ;;  %v9968_v10 = vstv %s9956_s3  ;;  %10012 = sst [smem:[#allocation100_spill]] %s6818_s28  ;;  %s6838_s3 = sld [smem:[#allocation9 + $0x13]] }
 0x270   : > { %v1172_v51 = vmul.f32 %v9968_v10, %v954_v49  ;;  %v1376_v2 = vadd.f32 %v1374_v21, %v1370_v29  ;;  %v1387_v30 = vadd.f32 %v9969_v24, %v1381_v48  ;;  %v9971_v63 = vstv %s9958_s22  ;;  %10014 = sst [smem:[#allocation104_spill]] %s6826_s6  ;;  %s6840_s22 = sld [smem:[#allocation9 + $0x37]] }
 0x271   : > { %v1391_v26 = vmul.f32 %v9971_v63, %v954_v49  ;;  %v1606_v13 = vadd.f32 %v9972_v32, %v1600_v28  ;;  %v1595_v27 = vadd.f32 %v1593_v41, %v1589_v15  ;;  %v1814_v50 = vadd.f32 %v1812_v53, %v1808_v60  ;;  %10015 = sst [smem:[#allocation106_spill]] %s6828_s30 }
 0x272   : > { %v9973_v23 = vstv %s9960_s19  ;;  %v1825_v7 = vadd.f32 %v9974_v36, %v1819_v3  ;;  %v1829_v37 = vmul.f32 %v1828_v6, %v954_v49  ;;  %v9975_v54 = vmov %v9951_v9  ;;  %10013 = sst [smem:[#allocation102_spill]] %s6824_s17  ;;  %s6844_s19 = sld [smem:[#allocation9 + $0x5b]] }
 0x273   : > { %v1610_v34 = vmul.f32 %v9973_v23, %v954_v49  ;;  %v1161_v55 = vmul.f32 %v9975_v54, %v940_v12  ;;  %v9976_v40 = vmov %v9952_v58  ;;  %v9978_v17 = vstv %s9965_s15  ;;  %10016 = sst [smem:[#allocation108_spill]] %s6830_s27  ;;  %s6846_s15 = sld [smem:[#allocation9 + $0x7f]] }
 0x274   : > { %v1380_v35 = vmul.f32 %v9976_v40, %v940_v12  ;;  %v1605_v31 = vmul.f32 %v9978_v17, %v9977_v0  ;;  %v6434_v42 = vadd.f32 %v1172_v51, %v1168_v22  ;;  %v9979_v5 = vmov %v9953_v25  ;;  %10017 = sst [smem:[#allocation101_spill]] %s6832_s16  ;;  %s6850_s16 = sld [smem:[#allocation9 + $0x3a]] }
 0x275   : > { %v1599_v45 = vmul.f32 %v9979_v5, %v940_v12  ;;  %v9980_v14 = vmov %v9954_v44  ;;  %v9981_v56 = vstv %s9970_s18  ;;  %v6443_v59 = vadd.f32 %v1391_v26, %v1387_v30  ;;  %10018 = sst [smem:[#allocation103_spill]] %s6838_s3  ;;  %s6848_s18 = sld [smem:[#allocation9 + $0x16]] }
 0x276   : > { %v1818_v9 = vmul.f32 %v9980_v14, %v940_v12  ;;  %v1824_v58 = vmul.f32 %v9981_v56, %v9977_v0  ;;  %v6445_v1 = vadd.f32 %v1829_v37, %v1825_v7  ;;  %v1163_v18 = vadd.f32 %v1161_v55, %v1157_v11  ;;  %10019 = sst [smem:[#allocation105_spill]] %s6840_s22  ;;  %s6857_s3 = sld [smem:[#allocation9 + $0x5e]] }
 0x277   : > { %v1382_v25 = vadd.f32 %v1380_v35, %v1376_v2  ;;  %v6447_v61 = vadd.f32 %v1610_v34, %v1606_v13  ;;  %v1601_v44 = vadd.f32 %v1599_v45, %v1595_v27  ;;  %v9982_v57 = vmov %v9968_v10  ;;  %s6859_s22 = sld [smem:[#allocation9 + $0x82]]  ;;  %s6863_s27 = sld [smem:[#allocation9 + $0x19]] }
 0x278   : > { %v1820_v8 = vadd.f32 %v1818_v9, %v1814_v50  ;;  %v1173_v48 = vmul.f32 %v9982_v57, %v956_v33  ;;  %v1169_v52 = vadd.f32 %v9983_v4, %v1163_v18  ;;  %v9985_v49 = vmov %v9971_v63  ;;  %10020 = sst [smem:[#allocation107_spill]] %s6844_s19  ;;  %s6865_s19 = sld [smem:[#allocation9 + $0x1f]] }
 0x279   : > { %v1388_v38 = vadd.f32 %v9984_v19, %v1382_v25  ;;  %v1392_v12 = vmul.f32 %v9985_v49, %v956_v33  ;;  %v1607_v28 = vadd.f32 %v1605_v31, %v1601_v44  ;;  %v9986_v3 = vmov %v9973_v23  ;;  %10021 = sst [smem:[#allocation33_spill]] %s6846_s15  ;;  %s7000_s15 = sld [smem:[#allocation10]] }
 0x27a   : > { %v1611_v62 = vmul.f32 %v9986_v3, %v956_v33  ;;  %v1826_v29 = vadd.f32 %v1824_v58, %v1820_v8  ;;  %v1830_v39 = vmul.f32 %v1828_v6, %v956_v33  ;;  %v1865_v11 = vmul.f32 %v6434_v42, %v6434_v42  ;;  %10023 = sst [smem:[#allocation109_spill]] %s6850_s16  ;;  %s6869_s16 = sld [smem:[#allocation9 + $0x3d]] }
 0x27b   : > { %v1867_v21 = vmul.f32 %v6443_v59, %v6443_v59  ;;  %v6461_v16 = vadd.f32 %v1173_v48, %v1169_v52  ;;  %v6463_v15 = vadd.f32 %v1392_v12, %v1388_v38  ;;  %v1869_v47 = vmul.f32 %v6447_v61, %v6447_v61  ;;  %10022 = sst [smem:[#allocation34_spill]] %s6848_s18  ;;  %s6871_s18 = sld [smem:[#allocation9 + $0x61]] }
 0x27c   : > { %v1871_v60 = vmul.f32 %v6445_v1, %v6445_v1  ;;  %v6469_v43 = vadd.f32 %v1611_v62, %v1607_v28  ;;  %v6471_v41 = vadd.f32 %v1830_v39, %v1826_v29  ;;  %10024 = sst [smem:[#allocation110_spill]] %s6857_s3  ;;  %s6873_s3 = sld [smem:[#allocation9 + $0x85]] }
 0x27d   : > { %v1837_v6 = vadd.f32 %v6461_v16, %v6434_v42  ;;  %v1844_v46 = vadd.f32 %v6463_v15, %v6443_v59  ;;  %v1866_v53 = vmul.f32 %v6461_v16, %v6461_v16  ;;  %v1868_v20 = vmul.f32 %v6463_v15, %v6463_v15  ;;  %10025 = sst [smem:[#allocation36_spill]] %s6859_s22  ;;  %s6875_s22 = sld [smem:[#allocation9 + $0x1c]] }
 0x27e   : > { %v1851_v22 = vadd.f32 %v6469_v43, %v6447_v61  ;;  %v1858_v10 = vadd.f32 %v6471_v41, %v6445_v1  ;;  %v1870_v51 = vmul.f32 %v6469_v43, %v6469_v43  ;;  %v1872_v2 = vmul.f32 %v6471_v41, %v6471_v41  ;;  %10026 = sst [smem:[#allocation37_spill]] %s6863_s27  ;;  %s6881_s27 = sld [smem:[#allocation9 + $0x64]] }
 0x27f   : > { %v1838_v24 = vrot.slane %v1837_v6, 4  ;;  %v1845_v30 = vrot.slane %v1844_v46, 4  ;;  %v1873_v63 = vadd.f32 %v1866_v53, %v1865_v11  ;;  %v1880_v26 = vadd.f32 %v1868_v20, %v1867_v21  ;;  %10027 = sst [smem:[#allocation38_spill]] %s6865_s19 }
 0x280   : > { %v1852_v32 = vrot.slane %v1851_v22, 4  ;;  %v1859_v13 = vrot.slane %v1858_v10, 4  ;;  %v1887_v27 = vadd.f32 %v1870_v51, %v1869_v47  ;;  %v1894_v50 = vadd.f32 %v1872_v2, %v1871_v60  ;;  %10028 = sst [smem:[#allocation39_spill]] %s6869_s16  ;;  %s6879_s19 = sld [smem:[#allocation9 + $0x40]] }
 0x281   : > { %v1839_v23 = vadd.f32 %v1838_v24, %v1837_v6  ;;  %v1846_v34 = vadd.f32 %v1845_v30, %v1844_v46  ;;  %v1874_v36 = vrot.slane %v1873_v63, 4  ;;  %v1881_v7 = vrot.slane %v1880_v26, 4  ;;  %10029 = sst [smem:[#allocation35_spill]] %s6871_s18  ;;  %s6906_s18 = sld [smem:[#allocation9 + $0x46]] }
 0x282   : > { %v1853_v37 = vadd.f32 %v1852_v32, %v1851_v22  ;;  %v1860_v54 = vadd.f32 %v1859_v13, %v1858_v10  ;;  %v1888_v55 = vrot.slane %v1887_v27, 4  ;;  %v1895_v40 = vrot.slane %v1894_v50, 4  ;;  %10030 = sst [smem:[#allocation40_spill]] %s6873_s3  ;;  %s6892_s3 = sld [smem:[#allocation9 + $0x43]] }
 0x283   : > { %v1840_v35 = vrot.slane %v1839_v23, 2  ;;  %v1847_v0 = vrot.slane %v1846_v34, 2  ;;  %v1875_v17 = vadd.f32 %v1874_v36, %v1873_v63  ;;  %v1882_v31 = vadd.f32 %v1881_v7, %v1880_v26  ;;  %10031 = sst [smem:[#allocation44_spill]] %s6875_s22  ;;  %s6890_s22 = sld [smem:[#allocation9 + $0x88]] }
 0x284   : > { %v1854_v33 = vrot.slane %v1853_v37, 2  ;;  %v1861_v5 = vrot.slane %v1860_v54, 2  ;;  %v1889_v45 = vadd.f32 %v1888_v55, %v1887_v27  ;;  %v1896_v14 = vadd.f32 %v1895_v40, %v1894_v50  ;;  %10033 = sst [smem:[#allocation47_spill]] %s6881_s27  ;;  %s6896_s27 = sld [smem:[#allocation9 + $0x67]] }
 0x285   : > { %v1841_v9 = vadd.f32 %v1840_v35, %v1839_v23  ;;  %v1848_v56 = vadd.f32 %v1847_v0, %v1846_v34  ;;  %v1876_v58 = vrot.slane %v1875_v17, 2  ;;  %v1883_v18 = vrot.slane %v1882_v31, 2  ;;  %10076 = sst [smem:[#allocation63_spill]] %s7000_s15  ;;  %s7092_s16 = sld [smem:[#allocation9 + $0x2d]] }
 0x286   : > { %v1855_v25 = vadd.f32 %v1854_v33, %v1853_v37  ;;  %v1862_v44 = vadd.f32 %v1861_v5, %v1860_v54  ;;  %v1890_v8 = vrot.slane %v1889_v45, 2  ;;  %v1897_v57 = vrot.slane %v1896_v14, 2  ;;  %10032 = sst [smem:[#allocation46_spill]] %s6879_s19  ;;  %s6898_s19 = sld [smem:[#allocation9 + $0x8b]] }
 0x287   : > { %v1877_v48 = vadd.f32 %v1876_v58, %v1875_v17  ;;  %v1884_v4 = vadd.f32 %v1883_v18, %v1882_v31  ;;  %v1842_v52 = vrot.slane %v1841_v9, 1  ;;  %v1849_v19 = vrot.slane %v1848_v56, 1  ;;  %10039 = sst [smem:[#allocation41_spill]] %s6906_s18  ;;  %s7225_s15 = sld [smem:[#allocation9 + $0xf]] }
 0x288   : > { %v1891_v38 = vadd.f32 %v1890_v8, %v1889_v45  ;;  %v1898_v49 = vadd.f32 %v1897_v57, %v1896_v14  ;;  %v1856_v12 = vrot.slane %v1855_v25, 1  ;;  %v1863_v28 = vrot.slane %v1862_v44, 1  ;;  %10035 = sst [smem:[#allocation49_spill]] %s6892_s3  ;;  %s7277_s18 = sld [smem:[#allocation9 + $0x11]] }
 0x289   : > { %v1878_v3 = vrot.slane %v1877_v48, 1  ;;  %v1885_v62 = vrot.slane %v1884_v4, 1  ;;  %v1843_v29 = vadd.f32 %v1842_v52, %v1841_v9  ;;  %v1850_v39 = vadd.f32 %v1849_v19, %v1848_v56  ;;  %10034 = sst [smem:[#allocation48_spill]] %s6890_s22  ;;  %s10184_s3 = sld [smem:[#allocation107_spill]] }
 0x28a   : > { %v1892_v11 = vrot.slane %v1891_v38, 1  ;;  %v1899_v21 = vrot.slane %v1898_v49, 1  ;;  %v1857_v47 = vadd.f32 %v1856_v12, %v1855_v25  ;;  %v1864_v60 = vadd.f32 %v1863_v28, %v1862_v44  ;;  %10036 = sst [smem:[#allocation50_spill]] %s6896_s27  ;;  %s6904_s22 = sld [smem:[#allocation9 + $0x22]] }
 0x28b   : > { %v1879_v6 = vadd.f32 %v1878_v3, %v1877_v48  ;;  %v1886_v46 = vadd.f32 %v1885_v62, %v1884_v4  ;;  %v1901_v53 = vmul.f32 0.0625, %v1843_v29  ;;  %v1902_v20 = vmul.f32 0.0625, %v1850_v39  ;;  %v1949_v62 = vpop.permute.xlu1 %1948  ;;  %s6912_s27 = sld [smem:[#allocation9 + $0x6a]]  ;;  %10107 = sst [smem:[#allocation189_spill]] %s7092_s16 }
 0x28c   : > { %v1893_v22 = vadd.f32 %v1892_v11, %v1891_v38  ;;  %v1900_v10 = vadd.f32 %v1899_v21, %v1898_v49  ;;  %v1903_v51 = vmul.f32 0.0625, %v1857_v47  ;;  %v1904_v2 = vmul.f32 0.0625, %v1864_v60  ;;  %10037 = sst [smem:[#allocation51_spill]] %s6898_s19  ;;  %s6914_s19 = sld [smem:[#allocation9 + $0x8e]] }
 0x28d   : > { %v1905_v24 = vmul.f32 0.0625, %v1879_v6  ;;  %v1906_v30 = vmul.f32 0.0625, %v1886_v46  ;;  %v1909_v63 = vmul.f32 %v1901_v53, %v1901_v53  ;;  %v1910_v26 = vmul.f32 %v1902_v20, %v1902_v20  ;;  %s7197_s16 = sld [smem:[#allocation9 + $0xe]]  ;;  %10135 = sst [smem:[#allocation205_spill]] %s7225_s15 }
 0x28e   : > { %v1907_v32 = vmul.f32 0.0625, %v1893_v22  ;;  %v1908_v13 = vmul.f32 0.0625, %v1900_v10  ;;  %v1911_v27 = vmul.f32 %v1903_v51, %v1903_v51  ;;  %v1912_v50 = vmul.f32 %v1904_v2, %v1904_v2  ;;  %10145 = sst [smem:[#allocation80_spill]] %s7277_s18  ;;  %s10198_s18 = sld [smem:[#allocation109_spill]] }
 0x28f   : > { %v1913_v23 = vsub.f32 %v1905_v24, %v1909_v63  ;;  %v1914_v34 = vsub.f32 %v1906_v30, %v1910_v26  ;;  %v1925_v36 = vsub.f32 %v6434_v42, %v1901_v53  ;;  %v1927_v7 = vsub.f32 %v6443_v59, %v1902_v20  ;;  %v1944_v59 = vpop.permute.xlu0 %1943  ;;  %v1967_v10 = vpop.permute.xlu1 %1966  ;;  %s7445_s15 = sld [smem:[#allocation9 + $0x5d]] }
 0x290   : > { %v1915_v37 = vsub.f32 %v1907_v32, %v1911_v27  ;;  %v1916_v54 = vsub.f32 %v1908_v13, %v1912_v50  ;;  %v1929_v55 = vsub.f32 %v6447_v61, %v1903_v51  ;;  %v1931_v40 = vsub.f32 %v6445_v1, %v1904_v2  ;;  %10038 = sst [smem:[#allocation52_spill]] %s6904_s22  ;;  %s7090_s22 = sld [smem:[#allocation9 + $0x9]] }
 0x291   : > { %v1917_v35 = vadd.f32 1e-05, %v1913_v23  ;;  %v1918_v0 = vadd.f32 1e-05, %v1914_v34  ;;  %v1926_v17 = vsub.f32 %v6461_v16, %v1901_v53  ;;  %v1928_v31 = vsub.f32 %v6463_v15, %v1902_v20  ;;  %10040 = sst [smem:[#allocation42_spill]] %s6912_s27  ;;  %s7227_s27 = sld [smem:[#allocation9 + $0x33]] }
 0x292   : > { %v1919_v33 = vadd.f32 1e-05, %v1915_v37  ;;  %v1920_v5 = vadd.f32 1e-05, %v1916_v54  ;;  %v1930_v45 = vsub.f32 %v6469_v43, %v1903_v51  ;;  %v1932_v42 = vsub.f32 %v6471_v41, %v1904_v2  ;;  %10041 = sst [smem:[#allocation43_spill]] %s6914_s19  ;;  %s10178_s19 = sld [smem:[#allocation105_spill]] }
 0x293   : > { %3818 = vrsqrt.f32 %v1917_v35  ;;  %v6497_v57 = vpop.permute.xlu0 %1961  ;;  %10127 = sst [smem:[#allocation201_spill]] %s7197_s16  ;;  %s7567_s16 = sld [smem:[#allocation9 + $0x3f]] }
 0x294   : > { %3820 = vrsqrt.f32 %v1918_v0 }
 0x295   : > { %3822 = vrsqrt.f32 %v1919_v33  ;;  %10199 = sst [smem:[#allocation97_spill]] %s7445_s15 }
 0x296   : > { %3824 = vrsqrt.f32 %v1920_v5  ;;  %10106 = sst [smem:[#allocation184_spill]] %s7090_s22  ;;  %s7199_s22 = sld [smem:[#allocation9 + $0x32]] }
 0x297   : > { %10137 = sst [smem:[#allocation206_spill]] %s7227_s27  ;;  %s7417_s27 = sld [smem:[#allocation9 + $0x80]] }
 0x29c   : > { %10128 = sst [smem:[#allocation202_spill]] %s7199_s22  ;;  %s7543_s22 = sld [smem:[#allocation9 + $0x84]] }
 0x29d   : > { %v3819_v61 = vpop.eup %3818  ;;  %10187 = sst [smem:[#allocation94_spill]] %s7417_s27 }
 0x29e   : > { %v3821_v14 = vpop.eup %3820  ;;  %v1933_v1 = vmul.f32 %v3819_v61, %v1925_v36  ;;  %v1934_v9 = vmul.f32 %v3819_v61, %v1926_v17 }
 0x29f   : > { %v3823_v56 = vpop.eup %3822  ;;  %v1935_v58 = vmul.f32 %v3821_v14, %v1927_v7  ;;  %v1936_v16 = vmul.f32 %v3821_v14, %v1928_v31 }
 0x2a0   : > { %v3825_v18 = vpop.eup %3824  ;;  %v1937_v15 = vmul.f32 %v3823_v56, %v1929_v55  ;;  %v1951_v25 = vmul.f32 %v1944_v59, %v1933_v1  ;;  %v1938_v44 = vmul.f32 %v3823_v56, %v1930_v45  ;;  %v1952_v21 = vmul.f32 %v1949_v62, %v1934_v9 }
 0x2a1   : > { %v1939_v8 = vmul.f32 %v3825_v18, %v1931_v40  ;;  %v1953_v43 = vmul.f32 %v1944_v59, %v1935_v58  ;;  %v1940_v41 = vmul.f32 %v3825_v18, %v1932_v42  ;;  %v1954_v47 = vmul.f32 %v1949_v62, %v1936_v16 }
 0x2a2   : > { %v1955_v48 = vmul.f32 %v1944_v59, %v1937_v15  ;;  %v6500_v4 = vadd.f32 %v6497_v57, %v1951_v25  ;;  %v1956_v46 = vmul.f32 %v1949_v62, %v1938_v44  ;;  %v6520_v51 = vadd.f32 %v1967_v10, %v1952_v21 }
 0x2a3   : > { %v1957_v52 = vmul.f32 %v1944_v59, %v1939_v8  ;;  %v6503_v19 = vadd.f32 %v6497_v57, %v1953_v43  ;;  %v6522_v2 = vadd.f32 %v1967_v10, %v1954_v47  ;;  %v1958_v9 = vmul.f32 %v1949_v62, %v1940_v41 }
 0x2a4   : > { %v6506_v38 = vadd.f32 %v6497_v57, %v1955_v48  ;;  %v6509_v49 = vmul.f32 0.70710677, %v6500_v4  ;;  %v6524_v24 = vadd.f32 %v1967_v10, %v1956_v46  ;;  %v6527_v30 = vmul.f32 0.70710677, %v6520_v51 }
 0x2a5   : > { %v6512_v12 = vmul.f32 0.70710677, %v6503_v19  ;;  %v6530_v63 = vmul.f32 0.70710677, %v6522_v2  ;;  %v6553_v15 = vadd.f32 %v6497_v57, %v1957_v52  ;;  %v6556_v48 = vadd.f32 %v1967_v10, %v1958_v9 }
 0x2a6   : > { %v6515_v28 = vmul.f32 0.70710677, %v6506_v38  ;;  %v2009_v3 = vand.u32 2147483647, %v6509_v49  ;;  %v6533_v26 = vmul.f32 0.70710677, %v6524_v24 }
 0x2a7   : > { %v2011_v29 = vand.u32 2147483647, %v6512_v12  ;;  %v2010_v27 = vand.u32 2147483647, %v6527_v30  ;;  %v2012_v50 = vand.u32 2147483647, %v6530_v63 }
 0x2a8   : > { %v2013_v39 = vand.u32 2147483647, %v6515_v28  ;;  %v2017_v11 = vmul.f32 0.3275911, %v2009_v3  ;;  %v2121_v32 = vsub.f32 0.0, %v2009_v3  ;;  %vm1993_vm13 = vcmp.ge.f32.partialorder %v6509_v49, 0.0 }
 0x2a9   : > { %v2019_v60 = vmul.f32 0.3275911, %v2011_v29  ;;  %v2123_v13 = vsub.f32 0.0, %v2011_v29  ;;  %v6538_v34 = vand.u32 2147483647, %v6533_v26  ;;  %vm1995_vm14 = vcmp.ge.f32.partialorder %v6512_v12, 0.0 }
 0x2aa   : > { %v2021_v6 = vmul.f32 0.3275911, %v2013_v39  ;;  %v2025_v53 = vadd.f32 1.0, %v2017_v11  ;;  %v2125_v23 = vsub.f32 0.0, %v2013_v39  ;;  %v2129_v7 = vmul.f32 %v2121_v32, %v2009_v3 }
 0x2ab   : > { %v2027_v20 = vadd.f32 1.0, %v2019_v60  ;;  %v2018_v37 = vmul.f32 0.3275911, %v2010_v27  ;;  %v2020_v54 = vmul.f32 0.3275911, %v2012_v50  ;;  %v2131_v35 = vmul.f32 %v2123_v13, %v2011_v29 }
 0x2ac   : > { %v2029_v22 = vadd.f32 1.0, %v2021_v6  ;;  %3826 = vrcp.f32 %v2025_v53  ;;  %v2022_v0 = vmul.f32 0.3275911, %v6538_v34  ;;  %v2133_v59 = vmul.f32 %v2125_v23, %v2013_v39 }
 0x2ad   : > { %3828 = vrcp.f32 %v2027_v20  ;;  %v2026_v33 = vadd.f32 1.0, %v2018_v37  ;;  %v2028_v5 = vadd.f32 1.0, %v2020_v54  ;;  %v2137_v1 = vmul.f32 1.442695, %v2129_v7 }
 0x2ae   : > { %3830 = vrcp.f32 %v2029_v22  ;;  %v2030_v61 = vadd.f32 1.0, %v2022_v0  ;;  %v2141_v16 = vmul.f32 1.442695, %v2131_v35  ;;  %v2145_v8 = vmul.f32 1.442695, %v2133_v59 }
 0x2af   : > { %3832 = vrcp.f32 %v2026_v33  ;;  %v2122_v29 = vsub.f32 0.0, %v2010_v27  ;;  %v2124_v39 = vsub.f32 0.0, %v2012_v50  ;;  %v6562_v57 = vmul.f32 0.70710677, %v6553_v15 }
 0x2b0   : > { %3834 = vrcp.f32 %v2028_v5  ;;  %v6566_v47 = vmul.f32 0.70710677, %v6556_v48  ;;  %v2126_v60 = vsub.f32 0.0, %v6538_v34  ;;  %v1977_v6 = vmul.f32 0.5, %v6500_v4 }
 0x2b1   : > { %3836 = vrcp.f32 %v2030_v61  ;;  %v9987_v22 = vmov -1.0   ;;  %v2130_v13 = vmul.f32 %v2122_v29, %v2010_v27  ;;  %v2132_v23 = vmul.f32 %v2124_v39, %v2012_v50 }
 0x2b2   : > { %3838 = vpow2.f32 %v2137_v1  ;;  %v2001_v10 = vsel %vm1993_vm13, 1.0, %v9987_v22  ;;  %v6581_v37 = vand.u32 2147483647, %v6562_v57  ;;  %v6588_v49 = vand.u32 2147483647, %v6566_v47 }
 0x2b3   : > { %3840 = vpow2.f32 %v2141_v16  ;;  %v2134_v27 = vmul.f32 %v2126_v60, %v6538_v34  ;;  %vm1997_vm15 = vcmp.ge.f32.partialorder %v6515_v28, 0.0  ;;  %v2143_v1 = vmul.f32 1.442695, %v2132_v23 }
 0x2b4   : > { %3842 = vpow2.f32 %v2145_v8  ;;  %v2005_v12 = vsel %vm1997_vm15, 1.0, %v9987_v22  ;;  %vm1994_vm0 = vcmp.ge.f32.partialorder %v6527_v30, 0.0  ;;  %vm1996_vm1 = vcmp.ge.f32.partialorder %v6530_v63, 0.0 }
 0x2b5   : > { %vm1998_vm3 = vcmp.ge.f32.partialorder %v6533_v26, 0.0  ;;  %vm1999_vm4 = vcmp.ge.f32.partialorder %v6562_v57, 0.0  ;;  %vm2000_vm8 = vcmp.ge.f32.partialorder %v6566_v47, 0.0 }
 0x2b6   : > { %v6540_v36 = vpop.eup %3826  ;;  %v2006_v26 = vsel %vm1998_vm3, 1.0, %v9987_v22  ;;  %v2008_v57 = vsel %vm2000_vm8, 1.0, %v9987_v22 }
 0x2b7   : > { %v6542_v55 = vpop.eup %3828  ;;  %v2049_v40 = vmul.f32 1.0614054, %v6540_v36 }
 0x2b8   : > { %v6546_v17 = vpop.eup %3830  ;;  %v2051_v31 = vmul.f32 1.0614054, %v6542_v55 }
 0x2b9   : > { %v2053_v45 = vmul.f32 1.0614054, %v6546_v17  ;;  %v2057_v42 = vadd.f32 -1.4531521, %v2049_v40  ;;  %v6572_v20 = vpop.eup %3832 }
 0x2ba   : > { %v2059_v14 = vadd.f32 -1.4531521, %v2051_v31  ;;  %v6578_v7 = vpop.eup %3834  ;;  %v2050_v40 = vmul.f32 1.0614054, %v6572_v20 }
 0x2bb   : > { %v2061_v56 = vadd.f32 -1.4531521, %v2053_v45  ;;  %v2065_v58 = vmul.f32 %v6540_v36, %v2057_v42  ;;  %v6585_v35 = vpop.eup %3836  ;;  %v2052_v31 = vmul.f32 1.0614054, %v6578_v7 }
 0x2bc   : > { %v2067_v18 = vmul.f32 %v6542_v55, %v2059_v14  ;;  %v2054_v5 = vmul.f32 1.0614054, %v6585_v35  ;;  %v2058_v45 = vadd.f32 -1.4531521, %v2050_v40  ;;  %v3839_v42 = vpop.eup %3838  ;;  %v2139_v14 = vmul.f32 1.442695, %v2130_v13 }
 0x2bd   : > { %v2069_v25 = vmul.f32 %v6546_v17, %v2061_v56  ;;  %v2073_v44 = vadd.f32 1.4214138, %v2065_v58  ;;  %v2060_v61 = vadd.f32 -1.4531521, %v2052_v31  ;;  %v3841_v9 = vpop.eup %3840 }
 0x2be   : > { %v2075_v43 = vadd.f32 1.4214138, %v2067_v18  ;;  %v2062_v16 = vadd.f32 -1.4531521, %v2054_v5  ;;  %v2066_v34 = vmul.f32 %v6572_v20, %v2058_v45  ;;  %v2023_v18 = vmul.f32 0.3275911, %v6581_v37  ;;  %v3843_v8 = vpop.eup %3842 }
 0x2bf   : > { %v2077_v41 = vadd.f32 1.4214138, %v2069_v25  ;;  %v2081_v3 = vmul.f32 %v6540_v36, %v2073_v44  ;;  %v2147_v44 = vmul.f32 1.442695, %v2134_v27  ;;  %3844 = vpow2.f32 %v2139_v14 }
 0x2c0   : > { %v2083_v62 = vmul.f32 %v6542_v55, %v2075_v43  ;;  %3846 = vpow2.f32 %v2143_v1  ;;  %v2031_v60 = vadd.f32 1.0, %v2023_v18 }
 0x2c1   : > { %v2085_v52 = vmul.f32 %v6546_v17, %v2077_v41  ;;  %v2089_v11 = vadd.f32 -0.28449672, %v2081_v3  ;;  %v2070_v41 = vmul.f32 %v6585_v35, %v2062_v16  ;;  %v2074_v3 = vadd.f32 1.4214138, %v2066_v34 }
 0x2c2   : > { %v2091_v21 = vadd.f32 -0.28449672, %v2083_v62  ;;  %3848 = vpow2.f32 %v2147_v44  ;;  %v2002_v44 = vsel %vm1994_vm0, 1.0, %v9987_v22 }
 0x2c3   : > { %v2093_v46 = vadd.f32 -0.28449672, %v2085_v52  ;;  %v2097_v53 = vmul.f32 %v6540_v36, %v2089_v11  ;;  %v2078_v52 = vadd.f32 1.4214138, %v2070_v41  ;;  %v2082_v11 = vmul.f32 %v6572_v20, %v2074_v3 }
 0x2c4   : > { %v2099_v32 = vmul.f32 %v6542_v55, %v2091_v21  ;;  %v2003_v21 = vsel %vm1995_vm14, 1.0, %v9987_v22  ;;  %3850 = vrcp.f32 %v2031_v60 }
 0x2c5   : > { %v2101_v4 = vmul.f32 %v6546_v17, %v2093_v46  ;;  %v2105_v54 = vadd.f32 0.2548296, %v2097_v53  ;;  %v2086_v13 = vmul.f32 %v6585_v35, %v2078_v52  ;;  %v2090_v23 = vadd.f32 -0.28449672, %v2082_v11 }
 0x2c6   : > { %v2107_v0 = vadd.f32 0.2548296, %v2099_v32 }
 0x2c7   : > { %v2109_v50 = vadd.f32 0.2548296, %v2101_v4  ;;  %v2113_v33 = vmul.f32 %v6540_v36, %v2105_v54  ;;  %v2068_v36 = vmul.f32 %v6578_v7, %v2060_v61  ;;  %v2098_v31 = vmul.f32 %v6572_v20, %v2090_v23 }
 0x2c8   : > { %v2115_v59 = vmul.f32 %v6542_v55, %v2107_v0  ;;  %v2024_v55 = vmul.f32 0.3275911, %v6588_v49  ;;  %v2094_v0 = vadd.f32 -0.28449672, %v2086_v13  ;;  %v1979_v61 = vmul.f32 0.5, %v6503_v19 }
 0x2c9   : > { %v2117_v56 = vmul.f32 %v6546_v17, %v2109_v50  ;;  %v2153_v58 = vmul.f32 %v3839_v42, %v2113_v33  ;;  %v2076_v17 = vadd.f32 1.4214138, %v2068_v36  ;;  %v2106_v42 = vadd.f32 0.2548296, %v2098_v31  ;;  %v3845_v1 = vpop.eup %3844 }
 0x2ca   : > { %v2155_v25 = vmul.f32 %v3841_v9, %v2115_v59  ;;  %v2032_v40 = vadd.f32 1.0, %v2024_v55  ;;  %v2102_v45 = vmul.f32 %v6585_v35, %v2094_v0  ;;  %v2847_v33 = vstv %s6812_s24  ;;  %s6961_s24 = sld [smem:[#allocation9 + $0xc]] }
 0x2cb   : > { %v2161_v43 = vsub.f32 1.0, %v2153_v58  ;;  %v2157_v62 = vmul.f32 %v3843_v8, %v2117_v56  ;;  %v2084_v46 = vmul.f32 %v6578_v7, %v2076_v17  ;;  %v2114_v14 = vmul.f32 %v6572_v20, %v2106_v42  ;;  %v3847_v56 = vpop.eup %3846 }
 0x2cc   : > { %v2163_v29 = vsub.f32 1.0, %v2155_v25  ;;  %3852 = vrcp.f32 %v2032_v40  ;;  %v2110_v28 = vadd.f32 0.2548296, %v2102_v45  ;;  %v3849_v18 = vpop.eup %3848  ;;  %v2004_v8 = vsel %vm1996_vm1, 1.0, %v9987_v22 }
 0x2cd   : > { %v2169_v39 = vmul.f32 %v2161_v43, %v2001_v10  ;;  %v2165_v4 = vsub.f32 1.0, %v2157_v62  ;;  %v2092_v54 = vadd.f32 -0.28449672, %v2084_v46  ;;  %v2154_v34 = vmul.f32 %v3845_v1, %v2114_v14 }
 0x2ce   : > { %v2171_v53 = vmul.f32 %v2163_v29, %v2003_v21  ;;  %v2118_v16 = vmul.f32 %v6585_v35, %v2110_v28  ;;  %v6636_v55 = vpop.eup %3850  ;;  %v1980_v17 = vmul.f32 0.5, %v6522_v2  ;;  %v1982_v21 = vmul.f32 0.5, %v6524_v24 }
 0x2cf   : > { %v2177_v32 = vadd.f32 1.0, %v2169_v39  ;;  %v2100_v27 = vmul.f32 %v6578_v7, %v2092_v54  ;;  %v2162_v20 = vsub.f32 1.0, %v2154_v34  ;;  %v2055_v11 = vmul.f32 1.0614054, %v6636_v55 }
 0x2d0   : > { %v2179_v50 = vadd.f32 1.0, %v2171_v53  ;;  %v2158_v19 = vmul.f32 %v3849_v18, %v2118_v16  ;;  %10057 = sst [smem:[#allocation61_spill]] %s6961_s24  ;;  %s6978_s24 = sld [smem:[#allocation9 + $0x2a]] }
 0x2d1   : > { %v2185_v10 = vmul.f32 %v2177_v32, %v1977_v6  ;;  %v2173_v6 = vmul.f32 %v2165_v4, %v2005_v12  ;;  %v2108_v59 = vadd.f32 0.2548296, %v2100_v27  ;;  %v2170_v43 = vmul.f32 %v2162_v20, %v2002_v44 }
 0x2d2   : > { %v2187_v58 = vmul.f32 %v2179_v50, %v1979_v61  ;;  %v2166_v63 = vsub.f32 1.0, %v2158_v19  ;;  %v2063_v31 = vadd.f32 -1.4531521, %v2055_v11 }
 0x2d3   : > { %v6615_v5 = vsel %vm413_vm2, %v2185_v10, 0.0  ;;  %v2116_v9 = vmul.f32 %v6578_v7, %v2108_v59  ;;  %v2181_v25 = vadd.f32 1.0, %v2173_v6  ;;  %v1981_v7 = vmul.f32 0.5, %v6506_v38 }
 0x2d4   : > { %2257 = vrot.lane.b32.xlu0 %v6615_v5, %s9989_s14  ;;  %v6633_v35 = vsel %vm413_vm2, %v2187_v58, 0.0  ;;  %v1978_v38 = vmul.f32 0.5, %v6520_v51  ;;  %v2174_v62 = vmul.f32 %v2166_v63, %v2006_v26  ;;  %v2178_v29 = vadd.f32 1.0, %v2170_v43 }
 0x2d5   : > { %v2156_v36 = vmul.f32 %v3847_v56, %v2116_v9  ;;  %v2189_v41 = vmul.f32 %v2181_v25, %v1981_v7  ;;  %v2289_v51 = vrot.slane %v6615_v5, 1  ;;  %v2201_v13 = vrot.slane %v6615_v5, 7 }
 0x2d6   : > { %v6643_v52 = vpop.eup %3852  ;;  %v2182_v60 = vadd.f32 1.0, %v2174_v62  ;;  %v2186_v46 = vmul.f32 %v2178_v29, %v1978_v38  ;;  %v2202_v4 = vrot.slane %v6633_v35, 7  ;;  %v2290_v24 = vrot.slane %v6633_v35, 1  ;;  %10065 = sst [smem:[#allocation147_spill]] %s6978_s24  ;;  %s10173_s24 = sld [smem:[#allocation103_spill]] }
 0x2d7   : > { %v2164_v30 = vsub.f32 1.0, %v2156_v36  ;;  %v6649_v53 = vsel %vm413_vm2, %v2189_v41, 0.0  ;;  %v2056_v54 = vmul.f32 1.0614054, %v6643_v52  ;;  %v2071_v7 = vmul.f32 %v6636_v55, %v2063_v31 }
 0x2d8   : > { %2273 = vrot.lane.b32.xlu0 %v6615_v5, %s9990_s11  ;;  %v2190_v23 = vmul.f32 %v2182_v60, %v1982_v21  ;;  %v6655_v2 = vsel %vm413_vm2, %v2186_v46, 0.0  ;;  %v2203_v61 = vrot.slane %v6649_v53, 7  ;;  %v2291_v9 = vrot.slane %v6649_v53, 1 }
 0x2d9   : > { %v2172_v3 = vmul.f32 %v2164_v30, %v2004_v8  ;;  %2259 = vrot.lane.b32.xlu1 %v6655_v2, %s9989_s14  ;;  %v2293_v40 = vrot.slane %v6655_v2, 1  ;;  %v2205_v0 = vrot.slane %v6655_v2, 7  ;;  %v2064_v56 = vadd.f32 -1.4531521, %v2056_v54 }
 0x2da   : > { %v6670_v12 = vsel %vm413_vm2, %v2190_v23, 0.0  ;;  %v2079_v63 = vadd.f32 1.4214138, %v2071_v7  ;;  %v2127_v43 = vsub.f32 0.0, %v6581_v37  ;;  %v2128_v26 = vsub.f32 0.0, %v6588_v49 }
 0x2db   : > { %v2180_v39 = vadd.f32 1.0, %v2172_v3  ;;  %v6676_v42 = vsel %vm896_vm5, %v2289_v51, %v2293_v40  ;;  %v6680_v6 = vsel %vm795_vm6, %v2201_v13, %v2205_v0  ;;  %v2213_v59 = vsel %vm795_vm6, %v2205_v0, %v2201_v13 }
 0x2dc   : > { %2261 = vrot.lane.b32.xlu0 %v6633_v35, %s9989_s14  ;;  %v2301_v1 = vsel %vm896_vm5, %v2293_v40, %v2289_v51  ;;  %v2207_v16 = vrot.slane %v6670_v12, 7  ;;  %v2295_v18 = vrot.slane %v6670_v12, 1  ;;  %v2072_v44 = vmul.f32 %v6643_v52, %v2064_v56 }
 0x2dd   : > { %v2188_v32 = vmul.f32 %v2180_v39, %v1980_v17  ;;  %2275 = vrot.lane.b32.xlu1 %v6655_v2, %s9990_s11  ;;  %v6732_v8 = vsel %vm806_vm7, %v2213_v59, 0.0  ;;  %v2087_v3 = vmul.f32 %v6636_v55, %v2079_v63  ;;  %v2135_v38 = vmul.f32 %v2127_v43, %v6581_v37 }
 0x2de   : > { %v6710_v25 = vsel %vm795_vm6, %v2203_v61, %v2207_v16  ;;  %v6714_v36 = vsel %vm795_vm6, %v2207_v16, %v2203_v61  ;;  %v6720_v19 = vsel %vm896_vm5, %v2291_v9, %v2295_v18  ;;  %v6724_v20 = vsel %vm896_vm5, %v2295_v18, %v2291_v9 }
 0x2df   : > { %v6662_v10 = vsel %vm413_vm2, %v2188_v32, 0.0  ;;  %v2080_v41 = vadd.f32 1.4214138, %v2072_v44  ;;  %v2136_v29 = vmul.f32 %v2128_v26, %v6588_v49  ;;  %v2095_v17 = vadd.f32 -0.28449672, %v2087_v3 }
 0x2e0   : > { %v2206_v27 = vrot.slane %v6662_v10, 7  ;;  %v2294_v50 = vrot.slane %v6662_v10, 1  ;;  %2313 = vrot.lane.b32.xlu0 %v6676_v42, %s9989_s14  ;;  %v2149_v39 = vmul.f32 1.442695, %v2135_v38  ;;  %v6770_v13 = vsel %vm910_vm10, %v2301_v1, 0.0 }
 0x2e1   : > { %2263 = vrot.lane.b32.xlu1 %v6662_v10, %s9989_s14  ;;  %v2088_v62 = vmul.f32 %v6643_v52, %v2080_v41  ;;  %v2151_v21 = vmul.f32 1.442695, %v2136_v29  ;;  %v2103_v37 = vmul.f32 %v6636_v55, %v2095_v17  ;;  %v2007_v31 = vsel %vm1999_vm4, 1.0, %v9987_v22 }
 0x2e2   : > { %v6689_v28 = vsel %vm795_vm6, %v2202_v4, %v2206_v27  ;;  %v6693_v14 = vsel %vm896_vm5, %v2290_v24, %v2294_v50  ;;  %v2214_v58 = vsel %vm795_vm6, %v2206_v27, %v2202_v4  ;;  %v6705_v34 = vsel %vm896_vm5, %v2294_v50, %v2290_v24 }
 0x2e3   : > { %v2096_v11 = vadd.f32 -0.28449672, %v2088_v62  ;;  %3854 = vpow2.f32 %v2149_v39  ;;  %v2111_v49 = vadd.f32 0.2548296, %v2103_v37  ;;  %v6764_v32 = vsel %vm806_vm7, %v2214_v58, 0.0 }
 0x2e4   : > { %2329 = vrot.lane.b32.xlu0 %v6676_v42, %s9990_s11  ;;  %3856 = vpow2.f32 %v2151_v21  ;;  %v6855_v22 = vsel %vm806_vm7, %v6714_v36, 0.0  ;;  %v1983_v61 = vmul.f32 0.5, %v6553_v15  ;;  %v1984_v1 = vmul.f32 0.5, %v6556_v48 }
 0x2e5   : > { %2227 = vrot.lane.b32.xlu1 %v6680_v6, %s9989_s14  ;;  %v2104_v60 = vmul.f32 %v6643_v52, %v2096_v11  ;;  %v2119_v23 = vmul.f32 %v6636_v55, %v2111_v49  ;;  %v6886_v9 = vsel %vm910_vm10, %v6705_v34, 0.0  ;;  %v2355_v56 = vstv %s6766_s1  ;;  %s7027_s1 = sld [smem:[#allocation10 + $0x3]] }
 0x2e6   : > { %v2574_v58 = vstv %s6774_s29  ;;  %v2793_v16 = vstv %s6776_s25  ;;  %v3012_v34 = vstv %s6782_s2  ;;  %v2373_v18 = vstv %s6784_s21  ;;  %s6918_s2 = sld [smem:[#allocation9 + $0x3]]  ;;  %s6920_s25 = sld [smem:[#allocation9 + $0x27]] }
 0x2e7   : > { %v2112_v46 = vadd.f32 0.2548296, %v2104_v60  ;;  %v2592_v36 = vstv %s6786_s12  ;;  %v2811_v7 = vstv %s6788_s13  ;;  %v3030_v44 = vstv %s6790_s23  ;;  %s6935_s29 = sld [smem:[#allocation9 + $0x4b]]  ;;  %s6949_s23 = sld [smem:[#allocation9 + $0x4d]] }
 0x2e8   : > { %2225 = vrot.lane.b32.xlu0 %v6732_v8, %s9989_s14  ;;  %v2391_v63 = vstv %s6802_s8  ;;  %v2409_v43 = vstv %s6804_s7  ;;  %v2610_v41 = vstv %s6806_s26  ;;  %s6937_s8 = sld [smem:[#allocation9 + $0x6f]]  ;;  %s6941_s26 = sld [smem:[#allocation9 + $0x5]]  ;;  %v7147_v51 = vmul.f32 %v2355_v56, %v6680_v6 }
 0x2e9   : > { %2243 = vrot.lane.b32.xlu1 %v6680_v6, %s9990_s11  ;;  %v2120_v4 = vmul.f32 %v6643_v52, %v2112_v46  ;;  %v2628_v38 = vstv %s6808_s20  ;;  %v2829_v62 = vstv %s6810_s10  ;;  %s6943_s7 = sld [smem:[#allocation9 + $0x29]]  ;;  %v3048_v29 = vstv %s6816_s0  ;;  %s6963_s20 = sld [smem:[#allocation9 + $0x30]] }
 0x2ea   : > { %v3066_v17 = vstv %s6818_s28  ;;  %v2427_v39 = vstv %s6792_s4  ;;  %s6951_s12 = sld [smem:[#allocation9 + $0x71]]  ;;  %v2646_v11 = vstv %s6796_s5  ;;  %v2865_v21 = vstv %s6798_s9  ;;  %s6969_s9 = sld [smem:[#allocation9 + $0x54]] }
 0x2eb   : > { %v3084_v37 = vstv %s6824_s17  ;;  %v2445_v60 = vstv %s6826_s6  ;;  %s6971_s4 = sld [smem:[#allocation9 + $0x78]]  ;;  %s7008_s17 = sld [smem:[#allocation10 + $0x1]]  ;;  %v7170_v30 = vmul.f32 %v2793_v16, %v6680_v6 }
 0x2ec   : > { %2241 = vrot.lane.b32.xlu0 %v6732_v8, %s9990_s11  ;;  %10042 = sst [smem:[#allocation45_spill]] %s6918_s2  ;;  %s7002_s5 = sld [smem:[#allocation9]] }
 0x2ed   : > { %2231 = vrot.lane.b32.xlu1 %v6689_v28, %s9989_s14  ;;  %v3855_v24 = vpop.eup %3854  ;;  %10043 = sst [smem:[#allocation54_spill]] %s6920_s25  ;;  %s7010_s6 = sld [smem:[#allocation9 + $0x24]] }
 0x2ee   : > { %v3857_v54 = vpop.eup %3856  ;;  %v2159_v55 = vmul.f32 %v3855_v24, %v2119_v23  ;;  %10044 = sst [smem:[#allocation55_spill]] %s6935_s29  ;;  %v9062_v23 = vstv %s6828_s30  ;;  %s7015_s10 = sld [smem:[#allocation10 + $0x2]] }
 0x2ef   : > { %v2160_v52 = vmul.f32 %v3857_v54, %v2120_v4  ;;  %10045 = sst [smem:[#allocation56_spill]] %s6937_s8  ;;  %s7017_s21 = sld [smem:[#allocation9 + $0x48]]  ;;  %v7204_v54 = vmul.f32 %v2793_v16, %v6732_v8  ;;  %v7237_v16 = vmul.f32 %v3030_v44, %v6655_v2  ;;  %v7347_v4 = vmul.f32 %v3084_v37, %v6633_v35 }
 0x2f0   : > { %2277 = vrot.lane.b32.xlu0 %v6633_v35, %s9990_s11  ;;  %v2167_v40 = vsub.f32 1.0, %v2159_v55  ;;  %10046 = sst [smem:[#allocation57_spill]] %s6941_s26  ;;  %s7042_s0 = sld [smem:[#allocation9 + $0x8]]  ;;  %v7294_v55 = vmul.f32 %v2391_v63, %v6676_v42 }
 0x2f1   : > { %2247 = vrot.lane.b32.xlu1 %v6689_v28, %s9990_s11  ;;  %v2168_v0 = vsub.f32 1.0, %v2160_v52  ;;  %10047 = sst [smem:[#allocation58_spill]] %s6943_s7  ;;  %s7072_s25 = sld [smem:[#allocation9 + $0x4a]]  ;;  %v7284_v52 = vmul.f32 %v3048_v29, %v6770_v13  ;;  %10161 = vst [vmem:[#allocation119_spill] sm:$0xff] %v7347_v4 }
 0x2f2   : > { %v2175_v47 = vmul.f32 %v2167_v40, %v2007_v31  ;;  %10049 = sst [smem:[#allocation59_spill]] %s6949_s23  ;;  %s7029_s23 = sld [smem:[#allocation9 + $0x6c]]  ;;  %v7209_v40 = vmul.f32 %v3012_v34, %v6732_v8  ;;  %10149 = vst [vmem:[#allocation118_spill] sm:$0xff] %v7294_v55 }
 0x2f3   : > { %v2176_v27 = vmul.f32 %v2168_v0, %v2008_v57  ;;  %10051 = sst [smem:[#allocation60_spill]] %s6951_s12  ;;  %s7044_s28 = sld [smem:[#allocation9 + $0x2c]]  ;;  %v7175_v57 = vmul.f32 %v3012_v34, %v6680_v6  ;;  %v7242_v34 = vmul.f32 %v2391_v63, %v6770_v13  ;;  %v7299_v0 = vmul.f32 %v2610_v41, %v6676_v42 }
 0x2f4   : > { %2317 = vrot.lane.b32.xlu0 %v6693_v14, %s9989_s14  ;;  %v2183_v50 = vadd.f32 1.0, %v2175_v47  ;;  %10058 = sst [smem:[#allocation139_spill]] %s6963_s20  ;;  %s6976_s12 = sld [smem:[#allocation9 + $0x6]]  ;;  %v7318_v63 = vmul.f32 %v2409_v43, %v6764_v32 }
 0x2f5   : > { %2279 = vrot.lane.b32.xlu1 %v6662_v10, %s9990_s11  ;;  %v2184_v59 = vadd.f32 1.0, %v2176_v27  ;;  %10062 = sst [smem:[#allocation142_spill]] %s6969_s9  ;;  %s7054_s20 = sld [smem:[#allocation9 + $0x50]]  ;;  %v7084_v27 = vmul.f32 %v2811_v7, %v6615_v5  ;;  %10150 = vst [vmem:[#allocation213_spill] sm:$0xff] %v7299_v0 }
 0x2f6   : > { %v2191_v15 = vmul.f32 %v2183_v50, %v1983_v61  ;;  %10063 = sst [smem:[#allocation143_spill]] %s6971_s4  ;;  %s6986_s9 = sld [smem:[#allocation9 + $0x72]]  ;;  %10156 = vst [vmem:[#allocation122_spill] sm:$0xff] %v7318_v63 }
 0x2f7   : > { %v2192_v48 = vmul.f32 %v2184_v59, %v1984_v1  ;;  %10077 = sst [smem:[#allocation64_spill]] %s7002_s5  ;;  %v7037_v1 = vsel %vm910_vm10, %v6724_v20, 0.0  ;;  %s10105_s26 = smov 127  }
 0x2f8   : > { %2333 = vrot.lane.b32.xlu0 %v6693_v14, %s9990_s11  ;;  %v6927_v26 = vsel %vm413_vm2, %v2191_v15, 0.0  ;;  %10079 = sst [smem:[#allocation68_spill]] %s7008_s17  ;;  %v7068_v15 = vmul.f32 %v2373_v18, %v6615_v5  ;;  %s7110_s30 = sld [smem:[#allocation9 + $0x51]] }
 0x2f9   : > { %2315 = vrot.lane.b32.xlu1 %v6770_v13, %s9989_s14  ;;  %v6931_v3 = vsel %vm413_vm2, %v2192_v48, 0.0  ;;  %v2204_v49 = vrot.slane %v6927_v26, 7  ;;  %10080 = sst [smem:[#allocation70_spill]] %s7010_s6  ;;  %v2292_v20 = vrot.slane %v6927_v26, 1  ;;  %v7079_v48 = vmul.f32 %v2592_v36, %v6615_v5  ;;  %s7112_s2 = sld [smem:[#allocation9 + $0x75]] }
 0x2fa   : > { %v2208_v46 = vrot.slane %v6931_v3, 7  ;;  %10064 = sst [smem:[#allocation146_spill]] %s6976_s12  ;;  %v2296_v50 = vrot.slane %v6931_v3, 1  ;;  %s10121_s17 = smov 1  }
 0x2fb   : > { %10081 = sst [smem:[#allocation71_spill]] %s7015_s10  ;;  %s7163_s10 = sld [smem:[#allocation9 + $0x2f]] }
 0x2fc   : > { %2229 = vrot.lane.b32.xlu0 %v6764_v32, %s9989_s14  ;;  %10070 = sst [smem:[#allocation62_spill]] %s6986_s9  ;;  %v6994_v59 = vsel %vm795_vm6, %v2204_v49, %v2208_v46  ;;  %v2216_v61 = vsel %vm795_vm6, %v2208_v46, %v2204_v49  ;;  %v7102_v46 = vmul.f32 %v2427_v39, %v6633_v35  ;;  %v2304_v49 = vsel %vm896_vm5, %v2296_v50, %v2292_v20  ;;  %s7213_s6 = sld [smem:[#allocation9 + $0x7a]] }
 0x2fd   : > { %2331 = vrot.lane.b32.xlu1 %v6770_v13, %s9990_s11  ;;  %10082 = sst [smem:[#allocation72_spill]] %s7017_s21  ;;  %v7025_v47 = vsel %vm806_vm7, %v2216_v61, 0.0  ;;  %v7097_v61 = vmul.f32 %v3030_v44, %v6615_v5  ;;  %v7117_v5 = vmul.f32 %v2646_v11, %v6633_v35  ;;  %v7121_v31 = vsel %vm896_vm5, %v2292_v20, %v2296_v50  ;;  %s7251_s8 = sld [smem:[#allocation9 + $0x57]] }
 0x2fe   : > { %10083 = sst [smem:[#allocation73_spill]] %s7027_s1  ;;  %10108 = vst [vmem:[#allocation114_spill] sm:$0xff] %v7102_v46  ;;  %v7134_v45 = vsel %vm910_vm10, %v2304_v49, 0.0  ;;  %v7155_v20 = vmul.f32 %v2574_v58, %v6680_v6  ;;  %v7190_v6 = vmul.f32 %v2355_v56, %v6732_v8  ;;  %v7195_v50 = vmul.f32 %v2574_v58, %v6732_v8  ;;  %s7279_s4 = sld [smem:[#allocation9 + $0x35]] }
 0x2ff   : > { %10084 = sst [smem:[#allocation74_spill]] %s7029_s23  ;;  %10111 = vst [vmem:[#allocation211_spill] sm:$0xff] %v7117_v5  ;;  %s7161_s1 = sld [smem:[#allocation9 + $0xb]]  ;;  %v7218_v56 = vmul.f32 %v2373_v18, %v6655_v2  ;;  %v7223_v58 = vmul.f32 %v2592_v36, %v6655_v2  ;;  %v7232_v8 = vmul.f32 %v2811_v7, %v6655_v2  ;;  %v7247_v18 = vmul.f32 %v2409_v43, %v6689_v28 }
 0x300   : > { %2245 = vrot.lane.b32.xlu0 %v6764_v32, %s9990_s11  ;;  %10086 = sst [smem:[#allocation75_spill]] %s7042_s0  ;;  %s7063_s0 = sld [smem:[#allocation9 + $0x26]]  ;;  %v7258_v2 = vmul.f32 %v2610_v41, %v6770_v13  ;;  %v7263_v36 = vmul.f32 %v2628_v38, %v6689_v28  ;;  %v7268_v7 = vmul.f32 %v2829_v62, %v6770_v13  ;;  %v7273_v44 = vmul.f32 %v2847_v33, %v6689_v28 }
 0x301   : > { %2235 = vrot.lane.b32.xlu1 %v6710_v25, %s9989_s14  ;;  %10088 = sst [smem:[#allocation76_spill]] %s7044_s28  ;;  %s7056_s28 = sld [smem:[#allocation9 + $0x74]]  ;;  %10139 = vst [vmem:[#allocation212_spill] sm:$0xff] %v7247_v18  ;;  %v7289_v49 = vmul.f32 %v3066_v17, %v6689_v28  ;;  %v7308_v28 = vmul.f32 %v2829_v62, %v6676_v42  ;;  %v7313_v13 = vmul.f32 %v3048_v29, %v6676_v42 }
 0x302   : > { %10094 = sst [smem:[#allocation65_spill]] %s7054_s20  ;;  %10142 = vst [vmem:[#allocation112_spill] sm:$0xff] %v7263_v36  ;;  %10143 = vst [vmem:[#allocation116_spill] sm:$0xff] %v7273_v44  ;;  %s7301_s9 = sld [smem:[#allocation9 + $0x59]]  ;;  %v7323_v41 = vmul.f32 %v2628_v38, %v6764_v32  ;;  %v7330_v62 = vmul.f32 %v2847_v33, %v6764_v32  ;;  %v7335_v42 = vmul.f32 %v2865_v21, %v6633_v35 }
 0x303   : > { %10102 = sst [smem:[#allocation77_spill]] %s7072_s25  ;;  %10147 = vst [vmem:[#allocation113_spill] sm:$0xff] %v7289_v49  ;;  %10154 = vst [vmem:[#allocation214_spill] sm:$0xff] %v7308_v28  ;;  %v7342_v38 = vmul.f32 %v3066_v17, %v6764_v32  ;;  %v7356_v29 = vmul.f32 %v2427_v39, %v6662_v10  ;;  %v7361_v32 = vmul.f32 %v2646_v11, %v6662_v10  ;;  %s10166_s21 = sld [smem:[#allocation108_spill]] }
 0x304   : > { %2265 = vrot.lane.b32.xlu0 %v6649_v53, %s9989_s14  ;;  %10109 = sst [smem:[#allocation190_spill]] %s7110_s30  ;;  %s7181_s25 = sld [smem:[#allocation9 + $0x77]]  ;;  %10155 = vst [vmem:[#allocation120_spill] sm:$0xff] %v7313_v13  ;;  %10157 = vst [vmem:[#allocation115_spill] sm:$0xff] %v7323_v41  ;;  %v7372_v43 = vmul.f32 %v2865_v21, %v6662_v10  ;;  %v7377_v39 = vmul.f32 %v3084_v37, %v6662_v10  ;;  %v7388_v35 = vmul.f32 %v2445_v60, %v6693_v14 }
 0x305   : > { %2251 = vrot.lane.b32.xlu1 %v6710_v25, %s9990_s11  ;;  %10110 = sst [smem:[#allocation195_spill]] %s7112_s2  ;;  %s7211_s30 = sld [smem:[#allocation9 + $0x56]]  ;;  %10158 = vst [vmem:[#allocation124_spill] sm:$0xff] %v7330_v62  ;;  %10159 = vst [vmem:[#allocation117_spill] sm:$0xff] %v7335_v42  ;;  %v7393_v21 = vmul.f32 %v9062_v23, %v6693_v14  ;;  %v10205_v23 = vstv %s10184_s3 }
 0x306   : > { %10100 = sst [smem:[#allocation69_spill]] %s7063_s0  ;;  %s7253_s0 = sld [smem:[#allocation9 + $0x7b]]  ;;  %10160 = vst [vmem:[#allocation126_spill] sm:$0xff] %v7342_v38  ;;  %10164 = vst [vmem:[#allocation207_spill] sm:$0xff] %v7356_v29 }
 0x307   : > { %10096 = sst [smem:[#allocation66_spill]] %s7056_s28  ;;  %s7074_s28 = sld [smem:[#allocation9 + $0x6e]]  ;;  %10165 = vst [vmem:[#allocation128_spill] sm:$0xff] %v7361_v32  ;;  %10170 = vst [vmem:[#allocation121_spill] sm:$0xff] %v7372_v43 }
 0x308   : > { %2281 = vrot.lane.b32.xlu0 %v6649_v53, %s9990_s11  ;;  %10119 = sst [smem:[#allocation196_spill]] %s7161_s1  ;;  %s10163_s2 = sld [smem:[#allocation106_spill]]  ;;  %10171 = vst [vmem:[#allocation208_spill] sm:$0xff] %v7377_v39  ;;  %10175 = vst [vmem:[#allocation123_spill] sm:$0xff] %v7388_v35 }
 0x309   : > { %2267 = vrot.lane.b32.xlu1 %v6670_v12, %s9989_s14  ;;  %10120 = sst [smem:[#allocation198_spill]] %s7163_s10  ;;  %s10167_s23 = sld [smem:[#allocation101_spill]]  ;;  %10176 = vst [vmem:[#allocation125_spill] sm:$0xff] %v7393_v21  ;;  %v10180_v24 = vstv %s10166_s21 }
 0x30a   : > { %10123 = sst [smem:[#allocation200_spill]] %s7181_s25  ;;  %s7365_s20 = sld [smem:[#allocation9 + $0x12]]  ;;  %v7404_v11 = vmul.f32 %v10180_v24, %v6693_v14  ;;  %v7422_v24 = vmul.f32 %v2445_v60, %v6886_v9  ;;  %v10195_v60 = vstv %s10178_s19 }
 0x30b   : > { %10132 = sst [smem:[#allocation203_spill]] %s7211_s30  ;;  %s7381_s7 = sld [smem:[#allocation9 + $0x5a]] }
 0x30c   : > { %2233 = vrot.lane.b32.xlu0 %v6855_v22, %s9989_s14  ;;  %10134 = sst [smem:[#allocation204_spill]] %s7213_s6  ;;  %s7383_s29 = sld [smem:[#allocation9 + $0x7e]]  ;;  %10181 = vst [vmem:[#allocation209_spill] sm:$0xff] %v7404_v11  ;;  %10188 = vst [vmem:[#allocation127_spill] sm:$0xff] %v7422_v24  ;;  %v7443_v24 = vmul.f32 %v10195_v60, %v6710_v25 }
 0x30d   : > { %2319 = vrot.lane.b32.xlu1 %v6886_v9, %s9989_s14  ;;  %10103 = sst [smem:[#allocation78_spill]] %s7074_s28  ;;  %s7179_s28 = sld [smem:[#allocation9 + $0x53]] }
 0x30e   : > { %10140 = sst [smem:[#allocation81_spill]] %s7251_s8  ;;  %s7397_s13 = sld [smem:[#allocation9 + $0x14]]  ;;  %v10193_v10 = vstv %s10163_s2  ;;  %10197 = vst [vmem:[#allocation131_spill] sm:$0xff] %v7443_v24 }
 0x30f   : > { %10141 = sst [smem:[#allocation79_spill]] %s7253_s0  ;;  %s7399_s5 = sld [smem:[#allocation9 + $0x38]]  ;;  %v10182_v17 = vstv %s10167_s23 }
 0x310   : > { %2249 = vrot.lane.b32.xlu0 %v6855_v22, %s9990_s11  ;;  %10146 = sst [smem:[#allocation86_spill]] %s7279_s4  ;;  %v7409_v33 = vmul.f32 %v10182_v17, %v6693_v14  ;;  %s10185_s0 = sld [smem:[#allocation33_spill]]  ;;  %v10189_v14 = vstv %s10173_s24 }
 0x311   : > { %2335 = vrot.lane.b32.xlu1 %v6886_v9, %s9990_s11  ;;  %10151 = sst [smem:[#allocation87_spill]] %s7301_s9  ;;  %s7415_s8 = sld [smem:[#allocation9 + $0x5c]]  ;;  %v7427_v17 = vmul.f32 %v10189_v14, %v6710_v25  ;;  %v10202_v14 = vstv %s10166_s21 }
 0x312   : > { %10168 = sst [smem:[#allocation91_spill]] %s7365_s20  ;;  %10183 = vst [vmem:[#allocation210_spill] sm:$0xff] %v7409_v33  ;;  %s7433_s4 = sld [smem:[#allocation9 + $0x39]]  ;;  %v7438_v33 = vmul.f32 %v10193_v10, %v6886_v9  ;;  %v7452_v37 = vmul.f32 %v10202_v14, %v6886_v9  ;;  %v7457_v10 = vmul.f32 %v10205_v23, %v6710_v25  ;;  %v10212_v14 = vstv %s10173_s24 }
 0x313   : > { %10122 = sst [smem:[#allocation199_spill]] %s7179_s28  ;;  %10190 = vst [vmem:[#allocation129_spill] sm:$0xff] %v7427_v17  ;;  %s10200_s9 = sld [smem:[#allocation110_spill]]  ;;  %v10207_v17 = vstv %s10167_s23  ;;  %v10214_v23 = vstv %s10178_s19 }
 0x314   : > { %2321 = vrot.lane.b32.xlu0 %v6720_v19, %s9989_s14  ;;  %10172 = sst [smem:[#allocation83_spill]] %s7381_s7  ;;  %10194 = vst [vmem:[#allocation130_spill] sm:$0xff] %v7438_v33  ;;  %s7447_s6 = sld [smem:[#allocation9 + $0x81]]  ;;  %10204 = vst [vmem:[#allocation215_spill] sm:$0xff] %v7452_v37  ;;  %v7462_v60 = vmul.f32 %v10207_v17, %v6886_v9  ;;  %v7476_v37 = vmul.f32 %v10212_v14, %v6855_v22  ;;  %v10216_v9 = vstv %s10184_s3 }
 0x315   : > { %2283 = vrot.lane.b32.xlu1 %v6670_v12, %s9990_s11  ;;  %10174 = sst [smem:[#allocation84_spill]] %s7383_s29  ;;  %10206 = vst [vmem:[#allocation132_spill] sm:$0xff] %v7457_v10  ;;  %s7469_s2 = sld [smem:[#allocation9 + $0x17]]  ;;  %v7481_v10 = vmul.f32 %v10214_v23, %v6855_v22  ;;  %v7486_v17 = vmul.f32 %v10216_v9, %v6855_v22 }
 0x316   : > { %10177 = sst [smem:[#allocation85_spill]] %s7397_s13  ;;  %10208 = vst [vmem:[#allocation133_spill] sm:$0xff] %v7462_v60  ;;  %v10209_v24 = vstv %s10185_s0  ;;  %s7471_s21 = sld [smem:[#allocation9 + $0x3b]]  ;;  %10213 = vst [vmem:[#allocation134_spill] sm:$0xff] %v7476_v37 }
 0x317   : > { %10179 = sst [smem:[#allocation89_spill]] %s7399_s5  ;;  %v7467_v33 = vmul.f32 %v10209_v24, %v6710_v25  ;;  %10215 = vst [vmem:[#allocation217_spill] sm:$0xff] %v7481_v10  ;;  %10217 = vst [vmem:[#allocation135_spill] sm:$0xff] %v7486_v17  ;;  %v10218_v25 = vmov %v10209_v24  ;;  %s10219_s23 = sld [smem:[#allocation37_spill]] }
 0x318   : > { %2337 = vrot.lane.b32.xlu0 %v6720_v19, %s9990_s11  ;;  %s6984_s11 = sld [smem:[#allocation9 + $0x4e]]  ;;  %10186 = sst [smem:[#allocation93_spill]] %s7415_s8  ;;  %v7491_v24 = vmul.f32 %v10218_v25, %v6855_v22 }
 0x319   : > { %2239 = vrot.lane.b32.xlu1 %v6994_v59, %s9989_s14  ;;  %10192 = sst [smem:[#allocation96_spill]] %s7433_s4  ;;  %10210 = vst [vmem:[#allocation216_spill] sm:$0xff] %v7467_v33  ;;  %s10221_s25 = sld [smem:[#allocation39_spill]]  ;;  %v10228_v33 = vstv %s10198_s18  ;;  %v10230_v17 = vstv %s10200_s9 }
 0x31a   : > { %10201 = sst [smem:[#allocation98_spill]] %s7447_s6  ;;  %10220 = vst [vmem:[#allocation136_spill] sm:$0xff] %v7491_v24  ;;  %s7493_s28 = sld [smem:[#allocation9 + $0x5f]]  ;;  %v7505_v9 = vmul.f32 %v10228_v33, %v6670_v12  ;;  %v7510_v10 = vmul.f32 %v10230_v17, %v6670_v12 }
 0x31b   : > { %10211 = sst [smem:[#allocation99_spill]] %s7469_s2  ;;  %s7495_s10 = sld [smem:[#allocation9 + $0x83]] }
 0x31c   : > { %2269 = vrot.lane.b32.xlu0 %v6927_v26, %s9989_s14  ;;  %s10223_s24 = sld [smem:[#allocation35_spill]]  ;;  %s10226_s19 = sld [smem:[#allocation40_spill]]  ;;  %10229 = vst [vmem:[#allocation138_spill] sm:$0xff] %v7505_v9  ;;  %10231 = vst [vmem:[#allocation137_spill] sm:$0xff] %v7510_v10  ;;  %v7534_v10 = vmul.f32 %v10230_v17, %v6649_v53 }
 0x31d   : > { %2323 = vrot.lane.b32.xlu1 %v7037_v1, %s9989_s14  ;;  %s7522_s0 = sld [smem:[#allocation9 + $0x18]]  ;;  %s7529_s3 = sld [smem:[#allocation9 + $0x3c]] }
 0x31e   : > { %10068 = sst [smem:[#allocation53_spill]] %s6984_s11  ;;  %s7303_s11 = sld [smem:[#allocation9 + $0x7d]]  ;;  %10239 = vst [vmem:[#allocation145_spill] sm:$0xff] %v7534_v10 }
 0x31f   : > { %s7541_s1 = sld [smem:[#allocation9 + $0x60]]  ;;  %10245 = sst [smem:[#allocation106_spill]] %s7543_s22 }
 0x320   : > { %2237 = vrot.lane.b32.xlu0 %v7025_v47, %s9989_s14  ;;  %s7061_s14 = sld [smem:[#allocation9 + $0x2]]  ;;  %10222 = sst [smem:[#allocation100_spill]] %s7493_s28 }
 0x321   : > { %2339 = vrot.lane.b32.xlu1 %v7037_v1, %s10105_s26  ;;  %10224 = sst [smem:[#allocation92_spill]] %s7495_s10  ;;  %s10244_s30 = sld [smem:[#allocation46_spill]] }
 0x322   : > { %s10247_s18 = sld [smem:[#allocation47_spill]]  ;;  %s10250_s9 = sld [smem:[#allocation48_spill]]  ;;  %v10252_v10 = vstv %s10223_s24 }
 0x323   : > { %10236 = sst [smem:[#allocation102_spill]] %s7522_s0  ;;  %s7593_s22 = sld [smem:[#allocation9 + $0x87]] }
 0x324   : > { %2253 = vrot.lane.b32.xlu0 %v7025_v47, %s10105_s26  ;;  %10152 = sst [smem:[#allocation88_spill]] %s7303_s11  ;;  %s10203_s11 = sld [smem:[#allocation36_spill]] }
 0x325   : > { %2255 = vrot.lane.b32.xlu1 %v6994_v59, %s10105_s26  ;;  %10238 = sst [smem:[#allocation90_spill]] %s7529_s3  ;;  %s10263_s12 = sld [smem:[#allocation38_spill]] }
 0x326   : > { %10099 = sst [smem:[#allocation67_spill]] %s7061_s14  ;;  %s10196_s14 = sld [smem:[#allocation34_spill]] }
 0x327   : > { %10243 = sst [smem:[#allocation104_spill]] %s7541_s1  ;;  %s7723_s7 = sld [smem:[#allocation9 + $0x89]] }
 0x328   : > { %2285 = vrot.lane.b32.xlu0 %v6927_v26, %s10105_s26  ;;  %10257 = sst [smem:[#allocation101_spill]] %s7567_s16  ;;  %s7591_s16 = sld [smem:[#allocation9 + $0x63]] }
 0x329   : > { %2271 = vrot.lane.b32.xlu1 %v6931_v3, %s10121_s17  ;;  %10267 = sst [smem:[#allocation105_spill]] %s7593_s22  ;;  %s7757_s29 = sld [smem:[#allocation9 + $0x68]] }
 0x32a   : > { %v10232_v22 = vstv %s10203_s11  ;;  %s7565_s11 = sld [smem:[#allocation9 + $0x1b]]  ;;  %s7759_s13 = sld [smem:[#allocation9 + $0x8c]] }
 0x32b   : > { %v7515_v25 = vmul.f32 %v10232_v22, %v6670_v12  ;;  %s7765_s8 = sld [smem:[#allocation9 + $0x21]]  ;;  %s7775_s2 = sld [smem:[#allocation9 + $0x8d]] }
 0x32c   : > { %2325 = vrot.lane.b32.xlu0 %v7121_v31, %s10121_s17  ;;  %v10225_v14 = vstv %s10196_s14  ;;  %s10242_s14 = sld [smem:[#allocation44_spill]]  ;;  %s7773_s4 = sld [smem:[#allocation9 + $0x69]] }
 0x32d   : > { %2287 = vrot.lane.b32.xlu1 %v6931_v3, %s10105_s26  ;;  %v7500_v23 = vmul.f32 %v10225_v14, %v6670_v12  ;;  %10233 = vst [vmem:[#allocation140_spill] sm:$0xff] %v7515_v25  ;;  %v10234_v24 = vmov %v10225_v14  ;;  %v7527_v14 = vmul.f32 %v10228_v33, %v6649_v53  ;;  %v10240_v12 = vmov %v10232_v22  ;;  %10318 = sst [smem:[#allocation44_spill]] %s7723_s7  ;;  %s7781_s0 = sld [smem:[#allocation9 + $0x23]] }
 0x32e   : > { %v7520_v37 = vmul.f32 %v10234_v24, %v6649_v53  ;;  %v7539_v22 = vmul.f32 %v10240_v12, %v6649_v53  ;;  %v10246_v24 = vstv %s10219_s23  ;;  %v10249_v25 = vstv %s10221_s25  ;;  %s10264_s23 = sld [smem:[#allocation49_spill]]  ;;  %10265 = sst [smem:[#allocation103_spill]] %s7591_s16 }
 0x32f   : > { %10227 = vst [vmem:[#allocation218_spill] sm:$0xff] %v7500_v23  ;;  %10237 = vst [vmem:[#allocation144_spill] sm:$0xff] %v7527_v14  ;;  %v7548_v33 = vmul.f32 %v10246_v24, %v6720_v19  ;;  %v7553_v17 = vmul.f32 %v10249_v25, %v6720_v19  ;;  %v7558_v53 = vmul.f32 %v10252_v10, %v6720_v19  ;;  %v10254_v12 = vstv %s10226_s19  ;;  %s10269_s25 = sld [smem:[#allocation51_spill]]  ;;  %s7617_s19 = sld [smem:[#allocation9 + $0x3e]] }
 0x330   : > { %2341 = vrot.lane.b32.xlu0 %v7121_v31, %s10105_s26  ;;  %10235 = vst [vmem:[#allocation141_spill] sm:$0xff] %v7520_v37  ;;  %10241 = vst [vmem:[#allocation149_spill] sm:$0xff] %v7539_v22  ;;  %v7563_v22 = vmul.f32 %v10254_v12, %v6720_v19  ;;  %10256 = sst [smem:[#allocation108_spill]] %s7565_s11  ;;  %v7577_v10 = vmul.f32 %v10249_v25, %v7037_v1  ;;  %s10266_s11 = sld [smem:[#allocation50_spill]] }
 0x331   : > { %2327 = vrot.lane.b32.xlu1 %v7134_v45, %s10121_s17  ;;  %s7367_s17 = sld [smem:[#allocation9 + $0x36]]  ;;  %10248 = vst [vmem:[#allocation151_spill] sm:$0xff] %v7548_v33  ;;  %10251 = vst [vmem:[#allocation153_spill] sm:$0xff] %v7553_v17  ;;  %v7572_v33 = vmul.f32 %v10246_v24, %v7037_v1  ;;  %10330 = sst [smem:[#allocation48_spill]] %s7757_s29 }
 0x332   : > { %10253 = vst [vmem:[#allocation155_spill] sm:$0xff] %v7558_v53  ;;  %10255 = vst [vmem:[#allocation156_spill] sm:$0xff] %v7563_v22  ;;  %v10260_v53 = vstv %s10223_s24  ;;  %v7587_v22 = vmul.f32 %v10254_v12, %v7037_v1  ;;  %v10268_v24 = vstv %s10242_s14  ;;  %s7615_s24 = sld [smem:[#allocation9 + $0x1a]]  ;;  %s10286_s14 = sld [smem:[#allocation52_spill]] }
 0x333   : > { %10258 = vst [vmem:[#allocation148_spill] sm:$0xff] %v7572_v33  ;;  %10259 = vst [vmem:[#allocation157_spill] sm:$0xff] %v7577_v10  ;;  %v7582_v19 = vmul.f32 %v10260_v53, %v7037_v1  ;;  %v7598_v25 = vmul.f32 %v10268_v24, %v6994_v59  ;;  %v10271_v53 = vstv %s10244_s30  ;;  %v10273_v1 = vstv %s10247_s18  ;;  %10332 = sst [smem:[#allocation38_spill]] %s7759_s13  ;;  %s10343_s1 = sld [smem:[#allocation45_spill]] }
 0x334   : > { %10262 = vst [vmem:[#allocation158_spill] sm:$0xff] %v7587_v22  ;;  %v7608_v12 = vmul.f32 %v10273_v1, %v6994_v59  ;;  %v10275_v22 = vstv %s10250_s9  ;;  %s7665_s9 = sld [smem:[#allocation9 + $0x42]]  ;;  %10334 = sst [smem:[#allocation49_spill]] %s7765_s8 }
 0x335   : > { %2343 = vrot.lane.b32.xlu1 %v7134_v45, %s10105_s26  ;;  %s7431_s26 = sld [smem:[#allocation9 + $0x15]]  ;;  %10261 = vst [vmem:[#allocation150_spill] sm:$0xff] %v7582_v19  ;;  %10270 = vst [vmem:[#allocation152_spill] sm:$0xff] %v7598_v25  ;;  %v7603_v19 = vmul.f32 %v10271_v53, %v6994_v59  ;;  %v7613_v10 = vmul.f32 %v10275_v22, %v6994_v59  ;;  %10278 = sst [smem:[#allocation33_spill]] %s7617_s19  ;;  %v7622_v53 = vmul.f32 %v10268_v24, %v7025_v47 }
 0x336   : > { %10274 = vst [vmem:[#allocation163_spill] sm:$0xff] %v7608_v12  ;;  %v10282_v12 = vstv %s10247_s18  ;;  %s7639_s19 = sld [smem:[#allocation9 + $0x62]]  ;;  %v10288_v24 = vstv %s10263_s12  ;;  %s7663_s18 = sld [smem:[#allocation9 + $0x1e]] }
 0x337   : > { %10169 = sst [smem:[#allocation82_spill]] %s7367_s17  ;;  %10272 = vst [vmem:[#allocation154_spill] sm:$0xff] %v7603_v19  ;;  %10276 = vst [vmem:[#allocation159_spill] sm:$0xff] %v7613_v10  ;;  %v10280_v19 = vstv %s10244_s30  ;;  %v7632_v59 = vmul.f32 %v10282_v12, %v7025_v47  ;;  %v7637_v10 = vmul.f32 %v10275_v22, %v7025_v47  ;;  %s10289_s30 = sld [smem:[#allocation41_spill]]  ;;  %v10293_v12 = vstv %s10266_s11 }
 0x338   : > { %10277 = sst [smem:[#allocation107_spill]] %s7615_s24  ;;  %10279 = vst [vmem:[#allocation164_spill] sm:$0xff] %v7622_v53  ;;  %v7627_v1 = vmul.f32 %v10280_v19, %v7025_v47  ;;  %s7641_s24 = sld [smem:[#allocation9 + $0x86]]  ;;  %v7646_v53 = vmul.f32 %v10288_v24, %v6927_v26  ;;  %v10291_v19 = vstv %s10264_s23  ;;  %v10295_v47 = vstv %s10269_s25 }
 0x339   : > { %10283 = vst [vmem:[#allocation161_spill] sm:$0xff] %v7632_v59  ;;  %10284 = vst [vmem:[#allocation165_spill] sm:$0xff] %v7637_v10  ;;  %v7656_v59 = vmul.f32 %v10293_v12, %v6927_v26  ;;  %v7661_v22 = vmul.f32 %v10295_v47, %v6927_v26  ;;  %s7689_s12 = sld [smem:[#allocation9 + $0x66]]  ;;  %s7691_s23 = sld [smem:[#allocation9 + $0x8a]] }
 0x33a   : > { %10281 = vst [vmem:[#allocation160_spill] sm:$0xff] %v7627_v1  ;;  %10290 = vst [vmem:[#allocation162_spill] sm:$0xff] %v7646_v53  ;;  %v7651_v1 = vmul.f32 %v10291_v19, %v6927_v26  ;;  %10297 = sst [smem:[#allocation110_spill]] %s7665_s9  ;;  %v7670_v53 = vmul.f32 %v10288_v24, %v6931_v3  ;;  %v10303_v26 = vmov %v10295_v47  ;;  %v10307_v24 = vstv %s10286_s14  ;;  %s7707_s11 = sld [smem:[#allocation9 + $0x1d]] }
 0x33b   : > { %10191 = sst [smem:[#allocation95_spill]] %s7431_s26  ;;  %10294 = vst [vmem:[#allocation167_spill] sm:$0xff] %v7656_v59  ;;  %10296 = vst [vmem:[#allocation168_spill] sm:$0xff] %v7661_v22  ;;  %v7680_v59 = vmul.f32 %v10293_v12, %v6931_v3  ;;  %v7685_v47 = vmul.f32 %v10303_v26, %v6931_v3  ;;  %s7721_s17 = sld [smem:[#allocation9 + $0x65]]  ;;  %v10319_v22 = vstv %s10286_s14 }
 0x33c   : > { %10285 = sst [smem:[#allocation34_spill]] %s7639_s19  ;;  %10292 = vst [vmem:[#allocation166_spill] sm:$0xff] %v7651_v1  ;;  %10299 = vst [vmem:[#allocation169_spill] sm:$0xff] %v7670_v53  ;;  %s10300_s19 = sld [smem:[#allocation43_spill]]  ;;  %v7675_v1 = vmul.f32 %v10291_v19, %v6931_v3  ;;  %v7696_v19 = vmul.f32 %v10307_v24, %v7121_v31  ;;  %v7728_v10 = vmul.f32 %v10319_v22, %v7134_v45 }
 0x33d   : > { %10302 = vst [vmem:[#allocation171_spill] sm:$0xff] %v7680_v59  ;;  %10304 = vst [vmem:[#allocation172_spill] sm:$0xff] %v7685_v47  ;;  %v10309_v12 = vstv %s10289_s30  ;;  %s7709_s25 = sld [smem:[#allocation9 + $0x41]]  ;;  %s7749_s14 = sld [smem:[#allocation9 + $0x20]] }
 0x33e   : > { %10287 = sst [smem:[#allocation109_spill]] %s7641_s24  ;;  %s10298_s24 = sld [smem:[#allocation42_spill]]  ;;  %10301 = vst [vmem:[#allocation170_spill] sm:$0xff] %v7675_v1  ;;  %10308 = vst [vmem:[#allocation173_spill] sm:$0xff] %v7696_v19  ;;  %v7701_v3 = vmul.f32 %v10309_v12, %v7121_v31 }
 0x33f   : > { %10305 = sst [smem:[#allocation36_spill]] %s7689_s12  ;;  %10320 = vst [vmem:[#allocation177_spill] sm:$0xff] %v7728_v10  ;;  %s7767_s26 = sld [smem:[#allocation9 + $0x45]] }
 0x340   : > { %10306 = sst [smem:[#allocation37_spill]] %s7691_s23  ;;  %10310 = vst [vmem:[#allocation174_spill] sm:$0xff] %v7701_v3  ;;  %v10321_v3 = vstv %s10289_s30  ;;  %s7751_s30 = sld [smem:[#allocation9 + $0x44]] }
 0x341   : > { %10311 = sst [smem:[#allocation39_spill]] %s7707_s11  ;;  %v7733_v59 = vmul.f32 %v10321_v3, %v7134_v45  ;;  %s10337_s15 = sld [smem:[#allocation34_spill]] }
 0x342   : > { %v10315_v19 = vstv %s10300_s19  ;;  %10317 = sst [smem:[#allocation40_spill]] %s7721_s17  ;;  %s10338_s6 = sld [smem:[#allocation109_spill]] }
 0x343   : > { %10312 = sst [smem:[#allocation35_spill]] %s7709_s25  ;;  %v7719_v12 = vmul.f32 %v10315_v19, %v7121_v31  ;;  %10322 = vst [vmem:[#allocation178_spill] sm:$0xff] %v7733_v59  ;;  %s10344_s3 = sld [smem:[#allocation54_spill]] }
 0x344   : > { %v10313_v47 = vstv %s10298_s24  ;;  %10326 = sst [smem:[#allocation46_spill]] %s7749_s14  ;;  %s7783_s24 = sld [smem:[#allocation9 + $0x47]] }
 0x345   : > { %v7714_v24 = vmul.f32 %v10313_v47, %v7121_v31  ;;  %10316 = vst [vmem:[#allocation176_spill] sm:$0xff] %v7719_v12  ;;  %v10324_v31 = vmov %v10315_v19  ;;  %10336 = sst [smem:[#allocation50_spill]] %s7767_s26  ;;  %s10345_s19 = sld [smem:[#allocation55_spill]] }
 0x346   : > { %v7589_v17 = vpop.permute.xlu0 %2257  ;;  %v7743_v19 = vmul.f32 %v10324_v31, %v7134_v45  ;;  %10327 = sst [smem:[#allocation47_spill]] %s7751_s30  ;;  %s7789_s20 = sld [smem:[#allocation9 + $0x6b]] }
 0x347   : > { %10314 = vst [vmem:[#allocation175_spill] sm:$0xff] %v7714_v24  ;;  %v7738_v24 = vmul.f32 %v10313_v47, %v7134_v45  ;;  %10339 = sst [smem:[#allocation51_spill]] %s7773_s4  ;;  %s10347_s16 = sld [smem:[#allocation56_spill]] }
 0x348   : > { %10325 = vst [vmem:[#allocation180_spill] sm:$0xff] %v7743_v19  ;;  %10340 = sst [smem:[#allocation52_spill]] %s7775_s2  ;;  %s7791_s10 = sld [smem:[#allocation9 + $0x8f]]  ;;  %v10353_v19 = vstv %s10343_s1 }
 0x349   : > { %10323 = vst [vmem:[#allocation179_spill] sm:$0xff] %v7738_v24  ;;  %10341 = sst [smem:[#allocation41_spill]] %s7781_s0  ;;  %s10350_s28 = sld [smem:[#allocation58_spill]]  ;;  %v7804_v53 = vmul.f32 %v10353_v19, %v7589_v17  ;;  %v10354_v1 = vstv %s10344_s3  ;;  %v10379_v39 = vstv %s10344_s3 }
 0x34a   : > { %v7703_v26 = vpop.permute.xlu0 %2273  ;;  %10342 = sst [smem:[#allocation42_spill]] %s7783_s24  ;;  %s10349_s22 = sld [smem:[#allocation57_spill]]  ;;  %v7809_v45 = vmul.f32 %v10354_v1, %v7589_v17 }
 0x34b   : > { %s10351_s27 = sld [smem:[#allocation59_spill]]  ;;  %v2260_v47 = vpop.permute.xlu1 %2259  ;;  %s10352_s5 = sld [smem:[#allocation60_spill]]  ;;  %v10356_v24 = vstv %s10345_s19  ;;  %v10381_v43 = vstv %s10345_s19 }
 0x34c   : > { %10346 = sst [smem:[#allocation43_spill]] %s7789_s20  ;;  %s10355_s23 = sld [smem:[#allocation61_spill]]  ;;  %v7816_v59 = vmul.f32 %v10356_v24, %v7589_v17 }
 0x34d   : > { %s10357_s25 = sld [smem:[#allocation139_spill]]  ;;  %v10358_v12 = vstv %s10347_s16  ;;  %s10359_s7 = sld [smem:[#allocation142_spill]] }
 0x34e   : > { %v2262_v22 = vpop.permute.xlu0 %2261  ;;  %10348 = sst [smem:[#allocation34_spill]] %s7791_s10  ;;  %v7821_v10 = vmul.f32 %v10358_v12, %v7589_v17  ;;  %s10360_s17 = sld [smem:[#allocation143_spill]] }
 0x34f   : > { %v10362_v31 = vstv %s10350_s28  ;;  %s10365_s13 = sld [smem:[#allocation146_spill]]  ;;  %s10367_s29 = sld [smem:[#allocation147_spill]] }
 0x350   : > { %v10361_v1 = vstv %s10349_s22  ;;  %v7833_v33 = vmul.f32 %v10362_v31, %v7703_v26  ;;  %s10370_s30 = sld [smem:[#allocation53_spill]]  ;;  %s10373_s14 = sld [smem:[#allocation62_spill]] }
 0x351   : > { %v7828_v3 = vmul.f32 %v10361_v1, %v7703_v26  ;;  %v10363_v24 = vstv %s10351_s27  ;;  %v10364_v17 = vstv %s10352_s5  ;;  %v2276_v1 = vpop.permute.xlu1 %2275  ;;  %s10377_s2 = sld [smem:[#allocation75_spill]]  ;;  %s10378_s4 = sld [smem:[#allocation76_spill]] }
 0x352   : > { %v7838_v14 = vmul.f32 %v10363_v24, %v7703_v26  ;;  %v7843_v12 = vmul.f32 %v10364_v17, %v7703_v26  ;;  %v2314_v25 = vpop.permute.xlu0 %2313  ;;  %v10366_v37 = vstv %s10355_s23  ;;  %s10380_s26 = sld [smem:[#allocation65_spill]]  ;;  %s10382_s8 = sld [smem:[#allocation66_spill]]  ;;  %v10407_v38 = vstv %s10355_s23 }
 0x353   : > { %v7851_v60 = vmul.f32 %v10366_v37, %v2262_v22  ;;  %v10369_v24 = vstv %s10357_s25  ;;  %v10372_v26 = vstv %s10359_s7  ;;  %s10389_s1 = sld [smem:[#allocation64_spill]]  ;;  %s10396_s19 = sld [smem:[#allocation74_spill]]  ;;  %v10413_v62 = vstv %s10359_s7 }
 0x354   : > { %v7855_v11 = vmul.f32 %v10369_v24, %v2262_v22  ;;  %v7859_v17 = vmul.f32 %v10372_v26, %v2262_v22  ;;  %v10375_v21 = vstv %s10360_s17  ;;  %v7871_v24 = vmul.f32 %v10353_v19, %v2260_v47  ;;  %s10394_s3 = sld [smem:[#allocation72_spill]]  ;;  %s10423_s7 = sld [smem:[#allocation67_spill]] }
 0x355   : > { %10368 = vst [vmem:[#allocation181_spill] sm:$0xff] %v7851_v60  ;;  %v7863_v35 = vmul.f32 %v10375_v21, %v2262_v22  ;;  %v7875_v26 = vmul.f32 %v10379_v39, %v2260_v47  ;;  %v7879_v21 = vmul.f32 %v10381_v43, %v2260_v47  ;;  %v10383_v22 = vstv %s10347_s16  ;;  %v2264_v37 = vpop.permute.xlu1 %2263  ;;  %s10392_s16 = sld [smem:[#allocation70_spill]]  ;;  %s10433_s23 = sld [smem:[#allocation77_spill]] }
 0x356   : > { %10371 = vst [vmem:[#allocation182_spill] sm:$0xff] %v7855_v11  ;;  %10374 = vst [vmem:[#allocation183_spill] sm:$0xff] %v7859_v17  ;;  %v7883_v23 = vmul.f32 %v10383_v22, %v2260_v47  ;;  %v2330_v9 = vpop.permute.xlu0 %2329  ;;  %v10384_v31 = vstv %s10365_s13  ;;  %v10385_v32 = vstv %s10367_s29  ;;  %v10386_v39 = vstv %s10370_s30  ;;  %s10461_s10 = sld [smem:[#allocation204_spill]]  ;;  %s10465_s20 = sld [smem:[#allocation205_spill]] }
 0x357   : > { %10376 = vst [vmem:[#allocation185_spill] sm:$0xff] %v7863_v35  ;;  %v7887_v19 = vmul.f32 %v10384_v31, %v2314_v25  ;;  %v7891_v29 = vmul.f32 %v10385_v32, %v2314_v25  ;;  %v7895_v4 = vmul.f32 %v10386_v39, %v2314_v25  ;;  %v10388_v43 = vstv %s10373_s14  ;;  %s10466_s24 = sld [smem:[#allocation206_spill]]  ;;  %s10472_s0 = sld [smem:[#allocation79_spill]] }
 0x358   : > { %v7899_v42 = vmul.f32 %v10388_v43, %v2314_v25  ;;  %v10391_v47 = vstv %s10349_s22  ;;  %v10393_v35 = vstv %s10350_s28  ;;  %v10395_v31 = vstv %s10351_s27  ;;  %s10405_s28 = sld [smem:[#allocation63_spill]]  ;;  %s10408_s27 = sld [smem:[#allocation68_spill]] }
 0x359   : > { %10387 = vst [vmem:[#allocation186_spill] sm:$0xff] %v7895_v4  ;;  %v7903_v22 = vmul.f32 %v10391_v47, %v2276_v1  ;;  %v7907_v5 = vmul.f32 %v10393_v35, %v2276_v1  ;;  %v7911_v46 = vmul.f32 %v10395_v31, %v2276_v1  ;;  %v10397_v32 = vstv %s10352_s5  ;;  %s10411_s22 = sld [smem:[#allocation71_spill]]  ;;  %s10414_s5 = sld [smem:[#allocation73_spill]] }
 0x35a   : > { %10390 = vst [vmem:[#allocation187_spill] sm:$0xff] %v7899_v42  ;;  %v7915_v39 = vmul.f32 %v10397_v32, %v2276_v1  ;;  %v10398_v17 = vstv %s10377_s2  ;;  %v10400_v43 = vstv %s10378_s4  ;;  %v10402_v11 = vstv %s10380_s26  ;;  %v2226_v63 = vpop.permute.xlu0 %2225  ;;  %s10474_s11 = sld [smem:[#allocation80_spill]]  ;;  %s10478_s12 = sld [smem:[#allocation86_spill]] }
 0x35b   : > { %v7919_v25 = vmul.f32 %v10398_v17, %v2330_v9  ;;  %v7923_v47 = vmul.f32 %v10400_v43, %v2330_v9  ;;  %v7927_v35 = vmul.f32 %v10402_v11, %v2330_v9  ;;  %v10404_v60 = vstv %s10382_s8  ;;  %s10480_s9 = sld [smem:[#allocation87_spill]] }
 0x35c   : > { %v7931_v31 = vmul.f32 %v10404_v60, %v2330_v9  ;;  %v7935_v1 = vmul.f32 %v10407_v38, %v2264_v37  ;;  %v10410_v32 = vstv %s10357_s25  ;;  %v7943_v43 = vmul.f32 %v10413_v62, %v2264_v37  ;;  %v2228_v60 = vpop.permute.xlu1 %2227  ;;  %s10436_s25 = sld [smem:[#allocation78_spill]] }
 0x35d   : > { %10399 = vst [vmem:[#allocation188_spill] sm:$0xff] %v7919_v25  ;;  %10401 = vst [vmem:[#allocation191_spill] sm:$0xff] %v7923_v47  ;;  %v7939_v17 = vmul.f32 %v10410_v32, %v2264_v37  ;;  %v10416_v41 = vstv %s10360_s17  ;;  %v10418_v9 = vstv %s10389_s1  ;;  %v10420_v13 = vstv %s10394_s3  ;;  %s10426_s17 = sld [smem:[#allocation69_spill]]  ;;  %s10443_s1 = sld [smem:[#allocation184_spill]] }
 0x35e   : > { %10403 = vst [vmem:[#allocation192_spill] sm:$0xff] %v7927_v35  ;;  %10406 = vst [vmem:[#allocation193_spill] sm:$0xff] %v7931_v31  ;;  %v7947_v11 = vmul.f32 %v10416_v41, %v2264_v37  ;;  %v2350_v38 = vmul.f32 %v10418_v9, %v2226_v63  ;;  %v2788_v32 = vmul.f32 %v10420_v13, %v2226_v63  ;;  %v10422_v49 = vmov %v10418_v9  ;;  %s10446_s3 = sld [smem:[#allocation190_spill]] }
 0x35f   : > { %10409 = vst [vmem:[#allocation111_spill] sm:$0xff] %v7935_v1  ;;  %10412 = vst [vmem:[#allocation194_spill] sm:$0xff] %v7939_v17  ;;  %v10419_v1 = vstv %s10392_s16  ;;  %v10421_v17 = vstv %s10396_s19  ;;  %v2351_v62 = vmul.f32 %v10422_v49, %v2228_v60  ;;  %v10425_v41 = vmov %v10420_v13  ;;  %s10444_s16 = sld [smem:[#allocation189_spill]]  ;;  %s10447_s19 = sld [smem:[#allocation195_spill]] }
 0x360   : > { %10415 = vst [vmem:[#allocation197_spill] sm:$0xff] %v7943_v43  ;;  %10417 = vst [vmem:[#allocation29_spill] sm:$0xff] %v7947_v11  ;;  %v2569_v31 = vmul.f32 %v10419_v1, %v2226_v63  ;;  %v3007_v35 = vmul.f32 %v10421_v17, %v2226_v63  ;;  %v10424_v43 = vmov %v10419_v1  ;;  %v2789_v37 = vmul.f32 %v10425_v41, %v2228_v60  ;;  %v2244_v55 = vpop.permute.xlu1 %2243 }
 0x361   : > { %v2570_v44 = vmul.f32 %v10424_v43, %v2228_v60  ;;  %v10427_v11 = vmov %v10421_v17  ;;  %v10428_v18 = vstv %s10405_s28  ;;  %v10429_v9 = vstv %s10408_s27  ;;  %s10449_s28 = sld [smem:[#allocation201_spill]]  ;;  %s10450_s27 = sld [smem:[#allocation202_spill]] }
 0x362   : > { %v3008_v36 = vmul.f32 %v10427_v11, %v2228_v60  ;;  %v2352_v42 = vadd.f32 %v2350_v38, %v10428_v18  ;;  %v2571_v28 = vadd.f32 %v2569_v31, %v10429_v9  ;;  %v10430_v1 = vstv %s10411_s22  ;;  %v2242_v60 = vpop.permute.xlu0 %2241  ;;  %s10452_s22 = sld [smem:[#allocation203_spill]] }
 0x363   : > { %v2790_v13 = vadd.f32 %v2788_v32, %v10430_v1  ;;  %v10431_v47 = vstv %s10414_s5  ;;  %v10432_v17 = vmov %v10428_v18  ;;  %v10434_v25 = vmov %v10429_v9  ;;  %s10455_s5 = sld [smem:[#allocation196_spill]] }
 0x364   : > { %v3009_v63 = vadd.f32 %v3007_v35, %v10431_v47  ;;  %v2353_v49 = vadd.f32 %v2351_v62, %v10432_v17  ;;  %v2572_v43 = vadd.f32 %v2570_v44, %v10434_v25  ;;  %v10435_v4 = vmov %v10430_v1 }
 0x365   : > { %v2791_v41 = vadd.f32 %v2789_v37, %v10435_v4  ;;  %v10437_v0 = vmov %v10431_v47  ;;  %v2358_v18 = vadd.f32 %v7190_v6, %v2352_v42  ;;  %v10438_v31 = vstv %s10423_s7  ;;  %s10457_s7 = sld [smem:[#allocation198_spill]] }
 0x366   : > { %v3010_v11 = vadd.f32 %v3008_v36, %v10437_v0  ;;  %v2362_v38 = vmul.f32 %v10438_v31, %v2242_v60  ;;  %v2577_v32 = vadd.f32 %v7195_v50, %v2571_v28  ;;  %v10439_v9 = vstv %s10426_s17  ;;  %s10458_s17 = sld [smem:[#allocation199_spill]] }
 0x367   : > { %v2581_v47 = vmul.f32 %v10439_v9, %v2242_v60  ;;  %v2359_v35 = vadd.f32 %v7147_v51, %v2353_v49  ;;  %v10440_v62 = vmov %v10438_v31  ;;  %v2578_v44 = vadd.f32 %v7155_v20, %v2572_v43  ;;  %v2278_v31 = vpop.permute.xlu0 %2277 }
 0x368   : > { %v2363_v1 = vmul.f32 %v10440_v62, %v2244_v55  ;;  %v10441_v4 = vmov %v10439_v9  ;;  %v2797_v0 = vadd.f32 %v7170_v30, %v2791_v41  ;;  %v10442_v36 = vstv %s10433_s23  ;;  %v2232_v9 = vpop.permute.xlu1 %2231  ;;  %s10459_s23 = sld [smem:[#allocation200_spill]] }
 0x369   : > { %v2582_v25 = vmul.f32 %v10441_v4, %v2244_v55  ;;  %v2801_v6 = vmul.f32 %v10442_v36, %v2244_v55  ;;  %v3016_v42 = vadd.f32 %v7175_v57, %v3010_v11  ;;  %v10445_v50 = vstv %s10436_s25  ;;  %s10467_s25 = sld [smem:[#allocation81_spill]] }
 0x36a   : > { %v3020_v28 = vmul.f32 %v10445_v50, %v2244_v55  ;;  %v2365_v37 = vadd.f32 %v2363_v1, %v2359_v35  ;;  %v2364_v17 = vadd.f32 %v2362_v38, %v2358_v18  ;;  %v2583_v49 = vadd.f32 %v2581_v47, %v2577_v32 }
 0x36b   : > { %v2584_v51 = vadd.f32 %v2582_v25, %v2578_v44  ;;  %v2803_v20 = vadd.f32 %v2801_v6, %v2797_v0  ;;  %v2796_v30 = vadd.f32 %v7204_v54, %v2790_v13  ;;  %v10448_v41 = vmov %v10442_v36 }
 0x36c   : > { %v3022_v43 = vadd.f32 %v3020_v28, %v3016_v42  ;;  %v2800_v62 = vmul.f32 %v10448_v41, %v2242_v60  ;;  %v2371_v57 = vadd.f32 %v7871_v24, %v2365_v37  ;;  %v10451_v11 = vstv %s10443_s1  ;;  %v2248_v36 = vpop.permute.xlu1 %2247 }
 0x36d   : > { %v2590_v55 = vadd.f32 %v7875_v26, %v2584_v51  ;;  %v8006_v35 = vmul.f32 %v10451_v11, %v2232_v9  ;;  %v10453_v18 = vstv %s10444_s16  ;;  %v2809_v32 = vadd.f32 %v7879_v21, %v2803_v20  ;;  %v2318_v21 = vpop.permute.xlu0 %2317 }
 0x36e   : > { %v8010_v38 = vmul.f32 %v10453_v18, %v2232_v9  ;;  %v3028_v47 = vadd.f32 %v7883_v23, %v3022_v43  ;;  %v10454_v54 = vstv %s10446_s3  ;;  %v10456_v1 = vstv %s10447_s19 }
 0x36f   : > { %v8016_v13 = vmul.f32 %v10454_v54, %v2232_v9  ;;  %v8020_v24 = vmul.f32 %v10456_v1, %v2232_v9  ;;  %v2370_v26 = vadd.f32 %v7804_v53, %v2364_v17  ;;  %v2589_v44 = vadd.f32 %v7809_v45, %v2583_v49 }
 0x370   : > { %v2802_v4 = vadd.f32 %v2800_v62, %v2796_v30  ;;  %v3015_v25 = vadd.f32 %v7209_v40, %v3009_v63  ;;  %v10460_v0 = vmov %v10445_v50  ;;  %v10462_v6 = vstv %s10449_s28  ;;  %v2280_v1 = vpop.permute.xlu1 %2279  ;;  %s10485_s28 = sld [smem:[#allocation88_spill]] }
 0x371   : > { %v3019_v23 = vmul.f32 %v10460_v0, %v2242_v60  ;;  %v8029_v42 = vmul.f32 %v10462_v6, %v2278_v31  ;;  %v10463_v50 = vstv %s10450_s27  ;;  %v10464_v37 = vstv %s10452_s22  ;;  %v2334_v18 = vpop.permute.xlu0 %2333  ;;  %s10553_s27 = sld [smem:[#allocation100_spill]] }
 0x372   : > { %v8033_v28 = vmul.f32 %v10463_v50, %v2278_v31  ;;  %v8037_v53 = vmul.f32 %v10464_v37, %v2278_v31  ;;  %v2376_v45 = vadd.f32 %v7068_v15, %v2370_v26  ;;  %v2595_v40 = vadd.f32 %v7079_v48, %v2589_v44  ;;  %s10555_s22 = sld [smem:[#allocation92_spill]] }
 0x373   : > { %v2808_v63 = vadd.f32 %v7816_v59, %v2802_v4  ;;  %v10468_v60 = vstv %s10455_s5  ;;  %v3021_v17 = vadd.f32 %v3019_v23, %v3015_v25  ;;  %v10469_v49 = vstv %s10457_s7 }
 0x374   : > { %v8044_v51 = vmul.f32 %v10468_v60, %v2248_v36  ;;  %v8048_v20 = vmul.f32 %v10469_v49, %v2248_v36  ;;  %v10470_v43 = vstv %s10458_s17  ;;  %v10471_v15 = vstv %s10459_s23 }
 0x375   : > { %v8052_v9 = vmul.f32 %v10470_v43, %v2248_v36  ;;  %v8056_v30 = vmul.f32 %v10471_v15, %v2248_v36  ;;  %v2382_v48 = vadd.f32 %v7828_v3, %v2376_v45  ;;  %v2601_v59 = vadd.f32 %v7833_v33, %v2595_v40 }
 0x376   : > { %v2814_v41 = vadd.f32 %v7084_v27, %v2808_v63  ;;  %v10473_v62 = vstv %s10461_s10  ;;  %v3027_v54 = vadd.f32 %v7821_v10, %v3021_v17  ;;  %v10475_v26 = vstv %s10465_s20  ;;  %s10511_s10 = sld [smem:[#allocation82_spill]] }
 0x377   : > { %v8063_v11 = vmul.f32 %v10473_v62, %v2278_v31  ;;  %v8068_v44 = vmul.f32 %v10475_v26, %v2318_v21  ;;  %v10476_v4 = vstv %s10466_s24  ;;  %v10477_v3 = vstv %s10467_s25 }
 0x378   : > { %v8072_v25 = vmul.f32 %v10476_v4, %v2318_v21  ;;  %v8076_v0 = vmul.f32 %v10477_v3, %v2318_v21  ;;  %v2820_v27 = vadd.f32 %v7838_v14, %v2814_v41  ;;  %v10479_v33 = vmov %v10462_v6  ;;  %v2316_v41 = vpop.permute.xlu1 %2315 }
 0x379   : > { %v8081_v31 = vmul.f32 %v10479_v33, %v2280_v1  ;;  %v10481_v23 = vmov %v10463_v50  ;;  %v10482_v36 = vmov %v10464_v37  ;;  %v3033_v50 = vadd.f32 %v7097_v61, %v3027_v54 }
 0x37a   : > { %v8085_v10 = vmul.f32 %v10481_v23, %v2280_v1  ;;  %v8089_v6 = vmul.f32 %v10482_v36, %v2280_v1  ;;  %v10483_v37 = vmov %v10473_v62  ;;  %v10484_v40 = vstv %s10472_s0 }
 0x37b   : > { %v8094_v45 = vmul.f32 %v10483_v37, %v2280_v1  ;;  %v8098_v63 = vmul.f32 %v10484_v40, %v2318_v21  ;;  %v2377_v14 = vadd.f32 %v7218_v56, %v2371_v57  ;;  %v2596_v60 = vadd.f32 %v7223_v58, %v2590_v55  ;;  %v2230_v57 = vpop.permute.xlu0 %2229 }
 0x37c   : > { %v2815_v17 = vadd.f32 %v7232_v8, %v2809_v32  ;;  %v3034_v49 = vadd.f32 %v7237_v16, %v3028_v47  ;;  %v10486_v43 = vstv %s10474_s11  ;;  %v3039_v15 = vadd.f32 %v7843_v12, %v3033_v50 }
 0x37d   : > { %v8106_v61 = vmul.f32 %v10486_v43, %v2334_v18  ;;  %v2383_v21 = vadd.f32 %v7903_v22, %v2377_v14  ;;  %v10487_v62 = vstv %s10478_s12  ;;  %v10488_v56 = vstv %s10480_s9 }
 0x37e   : > { %v8112_v54 = vmul.f32 %v10487_v62, %v2334_v18  ;;  %v8116_v58 = vmul.f32 %v10488_v56, %v2334_v18  ;;  %v10489_v8 = vstv %s10365_s13  ;;  %v2602_v16 = vadd.f32 %v7907_v5, %v2596_v60  ;;  %v2332_v60 = vpop.permute.xlu1 %2331  ;;  %s10520_s13 = sld [smem:[#allocation85_spill]] }
 0x37f   : > { %v2387_v55 = vmul.f32 %v10489_v8, %v2316_v41  ;;  %v10490_v32 = vstv %s10367_s29  ;;  %v2821_v12 = vadd.f32 %v7911_v46, %v2815_v17  ;;  %v10491_v1 = vstv %s10370_s30  ;;  %s10515_s29 = sld [smem:[#allocation84_spill]]  ;;  %s10530_s30 = sld [smem:[#allocation95_spill]] }
 0x380   : > { %v2606_v47 = vmul.f32 %v10490_v32, %v2316_v41  ;;  %v2825_v26 = vmul.f32 %v10491_v1, %v2316_v41  ;;  %v3040_v22 = vadd.f32 %v7915_v39, %v3034_v49  ;;  %v10492_v4 = vstv %s10373_s14  ;;  %s10528_s14 = sld [smem:[#allocation94_spill]] }
 0x381   : > { %v3044_v3 = vmul.f32 %v10492_v4, %v2316_v41  ;;  %v10493_v33 = vstv %s10485_s28  ;;  %v2389_v36 = vadd.f32 %v2387_v55, %v2383_v21  ;;  %v2388_v5 = vadd.f32 %v7887_v19, %v2382_v48 }
 0x382   : > { %v8131_v23 = vmul.f32 %v10493_v33, %v2334_v18  ;;  %v2608_v50 = vadd.f32 %v2606_v47, %v2602_v16  ;;  %v10494_v37 = vstv %s10443_s1  ;;  %v2827_v14 = vadd.f32 %v2825_v26, %v2821_v12  ;;  %v10500_v47 = vld [vmem:[#allocation118_spill] sm:$0xff]  ;;  %v2246_v26 = vpop.permute.xlu0 %2245  ;;  %s10536_s1 = sld [smem:[#allocation96_spill]] }
 0x383   : > { %v2404_v40 = vmul.f32 %v10494_v37, %v2230_v57  ;;  %v3046_v46 = vadd.f32 %v3044_v3, %v3040_v22  ;;  %v2607_v17 = vadd.f32 %v7891_v29, %v2601_v59  ;;  %v10495_v43 = vstv %s10444_s16  ;;  %v10504_v37 = vld [vmem:[#allocation188_spill] sm:$0xff]  ;;  %s10538_s16 = sld [smem:[#allocation97_spill]] }
 0x384   : > { %v2623_v39 = vmul.f32 %v10495_v43, %v2230_v57  ;;  %v2395_v49 = vadd.f32 %v7242_v34, %v2389_v36  ;;  %v10496_v41 = vstv %s10377_s2  ;;  %v2614_v21 = vadd.f32 %v7258_v2, %v2608_v50  ;;  %v10501_v34 = vld [vmem:[#allocation213_spill] sm:$0xff]  ;;  %v10502_v2 = vld [vmem:[#allocation186_spill] sm:$0xff]  ;;  %v10507_v43 = vld [vmem:[#allocation214_spill] sm:$0xff]  ;;  %s10527_s2 = sld [smem:[#allocation93_spill]] }
 0x385   : > { %v2399_v18 = vmul.f32 %v10496_v41, %v2332_v60  ;;  %v10497_v62 = vstv %s10378_s4  ;;  %v2833_v19 = vadd.f32 %v7268_v7, %v2827_v14  ;;  %v10498_v48 = vstv %s10380_s26  ;;  %v2236_v7 = vpop.permute.xlu1 %2235  ;;  %s10506_s4 = sld [smem:[#allocation91_spill]]  ;;  %s10524_s26 = sld [smem:[#allocation89_spill]] }
 0x386   : > { %v2618_v56 = vmul.f32 %v10497_v62, %v2332_v60  ;;  %v2837_v8 = vmul.f32 %v10498_v48, %v2332_v60  ;;  %v3052_v55 = vadd.f32 %v7284_v52, %v3046_v46  ;;  %v10499_v16 = vstv %s10382_s8  ;;  %v10505_v46 = vld [vmem:[#allocation191_spill] sm:$0xff]  ;;  %v10510_v62 = vld [vmem:[#allocation112_spill] sm:$0xff]  ;;  %s10513_s8 = sld [smem:[#allocation83_spill]] }
 0x387   : > { %v3056_v32 = vmul.f32 %v10499_v16, %v2332_v60  ;;  %v2401_v29 = vadd.f32 %v2399_v18, %v2395_v49  ;;  %v2394_v12 = vadd.f32 %v10500_v47, %v2388_v5  ;;  %v2613_v1 = vadd.f32 %v10501_v34, %v2607_v17  ;;  %v10509_v18 = vld [vmem:[#allocation212_spill] sm:$0xff]  ;;  %v2266_v34 = vpop.permute.xlu0 %2265 }
 0x388   : > { %v2620_v59 = vadd.f32 %v2618_v56, %v2614_v21  ;;  %v2839_v22 = vadd.f32 %v2837_v8, %v2833_v19  ;;  %v2826_v3 = vadd.f32 %v10502_v2, %v2820_v27  ;;  %v10503_v33 = vstv %s10446_s3  ;;  %v10508_v27 = vld [vmem:[#allocation187_spill] sm:$0xff]  ;;  %v10512_v19 = vld [vmem:[#allocation116_spill] sm:$0xff]  ;;  %s10539_s3 = sld [smem:[#allocation98_spill]] }
 0x389   : > { %v3058_v4 = vadd.f32 %v3056_v32, %v3052_v55  ;;  %v2842_v36 = vmul.f32 %v10503_v33, %v2230_v57  ;;  %v2407_v50 = vadd.f32 %v8006_v35, %v2401_v29  ;;  %v2400_v14 = vadd.f32 %v10504_v37, %v2394_v12  ;;  %v10514_v8 = vld [vmem:[#allocation113_spill] sm:$0xff]  ;;  %v10516_v55 = vld [vmem:[#allocation192_spill] sm:$0xff]  ;;  %v2252_v29 = vpop.permute.xlu1 %2251  ;;  %v10526_v37 = vld [vmem:[#allocation122_spill] sm:$0xff] }
 0x38a   : > { %v2626_v52 = vadd.f32 %v8010_v38, %v2620_v59  ;;  %v2619_v60 = vadd.f32 %v10505_v46, %v2613_v1  ;;  %v2845_v5 = vadd.f32 %v8016_v13, %v2839_v22  ;;  %v2832_v49 = vadd.f32 %v10507_v43, %v2826_v3  ;;  %v10521_v2 = vld [vmem:[#allocation193_spill] sm:$0xff]  ;;  %v10533_v43 = vld [vmem:[#allocation124_spill] sm:$0xff] }
 0x38b   : > { %v3064_v17 = vadd.f32 %v8020_v24, %v3058_v4  ;;  %v3045_v41 = vadd.f32 %v10508_v27, %v3039_v15  ;;  %v2413_v21 = vadd.f32 %v10509_v18, %v2407_v50  ;;  %v2406_v56 = vadd.f32 %v2404_v40, %v2400_v14  ;;  %v10517_v24 = vld [vmem:[#allocation120_spill] sm:$0xff] }
 0x38c   : > { %v2632_v35 = vadd.f32 %v10510_v62, %v2626_v52  ;;  %v2625_v38 = vadd.f32 %v2623_v39, %v2619_v60  ;;  %v2851_v48 = vadd.f32 %v10512_v19, %v2845_v5  ;;  %v2838_v16 = vadd.f32 %v10516_v55, %v2832_v49 }
 0x38d   : > { %v3070_v13 = vadd.f32 %v10514_v8, %v3064_v17  ;;  %v3051_v32 = vadd.f32 %v10517_v24, %v3045_v41  ;;  %v2419_v15 = vadd.f32 %v8044_v51, %v2413_v21  ;;  %v10518_v40 = vstv %s10447_s19  ;;  %s10546_s19 = sld [smem:[#allocation99_spill]] }
 0x38e   : > { %v2638_v59 = vadd.f32 %v8048_v20, %v2632_v35  ;;  %v3061_v47 = vmul.f32 %v10518_v40, %v2230_v57  ;;  %v10519_v39 = vstv %s10506_s4  ;;  %v2857_v1 = vadd.f32 %v8052_v9, %v2851_v48  ;;  %v2268_v35 = vpop.permute.xlu1 %2267  ;;  %v10540_v48 = vld [vmem:[#allocation126_spill] sm:$0xff] }
 0x38f   : > { %v8176_v12 = vmul.f32 %v10519_v39, %v2236_v7  ;;  %v3076_v22 = vadd.f32 %v8056_v30, %v3070_v13  ;;  %v2844_v4 = vadd.f32 %v2842_v36, %v2838_v16  ;;  %v3057_v3 = vadd.f32 %v10521_v2, %v3051_v32  ;;  %v10531_v36 = vld [vmem:[#allocation115_spill] sm:$0xff]  ;;  %v2282_v39 = vpop.permute.xlu0 %2281 }
 0x390   : > { %v10522_v51 = vstv %s10511_s10  ;;  %v10523_v20 = vstv %s10513_s8  ;;  %v10525_v50 = vstv %s10515_s29  ;;  %v2412_v14 = vadd.f32 %v10526_v37, %v2406_v56 }
 0x391   : > { %v8183_v33 = vmul.f32 %v10522_v51, %v2236_v7  ;;  %v8187_v57 = vmul.f32 %v10523_v20, %v2236_v7  ;;  %v8191_v52 = vmul.f32 %v10525_v50, %v2236_v7  ;;  %v3063_v9 = vadd.f32 %v3061_v47, %v3057_v3  ;;  %v10547_v3 = vld [vmem:[#allocation182_spill] sm:$0xff] }
 0x392   : > { %v10529_v46 = vstv %s10455_s5  ;;  %v2631_v60 = vadd.f32 %v10531_v36, %v2625_v38  ;;  %v10532_v5 = vstv %s10457_s7  ;;  %v2850_v49 = vadd.f32 %v10533_v43, %v2844_v4  ;;  %v10545_v4 = vld [vmem:[#allocation181_spill] sm:$0xff]  ;;  %s10627_s5 = sld [smem:[#allocation105_spill]]  ;;  %s10628_s7 = sld [smem:[#allocation107_spill]] }
 0x393   : > { %v2416_v30 = vmul.f32 %v10529_v46, %v2246_v26  ;;  %v2635_v17 = vmul.f32 %v10532_v5, %v2246_v26  ;;  %v10534_v27 = vstv %s10458_s17  ;;  %v10535_v18 = vstv %s10459_s23  ;;  %s10630_s17 = sld [smem:[#allocation33_spill]]  ;;  %s10643_s23 = sld [smem:[#allocation110_spill]] }
 0x394   : > { %v2854_v41 = vmul.f32 %v10534_v27, %v2246_v26  ;;  %v3073_v7 = vmul.f32 %v10535_v18, %v2246_v26  ;;  %v10537_v21 = vstv %s10520_s13  ;;  %v3069_v38 = vadd.f32 %v10540_v48, %v3063_v9 }
 0x395   : > { %v8206_v62 = vmul.f32 %v10537_v21, %v2252_v29  ;;  %v2418_v56 = vadd.f32 %v2416_v30, %v2412_v14  ;;  %v2637_v19 = vadd.f32 %v2635_v17, %v2631_v60  ;;  %v10541_v8 = vstv %s10524_s26  ;;  %v10549_v14 = vld [vmem:[#allocation183_spill] sm:$0xff] }
 0x396   : > { %v8211_v13 = vmul.f32 %v10541_v8, %v2252_v29  ;;  %v2856_v55 = vadd.f32 %v2854_v41, %v2850_v49  ;;  %v10542_v16 = vstv %s10527_s2  ;;  %v10543_v26 = vstv %s10528_s14  ;;  %v10554_v17 = vld [vmem:[#allocation114_spill] sm:$0xff]  ;;  %v10556_v49 = vld [vmem:[#allocation211_spill] sm:$0xff]  ;;  %v10557_v41 = vld [vmem:[#allocation185_spill] sm:$0xff] }
 0x397   : > { %v8215_v24 = vmul.f32 %v10542_v16, %v2252_v29  ;;  %v8219_v32 = vmul.f32 %v10543_v26, %v2252_v29  ;;  %v10544_v40 = vstv %s10530_s30  ;;  %v2424_v2 = vadd.f32 %v10545_v4, %v2418_v56  ;;  %v10559_v56 = vld [vmem:[#allocation117_spill] sm:$0xff]  ;;  %v2320_v26 = vpop.permute.xlu1 %2319  ;;  %s10709_s30 = sld [smem:[#allocation52_spill]] }
 0x398   : > { %v8223_v47 = vmul.f32 %v10544_v40, %v2266_v34  ;;  %v2643_v51 = vadd.f32 %v10547_v3, %v2637_v19  ;;  %v3075_v20 = vadd.f32 %v3073_v7, %v3069_v38  ;;  %v10548_v50 = vstv %s10536_s1  ;;  %s10719_s1 = sld [smem:[#allocation41_spill]] }
 0x399   : > { %v8229_v37 = vmul.f32 %v10548_v50, %v2266_v34  ;;  %v2862_v9 = vadd.f32 %v10549_v14, %v2856_v55  ;;  %v10550_v46 = vstv %s10538_s16  ;;  %v10551_v30 = vstv %s10539_s3  ;;  %s10722_s16 = sld [smem:[#allocation42_spill]]  ;;  %s10724_s3 = sld [smem:[#allocation43_spill]] }
 0x39a   : > { %v8234_v29 = vmul.f32 %v10550_v46, %v2266_v34  ;;  %v8238_v36 = vmul.f32 %v10551_v30, %v2266_v34  ;;  %v10552_v60 = vmov %v10544_v40  ;;  %v2430_v43 = vadd.f32 %v10554_v17, %v2424_v2  ;;  %v10563_v2 = vld [vmem:[#allocation119_spill] sm:$0xff] }
 0x39b   : > { %v8242_v5 = vmul.f32 %v10552_v60, %v2268_v35  ;;  %v2649_v27 = vadd.f32 %v10556_v49, %v2643_v51  ;;  %v3081_v18 = vadd.f32 %v10557_v41, %v3075_v20  ;;  %v10558_v7 = vmov %v10548_v50  ;;  %v10569_v49 = vld [vmem:[#allocation194_spill] sm:$0xff] }
 0x39c   : > { %v8249_v21 = vmul.f32 %v10558_v7, %v2268_v35  ;;  %v2868_v19 = vadd.f32 %v10559_v56, %v2862_v9  ;;  %v10560_v48 = vmov %v10550_v46  ;;  %v10561_v38 = vmov %v10551_v30  ;;  %v10567_v30 = vld [vmem:[#allocation111_spill] sm:$0xff] }
 0x39d   : > { %v8254_v34 = vmul.f32 %v10560_v48, %v2268_v35  ;;  %v8258_v8 = vmul.f32 %v10561_v38, %v2268_v35  ;;  %v10562_v55 = vstv %s10546_s19  ;;  %v2436_v40 = vadd.f32 %v8029_v42, %v2430_v43  ;;  %v2234_v42 = vpop.permute.xlu0 %2233  ;;  %v10572_v56 = vld [vmem:[#allocation197_spill] sm:$0xff] }
 0x39e   : > { %v8262_v16 = vmul.f32 %v10562_v55, %v2282_v39  ;;  %v2655_v4 = vadd.f32 %v8033_v28, %v2649_v27  ;;  %v3087_v3 = vadd.f32 %v10563_v2, %v3081_v18  ;;  %v10564_v51 = vstv %s7471_s21  ;;  %v10575_v2 = vld [vmem:[#allocation128_spill] sm:$0xff] }
 0x39f   : > { %v8269_v20 = vmul.f32 %v10564_v51, %v2282_v39  ;;  %v2874_v50 = vadd.f32 %v8037_v53, %v2868_v19  ;;  %v10565_v14 = vstv %s10553_s27  ;;  %v10566_v9 = vstv %s10555_s22  ;;  %v10571_v53 = vld [vmem:[#allocation207_spill] sm:$0xff] }
 0x3a0   : > { %v8274_v35 = vmul.f32 %v10565_v14, %v2282_v39  ;;  %v8278_v46 = vmul.f32 %v10566_v9, %v2282_v39  ;;  %v2425_v60 = vadd.f32 %v10567_v30, %v2419_v15  ;;  %v3093_v28 = vadd.f32 %v8063_v11, %v3087_v3  ;;  %v10574_v39 = vld [vmem:[#allocation29_spill] sm:$0xff]  ;;  %v10578_v30 = vld [vmem:[#allocation121_spill] sm:$0xff] }
 0x3a1   : > { %v10568_v17 = vstv %s10465_s20  ;;  %v2644_v27 = vadd.f32 %v10569_v49, %v2638_v59  ;;  %v10570_v41 = vstv %s10466_s24  ;;  %v2863_v19 = vadd.f32 %v10572_v56, %v2857_v1  ;;  %s10608_s20 = sld [smem:[#allocation102_spill]]  ;;  %s10624_s24 = sld [smem:[#allocation103_spill]] }
 0x3a2   : > { %v2441_v43 = vmul.f32 %v10568_v17, %v2320_v26  ;;  %v2660_v18 = vmul.f32 %v10570_v41, %v2320_v26  ;;  %v2431_v7 = vadd.f32 %v10571_v53, %v2425_v60  ;;  %v10573_v48 = vstv %s10467_s25  ;;  %v10579_v60 = vld [vmem:[#allocation208_spill] sm:$0xff]  ;;  %s10646_s25 = sld [smem:[#allocation36_spill]] }
 0x3a3   : > { %v2879_v38 = vmul.f32 %v10573_v48, %v2320_v26  ;;  %v3082_v55 = vadd.f32 %v10574_v39, %v3076_v22  ;;  %v2650_v15 = vadd.f32 %v10575_v2, %v2644_v27  ;;  %v10576_v51 = vstv %s10472_s0  ;;  %v10580_v22 = vld [vmem:[#allocation123_spill] sm:$0xff]  ;;  %v2336_v48 = vpop.permute.xlu1 %2335  ;;  %s10610_s0 = sld [smem:[#allocation90_spill]] }
 0x3a4   : > { %v3098_v14 = vmul.f32 %v10576_v51, %v2320_v26  ;;  %v2442_v11 = vadd.f32 %v8068_v44, %v2436_v40  ;;  %v10577_v3 = vstv %s10506_s4  ;;  %v2437_v59 = vadd.f32 %v8081_v31, %v2431_v7  ;;  %v10582_v7 = vld [vmem:[#allocation125_spill] sm:$0xff]  ;;  %s10666_s4 = sld [smem:[#allocation39_spill]] }
 0x3a5   : > { %v2458_v9 = vmul.f32 %v10577_v3, %v2234_v42  ;;  %v2869_v17 = vadd.f32 %v10578_v30, %v2863_v19  ;;  %v3088_v49 = vadd.f32 %v10579_v60, %v3082_v55  ;;  %v2661_v1 = vadd.f32 %v8072_v25, %v2655_v4  ;;  %v2250_v3 = vpop.permute.xlu0 %2249  ;;  %v10587_v30 = vld [vmem:[#allocation210_spill] sm:$0xff] }
 0x3a6   : > { %v2656_v41 = vadd.f32 %v8085_v10, %v2650_v15  ;;  %v2448_v53 = vadd.f32 %v10580_v22, %v2442_v11  ;;  %v10581_v27 = vstv %s10511_s10  ;;  %v2880_v26 = vadd.f32 %v8076_v0, %v2874_v50  ;;  %v10583_v10 = vld [vmem:[#allocation209_spill] sm:$0xff]  ;;  %v10586_v11 = vld [vmem:[#allocation127_spill] sm:$0xff]  ;;  %s10667_s10 = sld [smem:[#allocation35_spill]] }
 0x3a7   : > { %v2677_v56 = vmul.f32 %v10581_v27, %v2234_v42  ;;  %v2443_v44 = vadd.f32 %v2441_v43, %v2437_v59  ;;  %v2875_v40 = vadd.f32 %v8089_v6, %v2869_v17  ;;  %v3094_v31 = vadd.f32 %v8094_v45, %v3088_v49 }
 0x3a8   : > { %v2667_v19 = vadd.f32 %v10582_v7, %v2661_v1  ;;  %v2662_v39 = vadd.f32 %v2660_v18, %v2656_v41  ;;  %v2454_v25 = vadd.f32 %v8106_v61, %v2448_v53  ;;  %v2886_v4 = vadd.f32 %v10583_v10, %v2880_v26  ;;  %v10593_v53 = vld [vmem:[#allocation133_spill] sm:$0xff]  ;;  %v10595_v7 = vld [vmem:[#allocation134_spill] sm:$0xff] }
 0x3a9   : > { %v10584_v55 = vstv %s10513_s8  ;;  %v2881_v15 = vadd.f32 %v2879_v38, %v2875_v40  ;;  %v3100_v0 = vadd.f32 %v3098_v14, %v3094_v31  ;;  %v3099_v6 = vadd.f32 %v8098_v63, %v3093_v28  ;;  %v10589_v14 = vld [vmem:[#allocation130_spill] sm:$0xff]  ;;  %v10591_v28 = vld [vmem:[#allocation215_spill] sm:$0xff]  ;;  %s10671_s8 = sld [smem:[#allocation44_spill]] }
 0x3aa   : > { %v2896_v2 = vmul.f32 %v10584_v55, %v2234_v42  ;;  %v2673_v50 = vadd.f32 %v8112_v54, %v2667_v19  ;;  %v2460_v45 = vadd.f32 %v2458_v9, %v2454_v25  ;;  %v2892_v43 = vadd.f32 %v8116_v58, %v2886_v4 }
 0x3ab   : > { %v10585_v51 = vstv %s10515_s29  ;;  %v2449_v61 = vadd.f32 %v10586_v11, %v2443_v44  ;;  %v3105_v17 = vadd.f32 %v10587_v30, %v3099_v6  ;;  %v10588_v38 = vstv %s10474_s11  ;;  %v2284_v44 = vpop.permute.xlu1 %2283  ;;  %s10623_s11 = sld [smem:[#allocation101_spill]]  ;;  %s10691_s29 = sld [smem:[#allocation47_spill]] }
 0x3ac   : > { %v3115_v18 = vmul.f32 %v10585_v51, %v2234_v42  ;;  %v2679_v59 = vadd.f32 %v2677_v56, %v2673_v50  ;;  %v2453_v60 = vmul.f32 %v10588_v38, %v2336_v48  ;;  %v2668_v49 = vadd.f32 %v10589_v14, %v2662_v39  ;;  %v10599_v51 = vld [vmem:[#allocation129_spill] sm:$0xff] }
 0x3ad   : > { %v2898_v54 = vadd.f32 %v2896_v2, %v2892_v43  ;;  %v10590_v1 = vstv %s10478_s12  ;;  %v2887_v9 = vadd.f32 %v10591_v28, %v2881_v15  ;;  %v10592_v41 = vstv %s10480_s9  ;;  %v10597_v2 = vld [vmem:[#allocation217_spill] sm:$0xff]  ;;  %v2322_v43 = vpop.permute.xlu0 %2321  ;;  %v10604_v14 = vld [vmem:[#allocation216_spill] sm:$0xff]  ;;  %s10619_s9 = sld [smem:[#allocation106_spill]]  ;;  %s10622_s12 = sld [smem:[#allocation108_spill]] }
 0x3ae   : > { %v2672_v63 = vmul.f32 %v10590_v1, %v2336_v48  ;;  %v2891_v58 = vmul.f32 %v10592_v41, %v2336_v48  ;;  %v3111_v42 = vadd.f32 %v8131_v23, %v3105_v17  ;;  %v2455_v22 = vadd.f32 %v2453_v60, %v2449_v61  ;;  %v10602_v17 = vld [vmem:[#allocation131_spill] sm:$0xff] }
 0x3af   : > { %v3106_v27 = vadd.f32 %v10593_v53, %v3100_v0  ;;  %v10594_v56 = vstv %s10485_s28  ;;  %v2466_v19 = vadd.f32 %v10595_v7, %v2460_v45  ;;  %v10596_v39 = vstv %s10520_s13  ;;  %v2240_v41 = vpop.permute.xlu1 %2239  ;;  %s10647_s28 = sld [smem:[#allocation37_spill]]  ;;  %s10694_s13 = sld [smem:[#allocation48_spill]] }
 0x3b0   : > { %v3110_v26 = vmul.f32 %v10594_v56, %v2336_v48  ;;  %v2674_v40 = vadd.f32 %v2672_v63, %v2668_v49  ;;  %v2893_v31 = vadd.f32 %v2891_v58, %v2887_v9  ;;  %v2470_v25 = vmul.f32 %v10596_v39, %v2250_v3  ;;  %v10605_v63 = vld [vmem:[#allocation136_spill] sm:$0xff] }
 0x3b1   : > { %v3117_v10 = vadd.f32 %v3115_v18, %v3111_v42  ;;  %v2461_v4 = vadd.f32 %v8176_v12, %v2455_v22  ;;  %v2685_v23 = vadd.f32 %v10597_v2, %v2679_v59  ;;  %v10598_v50 = vstv %s10524_s26  ;;  %v10600_v18 = vld [vmem:[#allocation135_spill] sm:$0xff]  ;;  %v10615_v2 = vld [vmem:[#allocation138_spill] sm:$0xff]  ;;  %s10695_s26 = sld [smem:[#allocation38_spill]] }
 0x3b2   : > { %v3112_v55 = vadd.f32 %v3110_v26, %v3106_v27  ;;  %v2680_v15 = vadd.f32 %v8183_v33, %v2674_v40  ;;  %v2899_v0 = vadd.f32 %v8187_v57, %v2893_v31  ;;  %v2472_v48 = vadd.f32 %v2470_v25, %v2466_v19  ;;  %v10603_v33 = vld [vmem:[#allocation132_spill] sm:$0xff]  ;;  %v2338_v19 = vpop.permute.xlu0 %2337 }
 0x3b3   : > { %v2689_v6 = vmul.f32 %v10598_v50, %v2250_v3  ;;  %v2467_v45 = vadd.f32 %v10599_v51, %v2461_v4  ;;  %v2904_v61 = vadd.f32 %v10600_v18, %v2898_v54  ;;  %v10601_v12 = vstv %s10527_s2  ;;  %s10705_s2 = sld [smem:[#allocation50_spill]] }
 0x3b4   : > { %v3118_v11 = vadd.f32 %v8191_v52, %v3112_v55  ;;  %v2908_v30 = vmul.f32 %v10601_v12, %v2250_v3  ;;  %v2686_v59 = vadd.f32 %v10602_v17, %v2680_v15  ;;  %v2905_v38 = vadd.f32 %v10603_v33, %v2899_v0  ;;  %v10614_v55 = vld [vmem:[#allocation218_spill] sm:$0xff]  ;;  %v10618_v0 = vld [vmem:[#allocation137_spill] sm:$0xff] }
 0x3b5   : > { %v2478_v57 = vadd.f32 %v8223_v47, %v2472_v48  ;;  %v2691_v60 = vadd.f32 %v2689_v6, %v2685_v23  ;;  %v3123_v28 = vadd.f32 %v10605_v63, %v3117_v10  ;;  %v10606_v9 = vstv %s10528_s14  ;;  %v10613_v10 = vld [vmem:[#allocation141_spill] sm:$0xff]  ;;  %v10620_v48 = vld [vmem:[#allocation144_spill] sm:$0xff]  ;;  %v2324_v6 = vpop.permute.xlu1 %2323  ;;  %s10708_s14 = sld [smem:[#allocation51_spill]] }
 0x3b6   : > { %v3124_v49 = vadd.f32 %v10604_v14, %v3118_v11  ;;  %v2910_v1 = vadd.f32 %v2908_v30, %v2904_v61  ;;  %v3127_v52 = vmul.f32 %v10606_v9, %v2250_v3  ;;  %v2473_v58 = vadd.f32 %v8206_v62, %v2467_v45  ;;  %v10625_v11 = vld [vmem:[#allocation140_spill] sm:$0xff] }
 0x3b7   : > { %v2697_v54 = vadd.f32 %v8229_v37, %v2691_v60  ;;  %v10607_v42 = vstv %s10546_s19  ;;  %v2692_v53 = vadd.f32 %v8211_v13, %v2686_v59  ;;  %v10609_v56 = vstv %s7471_s21  ;;  %s10616_s21 = sld [smem:[#allocation104_spill]]  ;;  %s10726_s19 = sld [smem:[#allocation34_spill]] }
 0x3b8   : > { %v2489_v22 = vmul.f32 %v10607_v42, %v2284_v44  ;;  %v2916_v47 = vadd.f32 %v8234_v29, %v2910_v1  ;;  %v3129_v27 = vadd.f32 %v3127_v52, %v3123_v28  ;;  %v2708_v26 = vmul.f32 %v10609_v56, %v2284_v44  ;;  %v2270_v1 = vpop.permute.xlu0 %2269 }
 0x3b9   : > { %v2911_v40 = vadd.f32 %v8215_v24, %v2905_v38  ;;  %v2479_v3 = vadd.f32 %v8242_v5, %v2473_v58  ;;  %v2698_v31 = vadd.f32 %v8249_v21, %v2692_v53  ;;  %v10611_v37 = vstv %s10553_s27  ;;  %s10730_s27 = sld [smem:[#allocation28_spill]] }
 0x3ba   : > { %v2927_v7 = vmul.f32 %v10611_v37, %v2284_v44  ;;  %v3130_v62 = vadd.f32 %v8219_v32, %v3124_v49  ;;  %v3135_v13 = vadd.f32 %v8238_v36, %v3129_v27  ;;  %v10612_v39 = vstv %s10555_s22  ;;  %s10737_s22 = sld [smem:[#allocation27_spill]] }
 0x3bb   : > { %v2917_v29 = vadd.f32 %v8254_v34, %v2911_v40  ;;  %v3146_v25 = vmul.f32 %v10612_v39, %v2284_v44  ;;  %v2484_v4 = vadd.f32 %v10613_v10, %v2478_v57  ;;  %v2485_v24 = vadd.f32 %v10614_v55, %v2479_v3  ;;  %v10631_v57 = vld [vmem:[#allocation149_spill] sm:$0xff] }
 0x3bc   : > { %v2704_v5 = vadd.f32 %v10615_v2, %v2698_v31  ;;  %v3136_v21 = vadd.f32 %v8258_v8, %v3130_v62  ;;  %v10617_v23 = vstv %s10608_s20  ;;  %v2703_v34 = vadd.f32 %v10620_v48, %v2697_v54  ;;  %v10626_v8 = vld [vmem:[#allocation145_spill] sm:$0xff]  ;;  %v2340_v62 = vpop.permute.xlu1 %2339  ;;  %s10742_s20 = sld [smem:[#allocation22_spill]] }
 0x3bd   : > { %v2494_v15 = vmul.f32 %v10617_v23, %v2322_v43  ;;  %v2923_v32 = vadd.f32 %v10618_v0, %v2917_v29  ;;  %v2490_v36 = vadd.f32 %v8262_v16, %v2484_v4  ;;  %v10621_v50 = vstv %s10610_s0  ;;  %v10642_v29 = vld [vmem:[#allocation155_spill] sm:$0xff] }
 0x3be   : > { %v2713_v44 = vmul.f32 %v10621_v50, %v2322_v43  ;;  %v2491_v51 = vadd.f32 %v2489_v22, %v2485_v24  ;;  %v2710_v45 = vadd.f32 %v2708_v26, %v2704_v5  ;;  %v3142_v18 = vadd.f32 %v10625_v11, %v3136_v21  ;;  %v10639_v26 = vld [vmem:[#allocation153_spill] sm:$0xff] }
 0x3bf   : > { %v2922_v61 = vadd.f32 %v10626_v8, %v2916_v47  ;;  %v2929_v12 = vadd.f32 %v2927_v7, %v2923_v32  ;;  %v2496_v30 = vadd.f32 %v2494_v15, %v2490_v36  ;;  %v2709_v16 = vadd.f32 %v8269_v20, %v2703_v34  ;;  %v10637_v47 = vld [vmem:[#allocation151_spill] sm:$0xff]  ;;  %v10650_v15 = vld [vmem:[#allocation156_spill] sm:$0xff] }
 0x3c0   : > { %v10629_v17 = vstv %s10616_s21  ;;  %v3148_v33 = vadd.f32 %v3146_v25, %v3142_v18  ;;  %v3141_v60 = vadd.f32 %v10631_v57, %v3135_v13  ;;  %v10632_v14 = vstv %s10619_s9  ;;  %v10658_v57 = vld [vmem:[#allocation157_spill] sm:$0xff]  ;;  %s10744_s0 = sshll.u32 %s10737_s22, 6 }
 0x3c1   : > { %v2932_v59 = vmul.f32 %v10629_v17, %v2322_v43  ;;  %v2928_v38 = vadd.f32 %v8274_v35, %v2922_v61  ;;  %v3151_v49 = vmul.f32 %v10632_v14, %v2322_v43  ;;  %v2715_v63 = vadd.f32 %v2713_v44, %v2709_v16  ;;  %s402_s21 = scalar_lea.vmem [#allocation12], %s10744_s0 }
 0x3c2   : > { %v10633_v28 = vstv %s10622_s12  ;;  %v10634_v52 = vstv %s10623_s11  ;;  %v10635_v20 = vstv %s10624_s24  ;;  %v3147_v22 = vadd.f32 %v8278_v46, %v3141_v60  ;;  %s3680_s9 = sshll.u32 %s10742_s20, 10 }
 0x3c3   : > { %v2513_v9 = vmul.f32 %v10633_v28, %v2240_v41  ;;  %v2732_v54 = vmul.f32 %v10634_v52, %v2240_v41  ;;  %v2951_v58 = vmul.f32 %v10635_v20, %v2240_v41  ;;  %v2934_v42 = vadd.f32 %v2932_v59, %v2928_v38  ;;  %v10660_v28 = vld [vmem:[#allocation150_spill] sm:$0xff] }
 0x3c4   : > { %v10636_v35 = vstv %s10627_s5  ;;  %v2502_v27 = vadd.f32 %v10637_v47, %v2496_v30  ;;  %v10638_v43 = vstv %s10628_s7  ;;  %v2721_v40 = vadd.f32 %v10639_v26, %v2715_v63  ;;  %v2256_v63 = vpop.permute.xlu1 %2255  ;;  %s10749_s7 = sld [smem:[#allocation228_spill]] }
 0x3c5   : > { %v3170_v53 = vmul.f32 %v10636_v35, %v2240_v41  ;;  %v2506_v56 = vmul.f32 %v10638_v43, %v2338_v19  ;;  %v10640_v3 = vstv %s10630_s17  ;;  %v10641_v37 = vstv %s10337_s15  ;;  %s10670_s15 = sld [smem:[#allocation40_spill]] }
 0x3c6   : > { %v2725_v31 = vmul.f32 %v10640_v3, %v2338_v19  ;;  %v2944_v7 = vmul.f32 %v10641_v37, %v2338_v19  ;;  %v3153_v13 = vadd.f32 %v3151_v49, %v3147_v22  ;;  %v2940_v39 = vadd.f32 %v10642_v29, %v2934_v42  ;;  %v10662_v42 = vld [vmem:[#allocation158_spill] sm:$0xff] }
 0x3c7   : > { %v10644_v46 = vstv %s10338_s6  ;;  %v10645_v41 = vmov %v10617_v23  ;;  %v2508_v4 = vadd.f32 %v2506_v56, %v2502_v27  ;;  %v10648_v24 = vmov %v10621_v50  ;;  %s10690_s6 = sld [smem:[#allocation46_spill]] }
 0x3c8   : > { %v3163_v25 = vmul.f32 %v10644_v46, %v2338_v19  ;;  %v2495_v10 = vmul.f32 %v10645_v41, %v2324_v6  ;;  %v2727_v55 = vadd.f32 %v2725_v31, %v2721_v40  ;;  %v2714_v2 = vmul.f32 %v10648_v24, %v2324_v6  ;;  %v2238_v19 = vpop.permute.xlu0 %2237 }
 0x3c9   : > { %v10649_v5 = vmov %v10629_v17  ;;  %v2946_v23 = vadd.f32 %v2944_v7, %v2940_v39  ;;  %v3159_v0 = vadd.f32 %v10650_v15, %v3153_v13  ;;  %v10651_v36 = vmov %v10632_v14 }
 0x3ca   : > { %v2933_v21 = vmul.f32 %v10649_v5, %v2324_v6  ;;  %v2497_v32 = vadd.f32 %v2495_v10, %v2491_v51  ;;  %v3152_v48 = vmul.f32 %v10651_v36, %v2324_v6  ;;  %v2716_v34 = vadd.f32 %v2714_v2, %v2710_v45  ;;  %v10656_v6 = vld [vmem:[#allocation148_spill] sm:$0xff]  ;;  %v10674_v36 = vld [vmem:[#allocation154_spill] sm:$0xff]  ;;  %s8564_s17 = scalar_lea.hbm %s10749_s7, %s3680_s9 }
 0x3cb   : > { %v10652_v44 = vstv %s7663_s18  ;;  %v10653_v18 = vstv %s10643_s23  ;;  %v3165_v61 = vadd.f32 %v3163_v25, %v3159_v0  ;;  %v10654_v16 = vstv %s10646_s25 }
 0x3cc   : > { %v2935_v50 = vadd.f32 %v2933_v21, %v2929_v12  ;;  %v2530_v11 = vmul.f32 %v10652_v44, %v2270_v1  ;;  %v2749_v8 = vmul.f32 %v10653_v18, %v2270_v1  ;;  %v3154_v30 = vadd.f32 %v3152_v48, %v3148_v33  ;;  %v2254_v39 = vpop.permute.xlu0 %2253  ;;  %v10672_v21 = vld [vmem:[#allocation152_spill] sm:$0xff] }
 0x3cd   : > { %v8427_v17 = vmul.f32 %v10654_v16, %v2270_v1  ;;  %v10655_v59 = vstv %s10647_s28  ;;  %v2503_v38 = vadd.f32 %v10656_v6, %v2497_v32  ;;  %v10657_v45 = vmov %v10638_v43 }
 0x3ce   : > { %v8431_v51 = vmul.f32 %v10655_v59, %v2270_v1  ;;  %v2507_v12 = vmul.f32 %v10657_v45, %v2340_v62  ;;  %v2722_v60 = vadd.f32 %v10658_v57, %v2716_v34  ;;  %v10659_v14 = vmov %v10640_v3 }
 0x3cf   : > { %v2726_v49 = vmul.f32 %v10659_v14, %v2340_v62  ;;  %v2941_v52 = vadd.f32 %v10660_v28, %v2935_v50  ;;  %v10661_v33 = vmov %v10641_v37  ;;  %v3160_v22 = vadd.f32 %v10662_v42, %v3154_v30  ;;  %v2272_v50 = vpop.permute.xlu1 %2271  ;;  %v10680_v30 = vld [vmem:[#allocation164_spill] sm:$0xff]  ;;  %v10686_v42 = vld [vmem:[#allocation165_spill] sm:$0xff] }
 0x3d0   : > { %v2945_v20 = vmul.f32 %v10661_v33, %v2340_v62  ;;  %v10663_v35 = vmov %v10644_v46  ;;  %v2509_v47 = vadd.f32 %v2507_v12, %v2503_v38  ;;  %v10664_v43 = vstv %s10622_s12  ;;  %v10682_v12 = vld [vmem:[#allocation160_spill] sm:$0xff]  ;;  %s3251_s12 = sshll.u32 %s402_s21, 4  ;;  %s8566_s12 = int_to_ptr.vmem [resolvable:$true] %s3251_s12 }
 0x3d1   : > { %v3164_v1 = vmul.f32 %v10663_v35, %v2340_v62  ;;  %v2728_v27 = vadd.f32 %v2726_v49, %v2722_v60  ;;  %v2512_v56 = vmul.f32 %v10664_v43, %v2238_v19  ;;  %v10665_v26 = vstv %s10623_s11  ;;  %v2286_v49 = vpop.permute.xlu0 %2285 }
 0x3d2   : > { %v2731_v40 = vmul.f32 %v10665_v26, %v2238_v19  ;;  %v2947_v3 = vadd.f32 %v2945_v20, %v2941_v52  ;;  %v10668_v37 = vstv %s10624_s24  ;;  %v10669_v13 = vstv %s10627_s5  ;;  %v10684_v52 = vld [vmem:[#allocation161_spill] sm:$0xff] }
 0x3d3   : > { %v3166_v31 = vadd.f32 %v3164_v1, %v3160_v22  ;;  %v2950_v7 = vmul.f32 %v10668_v37, %v2238_v19  ;;  %v3169_v29 = vmul.f32 %v10669_v13, %v2238_v19  ;;  %v2515_v46 = vadd.f32 %v2513_v9, %v2509_v47  ;;  %v10676_v9 = vld [vmem:[#allocation163_spill] sm:$0xff] }
 0x3d4   : > { %v2734_v25 = vadd.f32 %v2732_v54, %v2728_v27  ;;  %v2514_v62 = vadd.f32 %v2512_v56, %v2508_v4  ;;  %v2733_v41 = vadd.f32 %v2731_v40, %v2727_v55  ;;  %v2953_v10 = vadd.f32 %v2951_v58, %v2947_v3  ;;  %v10678_v58 = vld [vmem:[#allocation159_spill] sm:$0xff] }
 0x3d5   : > { %v3172_v24 = vadd.f32 %v3170_v53, %v3166_v31  ;;  %v2952_v2 = vadd.f32 %v2950_v7, %v2946_v23  ;;  %v3171_v5 = vadd.f32 %v3169_v29, %v3165_v61  ;;  %v2521_v15 = vadd.f32 %v10672_v21, %v2515_v46  ;;  %v2288_v29 = vpop.permute.xlu1 %2287 }
 0x3d6   : > { %v10673_v0 = vstv %s10666_s4  ;;  %v2740_v48 = vadd.f32 %v10674_v36, %v2734_v25  ;;  %v10675_v19 = vstv %s10667_s10  ;;  %v2959_v54 = vadd.f32 %v10676_v9, %v2953_v10 }
 0x3d7   : > { %v2525_v32 = vmul.f32 %v10673_v0, %v2256_v63  ;;  %v2744_v34 = vmul.f32 %v10675_v19, %v2256_v63  ;;  %v10677_v4 = vstv %s10670_s15  ;;  %v3178_v44 = vadd.f32 %v10678_v58, %v3172_v24 }
 0x3d8   : > { %v2963_v55 = vmul.f32 %v10677_v4, %v2256_v63  ;;  %v10679_v53 = vstv %s10671_s8  ;;  %v2520_v16 = vadd.f32 %v10680_v30, %v2514_v62  ;;  %v10681_v59 = vmov %v10673_v0  ;;  %v10698_v0 = vld [vmem:[#allocation166_spill] sm:$0xff] }
 0x3d9   : > { %v3182_v23 = vmul.f32 %v10679_v53, %v2256_v63  ;;  %v2527_v18 = vadd.f32 %v2525_v32, %v2521_v15  ;;  %v2746_v61 = vadd.f32 %v2744_v34, %v2740_v48  ;;  %v2524_v6 = vmul.f32 %v10681_v59, %v2254_v39  ;;  %v10710_v30 = vld [vmem:[#allocation170_spill] sm:$0xff] }
 0x3da   : > { %v2965_v38 = vadd.f32 %v2963_v55, %v2959_v54  ;;  %v2739_v57 = vadd.f32 %v10682_v12, %v2733_v41  ;;  %v10683_v60 = vmov %v10675_v19  ;;  %v2958_v63 = vadd.f32 %v10684_v52, %v2952_v2  ;;  %v10696_v2 = vld [vmem:[#allocation162_spill] sm:$0xff]  ;;  %v10700_v19 = vld [vmem:[#allocation167_spill] sm:$0xff]  ;;  %v2328_v12 = vpop.permute.xlu1 %2327 }
 0x3db   : > { %v3184_v45 = vadd.f32 %v3182_v23, %v3178_v44  ;;  %v2743_v14 = vmul.f32 %v10683_v60, %v2254_v39  ;;  %v2526_v28 = vadd.f32 %v2524_v6, %v2520_v16  ;;  %v10685_v33 = vmov %v10677_v4  ;;  %v10703_v4 = vld [vmem:[#allocation169_spill] sm:$0xff]  ;;  %v10706_v44 = vld [vmem:[#allocation168_spill] sm:$0xff] }
 0x3dc   : > { %v2962_v20 = vmul.f32 %v10685_v33, %v2254_v39  ;;  %v3177_v22 = vadd.f32 %v10686_v42, %v3171_v5  ;;  %v10687_v1 = vmov %v10679_v53  ;;  %v10688_v27 = vstv %s7663_s18  ;;  %s10704_s18 = sld [smem:[#allocation49_spill]] }
 0x3dd   : > { %v2745_v35 = vadd.f32 %v2743_v14, %v2739_v57  ;;  %v3181_v47 = vmul.f32 %v10687_v1, %v2254_v39  ;;  %v2531_v43 = vmul.f32 %v10688_v27, %v2272_v50  ;;  %v10689_v56 = vstv %s10643_s23  ;;  %s3238_s23 = scalar_lea.sflag [#allocation4], %s10737_s22 }
 0x3de   : > { %v2750_v26 = vmul.f32 %v10689_v56, %v2272_v50  ;;  %v2532_v40 = vadd.f32 %v2530_v11, %v2526_v28  ;;  %v2964_v3 = vadd.f32 %v2962_v20, %v2958_v63  ;;  %v10692_v31 = vstv %s10646_s25  ;;  %v10714_v28 = vld [vmem:[#allocation172_spill] sm:$0xff]  ;;  %s3956_s25 = scalar_lea.vmem %s8566_s12, 1024 }
 0x3df   : > { %v2969_v37 = vmul.f32 %v10692_v31, %v2272_v50  ;;  %v10693_v7 = vstv %s10647_s28  ;;  %v2751_v46 = vadd.f32 %v2749_v8, %v2745_v35  ;;  %v3183_v25 = vadd.f32 %v3181_v47, %v3177_v22  ;;  %v2326_v8 = vpop.permute.xlu0 %2325  ;;  %p3957_p7 = scmp.ne.s32.totalorder %s8566_s12, %s3956_s25  ;;  %s4047_s28 = smov [#allocation12]  }
 0x3e0   : > { %v3188_v13 = vmul.f32 %v10693_v7, %v2272_v50  ;;  %v2533_v62 = vadd.f32 %v2531_v43, %v2527_v18  ;;  %v2752_v41 = vadd.f32 %v2750_v26, %v2746_v61  ;;  %v2970_v39 = vadd.f32 %v8427_v17, %v2964_v3  ;;  %s3960_s4 = sshll.u32 %s4047_s28, 4  ;;  %s3961_s4 = int_to_ptr.vmem [resolvable:$false] %s3960_s4 }
 0x3e1   : > { %v2971_v10 = vadd.f32 %v2969_v37, %v2965_v38  ;;  %v2538_v11 = vadd.f32 %v10696_v2, %v2532_v40  ;;  %v3189_v5 = vadd.f32 %v8431_v51, %v3183_v25  ;;  %v10697_v21 = vstv %s10690_s6  ;;  %v10712_v38 = vld [vmem:[#allocation171_spill] sm:$0xff]  ;;  %p3958_p12 = pnand %p3957_p7, %p4212_p6  ;;  %s3962_s10 = scalar_lea.vmem %s3961_s4, 2048 }
 0x3e2   : > { %v3190_v24 = vadd.f32 %v3188_v13, %v3184_v45  ;;  %v2542_v15 = vmul.f32 %v10697_v21, %v2286_v49  ;;  %v2757_v32 = vadd.f32 %v10698_v0, %v2751_v46  ;;  %v10699_v36 = vstv %s10691_s29  ;;  %p3963_p3 = scmp.lt.s32.totalorder %s8566_s12, %s3961_s4  ;;  %p3964_p13 = scmp.lt.s32.totalorder %s3962_s10, %s3956_s25 }
 0x3e3   : > { %v2761_v48 = vmul.f32 %v10699_v36, %v2286_v49  ;;  %v2976_v34 = vadd.f32 %v10700_v19, %v2970_v39  ;;  %v10701_v50 = vstv %s10694_s13  ;;  %v10702_v9 = vstv %s10695_s26  ;;  %v2342_v31 = vpop.permute.xlu0 %2341  ;;  %p3959_p9 = pneg %p3958_p12 }
 0x3e4   : > { %v2980_v17 = vmul.f32 %v10701_v50, %v2286_v49  ;;  %v3199_v54 = vmul.f32 %v10702_v9, %v2286_v49  ;;  %v2539_v55 = vadd.f32 %v10703_v4, %v2533_v62  ;;  %v2544_v58 = vadd.f32 %v2542_v15, %v2538_v11  ;;  %p3965_p10 = por %p3964_p13, %p3963_p3 }
 0x3e5   : > { %v2763_v51 = vadd.f32 %v2761_v48, %v2757_v32  ;;  %v3195_v53 = vadd.f32 %v10706_v44, %v3189_v5  ;;  %v10707_v23 = vmov %v10697_v21  ;;  %v2758_v16 = vadd.f32 %v10710_v30, %v2752_v41  ;;  %v10728_v5 = vld [vmem:[#allocation173_spill] sm:$0xff]  ;;  %v2344_v32 = vpop.permute.xlu1 %2343  ;;  %v10731_v48 = vld [vmem:[#allocation174_spill] sm:$0xff] }
 0x3e6   : > { %v2543_v18 = vmul.f32 %v10707_v23, %v2288_v29  ;;  %v2982_v61 = vadd.f32 %v2980_v17, %v2976_v34  ;;  %v10711_v59 = vmov %v10699_v36  ;;  %v2977_v45 = vadd.f32 %v10712_v38, %v2971_v10  ;;  %p3966_p0 = pnand %p3965_p10, %p3959_p9 }
 0x3e7   : > { %v2762_v6 = vmul.f32 %v10711_v59, %v2288_v29  ;;  %v3201_v57 = vadd.f32 %v3199_v54, %v3195_v53  ;;  %v10713_v14 = vmov %v10701_v50  ;;  %v3196_v52 = vadd.f32 %v10714_v28, %v3190_v24  ;;  %v10733_v50 = vld [vmem:[#allocation175_spill] sm:$0xff] }
 0x3e8   : > { %v2545_v60 = vadd.f32 %v2543_v18, %v2539_v55  ;;  %v2981_v49 = vmul.f32 %v10713_v14, %v2288_v29  ;;  %v10715_v33 = vmov %v10702_v9  ;;  %v10716_v42 = vstv %s10704_s18  ;;  %v10738_v18 = vld [vmem:[#allocation177_spill] sm:$0xff] }
 0x3e9   : > { %v2764_v63 = vadd.f32 %v2762_v6, %v2758_v16  ;;  %v3200_v20 = vmul.f32 %v10715_v33, %v2288_v29  ;;  %v2548_v22 = vmul.f32 %v10716_v42, %v2326_v8  ;;  %v10717_v35 = vstv %s10705_s2  ;;  %v3858_v6 = vld [vmem:[%s10730_s27] sm:$0xff] }
 0x3ea   : > { %v2767_v1 = vmul.f32 %v10717_v35, %v2326_v8  ;;  %v2983_v47 = vadd.f32 %v2981_v49, %v2977_v45  ;;  %v10718_v27 = vstv %s10708_s14  ;;  %v10720_v56 = vstv %s10709_s30  ;;  %v10740_v45 = vld [vmem:[#allocation178_spill] sm:$0xff] }
 0x3eb   : > { %v2986_v43 = vmul.f32 %v10718_v27, %v2326_v8  ;;  %v3205_v26 = vmul.f32 %v10720_v56, %v2326_v8  ;;  %v10721_v40 = vmov %v10716_v42  ;;  %v3202_v37 = vadd.f32 %v3200_v20, %v3196_v52  ;;  %v3859_v49 = vld [vmem:[%s10730_s27 + $0x10] sm:$0xff]  ;;  %v3860_v20 = vld [vmem:[%s10730_s27 + $0x20] sm:$0xff] }
 0x3ec   : > { %v2549_v3 = vmul.f32 %v10721_v40, %v2328_v12  ;;  %v2550_v7 = vadd.f32 %v2548_v22, %v2544_v58  ;;  %v2769_v13 = vadd.f32 %v2767_v1, %v2763_v51  ;;  %v10723_v46 = vmov %v10717_v35  ;;  %v10735_v58 = vld [vmem:[#allocation176_spill] sm:$0xff] }
 0x3ed   : > { %v2768_v29 = vmul.f32 %v10723_v46, %v2328_v12  ;;  %v2988_v25 = vadd.f32 %v2986_v43, %v2982_v61  ;;  %v3207_v62 = vadd.f32 %v3205_v26, %v3201_v57  ;;  %v10725_v39 = vmov %v10718_v27  ;;  %v3861_v43 = vld [vmem:[%s10730_s27 + $0x30] sm:$0xff] }
 0x3ee   : > { %v2551_v41 = vadd.f32 %v2549_v3, %v2545_v60  ;;  %v2987_v10 = vmul.f32 %v10725_v39, %v2328_v12  ;;  %v10727_v2 = vmov %v10720_v56  ;;  %v2556_v21 = vadd.f32 %v10728_v5, %v2550_v7  ;;  %v3862_v3 = vld [vmem:[%s10730_s27 + $0x8] sm:$0xff]  ;;  %v3863_v7 = vld [vmem:[%s10730_s27 + $0x18] sm:$0xff] }
 0x3ef   : > { %v2770_v24 = vadd.f32 %v2768_v29, %v2764_v63  ;;  %v3206_v11 = vmul.f32 %v10727_v2, %v2328_v12  ;;  %v10729_v15 = vstv %s10719_s1  ;;  %v2775_v8 = vadd.f32 %v10731_v48, %v2769_v13  ;;  %v10743_v63 = vld [vmem:[#allocation179_spill] sm:$0xff]  ;;  %v3864_v29 = vld [vmem:[%s10730_s27 + $0x28] sm:$0xff] }
 0x3f0   : > { %v2560_v0 = vmul.f32 %v10729_v15, %v2342_v31  ;;  %v2989_v36 = vadd.f32 %v2987_v10, %v2983_v47  ;;  %v10732_v19 = vstv %s10722_s16  ;;  %v2994_v17 = vadd.f32 %v10733_v50, %v2988_v25  ;;  %v10746_v47 = vld [vmem:[#allocation180_spill] sm:$0xff] }
 0x3f1   : > { %v2779_v34 = vmul.f32 %v10732_v19, %v2342_v31  ;;  %v3208_v9 = vadd.f32 %v3206_v11, %v3202_v37  ;;  %v10734_v4 = vstv %s10724_s3  ;;  %v3213_v51 = vadd.f32 %v10735_v58, %v3207_v62  ;;  %v3865_v62 = vld [vmem:[%s10730_s27 + $0x38] sm:$0xff] }
 0x3f2   : > { %v2562_v54 = vadd.f32 %v2560_v0, %v2556_v21  ;;  %v2998_v55 = vmul.f32 %v10734_v4, %v2342_v31  ;;  %v10736_v53 = vstv %s10726_s19  ;;  %v2557_v61 = vadd.f32 %v10738_v18, %v2551_v41 }
 0x3f3   : > { %v2781_v44 = vadd.f32 %v2779_v34, %v2775_v8  ;;  %v3217_v23 = vmul.f32 %v10736_v53, %v2342_v31  ;;  %v10739_v30 = vmov %v10729_v15  ;;  %v2776_v12 = vadd.f32 %v10740_v45, %v2770_v24 }
 0x3f4   : > { %v2561_v16 = vmul.f32 %v10739_v30, %v2344_v32  ;;  %v3000_v59 = vadd.f32 %v2998_v55, %v2994_v17  ;;  %v3221_v38 = vadd.f32 %v3858_v6, %v2562_v54  ;;  %v10741_v57 = vmov %v10732_v19 }
 0x3f5   : > { %v2780_v60 = vmul.f32 %v10741_v57, %v2344_v32  ;;  %v3219_v14 = vadd.f32 %v3217_v23, %v3213_v51  ;;  %v3223_v28 = vadd.f32 %v3859_v49, %v2781_v44  ;;  %v2995_v33 = vadd.f32 %v10743_v63, %v2989_v36 }
 0x3f6   : > { %v2563_v52 = vadd.f32 %v2561_v16, %v2557_v61  ;;  %v3225_v42 = vadd.f32 %v3860_v20, %v3000_v59  ;;  %3229 = vst [vmem:[%s402_s21] sm:$0xff] %v3221_v38  ;;  %v10745_v35 = vmov %v10734_v4  ;;  %v3214_v27 = vadd.f32 %v10746_v47, %v3208_v9 }
 0x3f7   : > { %v2782_v22 = vadd.f32 %v2780_v60, %v2776_v12  ;;  %v2999_v1 = vmul.f32 %v10745_v35, %v2344_v32  ;;  %v3227_v56 = vadd.f32 %v3861_v43, %v3219_v14  ;;  %3231 = vst [vmem:[%s402_s21 + $0x10] sm:$0xff] %v3223_v28  ;;  %v10747_v26 = vmov %v10736_v53 }
 0x3f8   : > { %v3218_v40 = vmul.f32 %v10747_v26, %v2344_v32  ;;  %v3222_v31 = vadd.f32 %v3862_v3, %v2563_v52  ;;  %3233 = vst [vmem:[%s402_s21 + $0x20] sm:$0xff] %v3225_v42 }
 0x3f9   : > { %v3001_v37 = vadd.f32 %v2999_v1, %v2995_v33  ;;  %v3224_v13 = vadd.f32 %v3863_v7, %v2782_v22  ;;  %3235 = vst [vmem:[%s402_s21 + $0x30] sm:$0xff] %v3227_v56 }
 0x3fa   : > { %v3220_v46 = vadd.f32 %v3218_v40, %v3214_v27  ;;  %3230 = vst [vmem:[%s402_s21 + $0x8] sm:$0xff] %v3222_v31 }
 0x3fb   : > { %v3226_v25 = vadd.f32 %v3864_v29, %v3001_v37  ;;  %3232 = vst [vmem:[%s402_s21 + $0x18] sm:$0xff] %v3224_v13 }
 0x3fc   : > { %v3228_v41 = vadd.f32 %v3865_v62, %v3220_v46 }
 0x3fd   : > { %3234 = vst [vmem:[%s402_s21 + $0x28] sm:$0xff] %v3226_v25 }
 0x3fe   : > { %3236 = vst [vmem:[%s402_s21 + $0x38] sm:$0xff] %v3228_v41 }
 0x3ff   : > { %3969 = shalt.err (!%p3966_p0)
}
 0x400   : > { %s3970_s15 = scalar_lea.hbm %s8564_s17, 1024  ;;  %s3974_s29 = scalar_lea.hbm %s10749_s7, 2048 }
 0x401   : > { %p3971_p11 = scmp.ne.s32.totalorder %s8564_s17, %s3970_s15  ;;  %p3975_p5 = scmp.lt.u32.totalorder %s8564_s17, %s10749_s7 }
 0x402   : > { %p3976_p4 = scmp.lt.u32.totalorder %s3974_s29, %s3970_s15  ;;  %p3978_p7 = scmp.lt.u32.totalorder %s3970_s15, %s8564_s17 }
 0x403   : > { %p3972_p1 = pnand %p3971_p11, %p4212_p6 }
 0x404   : > { %p3977_p8 = por %p3976_p4, %p3975_p5 }
 0x405   : > { %p3973_p2 = pneg %p3972_p1 }
 0x406   : > { %p3979_p12 = por %p3978_p7, %p3977_p8 }
 0x408   : > { %p3980_p9 = pnand %p3979_p12, %p3973_p2 }
 0x40a   : > { %3983 = shalt.err (!%p3980_p9)
}
 0x40b   : > { %s4048_s18 = smov 128   ;;  %s4049_s2 = smov 8  }
 0x40c   : > { %3699 = dma.vmem_to_hbm [thread:$0]  (%p4212_p6), %s8566_s12, 1024, %s8564_s17, %s3238_s23, %s4048_s18, %s4048_s18, %s4049_s2  }
 0x40d PF: > { %s10750_s14 = sld [smem:[#allocation18_spill]]  ;;  %s10751_s30 = sld [smem:[#allocation23_spill]] }
 0x40e   : > { %s10752_s1 = sld [smem:[#allocation21_spill]] }
 0x413   : > { %s3266_s16 = sand.u32 1, %s10750_s14   ;;  %p10753_p3 = scmp.ne.s32.totalorder %s10751_s30, 0 }
 0x414   : > { %p10754_p13 = scmp.ge.s32.totalorder %s10752_s1, 2  ;;  %s3267_s3 = scalar_lea.sflag [#allocation4], %s3266_s16 }
 0x416   : > { %p3719_p10 = pnand %p10754_p13, %p10753_p3 }
 0x418   : > { %4017 = dma.done.wait (!%p3719_p10), %s3267_s3, 1024  }
 0x419   : > { %4019 = vsyncadd (!%p3719_p10), %s3267_s3, 4294966272  ;;  %s10755_s12 = sld [smem:[#allocation24_spill]]  ;;  %s10756_s30 = sld [smem:[#allocation19_spill]] }
 0x41a   : > { %s10757_s10 = sld [smem:[#allocation20_spill]]  ;;  %s10758_s11 = sld [smem:[#allocation25_spill]] }
 0x41f   : > { %p25_p0 = scmp.ge.s32.totalorder %s10755_s12, 4  }
 0x421   :  { %27 = sbr.rel (!%p25_p0) target bundleno = 19 (0x13), region = 118 }
 0x428   :  { %3272 = vsyncpa [#allocation3], 1 }
 0x429   :  { %3274 = vsyncpa [#allocation3 + $0x1], 1 }
 0x42a   :  { %3275 = vsyncpa [#allocation4], 1 }
 0x42b   :  { %3277 = vsyncpa [#allocation4 + $0x1], 1 }
 0x42c   :  { %3278 = vsyncpa [#allocation5], 1 }
 0x42d   :  { %3280 = vsyncpa [#allocation5 + $0x1], 1 }
 0x42e   :  { %3281 = vsyncpa [#allocation8], 1 }
 0x42f   :  { %3282 = vsyncpa [#allocation11], 1 }

</bundles_post_ra>
